<compile_context>
chip_gen: v7x
topology: tpu7x:2x2x1
jax: 0.10.0
libtpu: 0.0.40
codegen_flags: <defaults>
</compile_context>

<pallas_src>
import jax
import jax.numpy as jnp
from jax.experimental import pallas as pl
from jax.experimental.pallas import tpu as pltpu


C1, C2 = 128, 256        # conv1 / conv2 output channels
K1 = 128                 # conv1 matmul K (75 real taps*channels, zero-padded to 128)
BLK1 = 208               # conv1 rows per pool-phase block (196 valid pooled positions + pad)
CONV2_OW = 16            # conv2 over-computed band width (valid is 10)
CONV2_ROWS = 10 * CONV2_OW          # 160 output rows / image (oh*16 + ow)
CONV2_IN_ROWS = 14 * CONV2_OW       # 224 width-im2col rows / image
K2 = 5 * C1              # 640 : width-taps merged into K


# --------------------- conv1: matmul + BN-shift + ReLU + 2x2 maxpool ---------------------

def _conv1_pool_kernel(a_ref, b_ref, shift_ref, o_ref):
    """One image per grid step.

    a_ref : (832, 128) bf16  im2col rows grouped as 4 pool-phase blocks of 208 rows
            (rows 196..207 of each block are zero padding).
    b_ref : (128, 128) bf16  conv1 weights (K padded 75->128).
    shift : (1, 128)   f32   conv bias folded with the BN shift.
    o_ref : (208, 128) bf16  pooled ReLU(conv+shift); rows = ph*14 + pw (196 valid).
    """
    b = b_ref[...]
    m = None
    for q in range(4):                                    # 4 pool phases (dy, dx)
        y = jnp.dot(a_ref[pl.ds(q * BLK1, BLK1), :], b,
                    preferred_element_type=jnp.float32)
        y = jnp.maximum(y + shift_ref[...], 0.0)
        m = y if m is None else jnp.maximum(m, y)         # fused 2x2 maxpool
    o_ref[...] = m.astype(o_ref.dtype)


def conv1_pool(a1, w1m, shift1, n):
    return pl.pallas_call(
        _conv1_pool_kernel,
        out_shape=jax.ShapeDtypeStruct((n * BLK1, C1), jnp.bfloat16),
        grid_spec=pltpu.PrefetchScalarGridSpec(
            num_scalar_prefetch=0,
            grid=(n,),
            in_specs=[
                pl.BlockSpec((4 * BLK1, K1), lambda i: (i, 0)),   # one image's im2col
                pl.BlockSpec((K1, C1), lambda i: (0, 0)),         # weights resident
                pl.BlockSpec((1, C1), lambda i: (0, 0)),          # folded shift
            ],
            out_specs=pl.BlockSpec((BLK1, C1), lambda i: (i, 0)),
        ),
        compiler_params=pltpu.CompilerParams(dimension_semantics=("parallel",)),
    )(a1, w1m, shift1)


# ------------- conv2: 5 aligned K=640 taps, local accumulation, shift + ReLU -------------

def _conv2_kernel(x_ref, w_ref, shift_ref, o_ref):
    """One image per grid step.

    x_ref : (224, 640) bf16  width-im2col rows = h*16 + w, channels = dj*128 + c.
    w_ref : (5, 640, 256) bf16  height-tap-major conv2 weights (BN1 scale folded in).
    shift : (1, 256)   f32   conv2 bias folded with the BN2 shift.
    o_ref : (160, 256) bf16  rows = oh*16 + ow (only ow < 10 are valid).
    """
    for rc in range(2):                                   # two 80-row output chunks
        base = rc * 80
        acc = None
        for di in range(5):                               # 5 height taps, K = 640 each
            a = x_ref[pl.ds(base + di * CONV2_OW, 80), :]  # 16-aligned, contiguous
            d = jnp.dot(a, w_ref[di], preferred_element_type=jnp.float32)
            acc = d if acc is None else acc + d            # local f32 accumulator (20 vregs)
        y = jnp.maximum(acc + shift_ref[...], 0.0)
        o_ref[pl.ds(base, 80), :] = y.astype(o_ref.dtype)  # single store per chunk


def conv2_bn_relu(xw, w2m, shift2, n):
    return pl.pallas_call(
        _conv2_kernel,
        out_shape=jax.ShapeDtypeStruct((n * CONV2_ROWS, C2), jnp.bfloat16),
        grid_spec=pltpu.PrefetchScalarGridSpec(
            num_scalar_prefetch=0,
            grid=(n,),
            in_specs=[
                pl.BlockSpec((CONV2_IN_ROWS, K2), lambda i: (i, 0)),   # one image
                pl.BlockSpec((5, K2, C2), lambda i: (0, 0, 0)),        # weights resident
                pl.BlockSpec((1, C2), lambda i: (0, 0)),
            ],
            out_specs=pl.BlockSpec((CONV2_ROWS, C2), lambda i: (i, 0)),
        ),
        compiler_params=pltpu.CompilerParams(dimension_semantics=("parallel",)),
    )(xw, w2m, shift2)


# ------------------------------------- JAX glue -------------------------------------------

def conv1_prepare(x_nhwc):
    """(N,32,32,3) bf16 -> (N*832, 128) im2col, rows grouped by pool phase, K padded to 128."""
    n = x_nhwc.shape[0]
    cols = [x_nhwc[:, di:di + 28, dj:dj + 28, :] for di in range(5) for dj in range(5)]
    patches = jnp.concatenate(cols, axis=-1)                       # (N,28,28,75)
    blocks = jnp.stack([patches[:, dy::2, dx::2, :]
                        for dy in (0, 1) for dx in (0, 1)], axis=1)  # (N,4,14,14,75)
    blocks = blocks.reshape(n, 4, 196, 75)
    blocks = jnp.pad(blocks, ((0, 0), (0, 0), (0, BLK1 - 196), (0, K1 - 75)))
    return blocks.reshape(n * 4 * BLK1, K1)


def conv2_prepare(p1):
    """(N,14,14,128) bf16 pooled act -> (N*224, 640) width-im2col (dj merged into channels)."""
    n = p1.shape[0]
    p1p = jnp.pad(p1, ((0, 0), (0, 0), (0, 20 - 14), (0, 0)))      # width 14 -> 20
    wins = [p1p[:, :, dj:dj + CONV2_OW, :] for dj in range(5)]
    xw = jnp.concatenate(wins, axis=-1)                            # (N,14,16,640)
    return xw.reshape(n * CONV2_IN_ROWS, K2)


def maxpool2x2(x_nhwc):
    n, h, w, c = x_nhwc.shape
    return x_nhwc.reshape(n, h // 2, 2, w // 2, 2, c).max(axis=(2, 4))


def init_params(key):
    ks = jax.random.split(key, 6)

    def conv_init(k, shape):                       # (Cout, Cin, KH, KW)
        fan_in = shape[1] * shape[2] * shape[3]
        return jax.random.normal(k, shape, jnp.float32) * (1.0 / jnp.sqrt(fan_in))

    def lin_init(k, shape):                        # (out, in)
        return jax.random.normal(k, shape, jnp.float32) * (1.0 / jnp.sqrt(shape[1]))

    return {
        "conv1_w": conv_init(ks[0], (C1, 3, 5, 5)),
        "conv1_b": jax.random.normal(ks[1], (C1,), jnp.float32) * 0.01,
        "conv2_w": conv_init(ks[2], (C2, C1, 5, 5)),
        "conv2_b": jax.random.normal(ks[3], (C2,), jnp.float32) * 0.01,
        "fc_w": lin_init(ks[4], (10, C2 * 5 * 5)),
        "fc_b": jax.random.normal(ks[5], (10,), jnp.float32) * 0.01,
        # custom BatchNorm2d module: weight=1, bias=0, running_mean=0, running_var=0
        "bn1_g": jnp.ones((C1,), jnp.float32), "bn1_b": jnp.zeros((C1,), jnp.float32),
        "bn1_rm": jnp.zeros((C1,), jnp.float32), "bn1_rv": jnp.zeros((C1,), jnp.float32),
        "bn2_g": jnp.ones((C2,), jnp.float32), "bn2_b": jnp.zeros((C2,), jnp.float32),
        "bn2_rm": jnp.zeros((C2,), jnp.float32), "bn2_rv": jnp.zeros((C2,), jnp.float32),
    }


def model_forward(x_nchw, p):
    """Eval-mode forward; returns pred = argmax(logits, 1) int32, like the module with y=None."""
    eps = 1e-5
    n = x_nchw.shape[0]
    x = jnp.transpose(x_nchw, (0, 2, 3, 1)).astype(jnp.bfloat16)    # NCHW -> NHWC, bf16

    # Eval BN: y = s*(z - rm) + beta with s = gamma/sqrt(rv+eps).  s > 0 here (gamma=1), so
    # ReLU/maxpool commute with s and we fold s into the NEXT layer's weights; kernels only
    # apply the per-channel shift.  NOTE: assumes gamma > 0 (true for this module's init).
    s1 = p["bn1_g"] / jnp.sqrt(p["bn1_rv"] + eps)                   # ~316
    s2 = p["bn2_g"] / jnp.sqrt(p["bn2_rv"] + eps)
    shift1 = (p["conv1_b"] - p["bn1_rm"] + p["bn1_b"] / s1).reshape(1, C1)
    shift2 = (p["conv2_b"] - p["bn2_rm"] + p["bn2_b"] / s2).reshape(1, C2)

    # ---- conv1 (3->128, k=5) + BN shift + ReLU + 2x2 maxpool, fused in one kernel ----
    w1m = jnp.transpose(p["conv1_w"], (2, 3, 1, 0)).reshape(75, C1)   # (di*5+dj)*3+c ordering
    w1m = jnp.pad(w1m, ((0, K1 - 75), (0, 0))).astype(jnp.bfloat16)   # K padded to 128
    a1 = conv1_prepare(x)                                             # (N*832, 128)
    out1 = conv1_pool(a1, w1m, shift1, n)                             # (N*208, 128) bf16
    p1 = out1.reshape(n, BLK1, C1)[:, :196, :].reshape(n, 14, 14, C1)  # pooled activation

    # ---- conv2 (128->256, k=5) + BN shift + ReLU : 5 aligned K=640 taps in-kernel ----
    w2 = jnp.transpose(p["conv2_w"], (2, 3, 1, 0))                    # (di, dj, cin, cout)
    w2 = (w2 * s1.reshape(1, 1, C1, 1)).reshape(5, K2, C2).astype(jnp.bfloat16)  # fold s1
    xw = conv2_prepare(p1)                                            # (N*224, 640)
    out2 = conv2_bn_relu(xw, w2, shift2, n)                           # (N*160, 256) bf16
    u2 = out2.reshape(n, 10, CONV2_OW, C2)[:, :, :10, :]              # valid 10x10 band
    u2p = maxpool2x2(u2)                                              # (N, 5, 5, 256) bf16

    # ---- FC (6400 -> 10) + argmax in plain XLA; s2 folded into the FC weights ----
    flat = jnp.transpose(u2p, (0, 3, 1, 2)).reshape(n, C2 * 25).astype(jnp.float32)
    fc_w_eff = p["fc_w"] * jnp.repeat(s2, 25)[None, :]                # NCHW flatten: c = idx//25
    logits = flat @ fc_w_eff.T + p["fc_b"]
    return jnp.argmax(logits, axis=1).astype(jnp.int32)


# --------------------------------------- main ----------------------------------------------

if __name__ == "__main__":
    key = jax.random.PRNGKey(0)
    k_x, k_p = jax.random.split(key)

    # Input shape is dictated by the module: 3 channels, 32x32 spatial -> 5x5 before the FC.
    x = jax.random.normal(k_x, (2, 3, 32, 32), jnp.float32)           # NCHW like PyTorch
    params = init_params(k_p)

    fwd = jax.jit(model_forward)
    pred = jax.block_until_ready(fwd(x, params))
    assert pred.shape == (2,) and pred.dtype == jnp.int32
    print("KERNEL_OK")
</pallas_src>

<mosaic_0001>
module attributes {stable_mosaic.version = 11 : i64} {
  func.func @_conv1_pool_kernel(%arg0: i32, %arg1: memref<832x128xbf16, #tpu.memory_space<vmem>>, %arg2: memref<128x128xbf16, #tpu.memory_space<vmem>>, %arg3: memref<1x128xf32, #tpu.memory_space<vmem>>, %arg4: memref<208x128xbf16, #tpu.memory_space<vmem>>) attributes {dimension_semantics = [#tpu.dimension_semantics<parallel>], iteration_bounds = array<i64: 2>, scalar_prefetch = 0 : i64, scratch_operands = 0 : i64, tpu.core_type = #tpu.core_type<tc>, window_params = [{transform_indices = @transform_0, window_bounds = array<i64: 832, 128>}, {pipeline_mode = #tpu.pipeline_mode<synchronous>, transform_indices = @transform_1, window_bounds = array<i64: 128, 128>}, {pipeline_mode = #tpu.pipeline_mode<synchronous>, transform_indices = @transform_2, window_bounds = array<i64: 1, 128>}, {transform_indices = @transform_3, window_bounds = array<i64: 208, 128>}]} {
    %c0 = arith.constant 0 : index
    %c0_0 = arith.constant 0 : index
    %0 = vector.load %arg2[%c0, %c0_0] : memref<128x128xbf16, #tpu.memory_space<vmem>>, vector<128x128xbf16>
    %c0_1 = arith.constant 0 : index
    %c0_2 = arith.constant 0 : index
    %1 = vector.load %arg1[%c0_1, %c0_2] : memref<832x128xbf16, #tpu.memory_space<vmem>>, vector<208x128xbf16>
    %cst = arith.constant dense<0.000000e+00> : vector<208x128xf32>
    %2 = tpu.matmul %1, %0, %cst {dimension_numbers = #tpu.dot_dimension_numbers<[1], [0], [0], [1], [0, 0, 1, 1], [], []>} : vector<208x128xbf16>, vector<128x128xbf16>, vector<208x128xf32> -> vector<208x128xf32>
    %c0_3 = arith.constant 0 : index
    %c0_4 = arith.constant 0 : index
    %3 = vector.load %arg3[%c0_3, %c0_4] : memref<1x128xf32, #tpu.memory_space<vmem>>, vector<1x128xf32>
    %4 = vector.broadcast %3 : vector<1x128xf32> to vector<208x128xf32>
    %5 = arith.addf %2, %4 : vector<208x128xf32>
    %cst_5 = arith.constant 0.000000e+00 : f32
    %6 = vector.broadcast %cst_5 : f32 to vector<208x128xf32>
    %7 = arith.maximumf %5, %6 : vector<208x128xf32>
    %c208 = arith.constant 208 : index
    %c0_6 = arith.constant 0 : index
    %8 = vector.load %arg1[%c208, %c0_6] : memref<832x128xbf16, #tpu.memory_space<vmem>>, vector<208x128xbf16>
    %cst_7 = arith.constant dense<0.000000e+00> : vector<208x128xf32>
    %9 = tpu.matmul %8, %0, %cst_7 {dimension_numbers = #tpu.dot_dimension_numbers<[1], [0], [0], [1], [0, 0, 1, 1], [], []>} : vector<208x128xbf16>, vector<128x128xbf16>, vector<208x128xf32> -> vector<208x128xf32>
    %c0_8 = arith.constant 0 : index
    %c0_9 = arith.constant 0 : index
    %10 = vector.load %arg3[%c0_8, %c0_9] : memref<1x128xf32, #tpu.memory_space<vmem>>, vector<1x128xf32>
    %11 = vector.broadcast %10 : vector<1x128xf32> to vector<208x128xf32>
    %12 = arith.addf %9, %11 : vector<208x128xf32>
    %cst_10 = arith.constant 0.000000e+00 : f32
    %13 = vector.broadcast %cst_10 : f32 to vector<208x128xf32>
    %14 = arith.maximumf %12, %13 : vector<208x128xf32>
    %15 = arith.maximumf %7, %14 : vector<208x128xf32>
    %c416 = arith.constant 416 : index
    %c0_11 = arith.constant 0 : index
    %16 = vector.load %arg1[%c416, %c0_11] : memref<832x128xbf16, #tpu.memory_space<vmem>>, vector<208x128xbf16>
    %cst_12 = arith.constant dense<0.000000e+00> : vector<208x128xf32>
    %17 = tpu.matmul %16, %0, %cst_12 {dimension_numbers = #tpu.dot_dimension_numbers<[1], [0], [0], [1], [0, 0, 1, 1], [], []>} : vector<208x128xbf16>, vector<128x128xbf16>, vector<208x128xf32> -> vector<208x128xf32>
    %c0_13 = arith.constant 0 : index
    %c0_14 = arith.constant 0 : index
    %18 = vector.load %arg3[%c0_13, %c0_14] : memref<1x128xf32, #tpu.memory_space<vmem>>, vector<1x128xf32>
    %19 = vector.broadcast %18 : vector<1x128xf32> to vector<208x128xf32>
    %20 = arith.addf %17, %19 : vector<208x128xf32>
    %cst_15 = arith.constant 0.000000e+00 : f32
    %21 = vector.broadcast %cst_15 : f32 to vector<208x128xf32>
    %22 = arith.maximumf %20, %21 : vector<208x128xf32>
    %23 = arith.maximumf %15, %22 : vector<208x128xf32>
    %c624 = arith.constant 624 : index
    %c0_16 = arith.constant 0 : index
    %24 = vector.load %arg1[%c624, %c0_16] : memref<832x128xbf16, #tpu.memory_space<vmem>>, vector<208x128xbf16>
    %cst_17 = arith.constant dense<0.000000e+00> : vector<208x128xf32>
    %25 = tpu.matmul %24, %0, %cst_17 {dimension_numbers = #tpu.dot_dimension_numbers<[1], [0], [0], [1], [0, 0, 1, 1], [], []>} : vector<208x128xbf16>, vector<128x128xbf16>, vector<208x128xf32> -> vector<208x128xf32>
    %c0_18 = arith.constant 0 : index
    %c0_19 = arith.constant 0 : index
    %26 = vector.load %arg3[%c0_18, %c0_19] : memref<1x128xf32, #tpu.memory_space<vmem>>, vector<1x128xf32>
    %27 = vector.broadcast %26 : vector<1x128xf32> to vector<208x128xf32>
    %28 = arith.addf %25, %27 : vector<208x128xf32>
    %cst_20 = arith.constant 0.000000e+00 : f32
    %29 = vector.broadcast %cst_20 : f32 to vector<208x128xf32>
    %30 = arith.maximumf %28, %29 : vector<208x128xf32>
    %31 = arith.maximumf %23, %30 : vector<208x128xf32>
    %32 = arith.truncf %31 : vector<208x128xf32> to vector<208x128xbf16>
    %c0_21 = arith.constant 0 : index
    %c0_22 = arith.constant 0 : index
    %33 = vector.load %arg4[%c0_21, %c0_22] : memref<208x128xbf16, #tpu.memory_space<vmem>>, vector<208x128xbf16>
    tpu.vector_store %arg4[%c0_21, %c0_22], %32 {strides = array<i32>} : memref<208x128xbf16, #tpu.memory_space<vmem>>, vector<208x128xbf16>,
    return
  }
  func.func @transform_0(%arg0: i32) -> (i32, i32) {
    %c0_i32 = arith.constant 0 : i32
    %c0_i32_0 = arith.constant 0 : i32
    return %arg0, %c0_i32 : i32, i32
  }
  func.func @transform_1(%arg0: i32) -> (i32, i32) {
    %c0_i32 = arith.constant 0 : i32
    %c0_i32_0 = arith.constant 0 : i32
    %c0_i32_1 = arith.constant 0 : i32
    return %c0_i32, %c0_i32_0 : i32, i32
  }
  func.func @transform_2(%arg0: i32) -> (i32, i32) {
    %c0_i32 = arith.constant 0 : i32
    %c0_i32_0 = arith.constant 0 : i32
    %c0_i32_1 = arith.constant 0 : i32
    return %c0_i32, %c0_i32_0 : i32, i32
  }
  func.func @transform_3(%arg0: i32) -> (i32, i32) {
    %c0_i32 = arith.constant 0 : i32
    %c0_i32_0 = arith.constant 0 : i32
    return %arg0, %c0_i32 : i32, i32
  }
}

module attributes {stable_mosaic.version = 11 : i64} {
  func.func @_conv2_kernel(%arg0: i32, %arg1: memref<224x640xbf16, #tpu.memory_space<vmem>>, %arg2: memref<5x640x256xbf16, #tpu.memory_space<vmem>>, %arg3: memref<1x256xf32, #tpu.memory_space<vmem>>, %arg4: memref<160x256xbf16, #tpu.memory_space<vmem>>) attributes {dimension_semantics = [#tpu.dimension_semantics<parallel>], iteration_bounds = array<i64: 2>, scalar_prefetch = 0 : i64, scratch_operands = 0 : i64, tpu.core_type = #tpu.core_type<tc>, window_params = [{transform_indices = @transform_0, window_bounds = array<i64: 224, 640>}, {pipeline_mode = #tpu.pipeline_mode<synchronous>, transform_indices = @transform_1, window_bounds = array<i64: 5, 640, 256>}, {pipeline_mode = #tpu.pipeline_mode<synchronous>, transform_indices = @transform_2, window_bounds = array<i64: 1, 256>}, {transform_indices = @transform_3, window_bounds = array<i64: 160, 256>}]} {
    %c0 = arith.constant 0 : index
    %c0_0 = arith.constant 0 : index
    %0 = vector.load %arg1[%c0, %c0_0] : memref<224x640xbf16, #tpu.memory_space<vmem>>, vector<80x640xbf16>
    %c0_1 = arith.constant 0 : index
    %c0_2 = arith.constant 0 : index
    %c0_3 = arith.constant 0 : index
    %1 = vector.load %arg2[%c0_1, %c0_2, %c0_3] : memref<5x640x256xbf16, #tpu.memory_space<vmem>>, vector<1x640x256xbf16>
    %2 = vector.shape_cast %1 : vector<1x640x256xbf16> to vector<640x256xbf16>
    %cst = arith.constant dense<0.000000e+00> : vector<80x256xf32>
    %3 = tpu.matmul %0, %2, %cst {dimension_numbers = #tpu.dot_dimension_numbers<[1], [0], [0], [1], [0, 0, 1, 1], [], []>} : vector<80x640xbf16>, vector<640x256xbf16>, vector<80x256xf32> -> vector<80x256xf32>
    %c16 = arith.constant 16 : index
    %c0_4 = arith.constant 0 : index
    %4 = vector.load %arg1[%c16, %c0_4] : memref<224x640xbf16, #tpu.memory_space<vmem>>, vector<80x640xbf16>
    %c1 = arith.constant 1 : index
    %c0_5 = arith.constant 0 : index
    %c0_6 = arith.constant 0 : index
    %5 = vector.load %arg2[%c1, %c0_5, %c0_6] : memref<5x640x256xbf16, #tpu.memory_space<vmem>>, vector<1x640x256xbf16>
    %6 = vector.shape_cast %5 : vector<1x640x256xbf16> to vector<640x256xbf16>
    %cst_7 = arith.constant dense<0.000000e+00> : vector<80x256xf32>
    %7 = tpu.matmul %4, %6, %cst_7 {dimension_numbers = #tpu.dot_dimension_numbers<[1], [0], [0], [1], [0, 0, 1, 1], [], []>} : vector<80x640xbf16>, vector<640x256xbf16>, vector<80x256xf32> -> vector<80x256xf32>
    %8 = arith.addf %3, %7 : vector<80x256xf32>
    %c32 = arith.constant 32 : index
    %c0_8 = arith.constant 0 : index
    %9 = vector.load %arg1[%c32, %c0_8] : memref<224x640xbf16, #tpu.memory_space<vmem>>, vector<80x640xbf16>
    %c2 = arith.constant 2 : index
    %c0_9 = arith.constant 0 : index
    %c0_10 = arith.constant 0 : index
    %10 = vector.load %arg2[%c2, %c0_9, %c0_10] : memref<5x640x256xbf16, #tpu.memory_space<vmem>>, vector<1x640x256xbf16>
    %11 = vector.shape_cast %10 : vector<1x640x256xbf16> to vector<640x256xbf16>
    %cst_11 = arith.constant dense<0.000000e+00> : vector<80x256xf32>
    %12 = tpu.matmul %9, %11, %cst_11 {dimension_numbers = #tpu.dot_dimension_numbers<[1], [0], [0], [1], [0, 0, 1, 1], [], []>} : vector<80x640xbf16>, vector<640x256xbf16>, vector<80x256xf32> -> vector<80x256xf32>
    %13 = arith.addf %8, %12 : vector<80x256xf32>
    %c48 = arith.constant 48 : index
    %c0_12 = arith.constant 0 : index
    %14 = vector.load %arg1[%c48, %c0_12] : memref<224x640xbf16, #tpu.memory_space<vmem>>, vector<80x640xbf16>
    %c3 = arith.constant 3 : index
    %c0_13 = arith.constant 0 : index
    %c0_14 = arith.constant 0 : index
    %15 = vector.load %arg2[%c3, %c0_13, %c0_14] : memref<5x640x256xbf16, #tpu.memory_space<vmem>>, vector<1x640x256xbf16>
    %16 = vector.shape_cast %15 : vector<1x640x256xbf16> to vector<640x256xbf16>
    %cst_15 = arith.constant dense<0.000000e+00> : vector<80x256xf32>
    %17 = tpu.matmul %14, %16, %cst_15 {dimension_numbers = #tpu.dot_dimension_numbers<[1], [0], [0], [1], [0, 0, 1, 1], [], []>} : vector<80x640xbf16>, vector<640x256xbf16>, vector<80x256xf32> -> vector<80x256xf32>
    %18 = arith.addf %13, %17 : vector<80x256xf32>
    %c64 = arith.constant 64 : index
    %c0_16 = arith.constant 0 : index
    %19 = vector.load %arg1[%c64, %c0_16] : memref<224x640xbf16, #tpu.memory_space<vmem>>, vector<80x640xbf16>
    %c4 = arith.constant 4 : index
    %c0_17 = arith.constant 0 : index
    %c0_18 = arith.constant 0 : index
    %20 = vector.load %arg2[%c4, %c0_17, %c0_18] : memref<5x640x256xbf16, #tpu.memory_space<vmem>>, vector<1x640x256xbf16>
    %21 = vector.shape_cast %20 : vector<1x640x256xbf16> to vector<640x256xbf16>
    %cst_19 = arith.constant dense<0.000000e+00> : vector<80x256xf32>
    %22 = tpu.matmul %19, %21, %cst_19 {dimension_numbers = #tpu.dot_dimension_numbers<[1], [0], [0], [1], [0, 0, 1, 1], [], []>} : vector<80x640xbf16>, vector<640x256xbf16>, vector<80x256xf32> -> vector<80x256xf32>
    %23 = arith.addf %18, %22 : vector<80x256xf32>
    %c0_20 = arith.constant 0 : index
    %c0_21 = arith.constant 0 : index
    %24 = vector.load %arg3[%c0_20, %c0_21] : memref<1x256xf32, #tpu.memory_space<vmem>>, vector<1x256xf32>
    %25 = vector.broadcast %24 : vector<1x256xf32> to vector<80x256xf32>
    %26 = arith.addf %23, %25 : vector<80x256xf32>
    %cst_22 = arith.constant 0.000000e+00 : f32
    %27 = vector.broadcast %cst_22 : f32 to vector<80x256xf32>
    %28 = arith.maximumf %26, %27 : vector<80x256xf32>
    %29 = arith.truncf %28 : vector<80x256xf32> to vector<80x256xbf16>
    %c0_23 = arith.constant 0 : index
    %c0_24 = arith.constant 0 : index
    %30 = vector.load %arg4[%c0_23, %c0_24] : memref<160x256xbf16, #tpu.memory_space<vmem>>, vector<80x256xbf16>
    tpu.vector_store %arg4[%c0_23, %c0_24], %29 {strides = array<i32>} : memref<160x256xbf16, #tpu.memory_space<vmem>>, vector<80x256xbf16>,
    %c80 = arith.constant 80 : index
    %c0_25 = arith.constant 0 : index
    %31 = vector.load %arg1[%c80, %c0_25] : memref<224x640xbf16, #tpu.memory_space<vmem>>, vector<80x640xbf16>
    %c0_26 = arith.constant 0 : index
    %c0_27 = arith.constant 0 : index
    %c0_28 = arith.constant 0 : index
    %32 = vector.load %arg2[%c0_26, %c0_27, %c0_28] : memref<5x640x256xbf16, #tpu.memory_space<vmem>>, vector<1x640x256xbf16>
    %33 = vector.shape_cast %32 : vector<1x640x256xbf16> to vector<640x256xbf16>
    %cst_29 = arith.constant dense<0.000000e+00> : vector<80x256xf32>
    %34 = tpu.matmul %31, %33, %cst_29 {dimension_numbers = #tpu.dot_dimension_numbers<[1], [0], [0], [1], [0, 0, 1, 1], [], []>} : vector<80x640xbf16>, vector<640x256xbf16>, vector<80x256xf32> -> vector<80x256xf32>
    %c96 = arith.constant 96 : index
    %c0_30 = arith.constant 0 : index
    %35 = vector.load %arg1[%c96, %c0_30] : memref<224x640xbf16, #tpu.memory_space<vmem>>, vector<80x640xbf16>
    %c1_31 = arith.constant 1 : index
    %c0_32 = arith.constant 0 : index
    %c0_33 = arith.constant 0 : index
    %36 = vector.load %arg2[%c1_31, %c0_32, %c0_33] : memref<5x640x256xbf16, #tpu.memory_space<vmem>>, vector<1x640x256xbf16>
    %37 = vector.shape_cast %36 : vector<1x640x256xbf16> to vector<640x256xbf16>
    %cst_34 = arith.constant dense<0.000000e+00> : vector<80x256xf32>
    %38 = tpu.matmul %35, %37, %cst_34 {dimension_numbers = #tpu.dot_dimension_numbers<[1], [0], [0], [1], [0, 0, 1, 1], [], []>} : vector<80x640xbf16>, vector<640x256xbf16>, vector<80x256xf32> -> vector<80x256xf32>
    %39 = arith.addf %34, %38 : vector<80x256xf32>
    %c112 = arith.constant 112 : index
    %c0_35 = arith.constant 0 : index
    %40 = vector.load %arg1[%c112, %c0_35] : memref<224x640xbf16, #tpu.memory_space<vmem>>, vector<80x640xbf16>
    %c2_36 = arith.constant 2 : index
    %c0_37 = arith.constant 0 : index
    %c0_38 = arith.constant 0 : index
    %41 = vector.load %arg2[%c2_36, %c0_37, %c0_38] : memref<5x640x256xbf16, #tpu.memory_space<vmem>>, vector<1x640x256xbf16>
    %42 = vector.shape_cast %41 : vector<1x640x256xbf16> to vector<640x256xbf16>
    %cst_39 = arith.constant dense<0.000000e+00> : vector<80x256xf32>
    %43 = tpu.matmul %40, %42, %cst_39 {dimension_numbers = #tpu.dot_dimension_numbers<[1], [0], [0], [1], [0, 0, 1, 1], [], []>} : vector<80x640xbf16>, vector<640x256xbf16>, vector<80x256xf32> -> vector<80x256xf32>
    %44 = arith.addf %39, %43 : vector<80x256xf32>
    %c128 = arith.constant 128 : index
    %c0_40 = arith.constant 0 : index
    %45 = vector.load %arg1[%c128, %c0_40] : memref<224x640xbf16, #tpu.memory_space<vmem>>, vector<80x640xbf16>
    %c3_41 = arith.constant 3 : index
    %c0_42 = arith.constant 0 : index
    %c0_43 = arith.constant 0 : index
    %46 = vector.load %arg2[%c3_41, %c0_42, %c0_43] : memref<5x640x256xbf16, #tpu.memory_space<vmem>>, vector<1x640x256xbf16>
    %47 = vector.shape_cast %46 : vector<1x640x256xbf16> to vector<640x256xbf16>
    %cst_44 = arith.constant dense<0.000000e+00> : vector<80x256xf32>
    %48 = tpu.matmul %45, %47, %cst_44 {dimension_numbers = #tpu.dot_dimension_numbers<[1], [0], [0], [1], [0, 0, 1, 1], [], []>} : vector<80x640xbf16>, vector<640x256xbf16>, vector<80x256xf32> -> vector<80x256xf32>
    %49 = arith.addf %44, %48 : vector<80x256xf32>
    %c144 = arith.constant 144 : index
    %c0_45 = arith.constant 0 : index
    %50 = vector.load %arg1[%c144, %c0_45] : memref<224x640xbf16, #tpu.memory_space<vmem>>, vector<80x640xbf16>
    %c4_46 = arith.constant 4 : index
    %c0_47 = arith.constant 0 : index
    %c0_48 = arith.constant 0 : index
    %51 = vector.load %arg2[%c4_46, %c0_47, %c0_48] : memref<5x640x256xbf16, #tpu.memory_space<vmem>>, vector<1x640x256xbf16>
    %52 = vector.shape_cast %51 : vector<1x640x256xbf16> to vector<640x256xbf16>
    %cst_49 = arith.constant dense<0.000000e+00> : vector<80x256xf32>
    %53 = tpu.matmul %50, %52, %cst_49 {dimension_numbers = #tpu.dot_dimension_numbers<[1], [0], [0], [1], [0, 0, 1, 1], [], []>} : vector<80x640xbf16>, vector<640x256xbf16>, vector<80x256xf32> -> vector<80x256xf32>
    %54 = arith.addf %49, %53 : vector<80x256xf32>
    %c0_50 = arith.constant 0 : index
    %c0_51 = arith.constant 0 : index
    %55 = vector.load %arg3[%c0_50, %c0_51] : memref<1x256xf32, #tpu.memory_space<vmem>>, vector<1x256xf32>
    %56 = vector.broadcast %55 : vector<1x256xf32> to vector<80x256xf32>
    %57 = arith.addf %54, %56 : vector<80x256xf32>
    %cst_52 = arith.constant 0.000000e+00 : f32
    %58 = vector.broadcast %cst_52 : f32 to vector<80x256xf32>
    %59 = arith.maximumf %57, %58 : vector<80x256xf32>
    %60 = arith.truncf %59 : vector<80x256xf32> to vector<80x256xbf16>
    %c80_53 = arith.constant 80 : index
    %c0_54 = arith.constant 0 : index
    %61 = vector.load %arg4[%c80_53, %c0_54] : memref<160x256xbf16, #tpu.memory_space<vmem>>, vector<80x256xbf16>
    tpu.vector_store %arg4[%c80_53, %c0_54], %60 {strides = array<i32>} : memref<160x256xbf16, #tpu.memory_space<vmem>>, vector<80x256xbf16>,
    return
  }
  func.func @transform_0(%arg0: i32) -> (i32, i32) {
    %c0_i32 = arith.constant 0 : i32
    %c0_i32_0 = arith.constant 0 : i32
    return %arg0, %c0_i32 : i32, i32
  }
  func.func @transform_1(%arg0: i32) -> (i32, i32, i32) {
    %c0_i32 = arith.constant 0 : i32
    %c0_i32_0 = arith.constant 0 : i32
    %c0_i32_1 = arith.constant 0 : i32
    %c0_i32_2 = arith.constant 0 : i32
    return %c0_i32, %c0_i32_0, %c0_i32_1 : i32, i32, i32
  }
  func.func @transform_2(%arg0: i32) -> (i32, i32) {
    %c0_i32 = arith.constant 0 : i32
    %c0_i32_0 = arith.constant 0 : i32
    %c0_i32_1 = arith.constant 0 : i32
    return %c0_i32, %c0_i32_0 : i32, i32
  }
  func.func @transform_3(%arg0: i32) -> (i32, i32) {
    %c0_i32 = arith.constant 0 : i32
    %c0_i32_0 = arith.constant 0 : i32
    return %arg0, %c0_i32 : i32, i32
  }
}

</mosaic_0001>

<bundles_post_ra>
// kernel: model_forward.2
= control target key start
LH: loop header
LB: loop body
LE: loop exit
PB: predicated region body
PF: predicated region fallthrough
CT: control target
= control target key end

     0   :  { %s2234_s12 = smov 0   ;;  %s2672_s0 = inlined_call_operand.vmem [shape: bf16[1664,128], index: 0, kind: input, shape index: {}]   ;;  %s2673_s1 = inlined_call_operand.vmem [shape: bf16[128,128], index: 1, kind: input, shape index: {}]   ;;  %s2674_s2 = inlined_call_operand.vmem [shape: f32[1,128], index: 2, kind: input, shape index: {}]   ;;  %s2675_s3 = inlined_call_operand.vmem [shape: bf16[416,128], index: 3, kind: output, shape index: {}]  }
   0x1 LB: > { %s1578_s13 = sadd.s32 4294967295, %s2210_s12   ;;  %p1582_p0 = scmp.ge.s32.totalorder %s2210_s12, 1  ;;  %s2210_s12 = sphi %s2234_s12, %s13_s12  }
   0x2   : > { %p138_p1 = scmp.lt.s32.totalorder %s2210_s12, 3 }
   0x4   : > { %p139_p2 = pnand %p1582_p0, %p138_p1 }
   0x5   : > { %v2143_v0 = vld [vmem:[%s2673_s1] sm:$0xff] (!%p139_p2)   ;;  %v2212_v1 = vmov (!%p139_p2), 0.0   ;;  %v2144_v2 = vld [vmem:[%s2673_s1 + $0x8] sm:$0xff] (!%p139_p2)   ;;  %s162_s18 = smul.u32 (!%p139_p2), 104, %s1578_s13  ;;  %vm2213_vm0 = vmmov (!%p139_p2), 0   ;;  %v2145_v3 = vld [vmem:[%s2673_s1 + $0x10] sm:$0xff] (!%p139_p2)  }
   0x6   : > { %142 = sbr.rel (%p139_p2) target bundleno = 463 (0x1cf), region = 32  ;;  %1861 = vmatprep.subr.bf16.mxu0 (!%p139_p2), %v2212_v1  ;;  %1929 = vmatprep.subr.bf16.mxu1 (!%p139_p2), %v2212_v1  ;;  %v2146_v4 = vld [vmem:[%s2673_s1 + $0x18] sm:$0xff] (!%p139_p2)   ;;  %v2147_v5 = vld [vmem:[%s2673_s1 + $0x20] sm:$0xff] (!%p139_p2)   ;;  %v2148_v6 = vld [vmem:[%s2673_s1 + $0x28] sm:$0xff] (!%p139_p2)  }
   0x7   : > { %1862 = vmatpush3.bf16.msra.mxu0 (!%p139_p2), %v2143_v0  ;;  %1930 = vmatpush3.bf16.msra.mxu1 (!%p139_p2), %v2143_v0  ;;  %p163_p3 = scmp.lt.s32.totalorder (!%p139_p2), %s162_s18, 207  ;;  %v2149_v7 = vld [vmem:[%s2673_s1 + $0x30] sm:$0xff] (!%p139_p2)   ;;  %v2150_v8 = vld [vmem:[%s2673_s1 + $0x38] sm:$0xff] (!%p139_p2)   ;;  %v2464_v61 = vld [vmem:[%s2674_s2] ss:$0 sm:$0xff] (!%p139_p2)  ;;  %s168_s10 = smul.u32 (!%p139_p2), 26, %s1578_s13 }
   0x8   : > { %1863 = vmatprep.subr.bf16.mxu0 (!%p139_p2), %v2212_v1  ;;  %1931 = vmatprep.subr.bf16.mxu1 (!%p139_p2), %v2212_v1 }
   0x9   : > { %1877 = vmatprep.mubr.msk.bf16.mxu0 (!%p139_p2), %vm2213_vm0, %v2212_v1  ;;  %1945 = vmatprep.mubr.msk.bf16.mxu1 (!%p139_p2), %vm2213_vm0, %v2212_v1  ;;  %p169_p4 = scmp.lt.s32.totalorder (!%p139_p2), %s168_s10, 51 }
   0xb   : > { %1864 = vmatpush3.bf16.msra.mxu0 (!%p139_p2), %v2144_v2  ;;  %1932 = vmatpush3.bf16.msra.mxu1 (!%p139_p2), %v2144_v2 }
   0xc   : > { %1865 = vmatprep.subr.bf16.mxu0 (!%p139_p2), %v2212_v1  ;;  %1933 = vmatprep.subr.bf16.mxu1 (!%p139_p2), %v2212_v1 }
   0xd   : > { %s2677_s18 = smov (!%p163_p3, %s162_s18), 207  ;;  %s2679_s10 = smov (!%p169_p4, %s168_s10), 51 }
   0xe   : > { %s1583_s21 = sshll.u32 %s2677_s18, 2  ;;  %s1584_s11 = sshll.u32 %s2679_s10, 2 }
   0xf   : > { %s2266_s24 = scalar_lea.vmem %s2672_s0, %s1583_s21  ;;  %1866 = vmatpush3.bf16.msra.mxu0 %v2145_v3  ;;  %1934 = vmatpush3.bf16.msra.mxu1 %v2145_v3  ;;  %s2583_s15 = scalar_lea.vmem %s2675_s3, %s1584_s11 }
  0x10   : > { %1867 = vmatprep.subr.bf16.mxu0 %v2212_v1  ;;  %1935 = vmatprep.subr.bf16.mxu1 %v2212_v1  ;;  %v2151_v9 = vld [vmem:[%s2266_s24] sm:$0xff]   ;;  %v2152_v10 = vld [vmem:[%s2266_s24 + $0x68] sm:$0xff]   ;;  %v2154_v12 = vld [vmem:[%s2266_s24 + $0x70] sm:$0xff]  }
  0x11   : > { %v2153_v11 = vld [vmem:[%s2266_s24 + $0x8] sm:$0xff]   ;;  %v2155_v13 = vld [vmem:[%s2266_s24 + $0x10] sm:$0xff]   ;;  %v2156_v14 = vld [vmem:[%s2266_s24 + $0x78] sm:$0xff]  }
  0x12   : > { %v2157_v15 = vld [vmem:[%s2266_s24 + $0x18] sm:$0xff]   ;;  %v2158_v16 = vld [vmem:[%s2266_s24 + $0x80] sm:$0xff]   ;;  %v2160_v18 = vld [vmem:[%s2266_s24 + $0x88] sm:$0xff]  }
  0x13   : > { %1868 = vmatpush3.bf16.msra.mxu0 %v2146_v4  ;;  %1936 = vmatpush3.bf16.msra.mxu1 %v2146_v4  ;;  %v2159_v17 = vld [vmem:[%s2266_s24 + $0x20] sm:$0xff]   ;;  %v2161_v19 = vld [vmem:[%s2266_s24 + $0x28] sm:$0xff]   ;;  %v2162_v20 = vld [vmem:[%s2266_s24 + $0x90] sm:$0xff]  }
  0x14   : > { %1869 = vmatprep.subr.bf16.mxu0 %v2212_v1  ;;  %1937 = vmatprep.subr.bf16.mxu1 %v2212_v1  ;;  %v2163_v21 = vld [vmem:[%s2266_s24 + $0x30] sm:$0xff]   ;;  %v2164_v22 = vld [vmem:[%s2266_s24 + $0x98] sm:$0xff]   ;;  %v2166_v24 = vld [vmem:[%s2266_s24 + $0xa0] sm:$0xff]  }
  0x15   : > { %v2165_v23 = vld [vmem:[%s2266_s24 + $0x38] sm:$0xff]   ;;  %v2167_v25 = vld [vmem:[%s2266_s24 + $0x40] sm:$0xff]   ;;  %v2168_v26 = vld [vmem:[%s2266_s24 + $0xa8] sm:$0xff]  }
  0x16   : > { %v2169_v27 = vld [vmem:[%s2266_s24 + $0x48] sm:$0xff]   ;;  %v2170_v28 = vld [vmem:[%s2266_s24 + $0xb0] sm:$0xff]   ;;  %v2172_v30 = vld [vmem:[%s2266_s24 + $0xb8] sm:$0xff]  }
  0x17   : > { %1870 = vmatpush3.bf16.msra.mxu0 %v2147_v5  ;;  %1938 = vmatpush3.bf16.msra.mxu1 %v2147_v5  ;;  %v2171_v29 = vld [vmem:[%s2266_s24 + $0x50] sm:$0xff]   ;;  %v2173_v31 = vld [vmem:[%s2266_s24 + $0x58] sm:$0xff]   ;;  %v2174_v32 = vld [vmem:[%s2266_s24 + $0xc0] sm:$0xff]  }
  0x18   : > { %1871 = vmatprep.subr.bf16.mxu0 %v2212_v1  ;;  %1939 = vmatprep.subr.bf16.mxu1 %v2212_v1  ;;  %v2175_v33 = vld [vmem:[%s2266_s24 + $0x60] sm:$0xff]   ;;  %v2176_v34 = vld [vmem:[%s2266_s24 + $0xc8] sm:$0xff]   ;;  %v2177_v35 = vld [vmem:[%s2266_s24 + $0xd0] sm:$0xff]  }
  0x19   : > { %v2178_v36 = vld [vmem:[%s2266_s24 + $0x138] sm:$0xff]   ;;  %v2180_v38 = vld [vmem:[%s2266_s24 + $0x140] sm:$0xff]   ;;  %v2182_v40 = vld [vmem:[%s2266_s24 + $0x148] sm:$0xff]  }
  0x1a   : > { %v2179_v37 = vld [vmem:[%s2266_s24 + $0xd8] sm:$0xff]   ;;  %v2181_v39 = vld [vmem:[%s2266_s24 + $0xe0] sm:$0xff]   ;;  %v2183_v41 = vld [vmem:[%s2266_s24 + $0xe8] sm:$0xff]  }
  0x1b   : > { %1872 = vmatpush3.bf16.msra.mxu0 %v2148_v6  ;;  %1940 = vmatpush3.bf16.msra.mxu1 %v2148_v6  ;;  %v2184_v42 = vld [vmem:[%s2266_s24 + $0x150] sm:$0xff]   ;;  %v2186_v44 = vld [vmem:[%s2266_s24 + $0x158] sm:$0xff]   ;;  %v2188_v46 = vld [vmem:[%s2266_s24 + $0x160] sm:$0xff]  }
  0x1c   : > { %1873 = vmatprep.subr.bf16.mxu0 %v2212_v1  ;;  %1941 = vmatprep.subr.bf16.mxu1 %v2212_v1  ;;  %v2185_v43 = vld [vmem:[%s2266_s24 + $0xf0] sm:$0xff]   ;;  %v2187_v45 = vld [vmem:[%s2266_s24 + $0xf8] sm:$0xff]   ;;  %v2189_v47 = vld [vmem:[%s2266_s24 + $0x100] sm:$0xff]  }
  0x1d   : > { %v2190_v48 = vld [vmem:[%s2266_s24 + $0x168] sm:$0xff]   ;;  %v2192_v50 = vld [vmem:[%s2266_s24 + $0x170] sm:$0xff]   ;;  %v2194_v52 = vld [vmem:[%s2266_s24 + $0x178] sm:$0xff]  }
  0x1e   : > { %v2191_v49 = vld [vmem:[%s2266_s24 + $0x108] sm:$0xff]   ;;  %v2193_v51 = vld [vmem:[%s2266_s24 + $0x110] sm:$0xff]   ;;  %v2195_v53 = vld [vmem:[%s2266_s24 + $0x118] sm:$0xff]  }
  0x1f   : > { %1874 = vmatpush3.bf16.msra.mxu0 %v2149_v7  ;;  %1942 = vmatpush3.bf16.msra.mxu1 %v2149_v7  ;;  %v2196_v54 = vld [vmem:[%s2266_s24 + $0x180] sm:$0xff]   ;;  %v2198_v56 = vld [vmem:[%s2266_s24 + $0x188] sm:$0xff]   ;;  %v2200_v58 = vld [vmem:[%s2266_s24 + $0x190] sm:$0xff]  }
  0x20   : > { %1875 = vmatprep.subr.bf16.mxu0 %v2212_v1  ;;  %1943 = vmatprep.subr.bf16.mxu1 %v2212_v1  ;;  %v2197_v55 = vld [vmem:[%s2266_s24 + $0x120] sm:$0xff]   ;;  %v2199_v57 = vld [vmem:[%s2266_s24 + $0x128] sm:$0xff]   ;;  %v2201_v59 = vld [vmem:[%s2266_s24 + $0x130] sm:$0xff]  }
  0x21   : > { %v2202_v60 = vld [vmem:[%s2266_s24 + $0x198] sm:$0xff]  }
  0x23   : > { %1876 = vmatpush3.bf16.msra.mxu0 %v2150_v8  ;;  %1944 = vmatpush3.bf16.msra.mxu1 %v2150_v8 }
  0x24   : > { %1997 = vmatprep.subr.bf16.mxu0 %v2212_v1  ;;  %2065 = vmatprep.subr.bf16.mxu1 %v2212_v1 }
  0x26   : > { %1878 = vmatmul.mubr.bf16.vlgmr.msra.gmra.mrb[0].mxu0 %v2151_v9  ;;  %1946 = vmatmul.mubr.bf16.vlgmr.msra.gmra.mrb[0].mxu1 %v2152_v10 }
  0x27   : > { %1998 = vmatpush3.bf16.msra.mxu0 %v2143_v0  ;;  %2066 = vmatpush3.bf16.msra.mxu1 %v2143_v0 }
  0x28   : > { %1881 = vmatprep.mubr.msk.bf16.mxu0 %vm2213_vm0, %v2212_v1  ;;  %1949 = vmatprep.mubr.msk.bf16.mxu1 %vm2213_vm0, %v2212_v1 }
  0x29   : > { %1999 = vmatprep.subr.bf16.mxu0 %v2212_v1  ;;  %2067 = vmatprep.subr.bf16.mxu1 %v2212_v1 }
  0x2b   : > { %2000 = vmatpush3.bf16.msra.mxu0 %v2144_v2  ;;  %2068 = vmatpush3.bf16.msra.mxu1 %v2144_v2 }
  0x2c   : > { %2001 = vmatprep.subr.bf16.mxu0 %v2212_v1  ;;  %2069 = vmatprep.subr.bf16.mxu1 %v2212_v1 }
  0x2e   : > { %1882 = vmatmul.mubr.bf16.gmra.mrb[4].mxu0 %v2153_v11  ;;  %1950 = vmatmul.mubr.bf16.gmra.mrb[4].mxu1 %v2154_v12 }
  0x2f   : > { %1885 = vmatprep.mubr.msk.bf16.mxu0 %vm2213_vm0, %v2212_v1  ;;  %1953 = vmatprep.mubr.msk.bf16.mxu1 %vm2213_vm0, %v2212_v1 }
  0x30   : > { %2002 = vmatpush3.bf16.msra.mxu0 %v2145_v3  ;;  %2070 = vmatpush3.bf16.msra.mxu1 %v2145_v3 }
  0x31   : > { %2003 = vmatprep.subr.bf16.mxu0 %v2212_v1  ;;  %2071 = vmatprep.subr.bf16.mxu1 %v2212_v1 }
  0x34   : > { %2004 = vmatpush3.bf16.msra.mxu0 %v2146_v4  ;;  %2072 = vmatpush3.bf16.msra.mxu1 %v2146_v4 }
  0x35   : > { %2005 = vmatprep.subr.bf16.mxu0 %v2212_v1  ;;  %2073 = vmatprep.subr.bf16.mxu1 %v2212_v1 }
  0x36   : > { %1886 = vmatmul.mubr.bf16.gmra.mrb[8].mxu0 %v2155_v13  ;;  %1954 = vmatmul.mubr.bf16.gmra.mrb[8].mxu1 %v2156_v14 }
  0x37   : > { %1889 = vmatprep.mubr.msk.bf16.mxu0 %vm2213_vm0, %v2212_v1  ;;  %1957 = vmatprep.mubr.msk.bf16.mxu1 %vm2213_vm0, %v2212_v1 }
  0x38   : > { %2006 = vmatpush3.bf16.msra.mxu0 %v2147_v5  ;;  %2074 = vmatpush3.bf16.msra.mxu1 %v2147_v5 }
  0x39   : > { %2007 = vmatprep.subr.bf16.mxu0 %v2212_v1  ;;  %2075 = vmatprep.subr.bf16.mxu1 %v2212_v1 }
  0x3c   : > { %2008 = vmatpush3.bf16.msra.mxu0 %v2148_v6  ;;  %2076 = vmatpush3.bf16.msra.mxu1 %v2148_v6 }
  0x3d   : > { %2009 = vmatprep.subr.bf16.mxu0 %v2212_v1  ;;  %2077 = vmatprep.subr.bf16.mxu1 %v2212_v1 }
  0x3e   : > { %1890 = vmatmul.mubr.bf16.gmra.mrb[12].mxu0 %v2157_v15  ;;  %1958 = vmatmul.mubr.bf16.gmra.mrb[12].mxu1 %v2158_v16 }
  0x3f   : > { %1893 = vmatprep.mubr.msk.bf16.mxu0 %vm2213_vm0, %v2212_v1  ;;  %1961 = vmatprep.mubr.msk.bf16.mxu1 %vm2213_vm0, %v2212_v1 }
  0x40   : > { %2010 = vmatpush3.bf16.msra.mxu0 %v2149_v7  ;;  %2078 = vmatpush3.bf16.msra.mxu1 %v2149_v7 }
  0x41   : > { %2011 = vmatprep.subr.bf16.mxu0 %v2212_v1  ;;  %2079 = vmatprep.subr.bf16.mxu1 %v2212_v1 }
  0x44   : > { %2012 = vmatpush3.bf16.msra.mxu0 %v2150_v8  ;;  %2080 = vmatpush3.bf16.msra.mxu1 %v2150_v8 }
  0x46   : > { %1894 = vmatmul.mubr.bf16.gmra.mrb[16].mxu0 %v2159_v17  ;;  %1962 = vmatmul.mubr.bf16.gmra.mrb[16].mxu1 %v2160_v18 }
  0x47   : > { %1897 = vmatprep.mubr.msk.bf16.mxu0 %vm2213_vm0, %v2212_v1  ;;  %1965 = vmatprep.mubr.msk.bf16.mxu1 %vm2213_vm0, %v2212_v1 }
  0x4e   : > { %1898 = vmatmul.mubr.bf16.gmra.mrb[20].mxu0 %v2161_v19  ;;  %1966 = vmatmul.mubr.bf16.gmra.mrb[20].mxu1 %v2162_v20 }
  0x4f   : > { %1901 = vmatprep.mubr.msk.bf16.mxu0 %vm2213_vm0, %v2212_v1  ;;  %1969 = vmatprep.mubr.msk.bf16.mxu1 %vm2213_vm0, %v2212_v1 }
  0x56   : > { %1902 = vmatmul.mubr.bf16.gmra.mrb[24].mxu0 %v2163_v21  ;;  %1970 = vmatmul.mubr.bf16.gmra.mrb[24].mxu1 %v2164_v22 }
  0x57   : > { %1905 = vmatprep.mubr.msk.bf16.mxu0 %vm2213_vm0, %v2212_v1  ;;  %1973 = vmatprep.mubr.msk.bf16.mxu1 %vm2213_vm0, %v2212_v1 }
  0x5e   : > { %1906 = vmatmul.mubr.bf16.gmra.mrb[28].mxu0 %v2165_v23  ;;  %1974 = vmatmul.mubr.bf16.gmra.mrb[28].mxu1 %v2166_v24 }
  0x5f   : > { %1909 = vmatprep.mubr.msk.bf16.mxu0 %vm2213_vm0, %v2212_v1  ;;  %1977 = vmatprep.mubr.msk.bf16.mxu1 %vm2213_vm0, %v2212_v1 }
  0x66   : > { %1910 = vmatmul.mubr.bf16.gmra.mrb[32].mxu0 %v2167_v25  ;;  %1978 = vmatmul.mubr.bf16.gmra.mrb[32].mxu1 %v2168_v26 }
  0x67   : > { %1913 = vmatprep.mubr.msk.bf16.mxu0 %vm2213_vm0, %v2212_v1  ;;  %1981 = vmatprep.mubr.msk.bf16.mxu1 %vm2213_vm0, %v2212_v1 }
  0x6e   : > { %1914 = vmatmul.mubr.bf16.gmra.mrb[36].mxu0 %v2169_v27  ;;  %1982 = vmatmul.mubr.bf16.gmra.mrb[36].mxu1 %v2170_v28 }
  0x6f   : > { %1917 = vmatprep.mubr.msk.bf16.mxu0 %vm2213_vm0, %v2212_v1  ;;  %1985 = vmatprep.mubr.msk.bf16.mxu1 %vm2213_vm0, %v2212_v1 }
  0x76   : > { %1918 = vmatmul.mubr.bf16.gmra.mrb[40].mxu0 %v2171_v29  ;;  %1986 = vmatmul.mubr.bf16.gmra.mrb[40].mxu1 %v2172_v30 }
  0x77   : > { %1921 = vmatprep.mubr.msk.bf16.mxu0 %vm2213_vm0, %v2212_v1  ;;  %1989 = vmatprep.mubr.msk.bf16.mxu1 %vm2213_vm0, %v2212_v1 }
  0x7e   : > { %1922 = vmatmul.mubr.bf16.gmra.mrb[44].mxu0 %v2173_v31  ;;  %1990 = vmatmul.mubr.bf16.gmra.mrb[44].mxu1 %v2174_v32 }
  0x7f   : > { %1925 = vmatprep.mubr.msk.bf16.mxu0 %vm2213_vm0, %v2212_v1  ;;  %1993 = vmatprep.mubr.msk.bf16.mxu1 %vm2213_vm0, %v2212_v1 }
  0x86   : > { %1926 = vmatmul.mubr.bf16.gmra.mrb[48].mxu0 %v2175_v33  ;;  %1994 = vmatmul.mubr.bf16.gmra.mrb[48].mxu1 %v2176_v34 }
  0x87   : > { %2013 = vmatprep.mubr.msk.bf16.mxu0 %vm2213_vm0, %v2212_v1  ;;  %2081 = vmatprep.mubr.msk.bf16.mxu1 %vm2213_vm0, %v2212_v1 }
  0x8e   : > { %2014 = vmatmul.mubr.bf16.vlgmr.msra.gmra.mrb[52].mxu0 %v2177_v35  ;;  %2082 = vmatmul.mubr.bf16.vlgmr.msra.gmra.mrb[52].mxu1 %v2178_v36 }
  0x8f   : > { %2017 = vmatprep.mubr.msk.bf16.mxu0 %vm2213_vm0, %v2212_v1  ;;  %2085 = vmatprep.mubr.msk.bf16.mxu1 %vm2213_vm0, %v2212_v1 }
  0x96   : > { %2018 = vmatmul.mubr.bf16.gmra.mrb[56].mxu0 %v2179_v37  ;;  %2086 = vmatmul.mubr.bf16.gmra.mrb[56].mxu1 %v2180_v38 }
  0x97   : > { %2021 = vmatprep.mubr.msk.bf16.mxu0 %vm2213_vm0, %v2212_v1  ;;  %2089 = vmatprep.mubr.msk.bf16.mxu1 %vm2213_vm0, %v2212_v1 }
  0x9e   : > { %2022 = vmatmul.mubr.bf16.gmra.mrb[60].mxu0 %v2181_v39  ;;  %2090 = vmatmul.mubr.bf16.gmra.mrb[60].mxu1 %v2182_v40 }
  0x9f   : > { %2025 = vmatprep.mubr.msk.bf16.mxu0 %vm2213_vm0, %v2212_v1  ;;  %2093 = vmatprep.mubr.msk.bf16.mxu1 %vm2213_vm0, %v2212_v1 }
  0xa6   : > { %2026 = vmatmul.mubr.bf16.gmra.mrb[64].mxu0 %v2183_v41  ;;  %2094 = vmatmul.mubr.bf16.gmra.mrb[64].mxu1 %v2184_v42 }
  0xa7   : > { %2029 = vmatprep.mubr.msk.bf16.mxu0 %vm2213_vm0, %v2212_v1  ;;  %2097 = vmatprep.mubr.msk.bf16.mxu1 %vm2213_vm0, %v2212_v1 }
  0xae   : > { %2030 = vmatmul.mubr.bf16.gmra.mrb[68].mxu0 %v2185_v43  ;;  %2098 = vmatmul.mubr.bf16.gmra.mrb[68].mxu1 %v2186_v44 }
  0xaf   : > { %2033 = vmatprep.mubr.msk.bf16.mxu0 %vm2213_vm0, %v2212_v1  ;;  %2101 = vmatprep.mubr.msk.bf16.mxu1 %vm2213_vm0, %v2212_v1 }
  0xb6   : > { %2034 = vmatmul.mubr.bf16.gmra.mrb[72].mxu0 %v2187_v45  ;;  %2102 = vmatmul.mubr.bf16.gmra.mrb[72].mxu1 %v2188_v46 }
  0xb7   : > { %2037 = vmatprep.mubr.msk.bf16.mxu0 %vm2213_vm0, %v2212_v1  ;;  %2105 = vmatprep.mubr.msk.bf16.mxu1 %vm2213_vm0, %v2212_v1 }
  0xbe   : > { %2038 = vmatmul.mubr.bf16.gmra.mrb[76].mxu0 %v2189_v47  ;;  %2106 = vmatmul.mubr.bf16.gmra.mrb[76].mxu1 %v2190_v48 }
  0xbf   : > { %2041 = vmatprep.mubr.msk.bf16.mxu0 %vm2213_vm0, %v2212_v1  ;;  %2109 = vmatprep.mubr.msk.bf16.mxu1 %vm2213_vm0, %v2212_v1 }
  0xc6   : > { %2042 = vmatmul.mubr.bf16.gmra.mrb[80].mxu0 %v2191_v49  ;;  %2110 = vmatmul.mubr.bf16.gmra.mrb[80].mxu1 %v2192_v50 }
  0xc7   : > { %2045 = vmatprep.mubr.msk.bf16.mxu0 %vm2213_vm0, %v2212_v1  ;;  %2113 = vmatprep.mubr.msk.bf16.mxu1 %vm2213_vm0, %v2212_v1 }
  0xce   : > { %2046 = vmatmul.mubr.bf16.gmra.mrb[84].mxu0 %v2193_v51  ;;  %2114 = vmatmul.mubr.bf16.gmra.mrb[84].mxu1 %v2194_v52 }
  0xcf   : > { %2049 = vmatprep.mubr.msk.bf16.mxu0 %vm2213_vm0, %v2212_v1  ;;  %2117 = vmatprep.mubr.msk.bf16.mxu1 %vm2213_vm0, %v2212_v1 }
  0xd6   : > { %2050 = vmatmul.mubr.bf16.gmra.mrb[88].mxu0 %v2195_v53  ;;  %2118 = vmatmul.mubr.bf16.gmra.mrb[88].mxu1 %v2196_v54 }
  0xd7   : > { %2053 = vmatprep.mubr.msk.bf16.mxu0 %vm2213_vm0, %v2212_v1  ;;  %2121 = vmatprep.mubr.msk.bf16.mxu1 %vm2213_vm0, %v2212_v1 }
  0xde   : > { %2054 = vmatmul.mubr.bf16.gmra.mrb[92].mxu0 %v2197_v55  ;;  %2122 = vmatmul.mubr.bf16.gmra.mrb[92].mxu1 %v2198_v56 }
  0xdf   : > { %2057 = vmatprep.mubr.msk.bf16.mxu0 %vm2213_vm0, %v2212_v1  ;;  %2125 = vmatprep.mubr.msk.bf16.mxu1 %vm2213_vm0, %v2212_v1 }
  0xe6   : > { %2058 = vmatmul.mubr.bf16.gmra.mrb[96].mxu0 %v2199_v57  ;;  %2126 = vmatmul.mubr.bf16.gmra.mrb[96].mxu1 %v2200_v58 }
  0xe7   : > { %2061 = vmatprep.mubr.msk.bf16.mxu0 %vm2213_vm0, %v2212_v1  ;;  %2129 = vmatprep.mubr.msk.bf16.mxu1 %vm2213_vm0, %v2212_v1 }
  0xee   : > { %2062 = vmatmul.mubr.bf16.gmra.mrb[100].mxu0 %v2201_v59  ;;  %2130 = vmatmul.mubr.bf16.gmra.mrb[100].mxu1 %v2202_v60 }
  0xf9   : > { %v384_v62 = vpop.f32.mrb[0].mxu0  ;;  %v651_v63 = vpop.f32.mrb[0].mxu1 }
  0xfa   : > { %v385_v0 = vadd.f32 %v2464_v61, %v384_v62  ;;  %v652_v2 = vadd.f32 %v2464_v61, %v651_v63  ;;  %v1879_v3 = vpop.f32.mrb[1].mxu0  ;;  %v1947_v4 = vpop.f32.mrb[1].mxu1 }
  0xfb   : > { %v387_v5 = vpop.f32.mrb[2].mxu0  ;;  %v654_v6 = vpop.f32.mrb[2].mxu1 }
  0xfc   : > { %v487_v1 = vmax.f32 %v385_v0, 0.0  ;;  %v754_v7 = vmax.f32 %v652_v2, 0.0  ;;  %v388_v8 = vadd.f32 %v2464_v61, %v387_v5  ;;  %v655_v9 = vadd.f32 %v2464_v61, %v654_v6  ;;  %v1880_v10 = vpop.f32.mrb[3].mxu0  ;;  %v1948_v11 = vpop.f32.mrb[3].mxu1 }
  0xfe   : > { %v2470_v12 = vmax.f32 %v487_v1, %v754_v7  ;;  %v488_v13 = vmax.f32 %v388_v8, 0.0  ;;  %v755_v14 = vmax.f32 %v655_v9, 0.0 }
 0x100   : > { %v2472_v15 = vmax.f32 %v488_v13, %v755_v14 }
 0x101   : > { %v392_v16 = vpop.f32.mrb[4].mxu0  ;;  %v659_v17 = vpop.f32.mrb[4].mxu1 }
 0x102   : > { %v393_v18 = vadd.f32 %v2464_v61, %v392_v16  ;;  %v660_v19 = vadd.f32 %v2464_v61, %v659_v17  ;;  %v1883_v20 = vpop.f32.mrb[5].mxu0  ;;  %v1951_v21 = vpop.f32.mrb[5].mxu1 }
 0x103   : > { %v395_v22 = vpop.f32.mrb[6].mxu0  ;;  %v662_v23 = vpop.f32.mrb[6].mxu1 }
 0x104   : > { %v489_v24 = vmax.f32 %v393_v18, 0.0  ;;  %v756_v25 = vmax.f32 %v660_v19, 0.0  ;;  %v396_v26 = vadd.f32 %v2464_v61, %v395_v22  ;;  %v663_v27 = vadd.f32 %v2464_v61, %v662_v23  ;;  %v1884_v28 = vpop.f32.mrb[7].mxu0  ;;  %v1952_v29 = vpop.f32.mrb[7].mxu1 }
 0x106   : > { %v2478_v30 = vmax.f32 %v489_v24, %v756_v25  ;;  %v490_v31 = vmax.f32 %v396_v26, 0.0  ;;  %v757_v32 = vmax.f32 %v663_v27, 0.0 }
 0x108   : > { %v2480_v33 = vmax.f32 %v490_v31, %v757_v32 }
 0x109   : > { %v400_v34 = vpop.f32.mrb[8].mxu0  ;;  %v667_v35 = vpop.f32.mrb[8].mxu1 }
 0x10a   : > { %v401_v36 = vadd.f32 %v2464_v61, %v400_v34  ;;  %v668_v37 = vadd.f32 %v2464_v61, %v667_v35  ;;  %v1887_v38 = vpop.f32.mrb[9].mxu0  ;;  %v1955_v39 = vpop.f32.mrb[9].mxu1 }
 0x10b   : > { %v403_v40 = vpop.f32.mrb[10].mxu0  ;;  %v670_v41 = vpop.f32.mrb[10].mxu1 }
 0x10c   : > { %v491_v42 = vmax.f32 %v401_v36, 0.0  ;;  %v758_v43 = vmax.f32 %v668_v37, 0.0  ;;  %v404_v44 = vadd.f32 %v2464_v61, %v403_v40  ;;  %v671_v45 = vadd.f32 %v2464_v61, %v670_v41  ;;  %v1888_v46 = vpop.f32.mrb[11].mxu0  ;;  %v1956_v47 = vpop.f32.mrb[11].mxu1 }
 0x10e   : > { %v2486_v48 = vmax.f32 %v491_v42, %v758_v43  ;;  %v492_v49 = vmax.f32 %v404_v44, 0.0  ;;  %v759_v50 = vmax.f32 %v671_v45, 0.0 }
 0x110   : > { %v2488_v51 = vmax.f32 %v492_v49, %v759_v50 }
 0x111   : > { %v408_v52 = vpop.f32.mrb[12].mxu0  ;;  %v675_v53 = vpop.f32.mrb[12].mxu1 }
 0x112   : > { %v409_v54 = vadd.f32 %v2464_v61, %v408_v52  ;;  %v676_v55 = vadd.f32 %v2464_v61, %v675_v53  ;;  %v1891_v56 = vpop.f32.mrb[13].mxu0  ;;  %v1959_v57 = vpop.f32.mrb[13].mxu1 }
 0x113   : > { %v411_v58 = vpop.f32.mrb[14].mxu0  ;;  %v678_v59 = vpop.f32.mrb[14].mxu1 }
 0x114   : > { %v493_v60 = vmax.f32 %v409_v54, 0.0  ;;  %v760_v62 = vmax.f32 %v676_v55, 0.0  ;;  %v412_v63 = vadd.f32 %v2464_v61, %v411_v58  ;;  %v679_v0 = vadd.f32 %v2464_v61, %v678_v59  ;;  %v1892_v2 = vpop.f32.mrb[15].mxu0  ;;  %v1960_v3 = vpop.f32.mrb[15].mxu1 }
 0x116   : > { %v2494_v4 = vmax.f32 %v493_v60, %v760_v62  ;;  %v494_v5 = vmax.f32 %v412_v63, 0.0  ;;  %v761_v6 = vmax.f32 %v679_v0, 0.0 }
 0x118   : > { %v2496_v1 = vmax.f32 %v494_v5, %v761_v6 }
 0x119   : > { %v416_v7 = vpop.f32.mrb[16].mxu0  ;;  %v683_v8 = vpop.f32.mrb[16].mxu1 }
 0x11a   : > { %v417_v9 = vadd.f32 %v2464_v61, %v416_v7  ;;  %v684_v10 = vadd.f32 %v2464_v61, %v683_v8  ;;  %v1895_v11 = vpop.f32.mrb[17].mxu0  ;;  %v1963_v13 = vpop.f32.mrb[17].mxu1 }
 0x11b   : > { %v419_v14 = vpop.f32.mrb[18].mxu0  ;;  %v686_v16 = vpop.f32.mrb[18].mxu1 }
 0x11c   : > { %v495_v17 = vmax.f32 %v417_v9, 0.0  ;;  %v762_v18 = vmax.f32 %v684_v10, 0.0  ;;  %v420_v19 = vadd.f32 %v2464_v61, %v419_v14  ;;  %v687_v20 = vadd.f32 %v2464_v61, %v686_v16  ;;  %v1896_v21 = vpop.f32.mrb[19].mxu0  ;;  %v1964_v22 = vpop.f32.mrb[19].mxu1 }
 0x11e   : > { %v2502_v23 = vmax.f32 %v495_v17, %v762_v18  ;;  %v496_v24 = vmax.f32 %v420_v19, 0.0  ;;  %v763_v25 = vmax.f32 %v687_v20, 0.0 }
 0x120   : > { %v2504_v26 = vmax.f32 %v496_v24, %v763_v25 }
 0x121   : > { %v424_v27 = vpop.f32.mrb[20].mxu0  ;;  %v691_v28 = vpop.f32.mrb[20].mxu1 }
 0x122   : > { %v425_v29 = vadd.f32 %v2464_v61, %v424_v27  ;;  %v692_v31 = vadd.f32 %v2464_v61, %v691_v28  ;;  %v1899_v32 = vpop.f32.mrb[21].mxu0  ;;  %v1967_v34 = vpop.f32.mrb[21].mxu1 }
 0x123   : > { %v427_v35 = vpop.f32.mrb[22].mxu0  ;;  %v694_v36 = vpop.f32.mrb[22].mxu1 }
 0x124   : > { %v497_v37 = vmax.f32 %v425_v29, 0.0  ;;  %v764_v38 = vmax.f32 %v692_v31, 0.0  ;;  %v428_v39 = vadd.f32 %v2464_v61, %v427_v35  ;;  %v695_v40 = vadd.f32 %v2464_v61, %v694_v36  ;;  %v1900_v41 = vpop.f32.mrb[23].mxu0  ;;  %v1968_v42 = vpop.f32.mrb[23].mxu1 }
 0x126   : > { %v2510_v43 = vmax.f32 %v497_v37, %v764_v38  ;;  %v498_v44 = vmax.f32 %v428_v39, 0.0  ;;  %v765_v45 = vmax.f32 %v695_v40, 0.0 }
 0x128   : > { %v2512_v46 = vmax.f32 %v498_v44, %v765_v45 }
 0x129   : > { %v432_v47 = vpop.f32.mrb[24].mxu0  ;;  %v699_v49 = vpop.f32.mrb[24].mxu1 }
 0x12a   : > { %v433_v50 = vadd.f32 %v2464_v61, %v432_v47  ;;  %v700_v52 = vadd.f32 %v2464_v61, %v699_v49  ;;  %v1903_v53 = vpop.f32.mrb[25].mxu0  ;;  %v1971_v54 = vpop.f32.mrb[25].mxu1 }
 0x12b   : > { %v435_v55 = vpop.f32.mrb[26].mxu0  ;;  %v702_v56 = vpop.f32.mrb[26].mxu1 }
 0x12c   : > { %v499_v57 = vmax.f32 %v433_v50, 0.0  ;;  %v766_v58 = vmax.f32 %v700_v52, 0.0  ;;  %v436_v59 = vadd.f32 %v2464_v61, %v435_v55  ;;  %v703_v60 = vadd.f32 %v2464_v61, %v702_v56  ;;  %v1904_v62 = vpop.f32.mrb[27].mxu0  ;;  %v1972_v63 = vpop.f32.mrb[27].mxu1 }
 0x12e   : > { %v2518_v0 = vmax.f32 %v499_v57, %v766_v58  ;;  %v500_v2 = vmax.f32 %v436_v59, 0.0  ;;  %v767_v3 = vmax.f32 %v703_v60, 0.0 }
 0x130   : > { %v2520_v5 = vmax.f32 %v500_v2, %v767_v3 }
 0x131   : > { %v440_v6 = vpop.f32.mrb[28].mxu0  ;;  %v707_v7 = vpop.f32.mrb[28].mxu1 }
 0x132   : > { %v441_v8 = vadd.f32 %v2464_v61, %v440_v6  ;;  %v708_v9 = vadd.f32 %v2464_v61, %v707_v7  ;;  %v1907_v10 = vpop.f32.mrb[29].mxu0  ;;  %v1975_v11 = vpop.f32.mrb[29].mxu1 }
 0x133   : > { %v443_v13 = vpop.f32.mrb[30].mxu0  ;;  %v710_v14 = vpop.f32.mrb[30].mxu1 }
 0x134   : > { %v501_v16 = vmax.f32 %v441_v8, 0.0  ;;  %v768_v17 = vmax.f32 %v708_v9, 0.0  ;;  %v444_v18 = vadd.f32 %v2464_v61, %v443_v13  ;;  %v711_v19 = vadd.f32 %v2464_v61, %v710_v14  ;;  %v1908_v20 = vpop.f32.mrb[31].mxu0  ;;  %v1976_v21 = vpop.f32.mrb[31].mxu1 }
 0x136   : > { %v2526_v22 = vmax.f32 %v501_v16, %v768_v17  ;;  %v502_v24 = vmax.f32 %v444_v18, 0.0  ;;  %v769_v25 = vmax.f32 %v711_v19, 0.0 }
 0x138   : > { %v2528_v27 = vmax.f32 %v502_v24, %v769_v25 }
 0x139   : > { %v448_v28 = vpop.f32.mrb[32].mxu0  ;;  %v715_v29 = vpop.f32.mrb[32].mxu1 }
 0x13a   : > { %v449_v31 = vadd.f32 %v2464_v61, %v448_v28  ;;  %v716_v32 = vadd.f32 %v2464_v61, %v715_v29  ;;  %v1911_v34 = vpop.f32.mrb[33].mxu0  ;;  %v1979_v35 = vpop.f32.mrb[33].mxu1 }
 0x13b   : > { %v451_v36 = vpop.f32.mrb[34].mxu0  ;;  %v718_v37 = vpop.f32.mrb[34].mxu1 }
 0x13c   : > { %v503_v38 = vmax.f32 %v449_v31, 0.0  ;;  %v770_v39 = vmax.f32 %v716_v32, 0.0  ;;  %v452_v40 = vadd.f32 %v2464_v61, %v451_v36  ;;  %v719_v41 = vadd.f32 %v2464_v61, %v718_v37  ;;  %v1912_v42 = vpop.f32.mrb[35].mxu0  ;;  %v1980_v44 = vpop.f32.mrb[35].mxu1 }
 0x13e   : > { %v2534_v45 = vmax.f32 %v503_v38, %v770_v39  ;;  %v504_v47 = vmax.f32 %v452_v40, 0.0  ;;  %v771_v49 = vmax.f32 %v719_v41, 0.0 }
 0x140   : > { %v2536_v50 = vmax.f32 %v504_v47, %v771_v49 }
 0x141   : > { %v456_v52 = vpop.f32.mrb[36].mxu0  ;;  %v723_v53 = vpop.f32.mrb[36].mxu1 }
 0x142   : > { %v457_v54 = vadd.f32 %v2464_v61, %v456_v52  ;;  %v724_v55 = vadd.f32 %v2464_v61, %v723_v53  ;;  %v1915_v56 = vpop.f32.mrb[37].mxu0  ;;  %v1983_v57 = vpop.f32.mrb[37].mxu1 }
 0x143   : > { %v459_v58 = vpop.f32.mrb[38].mxu0  ;;  %v726_v59 = vpop.f32.mrb[38].mxu1 }
 0x144   : > { %v505_v60 = vmax.f32 %v457_v54, 0.0  ;;  %v772_v62 = vmax.f32 %v724_v55, 0.0  ;;  %v460_v63 = vadd.f32 %v2464_v61, %v459_v58  ;;  %v727_v2 = vadd.f32 %v2464_v61, %v726_v59  ;;  %v1916_v3 = vpop.f32.mrb[39].mxu0  ;;  %v1984_v6 = vpop.f32.mrb[39].mxu1 }
 0x146   : > { %v2542_v7 = vmax.f32 %v505_v60, %v772_v62  ;;  %v506_v8 = vmax.f32 %v460_v63, 0.0  ;;  %v773_v9 = vmax.f32 %v727_v2, 0.0 }
 0x148   : > { %v2544_v10 = vmax.f32 %v506_v8, %v773_v9 }
 0x149   : > { %v464_v11 = vpop.f32.mrb[40].mxu0  ;;  %v731_v13 = vpop.f32.mrb[40].mxu1 }
 0x14a   : > { %v465_v14 = vadd.f32 %v2464_v61, %v464_v11  ;;  %v732_v16 = vadd.f32 %v2464_v61, %v731_v13  ;;  %v1919_v17 = vpop.f32.mrb[41].mxu0  ;;  %v1987_v18 = vpop.f32.mrb[41].mxu1 }
 0x14b   : > { %v467_v19 = vpop.f32.mrb[42].mxu0  ;;  %v734_v20 = vpop.f32.mrb[42].mxu1 }
 0x14c   : > { %v507_v21 = vmax.f32 %v465_v14, 0.0  ;;  %v774_v24 = vmax.f32 %v732_v16, 0.0  ;;  %v468_v25 = vadd.f32 %v2464_v61, %v467_v19  ;;  %v735_v28 = vadd.f32 %v2464_v61, %v734_v20  ;;  %v1920_v29 = vpop.f32.mrb[43].mxu0  ;;  %v1988_v31 = vpop.f32.mrb[43].mxu1 }
 0x14e   : > { %v2550_v32 = vmax.f32 %v507_v21, %v774_v24  ;;  %v508_v34 = vmax.f32 %v468_v25, 0.0  ;;  %v775_v35 = vmax.f32 %v735_v28, 0.0 }
 0x150   : > { %v2552_v36 = vmax.f32 %v508_v34, %v775_v35 }
 0x151   : > { %v472_v37 = vpop.f32.mrb[44].mxu0  ;;  %v739_v38 = vpop.f32.mrb[44].mxu1 }
 0x152   : > { %v473_v39 = vadd.f32 %v2464_v61, %v472_v37  ;;  %v740_v40 = vadd.f32 %v2464_v61, %v739_v38  ;;  %v1923_v41 = vpop.f32.mrb[45].mxu0  ;;  %v1991_v42 = vpop.f32.mrb[45].mxu1 }
 0x153   : > { %v475_v44 = vpop.f32.mrb[46].mxu0  ;;  %v742_v47 = vpop.f32.mrb[46].mxu1 }
 0x154   : > { %v509_v49 = vmax.f32 %v473_v39, 0.0  ;;  %v776_v52 = vmax.f32 %v740_v40, 0.0  ;;  %v476_v53 = vadd.f32 %v2464_v61, %v475_v44  ;;  %v743_v54 = vadd.f32 %v2464_v61, %v742_v47  ;;  %v1924_v55 = vpop.f32.mrb[47].mxu0  ;;  %v1992_v56 = vpop.f32.mrb[47].mxu1 }
 0x156   : > { %v2558_v57 = vmax.f32 %v509_v49, %v776_v52  ;;  %v510_v58 = vmax.f32 %v476_v53, 0.0  ;;  %v777_v59 = vmax.f32 %v743_v54, 0.0 }
 0x158   : > { %v2560_v60 = vmax.f32 %v510_v58, %v777_v59 }
 0x159   : > { %v480_v62 = vpop.f32.mrb[48].mxu0  ;;  %v747_v63 = vpop.f32.mrb[48].mxu1 }
 0x15a   : > { %v481_v2 = vadd.f32 %v2464_v61, %v480_v62  ;;  %v748_v3 = vadd.f32 %v2464_v61, %v747_v63  ;;  %v1927_v6 = vpop.f32.mrb[49].mxu0  ;;  %v1995_v8 = vpop.f32.mrb[49].mxu1 }
 0x15b   : > { %v483_v9 = vpop.f32.mrb[50].mxu0  ;;  %v750_v11 = vpop.f32.mrb[50].mxu1 }
 0x15c   : > { %v511_v13 = vmax.f32 %v481_v2, 0.0  ;;  %v778_v14 = vmax.f32 %v748_v3, 0.0  ;;  %v484_v16 = vadd.f32 %v2464_v61, %v483_v9  ;;  %v751_v17 = vadd.f32 %v2464_v61, %v750_v11  ;;  %v1928_v18 = vpop.f32.mrb[51].mxu0  ;;  %v1996_v19 = vpop.f32.mrb[51].mxu1 }
 0x15e   : > { %v2568_v20 = vmax.f32 %v511_v13, %v778_v14  ;;  %v512_v21 = vmax.f32 %v484_v16, 0.0  ;;  %v779_v24 = vmax.f32 %v751_v17, 0.0 }
 0x160   : > { %v2570_v25 = vmax.f32 %v512_v21, %v779_v24 }
 0x161   : > { %v944_v28 = vpop.f32.mrb[52].mxu0  ;;  %v1237_v29 = vpop.f32.mrb[52].mxu1 }
 0x162   : > { %v945_v31 = vadd.f32 %v2464_v61, %v944_v28  ;;  %v1238_v34 = vadd.f32 %v2464_v61, %v1237_v29  ;;  %v2015_v35 = vpop.f32.mrb[53].mxu0  ;;  %v2083_v37 = vpop.f32.mrb[53].mxu1 }
 0x163   : > { %v947_v38 = vpop.f32.mrb[54].mxu0  ;;  %v1240_v39 = vpop.f32.mrb[54].mxu1 }
 0x164   : > { %v1047_v40 = vmax.f32 %v945_v31, 0.0  ;;  %v1340_v41 = vmax.f32 %v1238_v34, 0.0  ;;  %v948_v42 = vadd.f32 %v2464_v61, %v947_v38  ;;  %v1241_v44 = vadd.f32 %v2464_v61, %v1240_v39  ;;  %v2016_v47 = vpop.f32.mrb[55].mxu0  ;;  %v2084_v49 = vpop.f32.mrb[55].mxu1 }
 0x166   : > { %v1073_v52 = vmax.f32 %v2470_v12, %v1047_v40  ;;  %v1048_v53 = vmax.f32 %v948_v42, 0.0  ;;  %v1341_v56 = vmax.f32 %v1241_v44, 0.0 }
 0x168   : > { %v1366_v54 = vmax.f32 %v1073_v52, %v1340_v41  ;;  %v1074_v55 = vmax.f32 %v2472_v15, %v1048_v53 }
 0x169   : > { %v952_v58 = vpop.f32.mrb[56].mxu0  ;;  %v1245_v59 = vpop.f32.mrb[56].mxu1 }
 0x16a   : > { %v1367_v62 = vmax.f32 %v1074_v55, %v1341_v56  ;;  %v953_v63 = vadd.f32 %v2464_v61, %v952_v58  ;;  %v1246_v2 = vadd.f32 %v2464_v61, %v1245_v59  ;;  %v2019_v3 = vpop.f32.mrb[57].mxu0  ;;  %v2087_v6 = vpop.f32.mrb[57].mxu1 }
 0x16b   : > { %v955_v12 = vpop.f32.mrb[58].mxu0  ;;  %v1248_v8 = vpop.f32.mrb[58].mxu1 }
 0x16c   : > { %v1703_v15 = vpack.c.bf16 %v1367_v62, %v1366_v54  ;;  %v1049_v9 = vmax.f32 %v953_v63, 0.0  ;;  %v1342_v11 = vmax.f32 %v1246_v2, 0.0  ;;  %v956_v13 = vadd.f32 %v2464_v61, %v955_v12  ;;  %v2020_v14 = vpop.f32.mrb[59].mxu0  ;;  %v2088_v16 = vpop.f32.mrb[59].mxu1 }
 0x16d   : > { %v1249_v17 = vadd.f32 %v2464_v61, %v1248_v8 }
 0x16e   : > { %1704 = vst [vmem:[%s2583_s15] sm:$0xff] %v1703_v15   ;;  %v1075_v18 = vmax.f32 %v2478_v30, %v1049_v9  ;;  %v1050_v19 = vmax.f32 %v956_v13, 0.0 }
 0x16f   : > { %v1343_v28 = vmax.f32 %v1249_v17, 0.0 }
 0x170   : > { %v1368_v21 = vmax.f32 %v1075_v18, %v1342_v11  ;;  %v1076_v24 = vmax.f32 %v2480_v33, %v1050_v19 }
 0x171   : > { %v960_v29 = vpop.f32.mrb[60].mxu0  ;;  %v1253_v31 = vpop.f32.mrb[60].mxu1 }
 0x172   : > { %v1369_v34 = vmax.f32 %v1076_v24, %v1343_v28  ;;  %v961_v35 = vadd.f32 %v2464_v61, %v960_v29  ;;  %v1254_v37 = vadd.f32 %v2464_v61, %v1253_v31  ;;  %v2023_v38 = vpop.f32.mrb[61].mxu0  ;;  %v2091_v39 = vpop.f32.mrb[61].mxu1 }
 0x173   : > { %v963_v40 = vpop.f32.mrb[62].mxu0  ;;  %v1256_v41 = vpop.f32.mrb[62].mxu1 }
 0x174   : > { %v1708_v42 = vpack.c.bf16 %v1369_v34, %v1368_v21  ;;  %v1051_v44 = vmax.f32 %v961_v35, 0.0  ;;  %v1344_v30 = vmax.f32 %v1254_v37, 0.0  ;;  %v964_v47 = vadd.f32 %v2464_v61, %v963_v40  ;;  %v2024_v49 = vpop.f32.mrb[63].mxu0  ;;  %v2092_v33 = vpop.f32.mrb[63].mxu1 }
 0x175   : > { %v1257_v52 = vadd.f32 %v2464_v61, %v1256_v41 }
 0x176   : > { %1765 = vst [vmem:[%s2583_s15 + $0x8] sm:$0xff] %v1708_v42   ;;  %v1077_v53 = vmax.f32 %v2486_v48, %v1051_v44  ;;  %v1052_v54 = vmax.f32 %v964_v47, 0.0 }
 0x177   : > { %v1345_v58 = vmax.f32 %v1257_v52, 0.0 }
 0x178   : > { %v1370_v55 = vmax.f32 %v1077_v53, %v1344_v30  ;;  %v1078_v56 = vmax.f32 %v2488_v51, %v1052_v54 }
 0x179   : > { %v968_v59 = vpop.f32.mrb[64].mxu0  ;;  %v1261_v62 = vpop.f32.mrb[64].mxu1 }
 0x17a   : > { %v1371_v63 = vmax.f32 %v1078_v56, %v1345_v58  ;;  %v969_v2 = vadd.f32 %v2464_v61, %v968_v59  ;;  %v1262_v3 = vadd.f32 %v2464_v61, %v1261_v62  ;;  %v2027_v6 = vpop.f32.mrb[65].mxu0  ;;  %v2095_v12 = vpop.f32.mrb[65].mxu1 }
 0x17b   : > { %v971_v8 = vpop.f32.mrb[66].mxu0  ;;  %v1264_v15 = vpop.f32.mrb[66].mxu1 }
 0x17c   : > { %v1713_v9 = vpack.c.bf16 %v1371_v63, %v1370_v55  ;;  %v1053_v11 = vmax.f32 %v969_v2, 0.0  ;;  %v1346_v48 = vmax.f32 %v1262_v3, 0.0  ;;  %v972_v13 = vadd.f32 %v2464_v61, %v971_v8  ;;  %v2028_v14 = vpop.f32.mrb[67].mxu0  ;;  %v2096_v51 = vpop.f32.mrb[67].mxu1 }
 0x17d   : > { %v1265_v16 = vadd.f32 %v2464_v61, %v1264_v15 }
 0x17e   : > { %1766 = vst [vmem:[%s2583_s15 + $0x10] sm:$0xff] %v1713_v9   ;;  %v1079_v17 = vmax.f32 %v2494_v4, %v1053_v11  ;;  %v1054_v18 = vmax.f32 %v972_v13, 0.0 }
 0x17f   : > { %v1347_v24 = vmax.f32 %v1265_v16, 0.0 }
 0x180   : > { %v1372_v19 = vmax.f32 %v1079_v17, %v1346_v48  ;;  %v1080_v21 = vmax.f32 %v2496_v1, %v1054_v18 }
 0x181   : > { %v976_v28 = vpop.f32.mrb[68].mxu0  ;;  %v1269_v29 = vpop.f32.mrb[68].mxu1 }
 0x182   : > { %v1373_v31 = vmax.f32 %v1080_v21, %v1347_v24  ;;  %v977_v34 = vadd.f32 %v2464_v61, %v976_v28  ;;  %v1270_v35 = vadd.f32 %v2464_v61, %v1269_v29  ;;  %v2031_v37 = vpop.f32.mrb[69].mxu0  ;;  %v2099_v38 = vpop.f32.mrb[69].mxu1 }
 0x183   : > { %v979_v39 = vpop.f32.mrb[70].mxu0  ;;  %v1272_v40 = vpop.f32.mrb[70].mxu1 }
 0x184   : > { %v1718_v41 = vpack.c.bf16 %v1373_v31, %v1372_v19  ;;  %v1055_v42 = vmax.f32 %v977_v34, 0.0  ;;  %v1348_v4 = vmax.f32 %v1270_v35, 0.0  ;;  %v980_v44 = vadd.f32 %v2464_v61, %v979_v39  ;;  %v2032_v30 = vpop.f32.mrb[71].mxu0  ;;  %v2100_v1 = vpop.f32.mrb[71].mxu1 }
 0x185   : > { %v1273_v47 = vadd.f32 %v2464_v61, %v1272_v40 }
 0x186   : > { %1767 = vst [vmem:[%s2583_s15 + $0x18] sm:$0xff] %v1718_v41   ;;  %v1081_v49 = vmax.f32 %v2502_v23, %v1055_v42  ;;  %v1056_v33 = vmax.f32 %v980_v44, 0.0 }
 0x187   : > { %v1349_v54 = vmax.f32 %v1273_v47, 0.0 }
 0x188   : > { %v1374_v52 = vmax.f32 %v1081_v49, %v1348_v4  ;;  %v1082_v53 = vmax.f32 %v2504_v26, %v1056_v33 }
 0x189   : > { %v984_v55 = vpop.f32.mrb[72].mxu0  ;;  %v1277_v56 = vpop.f32.mrb[72].mxu1 }
 0x18a   : > { %v1375_v58 = vmax.f32 %v1082_v53, %v1349_v54  ;;  %v985_v59 = vadd.f32 %v2464_v61, %v984_v55  ;;  %v1278_v62 = vadd.f32 %v2464_v61, %v1277_v56  ;;  %v2035_v63 = vpop.f32.mrb[73].mxu0  ;;  %v2103_v2 = vpop.f32.mrb[73].mxu1 }
 0x18b   : > { %v987_v3 = vpop.f32.mrb[74].mxu0  ;;  %v1280_v6 = vpop.f32.mrb[74].mxu1 }
 0x18c   : > { %v1723_v12 = vpack.c.bf16 %v1375_v58, %v1374_v52  ;;  %v1057_v8 = vmax.f32 %v985_v59, 0.0  ;;  %v1350_v23 = vmax.f32 %v1278_v62, 0.0  ;;  %v988_v15 = vadd.f32 %v2464_v61, %v987_v3  ;;  %v2036_v9 = vpop.f32.mrb[75].mxu0  ;;  %v2104_v26 = vpop.f32.mrb[75].mxu1 }
 0x18d   : > { %v1281_v11 = vadd.f32 %v2464_v61, %v1280_v6 }
 0x18e   : > { %1768 = vst [vmem:[%s2583_s15 + $0x20] sm:$0xff] %v1723_v12   ;;  %v1083_v48 = vmax.f32 %v2510_v43, %v1057_v8  ;;  %v1058_v13 = vmax.f32 %v988_v15, 0.0 }
 0x18f   : > { %v1351_v16 = vmax.f32 %v1281_v11, 0.0 }
 0x190   : > { %v1376_v14 = vmax.f32 %v1083_v48, %v1350_v23  ;;  %v1084_v51 = vmax.f32 %v2512_v46, %v1058_v13 }
 0x191   : > { %v992_v17 = vpop.f32.mrb[76].mxu0  ;;  %v1285_v18 = vpop.f32.mrb[76].mxu1 }
 0x192   : > { %v1377_v19 = vmax.f32 %v1084_v51, %v1351_v16  ;;  %v993_v21 = vadd.f32 %v2464_v61, %v992_v17  ;;  %v1286_v24 = vadd.f32 %v2464_v61, %v1285_v18  ;;  %v2039_v28 = vpop.f32.mrb[77].mxu0  ;;  %v2107_v29 = vpop.f32.mrb[77].mxu1 }
 0x193   : > { %v995_v31 = vpop.f32.mrb[78].mxu0  ;;  %v1288_v34 = vpop.f32.mrb[78].mxu1 }
 0x194   : > { %v1728_v35 = vpack.c.bf16 %v1377_v19, %v1376_v14  ;;  %v1059_v37 = vmax.f32 %v993_v21, 0.0  ;;  %v1352_v43 = vmax.f32 %v1286_v24, 0.0  ;;  %v996_v38 = vadd.f32 %v2464_v61, %v995_v31  ;;  %v2040_v39 = vpop.f32.mrb[79].mxu0  ;;  %v2108_v46 = vpop.f32.mrb[79].mxu1 }
 0x195   : > { %v1289_v40 = vadd.f32 %v2464_v61, %v1288_v34 }
 0x196   : > { %1769 = vst [vmem:[%s2583_s15 + $0x28] sm:$0xff] %v1728_v35   ;;  %v1085_v41 = vmax.f32 %v2518_v0, %v1059_v37  ;;  %v1060_v42 = vmax.f32 %v996_v38, 0.0 }
 0x197   : > { %v1353_v30 = vmax.f32 %v1289_v40, 0.0 }
 0x198   : > { %v1378_v4 = vmax.f32 %v1085_v41, %v1352_v43  ;;  %v1086_v44 = vmax.f32 %v2520_v5, %v1060_v42 }
 0x199   : > { %v1000_v1 = vpop.f32.mrb[80].mxu0  ;;  %v1293_v47 = vpop.f32.mrb[80].mxu1 }
 0x19a   : > { %v1379_v49 = vmax.f32 %v1086_v44, %v1353_v30  ;;  %v1001_v33 = vadd.f32 %v2464_v61, %v1000_v1  ;;  %v1294_v52 = vadd.f32 %v2464_v61, %v1293_v47  ;;  %v2043_v53 = vpop.f32.mrb[81].mxu0  ;;  %v2111_v54 = vpop.f32.mrb[81].mxu1 }
 0x19b   : > { %v1003_v55 = vpop.f32.mrb[82].mxu0  ;;  %v1296_v56 = vpop.f32.mrb[82].mxu1 }
 0x19c   : > { %v1733_v58 = vpack.c.bf16 %v1379_v49, %v1378_v4  ;;  %v1061_v59 = vmax.f32 %v1001_v33, 0.0  ;;  %v1354_v0 = vmax.f32 %v1294_v52, 0.0  ;;  %v1004_v62 = vadd.f32 %v2464_v61, %v1003_v55  ;;  %v2044_v63 = vpop.f32.mrb[83].mxu0  ;;  %v2112_v5 = vpop.f32.mrb[83].mxu1 }
 0x19d   : > { %v1297_v2 = vadd.f32 %v2464_v61, %v1296_v56 }
 0x19e   : > { %1770 = vst [vmem:[%s2583_s15 + $0x30] sm:$0xff] %v1733_v58   ;;  %v1087_v3 = vmax.f32 %v2526_v22, %v1061_v59  ;;  %v1062_v6 = vmax.f32 %v1004_v62, 0.0 }
 0x19f   : > { %v1355_v23 = vmax.f32 %v1297_v2, 0.0 }
 0x1a0   : > { %v1380_v12 = vmax.f32 %v1087_v3, %v1354_v0  ;;  %v1088_v8 = vmax.f32 %v2528_v27, %v1062_v6 }
 0x1a1   : > { %v1008_v15 = vpop.f32.mrb[84].mxu0  ;;  %v1301_v9 = vpop.f32.mrb[84].mxu1 }
 0x1a2   : > { %v1381_v26 = vmax.f32 %v1088_v8, %v1355_v23  ;;  %v1009_v11 = vadd.f32 %v2464_v61, %v1008_v15  ;;  %v1302_v48 = vadd.f32 %v2464_v61, %v1301_v9  ;;  %v2047_v13 = vpop.f32.mrb[85].mxu0  ;;  %v2115_v14 = vpop.f32.mrb[85].mxu1 }
 0x1a3   : > { %v1011_v51 = vpop.f32.mrb[86].mxu0  ;;  %v1304_v16 = vpop.f32.mrb[86].mxu1 }
 0x1a4   : > { %v1738_v17 = vpack.c.bf16 %v1381_v26, %v1380_v12  ;;  %v1063_v18 = vmax.f32 %v1009_v11, 0.0  ;;  %v1356_v22 = vmax.f32 %v1302_v48, 0.0  ;;  %v1012_v19 = vadd.f32 %v2464_v61, %v1011_v51  ;;  %v2048_v21 = vpop.f32.mrb[87].mxu0  ;;  %v2116_v27 = vpop.f32.mrb[87].mxu1 }
 0x1a5   : > { %v1305_v24 = vadd.f32 %v2464_v61, %v1304_v16 }
 0x1a6   : > { %1771 = vst [vmem:[%s2583_s15 + $0x38] sm:$0xff] %v1738_v17   ;;  %v1089_v28 = vmax.f32 %v2534_v45, %v1063_v18  ;;  %v1064_v29 = vmax.f32 %v1012_v19, 0.0 }
 0x1a7   : > { %v1357_v35 = vmax.f32 %v1305_v24, 0.0 }
 0x1a8   : > { %v1382_v31 = vmax.f32 %v1089_v28, %v1356_v22  ;;  %v1090_v34 = vmax.f32 %v2536_v50, %v1064_v29 }
 0x1a9   : > { %v1016_v37 = vpop.f32.mrb[88].mxu0  ;;  %v1309_v43 = vpop.f32.mrb[88].mxu1 }
 0x1aa   : > { %v1383_v38 = vmax.f32 %v1090_v34, %v1357_v35  ;;  %v1017_v39 = vadd.f32 %v2464_v61, %v1016_v37  ;;  %v1310_v46 = vadd.f32 %v2464_v61, %v1309_v43  ;;  %v2051_v40 = vpop.f32.mrb[89].mxu0  ;;  %v2119_v41 = vpop.f32.mrb[89].mxu1 }
 0x1ab   : > { %v1019_v42 = vpop.f32.mrb[90].mxu0  ;;  %v1312_v4 = vpop.f32.mrb[90].mxu1 }
 0x1ac   : > { %v1743_v44 = vpack.c.bf16 %v1383_v38, %v1382_v31  ;;  %v1065_v30 = vmax.f32 %v1017_v39, 0.0  ;;  %v1358_v45 = vmax.f32 %v1310_v46, 0.0  ;;  %v1020_v1 = vadd.f32 %v2464_v61, %v1019_v42  ;;  %v2052_v47 = vpop.f32.mrb[91].mxu0  ;;  %v2120_v50 = vpop.f32.mrb[91].mxu1 }
 0x1ad   : > { %v1313_v49 = vadd.f32 %v2464_v61, %v1312_v4 }
 0x1ae   : > { %1772 = vst [vmem:[%s2583_s15 + $0x40] sm:$0xff] %v1743_v44   ;;  %v1091_v33 = vmax.f32 %v2542_v7, %v1065_v30  ;;  %v1066_v52 = vmax.f32 %v1020_v1, 0.0 }
 0x1af   : > { %v1359_v55 = vmax.f32 %v1313_v49, 0.0 }
 0x1b0   : > { %v1384_v53 = vmax.f32 %v1091_v33, %v1358_v45  ;;  %v1092_v54 = vmax.f32 %v2544_v10, %v1066_v52 }
 0x1b1   : > { %v1024_v56 = vpop.f32.mrb[92].mxu0  ;;  %v1317_v58 = vpop.f32.mrb[92].mxu1 }
 0x1b2   : > { %v1385_v59 = vmax.f32 %v1092_v54, %v1359_v55  ;;  %v1025_v0 = vadd.f32 %v2464_v61, %v1024_v56  ;;  %v1318_v62 = vadd.f32 %v2464_v61, %v1317_v58  ;;  %v2055_v63 = vpop.f32.mrb[93].mxu0  ;;  %v2123_v5 = vpop.f32.mrb[93].mxu1 }
 0x1b3   : > { %v1027_v2 = vpop.f32.mrb[94].mxu0  ;;  %v1320_v3 = vpop.f32.mrb[94].mxu1 }
 0x1b4   : > { %v1748_v6 = vpack.c.bf16 %v1385_v59, %v1384_v53  ;;  %v1067_v12 = vmax.f32 %v1025_v0, 0.0  ;;  %v1360_v7 = vmax.f32 %v1318_v62, 0.0  ;;  %v1028_v8 = vadd.f32 %v2464_v61, %v1027_v2  ;;  %v2056_v23 = vpop.f32.mrb[95].mxu0  ;;  %v2124_v10 = vpop.f32.mrb[95].mxu1 }
 0x1b5   : > { %v1321_v15 = vadd.f32 %v2464_v61, %v1320_v3 }
 0x1b6   : > { %1773 = vst [vmem:[%s2583_s15 + $0x48] sm:$0xff] %v1748_v6   ;;  %v1093_v9 = vmax.f32 %v2550_v32, %v1067_v12  ;;  %v1068_v26 = vmax.f32 %v1028_v8, 0.0 }
 0x1b7   : > { %v1361_v13 = vmax.f32 %v1321_v15, 0.0 }
 0x1b8   : > { %v1386_v11 = vmax.f32 %v1093_v9, %v1360_v7  ;;  %v1094_v48 = vmax.f32 %v2552_v36, %v1068_v26 }
 0x1b9   : > { %v1032_v14 = vpop.f32.mrb[96].mxu0  ;;  %v1325_v51 = vpop.f32.mrb[96].mxu1 }
 0x1ba   : > { %v1387_v16 = vmax.f32 %v1094_v48, %v1361_v13  ;;  %v1033_v17 = vadd.f32 %v2464_v61, %v1032_v14  ;;  %v1326_v18 = vadd.f32 %v2464_v61, %v1325_v51  ;;  %v2059_v22 = vpop.f32.mrb[97].mxu0  ;;  %v2127_v19 = vpop.f32.mrb[97].mxu1 }
 0x1bb   : > { %v1035_v21 = vpop.f32.mrb[98].mxu0  ;;  %v1328_v27 = vpop.f32.mrb[98].mxu1 }
 0x1bc   : > { %v1753_v24 = vpack.c.bf16 %v1387_v16, %v1386_v11  ;;  %v1069_v28 = vmax.f32 %v1033_v17, 0.0  ;;  %v1362_v32 = vmax.f32 %v1326_v18, 0.0  ;;  %v1036_v29 = vadd.f32 %v2464_v61, %v1035_v21  ;;  %v2060_v31 = vpop.f32.mrb[99].mxu0  ;;  %v2128_v36 = vpop.f32.mrb[99].mxu1 }
 0x1bd   : > { %v1329_v34 = vadd.f32 %v2464_v61, %v1328_v27 }
 0x1be   : > { %1774 = vst [vmem:[%s2583_s15 + $0x50] sm:$0xff] %v1753_v24   ;;  %v1095_v35 = vmax.f32 %v2558_v57, %v1069_v28  ;;  %v1070_v37 = vmax.f32 %v1036_v29, 0.0 }
 0x1bf   : > { %v1363_v39 = vmax.f32 %v1329_v34, 0.0 }
 0x1c0   : > { %v1388_v43 = vmax.f32 %v1095_v35, %v1362_v32  ;;  %v1096_v38 = vmax.f32 %v2560_v60, %v1070_v37  ;;  %v2203_v60 = vld [vmem:[%s2674_s2] ss:$0 sm:$0xff] }
 0x1c1   : > { %v1040_v46 = vpop.f32.mrb[100].mxu0  ;;  %v1333_v40 = vpop.f32.mrb[100].mxu1 }
 0x1c2   : > { %v1389_v41 = vmax.f32 %v1096_v38, %v1363_v39  ;;  %v1041_v42 = vadd.f32 %v2464_v61, %v1040_v46  ;;  %v1334_v4 = vadd.f32 %v2464_v61, %v1333_v40  ;;  %v2063_v44 = vpop.f32.mrb[101].mxu0  ;;  %v2131_v30 = vpop.f32.mrb[101].mxu1 }
 0x1c3   : > { %v1043_v45 = vpop.f32.mrb[102].mxu0  ;;  %v1336_v1 = vpop.f32.mrb[102].mxu1 }
 0x1c4   : > { %v1758_v47 = vpack.c.bf16 %v1389_v41, %v1388_v43  ;;  %v1071_v57 = vmax.f32 %v1041_v42, 0.0  ;;  %v1364_v50 = vmax.f32 %v1334_v4, 0.0  ;;  %v1044_v49 = vadd.f32 %v2203_v60, %v1043_v45  ;;  %v2064_v33 = vpop.f32.mrb[103].mxu0  ;;  %v2132_v52 = vpop.f32.mrb[103].mxu1 }
 0x1c5   : > { %v1337_v53 = vadd.f32 %v2203_v60, %v1336_v1 }
 0x1c6   : > { %1775 = vst [vmem:[%s2583_s15 + $0x58] sm:$0xff] %v1758_v47   ;;  %v1097_v54 = vmax.f32 %v2568_v20, %v1071_v57  ;;  %v1072_v61 = vmax.f32 %v1044_v49, 0.0 }
 0x1c7   : > { %v1365_v58 = vmax.f32 %v1337_v53, 0.0 }
 0x1c8   : > { %v1390_v55 = vmax.f32 %v1097_v54, %v1364_v50  ;;  %v1098_v56 = vmax.f32 %v2570_v25, %v1072_v61 }
 0x1ca   : > { %v1391_v59 = vmax.f32 %v1098_v56, %v1365_v58 }
 0x1cc   : > { %v1763_v0 = vpack.c.bf16 %v1391_v59, %v1390_v55 }
 0x1ce   : > { %1776 = vst [vmem:[%s2583_s15 + $0x60] sm:$0xff] %v1763_v0  }
 0x1cf PF: > { %s13_s12 = sadd.s32 1, %s2210_s12  }
 0x1d0   : > { %p10_p5 = scmp.ge.s32.totalorder %s13_s12, 4  }
 0x1d2   :  { %12 = sbr.rel (!%p10_p5) target bundleno = 1 (0x1), region = 62 }

// kernel: mul.13
= control target key start
LH: loop header
LB: loop body
LE: loop exit
PB: predicated region body
PF: predicated region fallthrough
CT: control target
= control target key end

     0   :  { %vm5_vm0 = vcmask 1041409   ;;  %vm3948_vm1 = vcmask 7168   ;;  %vm3950_vm2 = vcmask 23552   ;;  %vm3949_vm3 = vcmask 15360   ;;  %s2241_s30 = smov 127   ;;  %s2242_s6 = smov 125   ;;  %s3946_s0 = inlined_call_operand.vmem [shape: f32[256,25], index: 0, kind: input, shape index: {}]   ;;  %s3947_s1 = inlined_call_operand.vmem [shape: f32[6400], index: 1, kind: output, shape index: {}]  }
   0x1   :  { %v1666_v0 = vld [vmem:[%s3946_s0 + $0xd7] sm:$0x1]   ;;  %v1678_v5 = vld [vmem:[%s3946_s0 + $0x5] sm:$0x1]   ;;  %v1672_v11 = vld [vmem:[%s3946_s0 + $0xae] sm:$0x1]  }
   0x2   :  { %v1667_v1 = vld [vmem:[%s3946_s0 + $0x56] sm:$0x2]   ;;  %v1679_v6 = vld [vmem:[%s3946_s0 + $0x84] sm:$0x2]   ;;  %v1673_v14 = vld [vmem:[%s3946_s0 + $0x2d] sm:$0x2]  }
   0x3   :  { %v1668_v2 = vld [vmem:[%s3946_s0 + $0xd7] sm:$0x1]   ;;  %v14_v3 = vsel %vm5_vm0, %v1667_v1, %v1666_v0  ;;  %v58_v8 = vsel %vm5_vm0, %v1679_v6, %v1678_v5  ;;  %v1680_v9 = vld [vmem:[%s3946_s0 + $0x5] sm:$0x1]   ;;  %v1674_v15 = vld [vmem:[%s3946_s0 + $0xae] sm:$0x1]   ;;  %v36_v18 = vsel %vm5_vm0, %v1673_v14, %v1672_v11 }
   0x4   :  { %v1669_v4 = vld [vmem:[%s3946_s0 + $0x56] sm:$0x2]   ;;  %v1681_v10 = vld [vmem:[%s3946_s0 + $0x84] sm:$0x2]   ;;  %v1675_v16 = vld [vmem:[%s3946_s0 + $0x2d] sm:$0x2]  }
   0x5   :  { %v20_v7 = vsel %vm5_vm0, %v1669_v4, %v1668_v2  ;;  %v64_v13 = vsel %vm5_vm0, %v1681_v10, %v1680_v9  ;;  %v42_v19 = vsel %vm5_vm0, %v1675_v16, %v1674_v15  ;;  %v1683_v20 = vld [vmem:[%s3946_s0 + $0xdc] sm:$0x1]   ;;  %vm3951_vm4 = vcmask 31744   ;;  %v1689_v27 = vld [vmem:[%s3946_s0 + $0xb3] sm:$0x1]   ;;  %s2243_s21 = smov 126  }
   0x6   :  { %v22_v12 = vsel %vm3948_vm1, %v20_v7, %v14_v3  ;;  %v66_v17 = vsel %vm3950_vm2, %v64_v13, %v58_v8  ;;  %v1684_v21 = vld [vmem:[%s3946_s0 + $0x5b] sm:$0x2]   ;;  %v44_v22 = vsel %vm3949_vm3, %v42_v19, %v36_v18  ;;  %vm3952_vm5 = vcmask 39936   ;;  %v1690_v28 = vld [vmem:[%s3946_s0 + $0x32] sm:$0x2]   ;;  %s2244_s28 = smov 124  }
   0x7   :  { %23 = vrot.lane.b32.xlu0 %v22_v12, %s2241_s30  ;;  %67 = vrot.lane.b32.xlu1 %v66_v17, %s2242_s6  ;;  %v79_v23 = vsel %vm5_vm0, %v1684_v21, %v1683_v20  ;;  %v1685_v24 = vld [vmem:[%s3946_s0 + $0xdc] sm:$0x1]   ;;  %v1691_v29 = vld [vmem:[%s3946_s0 + $0xb3] sm:$0x1]   ;;  %v101_v31 = vsel %vm5_vm0, %v1690_v28, %v1689_v27  ;;  %vm3953_vm6 = vcmask 48128   ;;  %vm3954_vm7 = vcmask 56320  }
   0x8   :  { %v1686_v25 = vld [vmem:[%s3946_s0 + $0x5b] sm:$0x2]   ;;  %v1692_v32 = vld [vmem:[%s3946_s0 + $0x32] sm:$0x2]   ;;  %v1695_v33 = vld [vmem:[%s3946_s0 + $0xa] sm:$0x1]  }
   0x9   :  { %v85_v26 = vsel %vm5_vm0, %v1686_v25, %v1685_v24  ;;  %v107_v34 = vsel %vm5_vm0, %v1692_v32, %v1691_v29  ;;  %v1696_v35 = vld [vmem:[%s3946_s0 + $0x89] sm:$0x2]   ;;  %v1701_v41 = vld [vmem:[%s3946_s0 + $0xe1] sm:$0x1]   ;;  %vm3955_vm8 = vcmask 64512   ;;  %s2245_s14 = smov 123  }
   0xa   :  { %v87_v30 = vsel %vm3951_vm4, %v85_v26, %v79_v23  ;;  %v1697_v36 = vld [vmem:[%s3946_s0 + $0xa] sm:$0x1]   ;;  %v109_v38 = vsel %vm3952_vm5, %v107_v34, %v101_v31  ;;  %v123_v39 = vsel %vm5_vm0, %v1696_v35, %v1695_v33  ;;  %v1702_v42 = vld [vmem:[%s3946_s0 + $0x60] sm:$0x2]   ;;  %v1707_v48 = vld [vmem:[%s3946_s0 + $0xb8] sm:$0x1]  }
   0xb   :  { %45 = vrot.lane.b32.xlu0 %v44_v22, %s2243_s21  ;;  %v1698_v37 = vld [vmem:[%s3946_s0 + $0x89] sm:$0x2]   ;;  %88 = vrot.lane.b32.xlu1 %v87_v30, %s2244_s28  ;;  %v145_v44 = vsel %vm5_vm0, %v1702_v42, %v1701_v41  ;;  %v1703_v45 = vld [vmem:[%s3946_s0 + $0xe1] sm:$0x1]   ;;  %s2246_s19 = smov 122   ;;  %vm3956_vm9 = vcmask 72704  }
   0xc   :  { %v129_v40 = vsel %vm5_vm0, %v1698_v37, %v1697_v36  ;;  %v1704_v46 = vld [vmem:[%s3946_s0 + $0x60] sm:$0x2]   ;;  %v1708_v49 = vld [vmem:[%s3946_s0 + $0x37] sm:$0x2]   ;;  %v1713_v53 = vld [vmem:[%s3946_s0 + $0xf] sm:$0x1]  }
   0xd   :  { %v131_v43 = vsel %vm3953_vm6, %v129_v40, %v123_v39  ;;  %v151_v47 = vsel %vm5_vm0, %v1704_v46, %v1703_v45  ;;  %v1709_v50 = vld [vmem:[%s3946_s0 + $0xb8] sm:$0x1]   ;;  %v167_v51 = vsel %vm5_vm0, %v1708_v49, %v1707_v48  ;;  %v1714_v56 = vld [vmem:[%s3946_s0 + $0x8e] sm:$0x2]   ;;  %v1719_v62 = vld [vmem:[%s3946_s0 + $0xe6] sm:$0x1]  }
   0xe   :  { %v1710_v52 = vld [vmem:[%s3946_s0 + $0x37] sm:$0x2]   ;;  %v153_v54 = vsel %vm3954_vm7, %v151_v47, %v145_v44  ;;  %v1715_v57 = vld [vmem:[%s3946_s0 + $0xf] sm:$0x1]   ;;  %v189_v60 = vsel %vm5_vm0, %v1714_v56, %v1713_v53  ;;  %v1720_v63 = vld [vmem:[%s3946_s0 + $0x65] sm:$0x2]  }
   0xf   :  { %110 = vrot.lane.b32.xlu0 %v109_v38, %s2245_s14  ;;  %132 = vrot.lane.b32.xlu1 %v131_v43, %s2246_s19  ;;  %v173_v55 = vsel %vm5_vm0, %v1710_v52, %v1709_v50  ;;  %v1716_v58 = vld [vmem:[%s3946_s0 + $0x8e] sm:$0x2]   ;;  %v211_v0 = vsel %vm5_vm0, %v1720_v63, %v1719_v62  ;;  %v1721_v1 = vld [vmem:[%s3946_s0 + $0xe6] sm:$0x1]   ;;  %vm3957_vm10 = vcmask 80896   ;;  %s2247_s5 = smov 121  }
  0x10   :  { %v175_v59 = vsel %vm3955_vm8, %v173_v55, %v167_v51  ;;  %v195_v61 = vsel %vm5_vm0, %v1716_v58, %v1715_v57  ;;  %v1722_v2 = vld [vmem:[%s3946_s0 + $0x65] sm:$0x2]   ;;  %v1725_v4 = vld [vmem:[%s3946_s0 + $0xbd] sm:$0x1]   ;;  %s2248_s12 = smov 120   ;;  %vm3958_vm11 = vcmask 89088  }
  0x11   :  { %v217_v3 = vsel %vm5_vm0, %v1722_v2, %v1721_v1  ;;  %v1726_v5 = vld [vmem:[%s3946_s0 + $0x3c] sm:$0x2]   ;;  %v197_v7 = vsel %vm3956_vm9, %v195_v61, %v189_v60  ;;  %v1731_v9 = vld [vmem:[%s3946_s0 + $0x14] sm:$0x1]   ;;  %vm262_vm12 = vcmask 97280   ;;  %s2249_s27 = smov 119  }
  0x12   :  { %v1727_v6 = vld [vmem:[%s3946_s0 + $0xbd] sm:$0x1]   ;;  %v219_v10 = vsel %vm3957_vm10, %v217_v3, %v211_v0  ;;  %v233_v11 = vsel %vm5_vm0, %v1726_v5, %v1725_v4  ;;  %v1732_v13 = vld [vmem:[%s3946_s0 + $0x93] sm:$0x2]   ;;  %v1737_v18 = vld [vmem:[%s3946_s0 + $0xeb] sm:$0x1]  }
  0x13   :  { %154 = vrot.lane.b32.xlu0 %v153_v54, %s2247_s5  ;;  %176 = vrot.lane.b32.xlu1 %v175_v59, %s2248_s12  ;;  %v1728_v8 = vld [vmem:[%s3946_s0 + $0x3c] sm:$0x2]   ;;  %v1733_v14 = vld [vmem:[%s3946_s0 + $0x14] sm:$0x1]   ;;  %v255_v16 = vsel %vm5_vm0, %v1732_v13, %v1731_v9  ;;  %vm266_vm13 = vcmask 105472   ;;  %s2250_s3 = smov 118  }
  0x14   :  { %v239_v12 = vsel %vm5_vm0, %v1728_v8, %v1727_v6  ;;  %v1734_v15 = vld [vmem:[%s3946_s0 + $0x93] sm:$0x2]   ;;  %v1738_v19 = vld [vmem:[%s3946_s0 + $0x6a] sm:$0x2]   ;;  %v1743_v23 = vld [vmem:[%s3946_s0 + $0xc2] sm:$0x1]  }
  0x15   :  { %v261_v17 = vsel %vm5_vm0, %v1734_v15, %v1733_v14  ;;  %v1739_v20 = vld [vmem:[%s3946_s0 + $0xeb] sm:$0x1]   ;;  %v241_v22 = vsel %vm3958_vm11, %v239_v12, %v233_v11  ;;  %v1744_v24 = vld [vmem:[%s3946_s0 + $0x41] sm:$0x2]   ;;  %v277_v27 = vsel %vm5_vm0, %v1738_v19, %v1737_v18  ;;  %vm244_vm14 = vcmask 113664   ;;  %s2251_s20 = smov 117  }
  0x16   :  { %v1740_v21 = vld [vmem:[%s3946_s0 + $0x6a] sm:$0x2]   ;;  %v1745_v25 = vld [vmem:[%s3946_s0 + $0xc2] sm:$0x1]   ;;  %v263_v26 = vsel %vm262_vm12, %v261_v17, %v255_v16  ;;  %v1749_v30 = vld [vmem:[%s3946_s0 + $0x19] sm:$0x1]   ;;  %v299_v31 = vsel %vm5_vm0, %v1744_v24, %v1743_v23 }
  0x17   :  { %198 = vrot.lane.b32.xlu0 %v197_v7, %s2249_s27  ;;  %220 = vrot.lane.b32.xlu1 %v219_v10, %s2250_s3  ;;  %v283_v28 = vsel %vm5_vm0, %v1740_v21, %v1739_v20  ;;  %v1746_v29 = vld [vmem:[%s3946_s0 + $0x41] sm:$0x2]   ;;  %v1750_v33 = vld [vmem:[%s3946_s0 + $0x98] sm:$0x2]   ;;  %s2252_s25 = smov 116   ;;  %vm222_vm15 = vcmask 121856  }
  0x18   :  { %v305_v32 = vsel %vm5_vm0, %v1746_v29, %v1745_v25  ;;  %v1751_v34 = vld [vmem:[%s3946_s0 + $0x19] sm:$0x1]   ;;  %v1755_v36 = vld [vmem:[%s3946_s0 + $0xf0] sm:$0x1]   ;;  %v285_v38 = vsel %vm266_vm13, %v283_v28, %v277_v27  ;;  %v321_v42 = vsel %vm5_vm0, %v1750_v33, %v1749_v30  ;;  %vm200_vm1 = vcmask 130048   ;;  %s2253_s11 = smov 115  }
  0x19   :  { %v1752_v35 = vld [vmem:[%s3946_s0 + $0x98] sm:$0x2]   ;;  %v1756_v37 = vld [vmem:[%s3946_s0 + $0x6f] sm:$0x2]   ;;  %v307_v41 = vsel %vm244_vm14, %v305_v32, %v299_v31  ;;  %v1761_v44 = vld [vmem:[%s3946_s0 + $0xc7] sm:$0x1]  }
  0x1a   :  { %v1757_v39 = vld [vmem:[%s3946_s0 + $0xf0] sm:$0x1]   ;;  %v327_v43 = vsel %vm5_vm0, %v1752_v35, %v1751_v34  ;;  %v1762_v45 = vld [vmem:[%s3946_s0 + $0x46] sm:$0x2]   ;;  %v343_v46 = vsel %vm5_vm0, %v1756_v37, %v1755_v36  ;;  %v1767_v50 = vld [vmem:[%s3946_s0 + $0x1e] sm:$0x1]  }
  0x1b   :  { %242 = vrot.lane.b32.xlu0 %v241_v22, %s2251_s20  ;;  %264 = vrot.lane.b32.xlu1 %v263_v26, %s2252_s25  ;;  %v1758_v40 = vld [vmem:[%s3946_s0 + $0x6f] sm:$0x2]   ;;  %v1763_v48 = vld [vmem:[%s3946_s0 + $0xc7] sm:$0x1]   ;;  %s2254_s18 = smov 114   ;;  %v329_v54 = vsel %vm222_vm15, %v327_v43, %v321_v42  ;;  %vm178_vm3 = vcmask 138240   ;;  %v365_v56 = vsel %vm5_vm0, %v1762_v45, %v1761_v44 }
  0x1c   :  { %v349_v47 = vsel %vm5_vm0, %v1758_v40, %v1757_v39  ;;  %v1764_v49 = vld [vmem:[%s3946_s0 + $0x46] sm:$0x2]   ;;  %v1768_v51 = vld [vmem:[%s3946_s0 + $0x9d] sm:$0x2]   ;;  %vm156_vm2 = vcmask 146432   ;;  %s2255_s29 = smov 113  }
  0x1d   :  { %v1769_v52 = vld [vmem:[%s3946_s0 + $0x1e] sm:$0x1]   ;;  %v351_v55 = vsel %vm200_vm1, %v349_v47, %v343_v46  ;;  %v371_v57 = vsel %vm5_vm0, %v1764_v49, %v1763_v48  ;;  %v1773_v58 = vld [vmem:[%s3946_s0 + $0xf5] sm:$0x1]   ;;  %v387_v60 = vsel %vm5_vm0, %v1768_v51, %v1767_v50  ;;  %v1779_v0 = vld [vmem:[%s3946_s0 + $0xcc] sm:$0x1]  }
  0x1e   :  { %v1770_v53 = vld [vmem:[%s3946_s0 + $0x9d] sm:$0x2]   ;;  %v1774_v59 = vld [vmem:[%s3946_s0 + $0x74] sm:$0x2]   ;;  %v1780_v1 = vld [vmem:[%s3946_s0 + $0x4b] sm:$0x2]   ;;  %v373_v4 = vsel %vm178_vm3, %v371_v57, %v365_v56 }
  0x1f   :  { %286 = vrot.lane.b32.xlu0 %v285_v38, %s2253_s11  ;;  %308 = vrot.lane.b32.xlu1 %v307_v41, %s2254_s18  ;;  %v393_v61 = vsel %vm5_vm0, %v1770_v53, %v1769_v52  ;;  %v1775_v62 = vld [vmem:[%s3946_s0 + $0xf5] sm:$0x1]   ;;  %v1781_v2 = vld [vmem:[%s3946_s0 + $0xcc] sm:$0x1]   ;;  %s2256_s7 = smov 112   ;;  %vm134_vm4 = vcmask 154624   ;;  %v409_v6 = vsel %vm5_vm0, %v1774_v59, %v1773_v58  ;;  %v431_v10 = vsel %vm5_vm0, %v1780_v1, %v1779_v0 }
  0x20   :  { %v1776_v63 = vld [vmem:[%s3946_s0 + $0x74] sm:$0x2]   ;;  %v1782_v3 = vld [vmem:[%s3946_s0 + $0x4b] sm:$0x2]   ;;  %v395_v5 = vsel %vm156_vm2, %v393_v61, %v387_v60  ;;  %vm112_vm5 = vcmask 162816   ;;  %s2257_s18 = smov 111  }
  0x21   :  { %v415_v7 = vsel %vm5_vm0, %v1776_v63, %v1775_v62  ;;  %v1785_v8 = vld [vmem:[%s3946_s0 + $0xa3] sm:$0x1]   ;;  %v437_v11 = vsel %vm5_vm0, %v1782_v3, %v1781_v2  ;;  %v1791_v14 = vld [vmem:[%s3946_s0 + $0xfa] sm:$0x1]   ;;  %s2258_s25 = smov 110   ;;  %vm90_vm6 = vcmask 171008  }
  0x22   :  { %v1786_v9 = vld [vmem:[%s3946_s0 + $0x22] sm:$0x2]   ;;  %v1792_v15 = vld [vmem:[%s3946_s0 + $0x79] sm:$0x2]   ;;  %v417_v18 = vsel %vm134_vm4, %v415_v7, %v409_v6  ;;  %v439_v19 = vsel %vm112_vm5, %v437_v11, %v431_v10  ;;  %vm69_vm7 = vcmask 179200   ;;  %s2260_s14 = smov 108  }
  0x23   :  { %330 = vrot.lane.b32.xlu0 %v329_v54, %s2255_s29  ;;  %352 = vrot.lane.b32.xlu1 %v351_v55, %s2256_s7  ;;  %v1787_v12 = vld [vmem:[%s3946_s0 + $0x23] sm:$0x1]   ;;  %v1793_v16 = vld [vmem:[%s3946_s0 + $0xfa] sm:$0x1]   ;;  %v453_v20 = vsel %vm5_vm0, %v1786_v9, %v1785_v8  ;;  %v475_v24 = vsel %vm5_vm0, %v1792_v15, %v1791_v14  ;;  %s2259_s7 = smov 109   ;;  %vm47_vm8 = vcmask 187392  }
  0x24   :  { %v1788_v13 = vld [vmem:[%s3946_s0 + $0xa2] sm:$0x2]   ;;  %v1794_v17 = vld [vmem:[%s3946_s0 + $0x79] sm:$0x2]   ;;  %v1797_v22 = vld [vmem:[%s3946_s0 + $0xd1] sm:$0x1]  }
  0x25   :  { %v459_v21 = vsel %vm5_vm0, %v1788_v13, %v1787_v12  ;;  %v1798_v23 = vld [vmem:[%s3946_s0 + $0x50] sm:$0x2]   ;;  %v481_v25 = vsel %vm5_vm0, %v1794_v17, %v1793_v16  ;;  %v1803_v28 = vld [vmem:[%s3946_s0 + $0xa8] sm:$0x1]   ;;  %vm25_vm9 = vcmask 195584   ;;  %s2261_s15 = smov 107  }
  0x26   :  { %v1799_v26 = vld [vmem:[%s3946_s0 + $0xd1] sm:$0x1]   ;;  %v1804_v29 = vld [vmem:[%s3946_s0 + $0x27] sm:$0x2]   ;;  %v461_v32 = vsel %vm90_vm6, %v459_v21, %v453_v20  ;;  %v483_v33 = vsel %vm69_vm7, %v481_v25, %v475_v24  ;;  %v497_v34 = vsel %vm5_vm0, %v1798_v23, %v1797_v22  ;;  %s2262_s16 = smov 106   ;;  %s2264_s26 = smov 104  }
  0x27   :  { %374 = vrot.lane.b32.xlu0 %v373_v4, %s2257_s18  ;;  %396 = vrot.lane.b32.xlu1 %v395_v5, %s2258_s25  ;;  %v1800_v27 = vld [vmem:[%s3946_s0 + $0x50] sm:$0x2]   ;;  %v1805_v30 = vld [vmem:[%s3946_s0 + $0xa8] sm:$0x1]   ;;  %v519_v36 = vsel %vm5_vm0, %v1804_v29, %v1803_v28  ;;  %s2263_s25 = smov 105   ;;  %s2265_s6 = smov 103  }
  0x28   :  { %v1806_v31 = vld [vmem:[%s3946_s0 + $0x27] sm:$0x2]   ;;  %v503_v35 = vsel %vm5_vm0, %v1800_v27, %v1799_v26  ;;  %v1809_v40 = vld [vmem:[%s3946_s0 + $0xff] sm:$0x1]   ;;  %v1812_v42 = vld [vmem:[%s3946_s0 + $0xd6] sm:$0x1]  }
  0x29   :  { %v525_v37 = vsel %vm5_vm0, %v1806_v31, %v1805_v30  ;;  %v505_v38 = vsel %vm47_vm8, %v503_v35, %v497_v34  ;;  %v1810_v41 = vld [vmem:[%s3946_s0 + $0x7e] sm:$0x2]   ;;  %v1813_v43 = vld [vmem:[%s3946_s0 + $0x55] sm:$0x2]   ;;  %v1815_v46 = vld [vmem:[%s3946_s0 + $0xad] sm:$0x1]  }
  0x2a   :  { %v527_v39 = vsel %vm25_vm9, %v525_v37, %v519_v36  ;;  %v541_v44 = vsel %vm5_vm0, %v1810_v41, %v1809_v40  ;;  %v552_v45 = vsel %vm5_vm0, %v1813_v43, %v1812_v42  ;;  %v1816_v47 = vld [vmem:[%s3946_s0 + $0x2c] sm:$0x2]   ;;  %v1818_v48 = vld [vmem:[%s3946_s0 + $0x4] sm:$0x1]   ;;  %v1820_v52 = vld [vmem:[%s3946_s0 + $0xdb] sm:$0x1]  }
  0x2b   :  { %418 = vrot.lane.b32.xlu0 %v417_v18, %s2259_s7  ;;  %440 = vrot.lane.b32.xlu1 %v439_v19, %s2260_s14  ;;  %v1819_v49 = vld [vmem:[%s3946_s0 + $0x83] sm:$0x2]   ;;  %s2266_s7 = smov 102   ;;  %v563_v50 = vsel %vm5_vm0, %v1816_v47, %v1815_v46  ;;  %v1821_v53 = vld [vmem:[%s3946_s0 + $0x5a] sm:$0x2]   ;;  %s2268_s17 = smov 100  }
  0x2c   :  { %v574_v51 = vsel %vm5_vm0, %v1819_v49, %v1818_v48  ;;  %v1823_v54 = vld [vmem:[%s3946_s0 + $0xb2] sm:$0x1]   ;;  %v584_v56 = vsel %vm5_vm0, %v1821_v53, %v1820_v52  ;;  %v1826_v58 = vld [vmem:[%s3946_s0 + $0x9] sm:$0x1]   ;;  %v1829_v60 = vld [vmem:[%s3946_s0 + $0xe0] sm:$0x1]  }
  0x2d   :  { %v1824_v55 = vld [vmem:[%s3946_s0 + $0x31] sm:$0x2]   ;;  %v1827_v59 = vld [vmem:[%s3946_s0 + $0x88] sm:$0x2]   ;;  %v1830_v61 = vld [vmem:[%s3946_s0 + $0x5f] sm:$0x2]  }
  0x2e   :  { %v595_v57 = vsel %vm5_vm0, %v1824_v55, %v1823_v54  ;;  %s2270_s27 = smov 98   ;;  %v606_v62 = vsel %vm5_vm0, %v1827_v59, %v1826_v58  ;;  %v617_v63 = vsel %vm5_vm0, %v1830_v61, %v1829_v60  ;;  %v1832_v0 = vld [vmem:[%s3946_s0 + $0xb7] sm:$0x1]   ;;  %v1835_v2 = vld [vmem:[%s3946_s0 + $0xe] sm:$0x1]   ;;  %s2272_s8 = smov 96  }
  0x2f   :  { %462 = vrot.lane.b32.xlu0 %v461_v32, %s2261_s15  ;;  %484 = vrot.lane.b32.xlu1 %v483_v33, %s2262_s16  ;;  %s2267_s16 = smov 101   ;;  %v1833_v1 = vld [vmem:[%s3946_s0 + $0x36] sm:$0x2]   ;;  %v1836_v3 = vld [vmem:[%s3946_s0 + $0x8d] sm:$0x2]   ;;  %vm7_vm10 = vcmask 203776  }
  0x30   :  { %v628_v4 = vsel %vm5_vm0, %v1833_v1, %v1832_v0  ;;  %v639_v5 = vsel %vm5_vm0, %v1836_v3, %v1835_v2  ;;  %v1838_v6 = vld [vmem:[%s3946_s0 + $0xe5] sm:$0x1]   ;;  %v1841_v8 = vld [vmem:[%s3946_s0 + $0xbc] sm:$0x1]   ;;  %s2274_s18 = smov 94   ;;  %s2275_s4 = smov 93  }
  0x31   :  { %v1839_v7 = vld [vmem:[%s3946_s0 + $0x64] sm:$0x2]   ;;  %v1842_v9 = vld [vmem:[%s3946_s0 + $0x3b] sm:$0x2]   ;;  %v2_v11 = vld [vmem:[%s3946_s0] sm:$0x1]  }
  0x32   :  { %v650_v10 = vsel %vm5_vm0, %v1839_v7, %v1838_v6  ;;  %v1665_v12 = vld [vmem:[%s3946_s0 + $0x7f] sm:$0x2]   ;;  %v661_v13 = vsel %vm5_vm0, %v1842_v9, %v1841_v8  ;;  %v1844_v14 = vld [vmem:[%s3946_s0 + $0x13] sm:$0x1]   ;;  %v1847_v17 = vld [vmem:[%s3946_s0 + $0xea] sm:$0x1]  }
  0x33   :  { %506 = vrot.lane.b32.xlu0 %v505_v38, %s2263_s25  ;;  %528 = vrot.lane.b32.xlu1 %v527_v39, %s2264_s26  ;;  %s2269_s26 = smov 99   ;;  %v1845_v15 = vld [vmem:[%s3946_s0 + $0x92] sm:$0x2]   ;;  %v6_v16 = vsel %vm5_vm0, %v1665_v12, %v2_v11  ;;  %v1848_v18 = vld [vmem:[%s3946_s0 + $0x69] sm:$0x2]   ;;  %s2276_s5 = smov 92  }
  0x34   :  { %8 = vst.msk [vmem:[%s3947_s1] ss:$25 sm:$0x3] %vm7_vm10, %v6_v16   ;;  %v672_v19 = vsel %vm5_vm0, %v1845_v15, %v1844_v14  ;;  %v683_v20 = vsel %vm5_vm0, %v1848_v18, %v1847_v17  ;;  %v1850_v21 = vld [vmem:[%s3946_s0 + $0xc1] sm:$0x1]   ;;  %s2277_s14 = smov 91  }
  0x35   :  { %v1851_v22 = vld [vmem:[%s3946_s0 + $0x40] sm:$0x2]   ;;  %v1853_v23 = vld [vmem:[%s3946_s0 + $0x18] sm:$0x1]   ;;  %s2278_s15 = smov 90   ;;  %s2279_s24 = smov 89  }
  0x36   :  { %v1854_v24 = vld [vmem:[%s3946_s0 + $0x97] sm:$0x2]   ;;  %v694_v25 = vsel %vm5_vm0, %v1851_v22, %v1850_v21  ;;  %v1856_v27 = vld [vmem:[%s3946_s0 + $0xef] sm:$0x1]   ;;  %v1859_v29 = vld [vmem:[%s3946_s0 + $0xc6] sm:$0x1]  }
  0x37   :  { %542 = vrot.lane.b32.xlu0 %v541_v44, %s2265_s6  ;;  %553 = vrot.lane.b32.xlu1 %v552_v45, %s2266_s7  ;;  %s2271_s7 = smov 97   ;;  %v705_v26 = vsel %vm5_vm0, %v1854_v24, %v1853_v23  ;;  %v1857_v28 = vld [vmem:[%s3946_s0 + $0x6e] sm:$0x2]   ;;  %v1860_v30 = vld [vmem:[%s3946_s0 + $0x45] sm:$0x2]   ;;  %s2280_s25 = smov 88  }
  0x38   :  { %v716_v31 = vsel %vm5_vm0, %v1857_v28, %v1856_v27  ;;  %v727_v32 = vsel %vm5_vm0, %v1860_v30, %v1859_v29  ;;  %v1862_v33 = vld [vmem:[%s3946_s0 + $0x1d] sm:$0x1]   ;;  %v1865_v35 = vld [vmem:[%s3946_s0 + $0xf4] sm:$0x1]   ;;  %s2282_s6 = smov 86   ;;  %vm28_vm10 = vcmask 1048568  }
  0x39   :  { %v1863_v34 = vld [vmem:[%s3946_s0 + $0x9c] sm:$0x2]   ;;  %v1866_v36 = vld [vmem:[%s3946_s0 + $0x73] sm:$0x2]   ;;  %v1868_v39 = vld [vmem:[%s3946_s0 + $0xcb] sm:$0x1]  }
  0x3a   :  { %v738_v37 = vsel %vm5_vm0, %v1863_v34, %v1862_v33  ;;  %v749_v38 = vsel %vm5_vm0, %v1866_v36, %v1865_v35  ;;  %v1869_v40 = vld [vmem:[%s3946_s0 + $0x4a] sm:$0x2]   ;;  %v1871_v41 = vld [vmem:[%s3946_s0 + $0x22] sm:$0x1]   ;;  %v1874_v45 = vld [vmem:[%s3946_s0 + $0xf9] sm:$0x1]  }
  0x3b   :  { %564 = vrot.lane.b32.xlu0 %v563_v50, %s2267_s16  ;;  %575 = vrot.lane.b32.xlu1 %v574_v51, %s2268_s17  ;;  %s2273_s17 = smov 95   ;;  %v1872_v42 = vld [vmem:[%s3946_s0 + $0xa1] sm:$0x2]   ;;  %s2284_s16 = smov 84   ;;  %v760_v43 = vsel %vm5_vm0, %v1869_v40, %v1868_v39  ;;  %v1875_v46 = vld [vmem:[%s3946_s0 + $0x78] sm:$0x2]  }
  0x3c   :  { %v771_v44 = vsel %vm5_vm0, %v1872_v42, %v1871_v41  ;;  %v1877_v47 = vld [vmem:[%s3946_s0 + $0xd0] sm:$0x1]   ;;  %v782_v49 = vsel %vm5_vm0, %v1875_v46, %v1874_v45  ;;  %v1880_v51 = vld [vmem:[%s3946_s0 + $0xa7] sm:$0x1]   ;;  %v1883_v53 = vld [vmem:[%s3946_s0 + $0xfe] sm:$0x1]  }
  0x3d   :  { %v1878_v48 = vld [vmem:[%s3946_s0 + $0x4f] sm:$0x2]   ;;  %v1881_v52 = vld [vmem:[%s3946_s0 + $0x26] sm:$0x2]   ;;  %v1884_v54 = vld [vmem:[%s3946_s0 + $0x7d] sm:$0x2]  }
  0x3e   :  { %v793_v50 = vsel %vm5_vm0, %v1878_v48, %v1877_v47  ;;  %v804_v55 = vsel %vm5_vm0, %v1881_v52, %v1880_v51  ;;  %v1887_v58 = vld [vmem:[%s3946_s0 + $0x54] sm:$0x2]   ;;  %v1889_v59 = vld [vmem:[%s3946_s0 + $0xac] sm:$0x1]   ;;  %v1893_v0 = vld [vmem:[%s3946_s0 + $0x82] sm:$0x2]  }
  0x3f   :  { %585 = vrot.lane.b32.xlu0 %v584_v56, %s2269_s26  ;;  %596 = vrot.lane.b32.xlu1 %v595_v57, %s2270_s27  ;;  %s2286_s26 = smov 82   ;;  %v815_v56 = vsel %vm5_vm0, %v1884_v54, %v1883_v53  ;;  %v1886_v57 = vld [vmem:[%s3946_s0 + $0xd5] sm:$0x1]   ;;  %v1890_v60 = vld [vmem:[%s3946_s0 + $0x2b] sm:$0x2]   ;;  %s2292_s27 = smov 76  }
  0x40   :  { %v826_v61 = vsel %vm5_vm0, %v1887_v58, %v1886_v57  ;;  %v1894_v1 = vld [vmem:[%s3946_s0 + $0xda] sm:$0x1]   ;;  %v1898_v6 = vld [vmem:[%s3946_s0 + $0x30] sm:$0x2]   ;;  %v1900_v7 = vld [vmem:[%s3946_s0 + $0x8] sm:$0x1]  }
  0x41   :  { %v1895_v2 = vld [vmem:[%s3946_s0 + $0x59] sm:$0x2]   ;;  %v1901_v8 = vld [vmem:[%s3946_s0 + $0x87] sm:$0x2]   ;;  %v1903_v11 = vld [vmem:[%s3946_s0 + $0xdf] sm:$0x1]  }
  0x42   :  { %v1904_v12 = vld [vmem:[%s3946_s0 + $0x5e] sm:$0x2]   ;;  %v1907_v14 = vld [vmem:[%s3946_s0 + $0x35] sm:$0x2]   ;;  %v1909_v17 = vld [vmem:[%s3946_s0 + $0xd] sm:$0x1]  }
  0x43   :  { %607 = vrot.lane.b32.xlu0 %v606_v62, %s2271_s7  ;;  %618 = vrot.lane.b32.xlu1 %v617_v63, %s2272_s8  ;;  %s2288_s7 = smov 80   ;;  %v837_v62 = vsel %vm5_vm0, %v1890_v60, %v1889_v59  ;;  %v1892_v63 = vld [vmem:[%s3946_s0 + $0x3] sm:$0x1]   ;;  %s2294_s8 = smov 74   ;;  %v891_v15 = vsel %vm5_vm0, %v1904_v12, %v1903_v11  ;;  %v1910_v18 = vld [vmem:[%s3946_s0 + $0x8c] sm:$0x2]  }
  0x44   :  { %v848_v3 = vsel %vm5_vm0, %v1893_v0, %v1892_v63  ;;  %s2298_s28 = smov 70   ;;  %v913_v21 = vsel %vm5_vm0, %v1910_v18, %v1909_v17  ;;  %vm72_vm11 = vcmask 1048552   ;;  %v1915_v24 = vld [vmem:[%s3946_s0 + $0xbb] sm:$0x1]   ;;  %v1918_v27 = vld [vmem:[%s3946_s0 + $0x12] sm:$0x1]  }
  0x45   :  { %v1919_v28 = vld [vmem:[%s3946_s0 + $0x91] sm:$0x2]   ;;  %s2299_s12 = smov 69   ;;  %v1922_v33 = vld [vmem:[%s3946_s0 + $0x68] sm:$0x2]   ;;  %s2301_s30 = smov 67  }
  0x46   :  { %v1924_v35 = vld [vmem:[%s3946_s0 + $0xc0] sm:$0x1]   ;;  %v1927_v40 = vld [vmem:[%s3946_s0 + $0x17] sm:$0x1]   ;;  %s2303_s19 = smov 65   ;;  %s2306_s13 = smov 62  }
  0x47   :  { %629 = vrot.lane.b32.xlu0 %v628_v4, %s2273_s17  ;;  %640 = vrot.lane.b32.xlu1 %v639_v5, %s2274_s18  ;;  %s2290_s17 = smov 78   ;;  %v858_v4 = vsel %vm5_vm0, %v1895_v2, %v1894_v1  ;;  %v1897_v5 = vld [vmem:[%s3946_s0 + $0xb1] sm:$0x1]   ;;  %s2296_s18 = smov 72   ;;  %v1925_v36 = vld [vmem:[%s3946_s0 + $0x3f] sm:$0x2]  }
  0x48   :  { %v869_v9 = vsel %vm5_vm0, %v1898_v6, %v1897_v5  ;;  %v968_v39 = vsel %vm5_vm0, %v1925_v36, %v1924_v35  ;;  %v1928_v41 = vld [vmem:[%s3946_s0 + $0x96] sm:$0x2]   ;;  %v1933_v48 = vld [vmem:[%s3946_s0 + $0xc5] sm:$0x1]   ;;  %v1936_v51 = vld [vmem:[%s3946_s0 + $0x1c] sm:$0x1]  }
  0x49   :  { %v979_v45 = vsel %vm5_vm0, %v1928_v41, %v1927_v40  ;;  %v1937_v52 = vld [vmem:[%s3946_s0 + $0x9b] sm:$0x2]   ;;  %v1940_v57 = vld [vmem:[%s3946_s0 + $0x72] sm:$0x2]   ;;  %v1942_v59 = vld [vmem:[%s3946_s0 + $0xca] sm:$0x1]  }
  0x4a   :  { %v1943_v60 = vld [vmem:[%s3946_s0 + $0x49] sm:$0x2]   ;;  %s2308_s2 = smov 60   ;;  %v1945_v0 = vld [vmem:[%s3946_s0 + $0x21] sm:$0x1]   ;;  %s2310_s20 = smov 58  }
  0x4b   :  { %651 = vrot.lane.b32.xlu0 %v650_v10, %s2275_s4  ;;  %662 = vrot.lane.b32.xlu1 %v661_v13, %s2276_s5  ;;  %s2281_s5 = smov 87   ;;  %v880_v10 = vsel %vm5_vm0, %v1901_v8, %v1900_v7  ;;  %v1906_v13 = vld [vmem:[%s3946_s0 + $0xb6] sm:$0x1]   ;;  %v1034_v63 = vsel %vm5_vm0, %v1943_v60, %v1942_v59  ;;  %v1946_v1 = vld [vmem:[%s3946_s0 + $0xa0] sm:$0x2]   ;;  %s2311_s4 = smov 57  }
  0x4c   :  { %v902_v16 = vsel %vm5_vm0, %v1907_v14, %v1906_v13  ;;  %v1045_v5 = vsel %vm5_vm0, %v1946_v1, %v1945_v0  ;;  %v1951_v8 = vld [vmem:[%s3946_s0 + $0xcf] sm:$0x1]   ;;  %v1954_v11 = vld [vmem:[%s3946_s0 + $0xa6] sm:$0x1]   ;;  %s2312_s9 = smov 56   ;;  %s2313_s22 = smov 55  }
  0x4d   :  { %v1955_v12 = vld [vmem:[%s3946_s0 + $0x25] sm:$0x2]   ;;  %v1958_v17 = vld [vmem:[%s3946_s0 + $0x7c] sm:$0x2]   ;;  %s2315_s11 = smov 53   ;;  %s2317_s29 = smov 51  }
  0x4e   :  { %v1971_v35 = vld [vmem:[%s3946_s0 + $0xb0] sm:$0x1]   ;;  %v1974_v40 = vld [vmem:[%s3946_s0 + $0x7] sm:$0x1]   ;;  %s2320_s23 = smov 48   ;;  %s2330_s10 = smov 38  }
  0x4f   :  { %673 = vrot.lane.b32.xlu0 %v672_v19, %s2277_s14  ;;  %684 = vrot.lane.b32.xlu1 %v683_v20, %s2278_s15  ;;  %s2283_s15 = smov 85   ;;  %v1912_v19 = vld [vmem:[%s3946_s0 + $0xe4] sm:$0x1]   ;;  %v1972_v36 = vld [vmem:[%s3946_s0 + $0x2f] sm:$0x2]   ;;  %s2331_s21 = smov 37  }
  0x50   :  { %v1913_v20 = vld [vmem:[%s3946_s0 + $0x63] sm:$0x2]   ;;  %v1975_v41 = vld [vmem:[%s3946_s0 + $0x86] sm:$0x2]   ;;  %v1989_v59 = vld [vmem:[%s3946_s0 + $0xba] sm:$0x1]  }
  0x51   :  { %v924_v23 = vsel %vm5_vm0, %v1913_v20, %v1912_v19  ;;  %v1960_v19 = vld [vmem:[%s3946_s0 + $0xd4] sm:$0x1]   ;;  %v1990_v60 = vld [vmem:[%s3946_s0 + $0x39] sm:$0x2]   ;;  %v1992_v0 = vld [vmem:[%s3946_s0 + $0x11] sm:$0x1]  }
  0x52   :  { %v1961_v20 = vld [vmem:[%s3946_s0 + $0x53] sm:$0x2]   ;;  %v1993_v1 = vld [vmem:[%s3946_s0 + $0x90] sm:$0x2]   ;;  %s2345_s3 = smov 23   ;;  %s2359_s14 = smov 9  }
  0x53   :  { %695 = vrot.lane.b32.xlu0 %v694_v25, %s2279_s24  ;;  %706 = vrot.lane.b32.xlu1 %v705_v26, %s2280_s25  ;;  %s2285_s25 = smov 83   ;;  %v1916_v25 = vld [vmem:[%s3946_s0 + $0x3a] sm:$0x2]   ;;  %s2304_s24 = smov 64  }
  0x54   :  { %v935_v29 = vsel %vm5_vm0, %v1916_v25, %v1915_v24  ;;  %v1963_v24 = vld [vmem:[%s3946_s0 + $0xab] sm:$0x1]  }
  0x55   :  { %v1964_v25 = vld [vmem:[%s3946_s0 + $0x2a] sm:$0x2]  }
  0x57   :  { %717 = vrot.lane.b32.xlu0 %v716_v31, %s2281_s5  ;;  %728 = vrot.lane.b32.xlu1 %v727_v32, %s2282_s6  ;;  %s2287_s6 = smov 81   ;;  %v946_v31 = vsel %vm5_vm0, %v1919_v28, %v1918_v27  ;;  %v1921_v32 = vld [vmem:[%s3946_s0 + $0xe9] sm:$0x1]   ;;  %v1966_v27 = vld [vmem:[%s3946_s0 + $0x2] sm:$0x1]   ;;  %s2318_s5 = smov 50  }
  0x58   :  { %v1967_v28 = vld [vmem:[%s3946_s0 + $0x81] sm:$0x2]  }
  0x5b   :  { %739 = vrot.lane.b32.xlu0 %v738_v37, %s2283_s15  ;;  %750 = vrot.lane.b32.xlu1 %v749_v38, %s2284_s16  ;;  %s2289_s16 = smov 79   ;;  %v957_v37 = vsel %vm5_vm0, %v1922_v33, %v1921_v32  ;;  %s2309_s15 = smov 59   ;;  %v1968_v32 = vld [vmem:[%s3946_s0 + $0xd9] sm:$0x1]  }
  0x5c   :  { %v1969_v33 = vld [vmem:[%s3946_s0 + $0x58] sm:$0x2]  }
  0x5f   :  { %761 = vrot.lane.b32.xlu0 %v760_v43, %s2285_s25  ;;  %772 = vrot.lane.b32.xlu1 %v771_v44, %s2286_s26  ;;  %s2291_s26 = smov 77   ;;  %v1930_v43 = vld [vmem:[%s3946_s0 + $0xee] sm:$0x1]   ;;  %s2328_s25 = smov 40  }
  0x60   :  { %v1931_v44 = vld [vmem:[%s3946_s0 + $0x6d] sm:$0x2]  }
  0x61   :  { %v990_v47 = vsel %vm5_vm0, %v1931_v44, %v1930_v43  ;;  %v1977_v43 = vld [vmem:[%s3946_s0 + $0xde] sm:$0x1]  }
  0x62   :  { %v1978_v44 = vld [vmem:[%s3946_s0 + $0x5d] sm:$0x2]  }
  0x63   :  { %783 = vrot.lane.b32.xlu0 %v782_v49, %s2287_s6  ;;  %794 = vrot.lane.b32.xlu1 %v793_v50, %s2288_s7  ;;  %s2293_s7 = smov 75   ;;  %s2302_s6 = smov 66   ;;  %v1934_v49 = vld [vmem:[%s3946_s0 + $0x44] sm:$0x2]  }
  0x64   :  { %v1001_v53 = vsel %vm5_vm0, %v1934_v49, %v1933_v48  ;;  %v1980_v48 = vld [vmem:[%s3946_s0 + $0xb5] sm:$0x1]  }
  0x65   :  { %v1981_v49 = vld [vmem:[%s3946_s0 + $0x34] sm:$0x2]  }
  0x67   :  { %805 = vrot.lane.b32.xlu0 %v804_v55, %s2289_s16  ;;  %816 = vrot.lane.b32.xlu1 %v815_v56, %s2290_s17  ;;  %s2295_s17 = smov 73   ;;  %v1012_v55 = vsel %vm5_vm0, %v1937_v52, %v1936_v51  ;;  %v1939_v56 = vld [vmem:[%s3946_s0 + $0xf3] sm:$0x1]   ;;  %s2316_s16 = smov 52   ;;  %v1983_v51 = vld [vmem:[%s3946_s0 + $0xc] sm:$0x1]  }
  0x68   :  { %v1984_v52 = vld [vmem:[%s3946_s0 + $0x8b] sm:$0x2]  }
  0x6b   :  { %827 = vrot.lane.b32.xlu0 %v826_v61, %s2291_s26  ;;  %838 = vrot.lane.b32.xlu1 %v837_v62, %s2292_s27  ;;  %s2297_s27 = smov 71   ;;  %s2307_s26 = smov 61   ;;  %v1023_v61 = vsel %vm5_vm0, %v1940_v57, %v1939_v56  ;;  %v1986_v56 = vld [vmem:[%s3946_s0 + $0xe3] sm:$0x1]  }
  0x6c   :  { %v1987_v57 = vld [vmem:[%s3946_s0 + $0x62] sm:$0x2]  }
  0x6f   :  { %849 = vrot.lane.b32.xlu0 %v848_v3, %s2293_s7  ;;  %859 = vrot.lane.b32.xlu1 %v858_v4, %s2294_s8  ;;  %s2305_s8 = smov 63   ;;  %v1948_v3 = vld [vmem:[%s3946_s0 + $0xf8] sm:$0x1]   ;;  %s2321_s7 = smov 47  }
  0x70   :  { %v1949_v4 = vld [vmem:[%s3946_s0 + $0x77] sm:$0x2]  }
  0x71   :  { %v1056_v7 = vsel %vm5_vm0, %v1949_v4, %v1948_v3  ;;  %v1995_v3 = vld [vmem:[%s3946_s0 + $0xe8] sm:$0x1]  }
  0x72   :  { %v1996_v4 = vld [vmem:[%s3946_s0 + $0x67] sm:$0x2]  }
  0x73   :  { %870 = vrot.lane.b32.xlu0 %v869_v9, %s2295_s17  ;;  %881 = vrot.lane.b32.xlu1 %v880_v10, %s2296_s18  ;;  %s2300_s17 = smov 68   ;;  %v1952_v9 = vld [vmem:[%s3946_s0 + $0x4e] sm:$0x2]   ;;  %s2319_s18 = smov 49  }
  0x74   :  { %v1067_v13 = vsel %vm5_vm0, %v1952_v9, %v1951_v8  ;;  %v1998_v8 = vld [vmem:[%s3946_s0 + $0xbf] sm:$0x1]  }
  0x75   :  { %v1999_v9 = vld [vmem:[%s3946_s0 + $0x3e] sm:$0x2]  }
  0x77   :  { %892 = vrot.lane.b32.xlu0 %v891_v15, %s2297_s27  ;;  %903 = vrot.lane.b32.xlu1 %v902_v16, %s2298_s28  ;;  %v1078_v15 = vsel %vm5_vm0, %v1955_v12, %v1954_v11  ;;  %v1957_v16 = vld [vmem:[%s3946_s0 + $0xfd] sm:$0x1]   ;;  %s2314_s27 = smov 54   ;;  %v2001_v11 = vld [vmem:[%s3946_s0 + $0x16] sm:$0x1]   ;;  %s2361_s28 = smov 7  }
  0x78   :  { %v2002_v12 = vld [vmem:[%s3946_s0 + $0x95] sm:$0x2]  }
  0x79   :  { %v24_v22 = vpop.permute.xlu0 %23   ;;  %v68_v26 = vpop.permute.xlu1 %67  }
  0x7a   :  { %1670 = vst.msk [vmem:[%s3947_s1 + $0x2a] ss:$-25 sm:$0x3] %vm25_vm9, %v24_v22   ;;  %vm93_vm9 = vcmask 1048544  }
  0x7b   :  { %1671 = vst.msk [vmem:[%s3947_s1 + $0x29] ss:$-25 sm:$0x3] %vm28_vm10, %v24_v22   ;;  %914 = vrot.lane.b32.xlu0 %v913_v21, %s2299_s12  ;;  %925 = vrot.lane.b32.xlu1 %v924_v23, %s2300_s17  ;;  %vm357_vm10 = vcmask 1048448   ;;  %v1089_v21 = vsel %vm5_vm0, %v1958_v17, %v1957_v16  ;;  %v1100_v23 = vsel %vm5_vm0, %v1961_v20, %v1960_v19  ;;  %s2322_s12 = smov 46   ;;  %s2347_s17 = smov 21  }
  0x7c   :  { %1682 = vst.msk [vmem:[%s3947_s1 + $0x1] ss:$25 sm:$0x3] %vm69_vm7, %v68_v26   ;;  %vm50_vm7 = vcmask 1048560   ;;  %v2004_v16 = vld [vmem:[%s3946_s0 + $0xed] sm:$0x1]  }
  0x7d   :  { %73 = vst.msk [vmem:[%s3947_s1] ss:$25 sm:$0x3] %vm72_vm11, %v68_v26   ;;  %v46_v30 = vpop.permute.xlu0 %45   ;;  %v89_v34 = vpop.permute.xlu1 %88   ;;  %vm269_vm11 = vcmask 1048480   ;;  %v2005_v17 = vld [vmem:[%s3946_s0 + $0x6c] sm:$0x2]  }
  0x7e   :  { %1676 = vst.msk [vmem:[%s3947_s1 + $0x22] ss:$-25 sm:$0x3] %vm47_vm8, %v46_v30   ;;  %vm137_vm8 = vcmask 1048528   ;;  %v2007_v19 = vld [vmem:[%s3946_s0 + $0xc4] sm:$0x1]  }
  0x7f   :  { %1677 = vst.msk [vmem:[%s3947_s1 + $0x21] ss:$-25 sm:$0x3] %vm50_vm7, %v46_v30   ;;  %936 = vrot.lane.b32.xlu0 %v935_v29, %s2301_s30  ;;  %947 = vrot.lane.b32.xlu1 %v946_v31, %s2302_s6  ;;  %vm3960_vm7 = vcmask 80896   ;;  %v1111_v29 = vsel %vm5_vm0, %v1964_v25, %v1963_v24  ;;  %v1122_v31 = vsel %vm5_vm0, %v1967_v28, %v1966_v27  ;;  %v2008_v20 = vld [vmem:[%s3946_s0 + $0x43] sm:$0x2]  }
  0x80   :  { %1687 = vst.msk [vmem:[%s3947_s1 + $0x2b] ss:$-25 sm:$0x3] %vm90_vm6, %v89_v34   ;;  %vm115_vm6 = vcmask 1048536   ;;  %v2010_v24 = vld [vmem:[%s3946_s0 + $0x1b] sm:$0x1]  }
  0x81   :  { %1688 = vst.msk [vmem:[%s3947_s1 + $0x2a] ss:$-25 sm:$0x3] %vm93_vm9, %v89_v34   ;;  %v111_v38 = vpop.permute.xlu0 %110   ;;  %v133_v42 = vpop.permute.xlu1 %132   ;;  %vm3961_vm9 = vcmask 72704   ;;  %v2011_v25 = vld [vmem:[%s3946_s0 + $0x9a] sm:$0x2]  }
  0x82   :  { %1693 = vst.msk [vmem:[%s3947_s1 + $0x23] ss:$-25 sm:$0x3] %vm112_vm5, %v111_v38   ;;  %vm181_vm5 = vcmask 1048512   ;;  %v2013_v27 = vld [vmem:[%s3946_s0 + $0xf2] sm:$0x1]  }
  0x83   :  { %1694 = vst.msk [vmem:[%s3947_s1 + $0x22] ss:$-25 sm:$0x3] %vm115_vm6, %v111_v38   ;;  %958 = vrot.lane.b32.xlu0 %v957_v37, %s2303_s19  ;;  %969 = vrot.lane.b32.xlu1 %v968_v39, %s2304_s24  ;;  %vm379_vm6 = vcmask 1048440   ;;  %v1132_v37 = vsel %vm5_vm0, %v1969_v33, %v1968_v32  ;;  %v1143_v39 = vsel %vm5_vm0, %v1972_v36, %v1971_v35  ;;  %v2014_v28 = vld [vmem:[%s3946_s0 + $0x71] sm:$0x2]  }
  0x84   :  { %1699 = vst.msk [vmem:[%s3947_s1 + $0x2] ss:$25 sm:$0x3] %vm134_vm4, %v133_v42   ;;  %vm159_vm4 = vcmask 1048520   ;;  %s2332_s24 = smov 36   ;;  %s2333_s6 = smov 35  }
  0x85   :  { %1700 = vst.msk [vmem:[%s3947_s1 + $0x1] ss:$25 sm:$0x3] %vm137_vm8, %v133_v42   ;;  %v155_v46 = vpop.permute.xlu0 %154   ;;  %v177_v50 = vpop.permute.xlu1 %176   ;;  %vm401_vm8 = vcmask 1048432   ;;  %v2016_v32 = vld [vmem:[%s3946_s0 + $0xc9] sm:$0x1]  }
  0x86   :  { %1705 = vst.msk [vmem:[%s3947_s1 + $0x2c] ss:$-25 sm:$0x3] %vm156_vm2, %v155_v46   ;;  %vm203_vm2 = vcmask 1048504   ;;  %v2017_v33 = vld [vmem:[%s3946_s0 + $0x48] sm:$0x2]  }
  0x87   :  { %1706 = vst.msk [vmem:[%s3947_s1 + $0x2b] ss:$-25 sm:$0x3] %vm159_vm4, %v155_v46   ;;  %980 = vrot.lane.b32.xlu0 %v979_v45, %s2305_s8  ;;  %991 = vrot.lane.b32.xlu1 %v990_v47, %s2306_s13  ;;  %vm3962_vm4 = vcmask 64512   ;;  %v1154_v45 = vsel %vm5_vm0, %v1975_v41, %v1974_v40  ;;  %v1165_v47 = vsel %vm5_vm0, %v1978_v44, %v1977_v43  ;;  %s2325_s8 = smov 43   ;;  %s2339_s19 = smov 29  }
  0x88   :  { %1711 = vst.msk [vmem:[%s3947_s1 + $0x24] ss:$-25 sm:$0x3] %vm178_vm3, %v177_v50   ;;  %vm225_vm3 = vcmask 1048496   ;;  %v2019_v35 = vld [vmem:[%s3946_s0 + $0x20] sm:$0x1]  }
  0x89   :  { %1712 = vst.msk [vmem:[%s3947_s1 + $0x23] ss:$-25 sm:$0x3] %vm181_vm5, %v177_v50   ;;  %v199_v54 = vpop.permute.xlu0 %198   ;;  %v221_v58 = vpop.permute.xlu1 %220   ;;  %vm3963_vm5 = vcmask 56320   ;;  %v2020_v36 = vld [vmem:[%s3946_s0 + $0x9f] sm:$0x2]  }
  0x8a   :  { %1717 = vst.msk [vmem:[%s3947_s1 + $0x3] ss:$25 sm:$0x3] %vm200_vm1, %v199_v54   ;;  %vm247_vm1 = vcmask 1048488   ;;  %v2022_v40 = vld [vmem:[%s3946_s0 + $0xf7] sm:$0x1]  }
  0x8b   :  { %1718 = vst.msk [vmem:[%s3947_s1 + $0x2] ss:$25 sm:$0x3] %vm203_vm2, %v199_v54   ;;  %1002 = vrot.lane.b32.xlu0 %v1001_v53, %s2307_s26  ;;  %1013 = vrot.lane.b32.xlu1 %v1012_v55, %s2308_s2  ;;  %vm423_vm2 = vcmask 1048424   ;;  %v1176_v53 = vsel %vm5_vm0, %v1981_v49, %v1980_v48  ;;  %v1187_v55 = vsel %vm5_vm0, %v1984_v52, %v1983_v51  ;;  %s2324_s26 = smov 44   ;;  %s2349_s2 = smov 19  }
  0x8c   :  { %1723 = vst.msk [vmem:[%s3947_s1 + $0x2d] ss:$-25 sm:$0x3] %vm222_vm15, %v221_v58   ;;  %vm335_vm15 = vcmask 1048456   ;;  %v2023_v41 = vld [vmem:[%s3946_s0 + $0x76] sm:$0x2]  }
  0x8d   :  { %1724 = vst.msk [vmem:[%s3947_s1 + $0x2c] ss:$-25 sm:$0x3] %vm225_vm3, %v221_v58   ;;  %v243_v62 = vpop.permute.xlu0 %242   ;;  %v265_v2 = vpop.permute.xlu1 %264   ;;  %vm445_vm3 = vcmask 1048416   ;;  %v2025_v43 = vld [vmem:[%s3946_s0 + $0xce] sm:$0x1]  }
  0x8e   :  { %1729 = vst.msk [vmem:[%s3947_s1 + $0x25] ss:$-25 sm:$0x3] %vm244_vm14, %v243_v62   ;;  %vm313_vm14 = vcmask 1048464   ;;  %v2026_v44 = vld [vmem:[%s3946_s0 + $0x4d] sm:$0x2]  }
  0x8f   :  { %1730 = vst.msk [vmem:[%s3947_s1 + $0x24] ss:$-25 sm:$0x3] %vm247_vm1, %v243_v62   ;;  %1024 = vrot.lane.b32.xlu0 %v1023_v61, %s2309_s15  ;;  %1035 = vrot.lane.b32.xlu1 %v1034_v63, %s2310_s20  ;;  %vm3964_vm1 = vcmask 48128   ;;  %v1198_v61 = vsel %vm5_vm0, %v1987_v57, %v1986_v56  ;;  %v1209_v63 = vsel %vm5_vm0, %v1990_v60, %v1989_v59  ;;  %s2335_s20 = smov 33   ;;  %s2353_s30 = smov 15  }
  0x90   :  { %1735 = vst.msk [vmem:[%s3947_s1 + $0x4] ss:$25 sm:$0x3] %vm266_vm13, %v265_v2   ;;  %vm291_vm13 = vcmask 1048472   ;;  %v2028_v48 = vld [vmem:[%s3946_s0 + $0xa5] sm:$0x1]  }
  0x91   :  { %1736 = vst.msk [vmem:[%s3947_s1 + $0x3] ss:$25 sm:$0x3] %vm269_vm11, %v265_v2   ;;  %v287_v6 = vpop.permute.xlu0 %286   ;;  %v309_v10 = vpop.permute.xlu1 %308   ;;  %vm3965_vm11 = vcmask 39936   ;;  %v2029_v49 = vld [vmem:[%s3946_s0 + $0x24] sm:$0x2]  }
  0x92   :  { %1741 = vst.msk [vmem:[%s3947_s1 + $0x2e] ss:$-25 sm:$0x3] %vm262_vm12, %v287_v6   ;;  %vm3959_vm12 = vcmask 89088   ;;  %v2031_v51 = vld [vmem:[%s3946_s0 + $0xfc] sm:$0x1]  }
  0x93   :  { %1742 = vst.msk [vmem:[%s3947_s1 + $0x2d] ss:$-25 sm:$0x3] %vm291_vm13, %v287_v6   ;;  %1046 = vrot.lane.b32.xlu0 %v1045_v5, %s2311_s4  ;;  %1057 = vrot.lane.b32.xlu1 %v1056_v7, %s2312_s9  ;;  %vm467_vm13 = vcmask 1048408   ;;  %v1220_v5 = vsel %vm5_vm0, %v1993_v1, %v1992_v0  ;;  %v1231_v7 = vsel %vm5_vm0, %v1996_v4, %v1995_v3  ;;  %s2334_s9 = smov 34   ;;  %s2341_s4 = smov 27  }
  0x94   :  { %1747 = vst.msk [vmem:[%s3947_s1 + $0x26] ss:$-25 sm:$0x3] %vm3959_vm12, %v309_v10   ;;  %vm3966_vm12 = vcmask 31744   ;;  %v2032_v52 = vld [vmem:[%s3946_s0 + $0x7b] sm:$0x2]  }
  0x95   :  { %1748 = vst.msk [vmem:[%s3947_s1 + $0x25] ss:$-25 sm:$0x3] %vm313_vm14, %v309_v10   ;;  %v331_v14 = vpop.permute.xlu0 %330   ;;  %v353_v18 = vpop.permute.xlu1 %352   ;;  %vm489_vm14 = vcmask 1048400   ;;  %v2034_v56 = vld [vmem:[%s3946_s0 + $0xd3] sm:$0x1]  }
  0x96   :  { %1753 = vst.msk [vmem:[%s3947_s1 + $0x5] ss:$25 sm:$0x3] %vm3960_vm7, %v331_v14   ;;  %vm533_vm7 = vcmask 1048384   ;;  %v2035_v57 = vld [vmem:[%s3946_s0 + $0x52] sm:$0x2]  }
  0x97   :  { %1754 = vst.msk [vmem:[%s3947_s1 + $0x4] ss:$25 sm:$0x3] %vm335_vm15, %v331_v14   ;;  %1068 = vrot.lane.b32.xlu0 %v1067_v13, %s2313_s22  ;;  %1079 = vrot.lane.b32.xlu1 %v1078_v15, %s2314_s27  ;;  %vm3967_vm15 = vcmask 23552   ;;  %s2327_s22 = smov 41   ;;  %v1242_v13 = vsel %vm5_vm0, %v1999_v9, %v1998_v8  ;;  %v1253_v15 = vsel %vm5_vm0, %v2002_v12, %v2001_v11  ;;  %s2355_s15 = smov 13  }
  0x98   :  { %1759 = vst.msk [vmem:[%s3947_s1 + $0x2f] ss:$-25 sm:$0x3] %vm3961_vm9, %v353_v18   ;;  %vm3968_vm9 = vcmask 15360   ;;  %v2037_v59 = vld [vmem:[%s3946_s0 + $0xaa] sm:$0x1]  }
  0x99   :  { %1760 = vst.msk [vmem:[%s3947_s1 + $0x2e] ss:$-25 sm:$0x3] %vm357_vm10, %v353_v18   ;;  %v375_v22 = vpop.permute.xlu0 %374   ;;  %v397_v26 = vpop.permute.xlu1 %396   ;;  %vm511_vm10 = vcmask 1048392   ;;  %v2038_v60 = vld [vmem:[%s3946_s0 + $0x29] sm:$0x2]  }
  0x9a   :  { %1765 = vst.msk [vmem:[%s3947_s1 + $0x27] ss:$-25 sm:$0x3] %vm3962_vm4, %v375_v22   ;;  %vm555_vm4 = vcmask 1040176   ;;  %v2040_v0 = vld [vmem:[%s3946_s0 + $0x1] sm:$0x1]  }
  0x9b   :  { %1766 = vst.msk [vmem:[%s3947_s1 + $0x26] ss:$-25 sm:$0x3] %vm379_vm6, %v375_v22   ;;  %1090 = vrot.lane.b32.xlu0 %v1089_v21, %s2315_s11  ;;  %1101 = vrot.lane.b32.xlu1 %v1100_v23, %s2316_s16  ;;  %vm3969_vm6 = vcmask 7168   ;;  %s2326_s11 = smov 42   ;;  %v1264_v21 = vsel %vm5_vm0, %v2005_v17, %v2004_v16  ;;  %v1275_v23 = vsel %vm5_vm0, %v2008_v20, %v2007_v19  ;;  %s2351_s16 = smov 17  }
  0x9c   :  { %1771 = vst.msk [vmem:[%s3947_s1 + $0x6] ss:$25 sm:$0x3] %vm3963_vm5, %v397_v26   ;;  %vm566_vm5 = vcmask 1031976   ;;  %v2041_v1 = vld [vmem:[%s3946_s0 + $0x80] sm:$0x2]  }
  0x9d   :  { %1772 = vst.msk [vmem:[%s3947_s1 + $0x5] ss:$25 sm:$0x3] %vm401_vm8, %v397_v26   ;;  %v419_v30 = vpop.permute.xlu0 %418   ;;  %v441_v34 = vpop.permute.xlu1 %440   ;;  %vm544_vm8 = vcmask 1048376   ;;  %v2042_v3 = vld [vmem:[%s3946_s0 + $0xd8] sm:$0x1]  }
  0x9e   :  { %1777 = vst.msk [vmem:[%s3947_s1 + $0x30] ss:$-25 sm:$0x3] %vm3964_vm1, %v419_v30   ;;  %vm598_vm1 = vcmask 1007376   ;;  %v2043_v4 = vld [vmem:[%s3946_s0 + $0x57] sm:$0x2]  }
  0x9f   :  { %1778 = vst.msk [vmem:[%s3947_s1 + $0x2f] ss:$-25 sm:$0x3] %vm423_vm2, %v419_v30   ;;  %1112 = vrot.lane.b32.xlu0 %v1111_v29, %s2317_s29  ;;  %1123 = vrot.lane.b32.xlu1 %v1122_v31, %s2318_s5  ;;  %vm577_vm2 = vcmask 1023776   ;;  %v1286_v29 = vsel %vm5_vm0, %v2011_v25, %v2010_v24  ;;  %v1297_v31 = vsel %vm5_vm0, %v2014_v28, %v2013_v27  ;;  %s2337_s5 = smov 31   ;;  %s2357_s29 = smov 11  }
  0xa0   :  { %1783 = vst.msk [vmem:[%s3947_s1 + $0x28] ss:$-25 sm:$0x3] %vm3965_vm11, %v441_v34   ;;  %vm609_vm11 = vcmask 999176   ;;  %v2045_v8 = vld [vmem:[%s3946_s0 + $0xaf] sm:$0x1]  }
  0xa1   :  { %1784 = vst.msk [vmem:[%s3947_s1 + $0x27] ss:$-25 sm:$0x3] %vm445_vm3, %v441_v34   ;;  %v463_v38 = vpop.permute.xlu0 %462   ;;  %v485_v42 = vpop.permute.xlu1 %484   ;;  %vm587_vm3 = vcmask 1015576   ;;  %v2046_v9 = vld [vmem:[%s3946_s0 + $0x2e] sm:$0x2]  }
  0xa2   :  { %1789 = vst.msk [vmem:[%s3947_s1 + $0x20] ss:$-25 sm:$0x3] %vm3966_vm12, %v463_v38   ;;  %vm642_vm12 = vcmask 974576   ;;  %v2048_v11 = vld [vmem:[%s3946_s0 + $0x6] sm:$0x1]  }
  0xa3   :  { %1790 = vst.msk [vmem:[%s3947_s1 + $0x6] ss:$25 sm:$0x3] %vm467_vm13, %v463_v38   ;;  %1133 = vrot.lane.b32.xlu0 %v1132_v37, %s2319_s18  ;;  %1144 = vrot.lane.b32.xlu1 %v1143_v39, %s2320_s23  ;;  %s2323_s23 = smov 45   ;;  %vm620_vm13 = vcmask 990976   ;;  %v1308_v37 = vsel %vm5_vm0, %v2017_v33, %v2016_v32  ;;  %v1319_v39 = vsel %vm5_vm0, %v2020_v36, %v2019_v35  ;;  %s2343_s18 = smov 25  }
  0xa4   :  { %1795 = vst.msk [vmem:[%s3947_s1 + $0x31] ss:$-25 sm:$0x3] %vm3967_vm15, %v485_v42   ;;  %vm653_vm15 = vcmask 966376   ;;  %v2049_v12 = vld [vmem:[%s3946_s0 + $0x85] sm:$0x2]  }
  0xa5   :  { %1796 = vst.msk [vmem:[%s3947_s1 + $0x30] ss:$-25 sm:$0x3] %vm489_vm14, %v485_v42   ;;  %v507_v46 = vpop.permute.xlu0 %506   ;;  %v529_v50 = vpop.permute.xlu1 %528   ;;  %vm631_vm14 = vcmask 982776   ;;  %v2051_v16 = vld [vmem:[%s3946_s0 + $0xdd] sm:$0x1]  }
  0xa6   :  { %1801 = vst.msk [vmem:[%s3947_s1 + $0x29] ss:$-25 sm:$0x3] %vm3968_vm9, %v507_v46   ;;  %vm686_vm9 = vcmask 941776   ;;  %v2052_v17 = vld [vmem:[%s3946_s0 + $0x5c] sm:$0x2]  }
  0xa7   :  { %1802 = vst.msk [vmem:[%s3947_s1 + $0x28] ss:$-25 sm:$0x3] %vm511_vm10, %v507_v46   ;;  %1155 = vrot.lane.b32.xlu0 %v1154_v45, %s2321_s7  ;;  %1166 = vrot.lane.b32.xlu1 %v1165_v47, %s2322_s12  ;;  %s2329_s7 = smov 39   ;;  %vm664_vm10 = vcmask 958176   ;;  %v1330_v45 = vsel %vm5_vm0, %v2023_v41, %v2022_v40  ;;  %v1341_v47 = vsel %vm5_vm0, %v2026_v44, %v2025_v43  ;;  %s2363_s13 = smov 5  }
  0xa8   :  { %1807 = vst.msk [vmem:[%s3947_s1 + $0x21] ss:$-25 sm:$0x3] %vm3969_vm6, %v529_v50   ;;  %vm697_vm6 = vcmask 933576   ;;  %v2054_v19 = vld [vmem:[%s3946_s0 + $0xb4] sm:$0x1]  }
  0xa9   :  { %1808 = vst.msk [vmem:[%s3947_s1 + $0x20] ss:$-25 sm:$0x3] %vm533_vm7, %v529_v50   ;;  %v543_v54 = vpop.permute.xlu0 %542   ;;  %v554_v58 = vpop.permute.xlu1 %553   ;;  %vm675_vm7 = vcmask 949976   ;;  %v2055_v20 = vld [vmem:[%s3946_s0 + $0x33] sm:$0x2]  }
  0xaa   :  { %1811 = vst.msk [vmem:[%s3947_s1 + $0x31] ss:$-25 sm:$0x3] %vm544_vm8, %v543_v54   ;;  %vm708_vm8 = vcmask 925376   ;;  %v2057_v24 = vld [vmem:[%s3946_s0 + $0xb] sm:$0x1]  }
  0xab   :  { %1177 = vrot.lane.b32.xlu0 %v1176_v53, %s2323_s23  ;;  %1814 = vst.msk [vmem:[%s3947_s1 + $0x29] ss:$-25 sm:$0x3] %vm555_vm4, %v554_v58   ;;  %1188 = vrot.lane.b32.xlu1 %v1187_v55, %s2324_s26  ;;  %s2336_s23 = smov 32   ;;  %vm719_vm4 = vcmask 917176   ;;  %v1352_v53 = vsel %vm5_vm0, %v2029_v49, %v2028_v48  ;;  %v1363_v55 = vsel %vm5_vm0, %v2032_v52, %v2031_v51 }
  0xac   :  { %v2058_v25 = vld [vmem:[%s3946_s0 + $0x8a] sm:$0x2]   ;;  %v2060_v27 = vld [vmem:[%s3946_s0 + $0xe2] sm:$0x1]   ;;  %v2063_v32 = vld [vmem:[%s3946_s0 + $0xb9] sm:$0x1]  }
  0xad   :  { %v565_v62 = vpop.permute.xlu0 %564   ;;  %v576_v2 = vpop.permute.xlu1 %575   ;;  %v2061_v28 = vld [vmem:[%s3946_s0 + $0x61] sm:$0x2]   ;;  %v2064_v33 = vld [vmem:[%s3946_s0 + $0x38] sm:$0x2]   ;;  %v2066_v35 = vld [vmem:[%s3946_s0 + $0x10] sm:$0x1]  }
  0xae   :  { %1817 = vst.msk [vmem:[%s3947_s1 + $0x21] ss:$-25 sm:$0x3] %vm566_vm5, %v565_v62   ;;  %vm730_vm5 = vcmask 908976   ;;  %v2067_v36 = vld [vmem:[%s3946_s0 + $0x8f] sm:$0x2]  }
  0xaf   :  { %1199 = vrot.lane.b32.xlu0 %v1198_v61, %s2325_s8  ;;  %578 = vst.msk [vmem:[%s3947_s1] ss:$25 sm:$0x3] %vm577_vm2, %v576_v2   ;;  %1210 = vrot.lane.b32.xlu1 %v1209_v63, %s2326_s11  ;;  %s2338_s8 = smov 30   ;;  %vm741_vm2 = vcmask 900776   ;;  %v1374_v61 = vsel %vm5_vm0, %v2035_v57, %v2034_v56  ;;  %v1385_v63 = vsel %vm5_vm0, %v2038_v60, %v2037_v59 }
  0xb0   :  { %v2069_v40 = vld [vmem:[%s3946_s0 + $0xe7] sm:$0x1]   ;;  %v2072_v43 = vld [vmem:[%s3946_s0 + $0xbe] sm:$0x1]   ;;  %v2075_v48 = vld [vmem:[%s3946_s0 + $0x15] sm:$0x1]  }
  0xb1   :  { %v586_v6 = vpop.permute.xlu0 %585   ;;  %v597_v10 = vpop.permute.xlu1 %596   ;;  %v2070_v41 = vld [vmem:[%s3946_s0 + $0x66] sm:$0x2]   ;;  %v2073_v44 = vld [vmem:[%s3946_s0 + $0x3d] sm:$0x2]   ;;  %v2076_v49 = vld [vmem:[%s3946_s0 + $0x94] sm:$0x2]  }
  0xb2   :  { %1822 = vst.msk [vmem:[%s3947_s1 + $0x2a] ss:$-25 sm:$0x3] %vm587_vm3, %v586_v6   ;;  %vm752_vm3 = vcmask 892576   ;;  %v2078_v51 = vld [vmem:[%s3946_s0 + $0xec] sm:$0x1]  }
  0xb3   :  { %1221 = vrot.lane.b32.xlu0 %v1220_v5, %s2327_s22  ;;  %1825 = vst.msk [vmem:[%s3947_s1 + $0x22] ss:$-25 sm:$0x3] %vm598_vm1, %v597_v10   ;;  %1232 = vrot.lane.b32.xlu1 %v1231_v7, %s2328_s25  ;;  %s2340_s22 = smov 28   ;;  %vm763_vm1 = vcmask 884376   ;;  %v1396_v5 = vsel %vm5_vm0, %v2041_v1, %v2040_v0  ;;  %v1406_v7 = vsel %vm5_vm0, %v2043_v4, %v2042_v3  ;;  %s2366_s25 = smov 2  }
  0xb4   :  { %v2079_v52 = vld [vmem:[%s3946_s0 + $0x6b] sm:$0x2]   ;;  %v2081_v56 = vld [vmem:[%s3946_s0 + $0xc3] sm:$0x1]   ;;  %v2084_v59 = vld [vmem:[%s3946_s0 + $0x1a] sm:$0x1]  }
  0xb5   :  { %v608_v14 = vpop.permute.xlu0 %607   ;;  %v619_v18 = vpop.permute.xlu1 %618   ;;  %v2082_v57 = vld [vmem:[%s3946_s0 + $0x42] sm:$0x2]   ;;  %v2085_v60 = vld [vmem:[%s3946_s0 + $0x99] sm:$0x2]   ;;  %v2087_v0 = vld [vmem:[%s3946_s0 + $0xf1] sm:$0x1]  }
  0xb6   :  { %1828 = vst.msk [vmem:[%s3947_s1 + $0x1] ss:$25 sm:$0x3] %vm609_vm11, %v608_v14   ;;  %vm774_vm11 = vcmask 876176   ;;  %v2088_v1 = vld [vmem:[%s3946_s0 + $0x70] sm:$0x2]  }
  0xb7   :  { %1243 = vrot.lane.b32.xlu0 %v1242_v13, %s2329_s7  ;;  %1831 = vst.msk [vmem:[%s3947_s1 + $0x2b] ss:$-25 sm:$0x3] %vm620_vm13, %v619_v18   ;;  %1254 = vrot.lane.b32.xlu1 %v1253_v15, %s2330_s10  ;;  %s2342_s7 = smov 26   ;;  %vm785_vm13 = vcmask 867976   ;;  %v1417_v13 = vsel %vm5_vm0, %v2046_v9, %v2045_v8  ;;  %v1428_v15 = vsel %vm5_vm0, %v2049_v12, %v2048_v11 }
  0xb8   :  { %v2090_v3 = vld [vmem:[%s3946_s0 + $0xc8] sm:$0x1]   ;;  %v2093_v8 = vld [vmem:[%s3946_s0 + $0x1f] sm:$0x1]   ;;  %v2096_v11 = vld [vmem:[%s3946_s0 + $0xf6] sm:$0x1]  }
  0xb9   :  { %v630_v22 = vpop.permute.xlu0 %629   ;;  %v641_v26 = vpop.permute.xlu1 %640   ;;  %v2091_v4 = vld [vmem:[%s3946_s0 + $0x47] sm:$0x2]   ;;  %v2094_v9 = vld [vmem:[%s3946_s0 + $0x9e] sm:$0x2]   ;;  %v2097_v12 = vld [vmem:[%s3946_s0 + $0x75] sm:$0x2]  }
  0xba   :  { %1834 = vst.msk [vmem:[%s3947_s1 + $0x23] ss:$-25 sm:$0x3] %vm631_vm14, %v630_v22   ;;  %vm796_vm14 = vcmask 859776  }
  0xbb   :  { %1265 = vrot.lane.b32.xlu0 %v1264_v21, %s2331_s21  ;;  %1837 = vst.msk [vmem:[%s3947_s1 + $0x2] ss:$25 sm:$0x3] %vm642_vm12, %v641_v26   ;;  %1276 = vrot.lane.b32.xlu1 %v1275_v23, %s2332_s24  ;;  %s2344_s21 = smov 24   ;;  %vm807_vm12 = vcmask 851576   ;;  %v1439_v21 = vsel %vm5_vm0, %v2052_v17, %v2051_v16  ;;  %v1450_v23 = vsel %vm5_vm0, %v2055_v20, %v2054_v19 }
  0xbc   :  { %v2099_v16 = vld [vmem:[%s3946_s0 + $0xcd] sm:$0x1]   ;;  %v2102_v19 = vld [vmem:[%s3946_s0 + $0xa4] sm:$0x1]  }
  0xbd   :  { %v652_v30 = vpop.permute.xlu0 %651   ;;  %v663_v34 = vpop.permute.xlu1 %662   ;;  %v2100_v17 = vld [vmem:[%s3946_s0 + $0x4c] sm:$0x2]   ;;  %v2103_v20 = vld [vmem:[%s3946_s0 + $0x23] sm:$0x2]  }
  0xbe   :  { %1840 = vst.msk [vmem:[%s3947_s1 + $0x2c] ss:$-25 sm:$0x3] %vm653_vm15, %v652_v30   ;;  %vm818_vm15 = vcmask 843376  }
  0xbf   :  { %1287 = vrot.lane.b32.xlu0 %v1286_v29, %s2333_s6  ;;  %1843 = vst.msk [vmem:[%s3947_s1 + $0x24] ss:$-25 sm:$0x3] %vm664_vm10, %v663_v34   ;;  %1298 = vrot.lane.b32.xlu1 %v1297_v31, %s2334_s9  ;;  %s2346_s6 = smov 22   ;;  %vm829_vm10 = vcmask 835176   ;;  %v1461_v29 = vsel %vm5_vm0, %v2058_v25, %v2057_v24  ;;  %v1472_v31 = vsel %vm5_vm0, %v2061_v28, %v2060_v27 }
  0xc0   :  { %v2105_v24 = vld [vmem:[%s3946_s0 + $0xfb] sm:$0x1]   ;;  %v2108_v27 = vld [vmem:[%s3946_s0 + $0xd2] sm:$0x1]  }
  0xc1   :  { %v674_v38 = vpop.permute.xlu0 %673   ;;  %v685_v42 = vpop.permute.xlu1 %684   ;;  %v2106_v25 = vld [vmem:[%s3946_s0 + $0x7a] sm:$0x2]   ;;  %v2109_v28 = vld [vmem:[%s3946_s0 + $0x51] sm:$0x2]  }
  0xc2   :  { %1846 = vst.msk [vmem:[%s3947_s1 + $0x3] ss:$25 sm:$0x3] %vm675_vm7, %v674_v38   ;;  %vm840_vm7 = vcmask 826976  }
  0xc3   :  { %1309 = vrot.lane.b32.xlu0 %v1308_v37, %s2335_s20  ;;  %1849 = vst.msk [vmem:[%s3947_s1 + $0x2d] ss:$-25 sm:$0x3] %vm686_vm9, %v685_v42   ;;  %1320 = vrot.lane.b32.xlu1 %v1319_v39, %s2336_s23  ;;  %s2348_s20 = smov 20   ;;  %vm851_vm9 = vcmask 818776   ;;  %v1483_v37 = vsel %vm5_vm0, %v2064_v33, %v2063_v32  ;;  %v1494_v39 = vsel %vm5_vm0, %v2067_v36, %v2066_v35 }
  0xc4   :  { %v2111_v32 = vld [vmem:[%s3946_s0 + $0xa9] sm:$0x1]  }
  0xc5   :  { %v696_v46 = vpop.permute.xlu0 %695   ;;  %v707_v50 = vpop.permute.xlu1 %706   ;;  %v2112_v33 = vld [vmem:[%s3946_s0 + $0x28] sm:$0x2]  }
  0xc6   :  { %1852 = vst.msk [vmem:[%s3947_s1 + $0x25] ss:$-25 sm:$0x3] %vm697_vm6, %v696_v46   ;;  %vm861_vm6 = vcmask 810576   ;;  %v1659_v35 = vsel %vm5_vm0, %v2112_v33, %v2111_v32 }
  0xc7   :  { %1331 = vrot.lane.b32.xlu0 %v1330_v45, %s2337_s5  ;;  %1855 = vst.msk [vmem:[%s3947_s1 + $0x4] ss:$25 sm:$0x3] %vm708_vm8, %v707_v50   ;;  %1342 = vrot.lane.b32.xlu1 %v1341_v47, %s2338_s8  ;;  %s2350_s5 = smov 18   ;;  %vm872_vm8 = vcmask 802376   ;;  %v1505_v45 = vsel %vm5_vm0, %v2070_v41, %v2069_v40  ;;  %v1516_v47 = vsel %vm5_vm0, %v2073_v44, %v2072_v43 }
  0xc9   :  { %v718_v54 = vpop.permute.xlu0 %717   ;;  %v729_v58 = vpop.permute.xlu1 %728  }
  0xca   :  { %1858 = vst.msk [vmem:[%s3947_s1 + $0x2e] ss:$-25 sm:$0x3] %vm719_vm4, %v718_v54   ;;  %vm883_vm4 = vcmask 794176  }
  0xcb   :  { %1353 = vrot.lane.b32.xlu0 %v1352_v53, %s2339_s19  ;;  %1861 = vst.msk [vmem:[%s3947_s1 + $0x26] ss:$-25 sm:$0x3] %vm730_vm5, %v729_v58   ;;  %1364 = vrot.lane.b32.xlu1 %v1363_v55, %s2340_s22  ;;  %s2352_s19 = smov 16   ;;  %vm894_vm5 = vcmask 785976   ;;  %v1527_v53 = vsel %vm5_vm0, %v2076_v49, %v2075_v48  ;;  %v1538_v55 = vsel %vm5_vm0, %v2079_v52, %v2078_v51  ;;  %s2365_s22 = smov 3  }
  0xcd   :  { %v740_v62 = vpop.permute.xlu0 %739   ;;  %v751_v2 = vpop.permute.xlu1 %750  }
  0xce   :  { %1864 = vst.msk [vmem:[%s3947_s1 + $0x5] ss:$25 sm:$0x3] %vm741_vm2, %v740_v62   ;;  %vm905_vm2 = vcmask 777776  }
  0xcf   :  { %1375 = vrot.lane.b32.xlu0 %v1374_v61, %s2341_s4  ;;  %1867 = vst.msk [vmem:[%s3947_s1 + $0x2f] ss:$-25 sm:$0x3] %vm752_vm3, %v751_v2   ;;  %1386 = vrot.lane.b32.xlu1 %v1385_v63, %s2342_s7  ;;  %s2354_s4 = smov 14   ;;  %vm916_vm3 = vcmask 769576   ;;  %v1549_v61 = vsel %vm5_vm0, %v2082_v57, %v2081_v56  ;;  %v1560_v63 = vsel %vm5_vm0, %v2085_v60, %v2084_v59 }
  0xd1   :  { %v762_v6 = vpop.permute.xlu0 %761   ;;  %v773_v10 = vpop.permute.xlu1 %772  }
  0xd2   :  { %1870 = vst.msk [vmem:[%s3947_s1 + $0x27] ss:$-25 sm:$0x3] %vm763_vm1, %v762_v6   ;;  %vm927_vm1 = vcmask 761376  }
  0xd3   :  { %1397 = vrot.lane.b32.xlu0 %v1396_v5, %s2343_s18  ;;  %1873 = vst.msk [vmem:[%s3947_s1 + $0x6] ss:$25 sm:$0x3] %vm774_vm11, %v773_v10   ;;  %1407 = vrot.lane.b32.xlu1 %v1406_v7, %s2344_s21  ;;  %s2356_s18 = smov 12   ;;  %vm938_vm11 = vcmask 753176   ;;  %v1571_v5 = vsel %vm5_vm0, %v2088_v1, %v2087_v0  ;;  %v1582_v7 = vsel %vm5_vm0, %v2091_v4, %v2090_v3 }
  0xd5   :  { %v784_v14 = vpop.permute.xlu0 %783   ;;  %v795_v18 = vpop.permute.xlu1 %794  }
  0xd6   :  { %1876 = vst.msk [vmem:[%s3947_s1 + $0x30] ss:$-25 sm:$0x3] %vm785_vm13, %v784_v14   ;;  %vm949_vm13 = vcmask 744976  }
  0xd7   :  { %1418 = vrot.lane.b32.xlu0 %v1417_v13, %s2345_s3  ;;  %1879 = vst.msk [vmem:[%s3947_s1 + $0x28] ss:$-25 sm:$0x3] %vm796_vm14, %v795_v18   ;;  %1429 = vrot.lane.b32.xlu1 %v1428_v15, %s2346_s6  ;;  %s2358_s3 = smov 10   ;;  %vm960_vm14 = vcmask 736776   ;;  %v1593_v13 = vsel %vm5_vm0, %v2094_v9, %v2093_v8  ;;  %v1604_v15 = vsel %vm5_vm0, %v2097_v12, %v2096_v11 }
  0xd9   :  { %v806_v22 = vpop.permute.xlu0 %805   ;;  %v817_v26 = vpop.permute.xlu1 %816  }
  0xda   :  { %1882 = vst.msk [vmem:[%s3947_s1 + $0x20] ss:$-25 sm:$0x3] %vm807_vm12, %v806_v22   ;;  %vm971_vm12 = vcmask 728576  }
  0xdb   :  { %1440 = vrot.lane.b32.xlu0 %v1439_v21, %s2347_s17  ;;  %1885 = vst.msk [vmem:[%s3947_s1 + $0x31] ss:$-25 sm:$0x3] %vm818_vm15, %v817_v26   ;;  %1451 = vrot.lane.b32.xlu1 %v1450_v23, %s2348_s20  ;;  %s2360_s17 = smov 8   ;;  %vm982_vm15 = vcmask 720376   ;;  %v1615_v21 = vsel %vm5_vm0, %v2100_v17, %v2099_v16  ;;  %v1626_v23 = vsel %vm5_vm0, %v2103_v20, %v2102_v19 }
  0xdd   :  { %v828_v30 = vpop.permute.xlu0 %827   ;;  %v839_v34 = vpop.permute.xlu1 %838  }
  0xde   :  { %1888 = vst.msk [vmem:[%s3947_s1 + $0x29] ss:$-25 sm:$0x3] %vm829_vm10, %v828_v30   ;;  %vm993_vm10 = vcmask 712176  }
  0xdf   :  { %1462 = vrot.lane.b32.xlu0 %v1461_v29, %s2349_s2  ;;  %1891 = vst.msk [vmem:[%s3947_s1 + $0x21] ss:$-25 sm:$0x3] %vm840_vm7, %v839_v34   ;;  %1473 = vrot.lane.b32.xlu1 %v1472_v31, %s2350_s5  ;;  %s2362_s2 = smov 6   ;;  %vm1004_vm7 = vcmask 703976   ;;  %v1637_v29 = vsel %vm5_vm0, %v2106_v25, %v2105_v24  ;;  %v1648_v31 = vsel %vm5_vm0, %v2109_v28, %v2108_v27  ;;  %vm1037_vm0 = vcmask 679376  }
  0xe1   :  { %v850_v38 = vpop.permute.xlu0 %849   ;;  %v860_v42 = vpop.permute.xlu1 %859  }
  0xe2   :  { %852 = vst.msk [vmem:[%s3947_s1] ss:$25 sm:$0x3] %vm851_vm9, %v850_v38   ;;  %vm1015_vm9 = vcmask 695776  }
  0xe3   :  { %1484 = vrot.lane.b32.xlu0 %v1483_v37, %s2351_s16  ;;  %1896 = vst.msk [vmem:[%s3947_s1 + $0x2a] ss:$-25 sm:$0x3] %vm861_vm6, %v860_v42   ;;  %1495 = vrot.lane.b32.xlu1 %v1494_v39, %s2352_s19  ;;  %s2364_s16 = smov 4   ;;  %vm1026_vm6 = vcmask 687576  }
  0xe5   :  { %v871_v46 = vpop.permute.xlu0 %870   ;;  %v882_v50 = vpop.permute.xlu1 %881  }
  0xe6   :  { %1899 = vst.msk [vmem:[%s3947_s1 + $0x22] ss:$-25 sm:$0x3] %vm872_vm8, %v871_v46   ;;  %vm1048_vm8 = vcmask 671176  }
  0xe7   :  { %1506 = vrot.lane.b32.xlu0 %v1505_v45, %s2353_s30  ;;  %1902 = vst.msk [vmem:[%s3947_s1 + $0x1] ss:$25 sm:$0x3] %vm883_vm4, %v882_v50   ;;  %1517 = vrot.lane.b32.xlu1 %v1516_v47, %s2354_s4  ;;  %vm1059_vm4 = vcmask 662976  }
  0xe9   :  { %v893_v54 = vpop.permute.xlu0 %892   ;;  %v904_v58 = vpop.permute.xlu1 %903  }
  0xea   :  { %1905 = vst.msk [vmem:[%s3947_s1 + $0x2b] ss:$-25 sm:$0x3] %vm894_vm5, %v893_v54   ;;  %vm1070_vm5 = vcmask 654776  }
  0xeb   :  { %1528 = vrot.lane.b32.xlu0 %v1527_v53, %s2355_s15  ;;  %1908 = vst.msk [vmem:[%s3947_s1 + $0x23] ss:$-25 sm:$0x3] %vm905_vm2, %v904_v58   ;;  %1539 = vrot.lane.b32.xlu1 %v1538_v55, %s2356_s18  ;;  %vm1081_vm2 = vcmask 646576  }
  0xed   :  { %v915_v62 = vpop.permute.xlu0 %914   ;;  %v926_v2 = vpop.permute.xlu1 %925  }
  0xee   :  { %1911 = vst.msk [vmem:[%s3947_s1 + $0x2] ss:$25 sm:$0x3] %vm916_vm3, %v915_v62   ;;  %vm1092_vm3 = vcmask 638376  }
  0xef   :  { %1550 = vrot.lane.b32.xlu0 %v1549_v61, %s2357_s29  ;;  %1914 = vst.msk [vmem:[%s3947_s1 + $0x2c] ss:$-25 sm:$0x3] %vm927_vm1, %v926_v2   ;;  %1561 = vrot.lane.b32.xlu1 %v1560_v63, %s2358_s3  ;;  %vm1103_vm1 = vcmask 630176  }
  0xf1   :  { %v937_v6 = vpop.permute.xlu0 %936   ;;  %v948_v10 = vpop.permute.xlu1 %947  }
  0xf2   :  { %1917 = vst.msk [vmem:[%s3947_s1 + $0x24] ss:$-25 sm:$0x3] %vm938_vm11, %v937_v6   ;;  %vm1114_vm11 = vcmask 621976  }
  0xf3   :  { %1572 = vrot.lane.b32.xlu0 %v1571_v5, %s2359_s14  ;;  %1920 = vst.msk [vmem:[%s3947_s1 + $0x3] ss:$25 sm:$0x3] %vm949_vm13, %v948_v10   ;;  %1583 = vrot.lane.b32.xlu1 %v1582_v7, %s2360_s17  ;;  %vm1125_vm13 = vcmask 613776  }
  0xf5   :  { %v959_v14 = vpop.permute.xlu0 %958   ;;  %v970_v18 = vpop.permute.xlu1 %969  }
  0xf6   :  { %1923 = vst.msk [vmem:[%s3947_s1 + $0x2d] ss:$-25 sm:$0x3] %vm960_vm14, %v959_v14   ;;  %vm1135_vm14 = vcmask 605576  }
  0xf7   :  { %1594 = vrot.lane.b32.xlu0 %v1593_v13, %s2361_s28  ;;  %1926 = vst.msk [vmem:[%s3947_s1 + $0x25] ss:$-25 sm:$0x3] %vm971_vm12, %v970_v18   ;;  %1605 = vrot.lane.b32.xlu1 %v1604_v15, %s2362_s2  ;;  %s2367_s28 = smov 1   ;;  %vm1146_vm12 = vcmask 597376  }
  0xf9   :  { %v981_v22 = vpop.permute.xlu0 %980   ;;  %v992_v26 = vpop.permute.xlu1 %991  }
  0xfa   :  { %1929 = vst.msk [vmem:[%s3947_s1 + $0x4] ss:$25 sm:$0x3] %vm982_vm15, %v981_v22   ;;  %vm1157_vm15 = vcmask 589176  }
  0xfb   :  { %1616 = vrot.lane.b32.xlu0 %v1615_v21, %s2363_s13  ;;  %1932 = vst.msk [vmem:[%s3947_s1 + $0x2e] ss:$-25 sm:$0x3] %vm993_vm10, %v992_v26   ;;  %1627 = vrot.lane.b32.xlu1 %v1626_v23, %s2364_s16  ;;  %vm1168_vm10 = vcmask 580976  }
  0xfd   :  { %v1003_v30 = vpop.permute.xlu0 %1002   ;;  %v1014_v34 = vpop.permute.xlu1 %1013  }
  0xfe   :  { %1935 = vst.msk [vmem:[%s3947_s1 + $0x26] ss:$-25 sm:$0x3] %vm1004_vm7, %v1003_v30   ;;  %vm1179_vm7 = vcmask 572776  }
  0xff   :  { %1638 = vrot.lane.b32.xlu0 %v1637_v29, %s2365_s22  ;;  %1938 = vst.msk [vmem:[%s3947_s1 + $0x5] ss:$25 sm:$0x3] %vm1015_vm9, %v1014_v34   ;;  %1649 = vrot.lane.b32.xlu1 %v1648_v31, %s2366_s25  ;;  %vm1190_vm9 = vcmask 564576  }
 0x101   :  { %v1025_v36 = vpop.permute.xlu0 %1024   ;;  %v1036_v37 = vpop.permute.xlu1 %1035  }
 0x102   :  { %1941 = vst.msk [vmem:[%s3947_s1 + $0x2f] ss:$-25 sm:$0x3] %vm1026_vm6, %v1025_v36   ;;  %vm1201_vm6 = vcmask 556376  }
 0x103   :  { %1660 = vrot.lane.b32.xlu0 %v1659_v35, %s2367_s28  ;;  %1944 = vst.msk [vmem:[%s3947_s1 + $0x27] ss:$-25 sm:$0x3] %vm1037_vm0, %v1036_v37   ;;  %vm1212_vm0 = vcmask 548176  }
 0x105   :  { %v1047_v38 = vpop.permute.xlu0 %1046   ;;  %v1058_v39 = vpop.permute.xlu1 %1057  }
 0x106   :  { %1947 = vst.msk [vmem:[%s3947_s1 + $0x6] ss:$25 sm:$0x3] %vm1048_vm8, %v1047_v38   ;;  %vm1223_vm8 = vcmask 539976  }
 0x107   :  { %1950 = vst.msk [vmem:[%s3947_s1 + $0x30] ss:$-25 sm:$0x3] %vm1059_vm4, %v1058_v39   ;;  %vm1234_vm4 = vcmask 531776  }
 0x109   :  { %v1069_v40 = vpop.permute.xlu0 %1068   ;;  %v1080_v41 = vpop.permute.xlu1 %1079  }
 0x10a   :  { %1953 = vst.msk [vmem:[%s3947_s1 + $0x28] ss:$-25 sm:$0x3] %vm1070_vm5, %v1069_v40   ;;  %vm1245_vm5 = vcmask 523576  }
 0x10b   :  { %1956 = vst.msk [vmem:[%s3947_s1 + $0x20] ss:$-25 sm:$0x3] %vm1081_vm2, %v1080_v41   ;;  %vm1256_vm2 = vcmask 515376  }
 0x10d   :  { %v1091_v42 = vpop.permute.xlu0 %1090   ;;  %v1102_v43 = vpop.permute.xlu1 %1101  }
 0x10e   :  { %1959 = vst.msk [vmem:[%s3947_s1 + $0x31] ss:$-25 sm:$0x3] %vm1092_vm3, %v1091_v42   ;;  %vm1267_vm3 = vcmask 507176  }
 0x10f   :  { %1962 = vst.msk [vmem:[%s3947_s1 + $0x29] ss:$-25 sm:$0x3] %vm1103_vm1, %v1102_v43   ;;  %vm1278_vm1 = vcmask 498976  }
 0x111   :  { %v1113_v44 = vpop.permute.xlu0 %1112   ;;  %v1124_v45 = vpop.permute.xlu1 %1123  }
 0x112   :  { %1965 = vst.msk [vmem:[%s3947_s1 + $0x21] ss:$-25 sm:$0x3] %vm1114_vm11, %v1113_v44   ;;  %vm1289_vm11 = vcmask 490776  }
 0x113   :  { %1126 = vst.msk [vmem:[%s3947_s1] ss:$25 sm:$0x3] %vm1125_vm13, %v1124_v45   ;;  %vm1300_vm13 = vcmask 482576  }
 0x115   :  { %v1134_v46 = vpop.permute.xlu0 %1133   ;;  %v1145_v47 = vpop.permute.xlu1 %1144  }
 0x116   :  { %1970 = vst.msk [vmem:[%s3947_s1 + $0x2a] ss:$-25 sm:$0x3] %vm1135_vm14, %v1134_v46   ;;  %vm1311_vm14 = vcmask 474376  }
 0x117   :  { %1973 = vst.msk [vmem:[%s3947_s1 + $0x22] ss:$-25 sm:$0x3] %vm1146_vm12, %v1145_v47   ;;  %vm1322_vm12 = vcmask 466176  }
 0x119   :  { %v1156_v48 = vpop.permute.xlu0 %1155   ;;  %v1167_v49 = vpop.permute.xlu1 %1166  }
 0x11a   :  { %1976 = vst.msk [vmem:[%s3947_s1 + $0x1] ss:$25 sm:$0x3] %vm1157_vm15, %v1156_v48   ;;  %vm1333_vm15 = vcmask 457976  }
 0x11b   :  { %1979 = vst.msk [vmem:[%s3947_s1 + $0x2b] ss:$-25 sm:$0x3] %vm1168_vm10, %v1167_v49   ;;  %vm1344_vm10 = vcmask 449776  }
 0x11d   :  { %v1178_v50 = vpop.permute.xlu0 %1177   ;;  %v1189_v51 = vpop.permute.xlu1 %1188  }
 0x11e   :  { %1982 = vst.msk [vmem:[%s3947_s1 + $0x23] ss:$-25 sm:$0x3] %vm1179_vm7, %v1178_v50   ;;  %vm1355_vm7 = vcmask 441576  }
 0x11f   :  { %1985 = vst.msk [vmem:[%s3947_s1 + $0x2] ss:$25 sm:$0x3] %vm1190_vm9, %v1189_v51   ;;  %vm1366_vm9 = vcmask 433376  }
 0x121   :  { %v1200_v52 = vpop.permute.xlu0 %1199   ;;  %v1211_v53 = vpop.permute.xlu1 %1210  }
 0x122   :  { %1988 = vst.msk [vmem:[%s3947_s1 + $0x2c] ss:$-25 sm:$0x3] %vm1201_vm6, %v1200_v52   ;;  %vm1377_vm6 = vcmask 425176  }
 0x123   :  { %1991 = vst.msk [vmem:[%s3947_s1 + $0x24] ss:$-25 sm:$0x3] %vm1212_vm0, %v1211_v53   ;;  %vm1388_vm0 = vcmask 416976  }
 0x125   :  { %v1222_v54 = vpop.permute.xlu0 %1221   ;;  %v1233_v55 = vpop.permute.xlu1 %1232  }
 0x126   :  { %1994 = vst.msk [vmem:[%s3947_s1 + $0x3] ss:$25 sm:$0x3] %vm1223_vm8, %v1222_v54   ;;  %vm1399_vm8 = vcmask 408776  }
 0x127   :  { %1997 = vst.msk [vmem:[%s3947_s1 + $0x2d] ss:$-25 sm:$0x3] %vm1234_vm4, %v1233_v55   ;;  %vm1409_vm4 = vcmask 400576  }
 0x129   :  { %v1244_v56 = vpop.permute.xlu0 %1243   ;;  %v1255_v57 = vpop.permute.xlu1 %1254  }
 0x12a   :  { %2000 = vst.msk [vmem:[%s3947_s1 + $0x25] ss:$-25 sm:$0x3] %vm1245_vm5, %v1244_v56   ;;  %vm1420_vm5 = vcmask 392376  }
 0x12b   :  { %2003 = vst.msk [vmem:[%s3947_s1 + $0x4] ss:$25 sm:$0x3] %vm1256_vm2, %v1255_v57   ;;  %vm1431_vm2 = vcmask 384176  }
 0x12d   :  { %v1266_v58 = vpop.permute.xlu0 %1265   ;;  %v1277_v59 = vpop.permute.xlu1 %1276  }
 0x12e   :  { %2006 = vst.msk [vmem:[%s3947_s1 + $0x2e] ss:$-25 sm:$0x3] %vm1267_vm3, %v1266_v58   ;;  %vm1442_vm3 = vcmask 375976  }
 0x12f   :  { %2009 = vst.msk [vmem:[%s3947_s1 + $0x26] ss:$-25 sm:$0x3] %vm1278_vm1, %v1277_v59   ;;  %vm1453_vm1 = vcmask 367776  }
 0x131   :  { %v1288_v60 = vpop.permute.xlu0 %1287   ;;  %v1299_v61 = vpop.permute.xlu1 %1298  }
 0x132   :  { %2012 = vst.msk [vmem:[%s3947_s1 + $0x5] ss:$25 sm:$0x3] %vm1289_vm11, %v1288_v60   ;;  %vm1464_vm11 = vcmask 359576  }
 0x133   :  { %2015 = vst.msk [vmem:[%s3947_s1 + $0x2f] ss:$-25 sm:$0x3] %vm1300_vm13, %v1299_v61   ;;  %vm1475_vm13 = vcmask 351376  }
 0x135   :  { %v1310_v62 = vpop.permute.xlu0 %1309   ;;  %v1321_v63 = vpop.permute.xlu1 %1320  }
 0x136   :  { %2018 = vst.msk [vmem:[%s3947_s1 + $0x27] ss:$-25 sm:$0x3] %vm1311_vm14, %v1310_v62   ;;  %vm1486_vm14 = vcmask 343176  }
 0x137   :  { %2021 = vst.msk [vmem:[%s3947_s1 + $0x6] ss:$25 sm:$0x3] %vm1322_vm12, %v1321_v63   ;;  %vm1497_vm12 = vcmask 334976  }
 0x139   :  { %v1332_v0 = vpop.permute.xlu0 %1331   ;;  %v1343_v1 = vpop.permute.xlu1 %1342  }
 0x13a   :  { %2024 = vst.msk [vmem:[%s3947_s1 + $0x30] ss:$-25 sm:$0x3] %vm1333_vm15, %v1332_v0   ;;  %vm1508_vm15 = vcmask 326776  }
 0x13b   :  { %2027 = vst.msk [vmem:[%s3947_s1 + $0x28] ss:$-25 sm:$0x3] %vm1344_vm10, %v1343_v1   ;;  %vm1519_vm10 = vcmask 318576  }
 0x13d   :  { %v1354_v2 = vpop.permute.xlu0 %1353   ;;  %v1365_v3 = vpop.permute.xlu1 %1364  }
 0x13e   :  { %2030 = vst.msk [vmem:[%s3947_s1 + $0x20] ss:$-25 sm:$0x3] %vm1355_vm7, %v1354_v2   ;;  %vm1530_vm7 = vcmask 310376  }
 0x13f   :  { %2033 = vst.msk [vmem:[%s3947_s1 + $0x31] ss:$-25 sm:$0x3] %vm1366_vm9, %v1365_v3   ;;  %vm1541_vm9 = vcmask 302176  }
 0x141   :  { %v1376_v4 = vpop.permute.xlu0 %1375   ;;  %v1387_v5 = vpop.permute.xlu1 %1386  }
 0x142   :  { %2036 = vst.msk [vmem:[%s3947_s1 + $0x29] ss:$-25 sm:$0x3] %vm1377_vm6, %v1376_v4   ;;  %vm1552_vm6 = vcmask 293976  }
 0x143   :  { %2039 = vst.msk [vmem:[%s3947_s1 + $0x21] ss:$-25 sm:$0x3] %vm1388_vm0, %v1387_v5   ;;  %vm1563_vm0 = vcmask 285776  }
 0x145   :  { %v1398_v6 = vpop.permute.xlu0 %1397   ;;  %v1408_v7 = vpop.permute.xlu1 %1407  }
 0x146   :  { %1400 = vst.msk [vmem:[%s3947_s1] ss:$25 sm:$0x3] %vm1399_vm8, %v1398_v6   ;;  %vm1574_vm8 = vcmask 277576  }
 0x147   :  { %2044 = vst.msk [vmem:[%s3947_s1 + $0x2a] ss:$-25 sm:$0x3] %vm1409_vm4, %v1408_v7   ;;  %vm1585_vm4 = vcmask 269376  }
 0x149   :  { %v1419_v8 = vpop.permute.xlu0 %1418   ;;  %v1430_v9 = vpop.permute.xlu1 %1429  }
 0x14a   :  { %2047 = vst.msk [vmem:[%s3947_s1 + $0x22] ss:$-25 sm:$0x3] %vm1420_vm5, %v1419_v8   ;;  %vm1596_vm5 = vcmask 261176  }
 0x14b   :  { %2050 = vst.msk [vmem:[%s3947_s1 + $0x1] ss:$25 sm:$0x3] %vm1431_vm2, %v1430_v9   ;;  %vm1607_vm2 = vcmask 252976  }
 0x14d   :  { %v1441_v10 = vpop.permute.xlu0 %1440   ;;  %v1452_v11 = vpop.permute.xlu1 %1451  }
 0x14e   :  { %2053 = vst.msk [vmem:[%s3947_s1 + $0x2b] ss:$-25 sm:$0x3] %vm1442_vm3, %v1441_v10   ;;  %vm1618_vm3 = vcmask 244776  }
 0x14f   :  { %2056 = vst.msk [vmem:[%s3947_s1 + $0x23] ss:$-25 sm:$0x3] %vm1453_vm1, %v1452_v11   ;;  %vm1629_vm1 = vcmask 236576  }
 0x151   :  { %v1463_v12 = vpop.permute.xlu0 %1462   ;;  %v1474_v13 = vpop.permute.xlu1 %1473  }
 0x152   :  { %2059 = vst.msk [vmem:[%s3947_s1 + $0x2] ss:$25 sm:$0x3] %vm1464_vm11, %v1463_v12   ;;  %vm1640_vm11 = vcmask 228376  }
 0x153   :  { %2062 = vst.msk [vmem:[%s3947_s1 + $0x2c] ss:$-25 sm:$0x3] %vm1475_vm13, %v1474_v13   ;;  %vm1651_vm13 = vcmask 220176  }
 0x155   :  { %v1485_v14 = vpop.permute.xlu0 %1484   ;;  %v1496_v15 = vpop.permute.xlu1 %1495  }
 0x156   :  { %2065 = vst.msk [vmem:[%s3947_s1 + $0x24] ss:$-25 sm:$0x3] %vm1486_vm14, %v1485_v14   ;;  %vm1662_vm14 = vcmask 211976  }
 0x157   :  { %2068 = vst.msk [vmem:[%s3947_s1 + $0x3] ss:$25 sm:$0x3] %vm1497_vm12, %v1496_v15  }
 0x159   :  { %v1507_v16 = vpop.permute.xlu0 %1506   ;;  %v1518_v17 = vpop.permute.xlu1 %1517  }
 0x15a   :  { %2071 = vst.msk [vmem:[%s3947_s1 + $0x2d] ss:$-25 sm:$0x3] %vm1508_vm15, %v1507_v16  }
 0x15b   :  { %2074 = vst.msk [vmem:[%s3947_s1 + $0x25] ss:$-25 sm:$0x3] %vm1519_vm10, %v1518_v17  }
 0x15d   :  { %v1529_v18 = vpop.permute.xlu0 %1528   ;;  %v1540_v19 = vpop.permute.xlu1 %1539  }
 0x15e   :  { %2077 = vst.msk [vmem:[%s3947_s1 + $0x4] ss:$25 sm:$0x3] %vm1530_vm7, %v1529_v18  }
 0x15f   :  { %2080 = vst.msk [vmem:[%s3947_s1 + $0x2e] ss:$-25 sm:$0x3] %vm1541_vm9, %v1540_v19  }
 0x161   :  { %v1551_v20 = vpop.permute.xlu0 %1550   ;;  %v1562_v21 = vpop.permute.xlu1 %1561  }
 0x162   :  { %2083 = vst.msk [vmem:[%s3947_s1 + $0x26] ss:$-25 sm:$0x3] %vm1552_vm6, %v1551_v20  }
 0x163   :  { %2086 = vst.msk [vmem:[%s3947_s1 + $0x5] ss:$25 sm:$0x3] %vm1563_vm0, %v1562_v21  }
 0x165   :  { %v1573_v22 = vpop.permute.xlu0 %1572   ;;  %v1584_v23 = vpop.permute.xlu1 %1583  }
 0x166   :  { %2089 = vst.msk [vmem:[%s3947_s1 + $0x2f] ss:$-25 sm:$0x3] %vm1574_vm8, %v1573_v22  }
 0x167   :  { %2092 = vst.msk [vmem:[%s3947_s1 + $0x27] ss:$-25 sm:$0x3] %vm1585_vm4, %v1584_v23  }
 0x169   :  { %v1595_v24 = vpop.permute.xlu0 %1594   ;;  %v1606_v25 = vpop.permute.xlu1 %1605  }
 0x16a   :  { %2095 = vst.msk [vmem:[%s3947_s1 + $0x6] ss:$25 sm:$0x3] %vm1596_vm5, %v1595_v24  }
 0x16b   :  { %2098 = vst.msk [vmem:[%s3947_s1 + $0x30] ss:$-25 sm:$0x3] %vm1607_vm2, %v1606_v25  }
 0x16d   :  { %v1617_v26 = vpop.permute.xlu0 %1616   ;;  %v1628_v27 = vpop.permute.xlu1 %1627  }
 0x16e   :  { %2101 = vst.msk [vmem:[%s3947_s1 + $0x28] ss:$-25 sm:$0x3] %vm1618_vm3, %v1617_v26  }
 0x16f   :  { %2104 = vst.msk [vmem:[%s3947_s1 + $0x20] ss:$-25 sm:$0x3] %vm1629_vm1, %v1628_v27  }
 0x171   :  { %v1639_v28 = vpop.permute.xlu0 %1638   ;;  %v1650_v29 = vpop.permute.xlu1 %1649  }
 0x172   :  { %2107 = vst.msk [vmem:[%s3947_s1 + $0x31] ss:$-25 sm:$0x3] %vm1640_vm11, %v1639_v28  }
 0x173   :  { %2110 = vst.msk [vmem:[%s3947_s1 + $0x29] ss:$-25 sm:$0x3] %vm1651_vm13, %v1650_v29  }
 0x175   :  { %v1661_v30 = vpop.permute.xlu0 %1660  }
 0x176   :  { %2113 = vst.msk [vmem:[%s3947_s1 + $0x21] ss:$-25 sm:$0x3] %vm1662_vm14, %v1661_v30  }

// kernel: model_forward.3
= control target key start
LH: loop header
LB: loop body
LE: loop exit
PB: predicated region body
PF: predicated region fallthrough
CT: control target
= control target key end

     0   :  { %s12471_s12 = smov 0   ;;  %s14073_s0 = inlined_call_operand.vmem [shape: bf16[448,640], index: 0, kind: input, shape index: {}]   ;;  %s14074_s1 = inlined_call_operand.vmem [shape: bf16[5,640,256], index: 1, kind: input, shape index: {}]   ;;  %s14075_s2 = inlined_call_operand.vmem [shape: f32[1,256], index: 2, kind: input, shape index: {}]   ;;  %s14076_s3 = inlined_call_operand.vmem [shape: bf16[320,256], index: 3, kind: output, shape index: {}]  }
   0x1 LB: > { %s9240_s13 = sadd.s32 4294967295, %s12448_s12   ;;  %p9244_p0 = scmp.ge.s32.totalorder %s12448_s12, 1  ;;  %s12448_s12 = sphi %s12471_s12, %s13_s12  }
   0x2   : > { %p139_p1 = scmp.lt.s32.totalorder %s12448_s12, 3 }
   0x4   : > { %p140_p2 = pnand %p9244_p0, %p139_p1 }
   0x5   : > { %v11511_v0 = vld [vmem:[%s14074_s1 + $0x284] ss:$8 sps:$4 sm:$0xff] (!%p140_p2)   ;;  %v11513_v1 = vld [vmem:[%s14074_s1 + $0x280] ss:$8 sps:$4 sm:$0xff] (!%p140_p2)   ;;  %v11514_v2 = vld [vmem:[%s14074_s1 + $0x294] ss:$8 sps:$4 sm:$0xff] (!%p140_p2)  }
   0x6   : > { %143 = sbr.rel (%p140_p2) target bundleno = 1100 (0x44c), region = 32  ;;  %907 = vmatprep.subr.bf16.mxu0 (!%p140_p2), %v11511_v0  ;;  %5409 = vmatprep.subr.bf16.mxu1 (!%p140_p2), %v11511_v0  ;;  %v11516_v3 = vld [vmem:[%s14074_s1 + $0x290] ss:$8 sps:$4 sm:$0xff] (!%p140_p2)   ;;  %v11517_v4 = vld [vmem:[%s14074_s1 + $0x2a4] ss:$8 sps:$4 sm:$0xff] (!%p140_p2)  }
   0x7   : > { %908 = vmatpush1.bf16.msra.mxu0 (!%p140_p2), %v11513_v1  ;;  %5410 = vmatpush1.bf16.msra.mxu1 (!%p140_p2), %v11513_v1  ;;  %s165_s22 = smul.u32 (!%p140_p2), 28, %s9240_s13  ;;  %v11519_v5 = vld [vmem:[%s14074_s1 + $0x2a0] ss:$8 sps:$4 sm:$0xff] (!%p140_p2)   ;;  %v11520_v6 = vld [vmem:[%s14074_s1 + $0x2b4] ss:$8 sps:$4 sm:$0xff] (!%p140_p2)  }
   0x8   : > { %909 = vmatprep.subr.bf16.mxu0 (!%p140_p2), %v11514_v2  ;;  %5411 = vmatprep.subr.bf16.mxu1 (!%p140_p2), %v11514_v2  ;;  %v11522_v7 = vld [vmem:[%s14074_s1 + $0x2b0] ss:$8 sps:$4 sm:$0xff] (!%p140_p2)   ;;  %v11523_v8 = vld [vmem:[%s14074_s1 + $0x2c4] ss:$8 sps:$4 sm:$0xff] (!%p140_p2)   ;;  %v11525_v9 = vld [vmem:[%s14074_s1 + $0x2c0] ss:$8 sps:$4 sm:$0xff] (!%p140_p2)  }
   0x9   : > { %p166_p3 = scmp.lt.s32.totalorder (!%p140_p2), %s165_s22, 55  ;;  %v11526_v10 = vld [vmem:[%s14074_s1 + $0x2d4] ss:$8 sps:$4 sm:$0xff] (!%p140_p2)   ;;  %v11528_v11 = vld [vmem:[%s14074_s1 + $0x2d0] ss:$8 sps:$4 sm:$0xff] (!%p140_p2)   ;;  %s172_s26 = smul.u32 (!%p140_p2), 20, %s9240_s13 }
   0xa   : > { %v11529_v12 = vld [vmem:[%s14074_s1 + $0x2e4] ss:$8 sps:$4 sm:$0xff] (!%p140_p2)   ;;  %v11531_v14 = vld [vmem:[%s14074_s1 + $0x2e0] ss:$8 sps:$4 sm:$0xff] (!%p140_p2)   ;;  %v11532_v15 = vld [vmem:[%s14074_s1 + $0x2f4] ss:$8 sps:$4 sm:$0xff] (!%p140_p2)  }
   0xb   : > { %910 = vmatpush1.bf16.msra.mxu0 (!%p140_p2), %v11516_v3  ;;  %5412 = vmatpush1.bf16.msra.mxu1 (!%p140_p2), %v11516_v3  ;;  %v11534_v17 = vld [vmem:[%s14074_s1 + $0x2f0] ss:$8 sps:$4 sm:$0xff] (!%p140_p2)   ;;  %v11535_v18 = vld [vmem:[%s14074_s1 + $0x304] ss:$8 sps:$4 sm:$0xff] (!%p140_p2)   ;;  %v11537_v19 = vld [vmem:[%s14074_s1 + $0x300] ss:$8 sps:$4 sm:$0xff] (!%p140_p2)  }
   0xc   : > { %911 = vmatprep.subr.bf16.mxu0 (!%p140_p2), %v11517_v4  ;;  %5413 = vmatprep.subr.bf16.mxu1 (!%p140_p2), %v11517_v4  ;;  %v11538_v20 = vld [vmem:[%s14074_s1 + $0x314] ss:$8 sps:$4 sm:$0xff] (!%p140_p2)   ;;  %v11540_v21 = vld [vmem:[%s14074_s1 + $0x310] ss:$8 sps:$4 sm:$0xff] (!%p140_p2)   ;;  %v11541_v22 = vld [vmem:[%s14074_s1 + $0x324] ss:$8 sps:$4 sm:$0xff] (!%p140_p2)  }
   0xd   : > { %s14078_s22 = smov (!%p166_p3, %s165_s22), 55  ;;  %v11543_v23 = vld [vmem:[%s14074_s1 + $0x320] ss:$8 sps:$4 sm:$0xff]   ;;  %v11544_v24 = vld [vmem:[%s14074_s1 + $0x334] ss:$8 sps:$4 sm:$0xff]   ;;  %p173_p4 = scmp.lt.s32.totalorder %s172_s26, 39 }
   0xe   : > { %s11501_s8 = smul.u32 20, %s14078_s22  ;;  %v11546_v25 = vld [vmem:[%s14074_s1 + $0x330] ss:$8 sps:$4 sm:$0xff]   ;;  %v11547_v26 = vld [vmem:[%s14074_s1 + $0x344] ss:$8 sps:$4 sm:$0xff]  }
   0xf   : > { %912 = vmatpush1.bf16.msra.mxu0 %v11519_v5  ;;  %5414 = vmatpush1.bf16.msra.mxu1 %v11519_v5  ;;  %v11549_v27 = vld [vmem:[%s14074_s1 + $0x340] ss:$8 sps:$4 sm:$0xff]   ;;  %v11550_v28 = vld [vmem:[%s14074_s1 + $0x354] ss:$8 sps:$4 sm:$0xff]   ;;  %v11552_v29 = vld [vmem:[%s14074_s1 + $0x350] ss:$8 sps:$4 sm:$0xff]  }
  0x10   : > { %913 = vmatprep.subr.bf16.mxu0 %v11520_v6  ;;  %5415 = vmatprep.subr.bf16.mxu1 %v11520_v6  ;;  %s12520_s17 = scalar_lea.vmem %s14073_s0, %s11501_s8  ;;  %v11553_v30 = vld [vmem:[%s14074_s1 + $0x364] ss:$8 sps:$4 sm:$0xff]   ;;  %v11555_v31 = vld [vmem:[%s14074_s1 + $0x360] ss:$8 sps:$4 sm:$0xff]   ;;  %v11556_v32 = vld [vmem:[%s14074_s1 + $0x374] ss:$8 sps:$4 sm:$0xff]  }
  0x11   : > { %v11561_v13 = vld [vmem:[%s12520_s17 + $0x2c] ss:$20 sps:$4 sm:$0xff]   ;;  %v11567_v16 = vld [vmem:[%s12520_s17 + $0xf4] ss:$20 sps:$4 sm:$0xff]   ;;  %v11558_v33 = vld [vmem:[%s14074_s1 + $0x370] ss:$8 sps:$4 sm:$0xff]  }
  0x12   : > { %939 = vmatprep.mubr.bf16.mxu0 %v11561_v13  ;;  %5441 = vmatprep.mubr.bf16.mxu1 %v11567_v16  ;;  %v11564_v34 = vld [vmem:[%s14074_s1 + $0x384] ss:$8 sps:$4 sm:$0xff]   ;;  %v11559_v35 = vld [vmem:[%s12520_s17 + $0x28] ss:$20 sps:$4 sm:$0xff]   ;;  %v11568_v41 = vld [vmem:[%s14074_s1 + $0x390] ss:$8 sps:$4 sm:$0xff]  }
  0x13   : > { %914 = vmatpush1.bf16.msra.mxu0 %v11522_v7  ;;  %5416 = vmatpush1.bf16.msra.mxu1 %v11522_v7  ;;  %v11565_v36 = vld [vmem:[%s12520_s17 + $0xf0] ss:$20 sps:$4 sm:$0xff]   ;;  %v11562_v37 = vld [vmem:[%s14074_s1 + $0x380] ss:$8 sps:$4 sm:$0xff]   ;;  %v11570_v38 = vld [vmem:[%s14074_s1 + $0x394] ss:$8 sps:$4 sm:$0xff]  }
  0x14   : > { %915 = vmatprep.subr.bf16.mxu0 %v11523_v8  ;;  %5417 = vmatprep.subr.bf16.mxu1 %v11523_v8  ;;  %v11589_v39 = vld [vmem:[%s12520_s17 + $0x54] ss:$20 sps:$4 sm:$0xff]   ;;  %v11591_v40 = vld [vmem:[%s12520_s17 + $0x11c] ss:$20 sps:$4 sm:$0xff]   ;;  %v11573_v42 = vld [vmem:[%s14074_s1 + $0x3a4] ss:$8 sps:$4 sm:$0xff]  }
  0x15   : > { %v11593_v43 = vld [vmem:[%s12520_s17 + $0x50] ss:$20 sps:$4 sm:$0xff]   ;;  %v11597_v44 = vld [vmem:[%s12520_s17 + $0x118] ss:$20 sps:$4 sm:$0xff]   ;;  %v11571_v45 = vld [vmem:[%s14074_s1 + $0x3a0] ss:$8 sps:$4 sm:$0xff]  }
  0x16   : > { %v11576_v46 = vld [vmem:[%s14074_s1 + $0x3b4] ss:$8 sps:$4 sm:$0xff]   ;;  %v11603_v48 = vld [vmem:[%s12520_s17 + $0x144] ss:$20 sps:$4 sm:$0xff]   ;;  %v11577_v53 = vld [vmem:[%s14074_s1 + $0x3c0] ss:$8 sps:$4 sm:$0xff]  }
  0x17   : > { %916 = vmatpush1.bf16.msra.mxu0 %v11525_v9  ;;  %5418 = vmatpush1.bf16.msra.mxu1 %v11525_v9  ;;  %v11601_v47 = vld [vmem:[%s12520_s17 + $0x7c] ss:$20 sps:$4 sm:$0xff]   ;;  %v11579_v50 = vld [vmem:[%s14074_s1 + $0x3c4] ss:$8 sps:$4 sm:$0xff]   ;;  %v11609_v52 = vld [vmem:[%s12520_s17 + $0x140] ss:$20 sps:$4 sm:$0xff]  }
  0x18   : > { %917 = vmatprep.subr.bf16.mxu0 %v11526_v10  ;;  %5419 = vmatprep.subr.bf16.mxu1 %v11526_v10  ;;  %v11574_v49 = vld [vmem:[%s14074_s1 + $0x3b0] ss:$8 sps:$4 sm:$0xff]   ;;  %v11582_v54 = vld [vmem:[%s14074_s1 + $0x3d4] ss:$8 sps:$4 sm:$0xff]   ;;  %v11615_v56 = vld [vmem:[%s12520_s17 + $0x16c] ss:$20 sps:$4 sm:$0xff]  }
  0x19   : > { %v11605_v51 = vld [vmem:[%s12520_s17 + $0x78] ss:$20 sps:$4 sm:$0xff]   ;;  %v11617_v59 = vld [vmem:[%s12520_s17 + $0xa0] ss:$20 sps:$4 sm:$0xff]   ;;  %v11621_v60 = vld [vmem:[%s12520_s17 + $0x168] ss:$20 sps:$4 sm:$0xff]  }
  0x1a   : > { %v11613_v55 = vld [vmem:[%s12520_s17 + $0xa4] ss:$20 sps:$4 sm:$0xff]   ;;  %v11583_v61 = vld [vmem:[%s14074_s1 + $0x3e0] ss:$8 sps:$4 sm:$0xff]   ;;  %v11588_v62 = vld [vmem:[%s14074_s1 + $0x3f4] ss:$8 sps:$4 sm:$0xff]  }
  0x1b   : > { %918 = vmatpush1.bf16.msra.mxu0 %v11528_v11  ;;  %5420 = vmatpush1.bf16.msra.mxu1 %v11528_v11  ;;  %v11580_v57 = vld [vmem:[%s14074_s1 + $0x3d0] ss:$8 sps:$4 sm:$0xff]   ;;  %v11585_v58 = vld [vmem:[%s14074_s1 + $0x3e4] ss:$8 sps:$4 sm:$0xff]   ;;  %v11627_v0 = vld [vmem:[%s12520_s17 + $0x194] ss:$20 sps:$4 sm:$0xff]  }
  0x1c   : > { %919 = vmatprep.subr.bf16.mxu0 %v11529_v12  ;;  %5421 = vmatprep.subr.bf16.mxu1 %v11529_v12  ;;  %v12644_v63 = vld [vmem:[%s12520_s17 + $0xcc] ss:$20 sps:$4 sm:$0xff]   ;;  %v11586_v1 = vld [vmem:[%s14074_s1 + $0x3f0] ss:$8 sps:$4 sm:$0xff]   ;;  %v11629_v4 = vld [vmem:[%s12520_s17 + $0xc8] ss:$20 sps:$4 sm:$0xff]  }
  0x1d   : > { %v11596_v2 = vld [vmem:[%s14074_s1 + $0x404] ss:$8 sps:$4 sm:$0xff]   ;;  %v11594_v3 = vld [vmem:[%s14074_s1 + $0x400] ss:$8 sps:$4 sm:$0xff]   ;;  %v11600_v6 = vld [vmem:[%s14074_s1 + $0x414] ss:$8 sps:$4 sm:$0xff]  }
  0x1e   : > { %v11633_v5 = vld [vmem:[%s12520_s17 + $0x190] ss:$20 sps:$4 sm:$0xff]   ;;  %v11639_v7 = vld [vmem:[%s12520_s17 + $0x34] ss:$20 sps:$4 sm:$0xff]   ;;  %s14080_s26 = smov (!%p173_p4, %s172_s26), 39 }
  0x1f   : > { %920 = vmatpush1.bf16.msra.mxu0 %v11531_v14  ;;  %5422 = vmatpush1.bf16.msra.mxu1 %v11531_v14  ;;  %v11642_v8 = vld [vmem:[%s12520_s17 + $0xfc] ss:$20 sps:$4 sm:$0xff]   ;;  %v11608_v10 = vld [vmem:[%s14074_s1 + $0x424] ss:$8 sps:$4 sm:$0xff]   ;;  %v11606_v11 = vld [vmem:[%s14074_s1 + $0x420] ss:$8 sps:$4 sm:$0xff]  }
  0x20   : > { %921 = vmatprep.subr.bf16.mxu0 %v11532_v15  ;;  %5423 = vmatprep.subr.bf16.mxu1 %v11532_v15  ;;  %v11598_v9 = vld [vmem:[%s14074_s1 + $0x410] ss:$8 sps:$4 sm:$0xff]   ;;  %v11612_v12 = vld [vmem:[%s14074_s1 + $0x434] ss:$8 sps:$4 sm:$0xff]   ;;  %v11620_v14 = vld [vmem:[%s14074_s1 + $0x444] ss:$8 sps:$4 sm:$0xff]  }
  0x21   : > { %v11610_v13 = vld [vmem:[%s14074_s1 + $0x430] ss:$8 sps:$4 sm:$0xff]   ;;  %v11618_v15 = vld [vmem:[%s14074_s1 + $0x440] ss:$8 sps:$4 sm:$0xff]   ;;  %v11624_v16 = vld [vmem:[%s14074_s1 + $0x454] ss:$8 sps:$4 sm:$0xff]  }
  0x22   : > { %s10920_s13 = sshll.u32 %s14080_s26, 3 }
  0x23   : > { %922 = vmatpush1.bf16.msra.mxu0 %v11534_v17  ;;  %5424 = vmatpush1.bf16.msra.mxu1 %v11534_v17  ;;  %v11622_v17 = vld [vmem:[%s14074_s1 + $0x450] ss:$8 sps:$4 sm:$0xff]   ;;  %s14016_s5 = scalar_lea.vmem %s14076_s3, %s10920_s13 }
  0x24   : > { %923 = vmatprep.subr.bf16.mxu0 %v11535_v18  ;;  %5425 = vmatprep.subr.bf16.mxu1 %v11535_v18  ;;  %v11632_v18 = vld [vmem:[%s14074_s1 + $0x464] ss:$8 sps:$4 sm:$0xff]  }
  0x27   : > { %924 = vmatpush1.bf16.msra.mxu0 %v11537_v19  ;;  %5426 = vmatpush1.bf16.msra.mxu1 %v11537_v19  ;;  %v11630_v19 = vld [vmem:[%s14074_s1 + $0x460] ss:$8 sps:$4 sm:$0xff]  }
  0x28   : > { %925 = vmatprep.subr.bf16.mxu0 %v11538_v20  ;;  %5427 = vmatprep.subr.bf16.mxu1 %v11538_v20  ;;  %v11636_v20 = vld [vmem:[%s14074_s1 + $0x474] ss:$8 sps:$4 sm:$0xff]  }
  0x2b   : > { %926 = vmatpush1.bf16.msra.mxu0 %v11540_v21  ;;  %5428 = vmatpush1.bf16.msra.mxu1 %v11540_v21  ;;  %v11634_v21 = vld [vmem:[%s14074_s1 + $0x470] ss:$8 sps:$4 sm:$0xff]  }
  0x2c   : > { %927 = vmatprep.subr.bf16.mxu0 %v11541_v22  ;;  %5429 = vmatprep.subr.bf16.mxu1 %v11541_v22  ;;  %v11645_v22 = vld [vmem:[%s14074_s1 + $0x484] ss:$8 sps:$4 sm:$0xff]  }
  0x2f   : > { %928 = vmatpush1.bf16.msra.mxu0 %v11543_v23  ;;  %5430 = vmatpush1.bf16.msra.mxu1 %v11543_v23  ;;  %v11637_v23 = vld [vmem:[%s12520_s17 + $0x30] ss:$20 sps:$4 sm:$0xff]  }
  0x30   : > { %929 = vmatprep.subr.bf16.mxu0 %v11544_v24  ;;  %5431 = vmatprep.subr.bf16.mxu1 %v11544_v24  ;;  %v11640_v24 = vld [vmem:[%s12520_s17 + $0xf8] ss:$20 sps:$4 sm:$0xff]  }
  0x33   : > { %930 = vmatpush1.bf16.msra.mxu0 %v11546_v25  ;;  %5432 = vmatpush1.bf16.msra.mxu1 %v11546_v25  ;;  %v11643_v25 = vld [vmem:[%s14074_s1 + $0x480] ss:$8 sps:$4 sm:$0xff]  }
  0x34   : > { %931 = vmatprep.subr.bf16.mxu0 %v11547_v26  ;;  %5433 = vmatprep.subr.bf16.mxu1 %v11547_v26  ;;  %v11648_v26 = vld [vmem:[%s14074_s1 + $0x494] ss:$8 sps:$4 sm:$0xff]  }
  0x37   : > { %932 = vmatpush1.bf16.msra.mxu0 %v11549_v27  ;;  %5434 = vmatpush1.bf16.msra.mxu1 %v11549_v27  ;;  %v11649_v27 = vld [vmem:[%s12520_s17 + $0x5c] ss:$20 sps:$4 sm:$0xff]  }
  0x38   : > { %933 = vmatprep.subr.bf16.mxu0 %v11550_v28  ;;  %5435 = vmatprep.subr.bf16.mxu1 %v11550_v28  ;;  %v11651_v28 = vld [vmem:[%s12520_s17 + $0x124] ss:$20 sps:$4 sm:$0xff]  }
  0x3b   : > { %934 = vmatpush1.bf16.msra.mxu0 %v11552_v29  ;;  %5436 = vmatpush1.bf16.msra.mxu1 %v11552_v29  ;;  %v11646_v29 = vld [vmem:[%s14074_s1 + $0x490] ss:$8 sps:$4 sm:$0xff]  }
  0x3c   : > { %935 = vmatprep.subr.bf16.mxu0 %v11553_v30  ;;  %5437 = vmatprep.subr.bf16.mxu1 %v11553_v30  ;;  %v11657_v30 = vld [vmem:[%s14074_s1 + $0x4a4] ss:$8 sps:$4 sm:$0xff]  }
  0x3f   : > { %936 = vmatpush1.bf16.msra.mxu0 %v11555_v31  ;;  %5438 = vmatpush1.bf16.msra.mxu1 %v11555_v31  ;;  %v11653_v31 = vld [vmem:[%s12520_s17 + $0x58] ss:$20 sps:$4 sm:$0xff]  }
  0x40   : > { %937 = vmatprep.subr.bf16.mxu0 %v11556_v32  ;;  %5439 = vmatprep.subr.bf16.mxu1 %v11556_v32  ;;  %v11654_v32 = vld [vmem:[%s12520_s17 + $0x120] ss:$20 sps:$4 sm:$0xff]  }
  0x43   : > { %938 = vmatpush1.bf16.msra.mxu0 %v11558_v33  ;;  %5440 = vmatpush1.bf16.msra.mxu1 %v11558_v33  ;;  %v11655_v33 = vld [vmem:[%s14074_s1 + $0x4a0] ss:$8 sps:$4 sm:$0xff]  }
  0x44   : > { %990 = vmatprep.subr.bf16.mxu0 %v11564_v34  ;;  %5492 = vmatprep.subr.bf16.mxu1 %v11564_v34  ;;  %v11658_v34 = vld [vmem:[%s12520_s17 + $0x84] ss:$20 sps:$4 sm:$0xff]  }
  0x46   : > { %940 = vmatmul.mubr.bf16.vlgmr.msra.gmra.mrb[0].mxu0 %v11559_v35  ;;  %5442 = vmatmul.mubr.bf16.vlgmr.msra.gmra.mrb[0].mxu1 %v11565_v36  ;;  %v11662_v35 = vld [vmem:[%s14074_s1 + $0x4b4] ss:$8 sps:$4 sm:$0xff]   ;;  %v11663_v36 = vld [vmem:[%s12520_s17 + $0x14c] ss:$20 sps:$4 sm:$0xff]  }
  0x47   : > { %991 = vmatpush1.bf16.msra.mxu0 %v11562_v37  ;;  %5493 = vmatpush1.bf16.msra.mxu1 %v11562_v37  ;;  %v11660_v37 = vld [vmem:[%s14074_s1 + $0x4b0] ss:$8 sps:$4 sm:$0xff]  }
  0x48   : > { %992 = vmatprep.subr.bf16.mxu0 %v11570_v38  ;;  %5494 = vmatprep.subr.bf16.mxu1 %v11570_v38  ;;  %v11669_v38 = vld [vmem:[%s14074_s1 + $0x4c4] ss:$8 sps:$4 sm:$0xff]  }
  0x49   : > { %949 = vmatprep.mubr.bf16.mxu0 %v11589_v39  ;;  %5451 = vmatprep.mubr.bf16.mxu1 %v11591_v40  ;;  %v11665_v39 = vld [vmem:[%s12520_s17 + $0x80] ss:$20 sps:$4 sm:$0xff]   ;;  %v11666_v40 = vld [vmem:[%s12520_s17 + $0x148] ss:$20 sps:$4 sm:$0xff]  }
  0x4b   : > { %993 = vmatpush1.bf16.msra.mxu0 %v11568_v41  ;;  %5495 = vmatpush1.bf16.msra.mxu1 %v11568_v41  ;;  %v11667_v41 = vld [vmem:[%s14074_s1 + $0x4c0] ss:$8 sps:$4 sm:$0xff]  }
  0x4c   : > { %994 = vmatprep.subr.bf16.mxu0 %v11573_v42  ;;  %5496 = vmatprep.subr.bf16.mxu1 %v11573_v42  ;;  %v11670_v42 = vld [vmem:[%s12520_s17 + $0xac] ss:$20 sps:$4 sm:$0xff]  }
  0x4e   : > { %950 = vmatmul.mubr.bf16.gmra.mrb[4].mxu0 %v11593_v43  ;;  %5452 = vmatmul.mubr.bf16.gmra.mrb[4].mxu1 %v11597_v44  ;;  %v11672_v43 = vld [vmem:[%s12520_s17 + $0x174] ss:$20 sps:$4 sm:$0xff]  }
  0x4f   : > { %995 = vmatpush1.bf16.msra.mxu0 %v11571_v45  ;;  %5497 = vmatpush1.bf16.msra.mxu1 %v11571_v45  ;;  %v11678_v44 = vld [vmem:[%s14074_s1 + $0x4d4] ss:$8 sps:$4 sm:$0xff]   ;;  %v11676_v45 = vld [vmem:[%s14074_s1 + $0x4d0] ss:$8 sps:$4 sm:$0xff]  }
  0x50   : > { %996 = vmatprep.subr.bf16.mxu0 %v11576_v46  ;;  %5498 = vmatprep.subr.bf16.mxu1 %v11576_v46  ;;  %v11681_v46 = vld [vmem:[%s14074_s1 + $0x4e4] ss:$8 sps:$4 sm:$0xff]  }
  0x51   : > { %959 = vmatprep.mubr.bf16.mxu0 %v11601_v47  ;;  %5461 = vmatprep.mubr.bf16.mxu1 %v11603_v48  ;;  %v11674_v47 = vld [vmem:[%s12520_s17 + $0xa8] ss:$20 sps:$4 sm:$0xff]   ;;  %v11675_v48 = vld [vmem:[%s12520_s17 + $0x170] ss:$20 sps:$4 sm:$0xff]  }
  0x53   : > { %997 = vmatpush1.bf16.msra.mxu0 %v11574_v49  ;;  %5499 = vmatpush1.bf16.msra.mxu1 %v11574_v49  ;;  %v11679_v49 = vld [vmem:[%s14074_s1 + $0x4e0] ss:$8 sps:$4 sm:$0xff]  }
  0x54   : > { %998 = vmatprep.subr.bf16.mxu0 %v11579_v50  ;;  %5500 = vmatprep.subr.bf16.mxu1 %v11579_v50  ;;  %v11682_v50 = vld [vmem:[%s12520_s17 + $0xd4] ss:$20 sps:$4 sm:$0xff]  }
  0x56   : > { %960 = vmatmul.mubr.bf16.gmra.mrb[8].mxu0 %v11605_v51  ;;  %5462 = vmatmul.mubr.bf16.gmra.mrb[8].mxu1 %v11609_v52  ;;  %v11684_v51 = vld [vmem:[%s12520_s17 + $0x19c] ss:$20 sps:$4 sm:$0xff]  }
  0x57   : > { %999 = vmatpush1.bf16.msra.mxu0 %v11577_v53  ;;  %5501 = vmatpush1.bf16.msra.mxu1 %v11577_v53  ;;  %v11690_v52 = vld [vmem:[%s14074_s1 + $0x4f4] ss:$8 sps:$4 sm:$0xff]   ;;  %v11688_v53 = vld [vmem:[%s14074_s1 + $0x4f0] ss:$8 sps:$4 sm:$0xff]  }
  0x58   : > { %1000 = vmatprep.subr.bf16.mxu0 %v11582_v54  ;;  %5502 = vmatprep.subr.bf16.mxu1 %v11582_v54  ;;  %v11693_v54 = vld [vmem:[%s14074_s1 + $0x4] ss:$8 sps:$4 sm:$0xff]  }
  0x59   : > { %969 = vmatprep.mubr.bf16.mxu0 %v11613_v55  ;;  %5471 = vmatprep.mubr.bf16.mxu1 %v11615_v56  ;;  %v11686_v55 = vld [vmem:[%s12520_s17 + $0xd0] ss:$20 sps:$4 sm:$0xff]   ;;  %v11687_v56 = vld [vmem:[%s12520_s17 + $0x198] ss:$20 sps:$4 sm:$0xff]  }
  0x5b   : > { %1001 = vmatpush1.bf16.msra.mxu0 %v11580_v57  ;;  %5503 = vmatpush1.bf16.msra.mxu1 %v11580_v57  ;;  %v12450_v57 = vmov 0  }
  0x5c   : > { %1002 = vmatprep.subr.bf16.mxu0 %v11585_v58  ;;  %5504 = vmatprep.subr.bf16.mxu1 %v11585_v58  ;;  %v11694_v58 = vld [vmem:[%s12520_s17 + $0x38] ss:$20 sps:$4 sm:$0xff]  }
  0x5e   : > { %970 = vmatmul.mubr.bf16.gmra.mrb[12].mxu0 %v11617_v59  ;;  %5472 = vmatmul.mubr.bf16.gmra.mrb[12].mxu1 %v11621_v60  ;;  %v11695_v59 = vld [vmem:[%s12520_s17 + $0x100] ss:$20 sps:$4 sm:$0xff]  }
  0x5f   : > { %1003 = vmatpush1.bf16.msra.mxu0 %v11583_v61  ;;  %5505 = vmatpush1.bf16.msra.mxu1 %v11583_v61  ;;  %v11691_v60 = vld [vmem:[%s14074_s1] ss:$8 sps:$4 sm:$0xff]   ;;  %v11698_v61 = vld [vmem:[%s14074_s1 + $0x14] ss:$8 sps:$4 sm:$0xff]  }
  0x60   : > { %1004 = vmatprep.subr.bf16.mxu0 %v11588_v62  ;;  %5506 = vmatprep.subr.bf16.mxu1 %v11588_v62  ;;  %v11696_v62 = vld [vmem:[%s14074_s1 + $0x10] ss:$8 sps:$4 sm:$0xff]  }
  0x61   : > { %979 = vmatprep.mubr.bf16.mxu0 %v12644_v63  ;;  %5481 = vmatprep.mubr.bf16.mxu1 %v11627_v0  ;;  %v11701_v0 = vld [vmem:[%s14074_s1 + $0x24] ss:$8 sps:$4 sm:$0xff]  }
  0x63   : > { %1005 = vmatpush1.bf16.msra.mxu0 %v11586_v1  ;;  %5507 = vmatpush1.bf16.msra.mxu1 %v11586_v1  ;;  %v11720_v1 = vld [vmem:[%s12520_s17 + $0x60] ss:$20 sps:$4 sm:$0xff]  }
  0x64   : > { %1006 = vmatprep.subr.bf16.mxu0 %v11596_v2  ;;  %5508 = vmatprep.subr.bf16.mxu1 %v11596_v2  ;;  %v11721_v2 = vld [vmem:[%s12520_s17 + $0x128] ss:$20 sps:$4 sm:$0xff]  }
  0x66   : > { %980 = vmatmul.mubr.bf16.gmra.mrb[16].mxu0 %v11629_v4  ;;  %5482 = vmatmul.mubr.bf16.gmra.mrb[16].mxu1 %v11633_v5  ;;  %v11704_v4 = vld [vmem:[%s14074_s1 + $0x34] ss:$8 sps:$4 sm:$0xff]   ;;  %v11702_v5 = vld [vmem:[%s14074_s1 + $0x30] ss:$8 sps:$4 sm:$0xff]  }
  0x67   : > { %1007 = vmatpush1.bf16.msra.mxu0 %v11594_v3  ;;  %5509 = vmatpush1.bf16.msra.mxu1 %v11594_v3  ;;  %v11699_v3 = vld [vmem:[%s14074_s1 + $0x20] ss:$8 sps:$4 sm:$0xff]  }
  0x68   : > { %1008 = vmatprep.subr.bf16.mxu0 %v11600_v6  ;;  %5510 = vmatprep.subr.bf16.mxu1 %v11600_v6  ;;  %v11707_v6 = vld [vmem:[%s14074_s1 + $0x44] ss:$8 sps:$4 sm:$0xff]  }
  0x69   : > { %1022 = vmatprep.mubr.bf16.mxu0 %v11639_v7  ;;  %5524 = vmatprep.mubr.bf16.mxu1 %v11642_v8  ;;  %v11728_v7 = vld [vmem:[%s12520_s17 + $0x88] ss:$20 sps:$4 sm:$0xff]   ;;  %v11729_v8 = vld [vmem:[%s12520_s17 + $0x150] ss:$20 sps:$4 sm:$0xff]  }
  0x6b   : > { %1009 = vmatpush1.bf16.msra.mxu0 %v11598_v9  ;;  %5511 = vmatpush1.bf16.msra.mxu1 %v11598_v9  ;;  %v11705_v9 = vld [vmem:[%s14074_s1 + $0x40] ss:$8 sps:$4 sm:$0xff]  }
  0x6c   : > { %1010 = vmatprep.subr.bf16.mxu0 %v11608_v10  ;;  %5512 = vmatprep.subr.bf16.mxu1 %v11608_v10  ;;  %v11710_v10 = vld [vmem:[%s14074_s1 + $0x54] ss:$8 sps:$4 sm:$0xff]  }
  0x6f   : > { %1011 = vmatpush1.bf16.msra.mxu0 %v11606_v11  ;;  %5513 = vmatpush1.bf16.msra.mxu1 %v11606_v11  ;;  %v11708_v11 = vld [vmem:[%s14074_s1 + $0x50] ss:$8 sps:$4 sm:$0xff]  }
  0x70   : > { %1012 = vmatprep.subr.bf16.mxu0 %v11612_v12  ;;  %5514 = vmatprep.subr.bf16.mxu1 %v11612_v12  ;;  %v11713_v12 = vld [vmem:[%s14074_s1 + $0x64] ss:$8 sps:$4 sm:$0xff]  }
  0x73   : > { %1013 = vmatpush1.bf16.msra.mxu0 %v11610_v13  ;;  %5515 = vmatpush1.bf16.msra.mxu1 %v11610_v13  ;;  %v11736_v13 = vld [vmem:[%s12520_s17 + $0xb0] ss:$20 sps:$4 sm:$0xff]  }
  0x74   : > { %1014 = vmatprep.subr.bf16.mxu0 %v11620_v14  ;;  %5516 = vmatprep.subr.bf16.mxu1 %v11620_v14  ;;  %v11737_v14 = vld [vmem:[%s12520_s17 + $0x178] ss:$20 sps:$4 sm:$0xff]  }
  0x77   : > { %1015 = vmatpush1.bf16.msra.mxu0 %v11618_v15  ;;  %5517 = vmatpush1.bf16.msra.mxu1 %v11618_v15  ;;  %v11711_v15 = vld [vmem:[%s14074_s1 + $0x60] ss:$8 sps:$4 sm:$0xff]  }
  0x78   : > { %1016 = vmatprep.subr.bf16.mxu0 %v11624_v16  ;;  %5518 = vmatprep.subr.bf16.mxu1 %v11624_v16  ;;  %v11716_v16 = vld [vmem:[%s14074_s1 + $0x74] ss:$8 sps:$4 sm:$0xff]  }
  0x7b   : > { %1017 = vmatpush1.bf16.msra.mxu0 %v11622_v17  ;;  %5519 = vmatpush1.bf16.msra.mxu1 %v11622_v17  ;;  %v11714_v17 = vld [vmem:[%s14074_s1 + $0x70] ss:$8 sps:$4 sm:$0xff]  }
  0x7c   : > { %1018 = vmatprep.subr.bf16.mxu0 %v11632_v18  ;;  %5520 = vmatprep.subr.bf16.mxu1 %v11632_v18  ;;  %v11719_v18 = vld [vmem:[%s14074_s1 + $0x84] ss:$8 sps:$4 sm:$0xff]  }
  0x7f   : > { %1019 = vmatpush1.bf16.msra.mxu0 %v11630_v19  ;;  %5521 = vmatpush1.bf16.msra.mxu1 %v11630_v19  ;;  %v11744_v19 = vld [vmem:[%s12520_s17 + $0xd8] ss:$20 sps:$4 sm:$0xff]  }
  0x80   : > { %1020 = vmatprep.subr.bf16.mxu0 %v11636_v20  ;;  %5522 = vmatprep.subr.bf16.mxu1 %v11636_v20  ;;  %v11745_v20 = vld [vmem:[%s12520_s17 + $0x1a0] ss:$20 sps:$4 sm:$0xff]  }
  0x83   : > { %1021 = vmatpush1.bf16.msra.mxu0 %v11634_v21  ;;  %5523 = vmatpush1.bf16.msra.mxu1 %v11634_v21  ;;  %v11717_v21 = vld [vmem:[%s14074_s1 + $0x80] ss:$8 sps:$4 sm:$0xff]  }
  0x84   : > { %1073 = vmatprep.subr.bf16.mxu0 %v11645_v22  ;;  %5575 = vmatprep.subr.bf16.mxu1 %v11645_v22  ;;  %v11724_v22 = vld [vmem:[%s14074_s1 + $0x94] ss:$8 sps:$4 sm:$0xff]  }
  0x86   : > { %1023 = vmatmul.mubr.bf16.vlgmr.msra.gmra.mrb[0].mxu0 %v11637_v23  ;;  %5525 = vmatmul.mubr.bf16.vlgmr.msra.gmra.mrb[0].mxu1 %v11640_v24  ;;  %v11751_v23 = vld [vmem:[%s12520_s17 + $0x4] ss:$20 sps:$4 sm:$0xff]  }
  0x87   : > { %1074 = vmatpush1.bf16.msra.mxu0 %v11643_v25  ;;  %5576 = vmatpush1.bf16.msra.mxu1 %v11643_v25  ;;  %v11722_v24 = vld [vmem:[%s14074_s1 + $0x90] ss:$8 sps:$4 sm:$0xff]   ;;  %v11727_v25 = vld [vmem:[%s14074_s1 + $0xa4] ss:$8 sps:$4 sm:$0xff]  }
  0x88   : > { %1075 = vmatprep.subr.bf16.mxu0 %v11648_v26  ;;  %5577 = vmatprep.subr.bf16.mxu1 %v11648_v26  ;;  %v11725_v26 = vld [vmem:[%s14074_s1 + $0xa0] ss:$8 sps:$4 sm:$0xff]  }
  0x89   : > { %1032 = vmatprep.mubr.bf16.mxu0 %v11649_v27  ;;  %5534 = vmatprep.mubr.bf16.mxu1 %v11651_v28  ;;  %v11732_v27 = vld [vmem:[%s14074_s1 + $0xb4] ss:$8 sps:$4 sm:$0xff]   ;;  %v11730_v28 = vld [vmem:[%s14074_s1 + $0xb0] ss:$8 sps:$4 sm:$0xff]  }
  0x8b   : > { %1076 = vmatpush1.bf16.msra.mxu0 %v11646_v29  ;;  %5578 = vmatpush1.bf16.msra.mxu1 %v11646_v29  ;;  %v11735_v29 = vld [vmem:[%s14074_s1 + $0xc4] ss:$8 sps:$4 sm:$0xff]  }
  0x8c   : > { %1077 = vmatprep.subr.bf16.mxu0 %v11657_v30  ;;  %5579 = vmatprep.subr.bf16.mxu1 %v11657_v30  ;;  %v11740_v30 = vld [vmem:[%s14074_s1 + $0xd4] ss:$8 sps:$4 sm:$0xff]  }
  0x8e   : > { %1033 = vmatmul.mubr.bf16.gmra.mrb[4].mxu0 %v11653_v31  ;;  %5535 = vmatmul.mubr.bf16.gmra.mrb[4].mxu1 %v11654_v32  ;;  %v11738_v31 = vld [vmem:[%s14074_s1 + $0xd0] ss:$8 sps:$4 sm:$0xff]   ;;  %v11743_v32 = vld [vmem:[%s14074_s1 + $0xe4] ss:$8 sps:$4 sm:$0xff]  }
  0x8f   : > { %1078 = vmatpush1.bf16.msra.mxu0 %v11655_v33  ;;  %5580 = vmatpush1.bf16.msra.mxu1 %v11655_v33  ;;  %v11741_v33 = vld [vmem:[%s14074_s1 + $0xe0] ss:$8 sps:$4 sm:$0xff]  }
  0x90   : > { %1042 = vmatprep.mubr.bf16.mxu0 %v11658_v34  ;;  %1079 = vmatprep.subr.bf16.mxu0 %v11662_v35  ;;  %v11748_v34 = vld [vmem:[%s14074_s1 + $0xf4] ss:$8 sps:$4 sm:$0xff]  }
  0x91   : > { %5544 = vmatprep.mubr.bf16.mxu1 %v11663_v36  ;;  %5581 = vmatprep.subr.bf16.mxu1 %v11662_v35  ;;  %v11746_v35 = vld [vmem:[%s14074_s1 + $0xf0] ss:$8 sps:$4 sm:$0xff]   ;;  %v11754_v36 = vld [vmem:[%s14074_s1 + $0x104] ss:$8 sps:$4 sm:$0xff]  }
  0x93   : > { %1080 = vmatpush1.bf16.msra.mxu0 %v11660_v37  ;;  %5582 = vmatpush1.bf16.msra.mxu1 %v11660_v37  ;;  %v11749_v37 = vld [vmem:[%s12520_s17] ss:$20 sps:$4 sm:$0xff]  }
  0x94   : > { %1081 = vmatprep.subr.bf16.mxu0 %v11669_v38  ;;  %5583 = vmatprep.subr.bf16.mxu1 %v11669_v38  ;;  %v11752_v38 = vld [vmem:[%s14074_s1 + $0x100] ss:$8 sps:$4 sm:$0xff]  }
  0x96   : > { %1043 = vmatmul.mubr.bf16.gmra.mrb[8].mxu0 %v11665_v39  ;;  %5545 = vmatmul.mubr.bf16.gmra.mrb[8].mxu1 %v11666_v40  ;;  %v11757_v39 = vld [vmem:[%s14074_s1 + $0x114] ss:$8 sps:$4 sm:$0xff]  }
  0x97   : > { %1082 = vmatpush1.bf16.msra.mxu0 %v11667_v41  ;;  %5584 = vmatpush1.bf16.msra.mxu1 %v11667_v41  ;;  %v12399_v40 = vld [vmem:[%s12520_s17 + $0xc8] ss:$20 sps:$4 sm:$0xff]   ;;  %v11755_v41 = vld [vmem:[%s14074_s1 + $0x110] ss:$8 sps:$4 sm:$0xff]  }
  0x98   : > { %1052 = vmatprep.mubr.bf16.mxu0 %v11670_v42  ;;  %5554 = vmatprep.mubr.bf16.mxu1 %v11672_v43  ;;  %v11760_v42 = vld [vmem:[%s14074_s1 + $0x124] ss:$8 sps:$4 sm:$0xff]  }
  0x99   : > { %1083 = vmatprep.subr.bf16.mxu0 %v11678_v44  ;;  %5585 = vmatprep.subr.bf16.mxu1 %v11678_v44  ;;  %v12400_v43 = vld [vmem:[%s12520_s17 + $0x2c] ss:$20 sps:$4 sm:$0xff]   ;;  %v12401_v44 = vld [vmem:[%s12520_s17 + $0xf4] ss:$20 sps:$4 sm:$0xff]  }
  0x9b   : > { %1084 = vmatpush1.bf16.msra.mxu0 %v11676_v45  ;;  %5586 = vmatpush1.bf16.msra.mxu1 %v11676_v45  ;;  %v11758_v45 = vld [vmem:[%s14074_s1 + $0x120] ss:$8 sps:$4 sm:$0xff]  }
  0x9c   : > { %1085 = vmatprep.subr.bf16.mxu0 %v11681_v46  ;;  %5587 = vmatprep.subr.bf16.mxu1 %v11681_v46  ;;  %v11763_v46 = vld [vmem:[%s14074_s1 + $0x134] ss:$8 sps:$4 sm:$0xff]  }
  0x9e   : > { %1053 = vmatmul.mubr.bf16.gmra.mrb[12].mxu0 %v11674_v47  ;;  %5555 = vmatmul.mubr.bf16.gmra.mrb[12].mxu1 %v11675_v48  ;;  %v12402_v47 = vld [vmem:[%s12520_s17 + $0x28] ss:$20 sps:$4 sm:$0xff]   ;;  %v12403_v48 = vld [vmem:[%s12520_s17 + $0xf0] ss:$20 sps:$4 sm:$0xff]  }
  0x9f   : > { %1062 = vmatprep.mubr.bf16.mxu0 %v11682_v50  ;;  %1086 = vmatpush1.bf16.msra.mxu0 %v11679_v49  ;;  %v11766_v50 = vld [vmem:[%s14074_s1 + $0x144] ss:$8 sps:$4 sm:$0xff]  }
  0xa0   : > { %5564 = vmatprep.mubr.bf16.mxu1 %v11684_v51  ;;  %5588 = vmatpush1.bf16.msra.mxu1 %v11679_v49  ;;  %v11761_v49 = vld [vmem:[%s14074_s1 + $0x130] ss:$8 sps:$4 sm:$0xff]   ;;  %v12404_v51 = vld [vmem:[%s12520_s17 + $0x54] ss:$20 sps:$4 sm:$0xff]  }
  0xa1   : > { %1087 = vmatprep.subr.bf16.mxu0 %v11690_v52  ;;  %5589 = vmatprep.subr.bf16.mxu1 %v11690_v52  ;;  %v12405_v52 = vld [vmem:[%s12520_s17 + $0x11c] ss:$20 sps:$4 sm:$0xff]  }
  0xa3   : > { %1088 = vmatpush1.bf16.msra.mxu0 %v11688_v53 }
  0xa4   : > { %5590 = vmatpush1.bf16.msra.mxu1 %v11688_v53  ;;  %1582 = vmatprep.subr.bf16.mxu0 %v11693_v54  ;;  %v11764_v53 = vld [vmem:[%s14074_s1 + $0x140] ss:$8 sps:$4 sm:$0xff]  }
  0xa5   : > { %6084 = vmatprep.subr.bf16.mxu1 %v11693_v54  ;;  %v11769_v54 = vld [vmem:[%s14074_s1 + $0x154] ss:$8 sps:$4 sm:$0xff]  }
  0xa6   : > { %1063 = vmatmul.mubr.bf16.gmra.mrb[16].mxu0 %v11686_v55  ;;  %5565 = vmatmul.mubr.bf16.gmra.mrb[16].mxu1 %v11687_v56  ;;  %v12406_v55 = vld [vmem:[%s12520_s17 + $0x50] ss:$20 sps:$4 sm:$0xff]   ;;  %v12407_v56 = vld [vmem:[%s12520_s17 + $0x118] ss:$20 sps:$4 sm:$0xff]  }
  0xa7   : > { %1105 = vmatprep.mubr.bf16.mxu0 %v12450_v57  ;;  %5607 = vmatprep.mubr.bf16.mxu1 %v12450_v57 }
  0xae   : > { %1106 = vmatmul.mubr.bf16.vlgmr.msra.gmra.mrb[0].mxu0 %v11694_v58  ;;  %5608 = vmatmul.mubr.bf16.vlgmr.msra.gmra.mrb[0].mxu1 %v11695_v59  ;;  %v11767_v58 = vld [vmem:[%s14074_s1 + $0x150] ss:$8 sps:$4 sm:$0xff]   ;;  %v11772_v59 = vld [vmem:[%s14074_s1 + $0x164] ss:$8 sps:$4 sm:$0xff]  }
  0xaf   : > { %1583 = vmatpush1.bf16.msra.mxu0 %v11691_v60  ;;  %6085 = vmatpush1.bf16.msra.mxu1 %v11691_v60  ;;  %v12408_v60 = vld [vmem:[%s12520_s17 + $0x7c] ss:$20 sps:$4 sm:$0xff]  }
  0xb0   : > { %1584 = vmatprep.subr.bf16.mxu0 %v11698_v61  ;;  %6086 = vmatprep.subr.bf16.mxu1 %v11698_v61  ;;  %v12409_v61 = vld [vmem:[%s12520_s17 + $0x144] ss:$20 sps:$4 sm:$0xff]  }
  0xb1   : > { %1115 = vmatprep.mubr.bf16.mxu0 %v12450_v57  ;;  %5617 = vmatprep.mubr.bf16.mxu1 %v12450_v57 }
  0xb3   : > { %1585 = vmatpush1.bf16.msra.mxu0 %v11696_v62  ;;  %6087 = vmatpush1.bf16.msra.mxu1 %v11696_v62  ;;  %v11770_v62 = vld [vmem:[%s14074_s1 + $0x160] ss:$8 sps:$4 sm:$0xff]  }
  0xb4   : > { %1586 = vmatprep.subr.bf16.mxu0 %v11701_v0  ;;  %6088 = vmatprep.subr.bf16.mxu1 %v11701_v0  ;;  %v11775_v0 = vld [vmem:[%s14074_s1 + $0x174] ss:$8 sps:$4 sm:$0xff]  }
  0xb6   : > { %1116 = vmatmul.mubr.bf16.gmra.mrb[4].mxu0 %v11720_v1  ;;  %5618 = vmatmul.mubr.bf16.gmra.mrb[4].mxu1 %v11721_v2  ;;  %v12410_v1 = vld [vmem:[%s12520_s17 + $0x78] ss:$20 sps:$4 sm:$0xff]   ;;  %v12411_v2 = vld [vmem:[%s12520_s17 + $0x140] ss:$20 sps:$4 sm:$0xff]  }
  0xb7   : > { %1587 = vmatpush1.bf16.msra.mxu0 %v11699_v3  ;;  %6089 = vmatpush1.bf16.msra.mxu1 %v11699_v3  ;;  %v11773_v3 = vld [vmem:[%s14074_s1 + $0x170] ss:$8 sps:$4 sm:$0xff]  }
  0xb8   : > { %1588 = vmatprep.subr.bf16.mxu0 %v11704_v4  ;;  %6090 = vmatprep.subr.bf16.mxu1 %v11704_v4  ;;  %v11778_v4 = vld [vmem:[%s14074_s1 + $0x184] ss:$8 sps:$4 sm:$0xff]  }
  0xb9   : > { %1125 = vmatprep.mubr.bf16.mxu0 %v12450_v57  ;;  %5627 = vmatprep.mubr.bf16.mxu1 %v12450_v57 }
  0xbb   : > { %1589 = vmatpush1.bf16.msra.mxu0 %v11702_v5  ;;  %6091 = vmatpush1.bf16.msra.mxu1 %v11702_v5  ;;  %v11776_v5 = vld [vmem:[%s14074_s1 + $0x180] ss:$8 sps:$4 sm:$0xff]  }
  0xbc   : > { %1590 = vmatprep.subr.bf16.mxu0 %v11707_v6  ;;  %6092 = vmatprep.subr.bf16.mxu1 %v11707_v6  ;;  %v12412_v6 = vld [vmem:[%s12520_s17 + $0xa4] ss:$20 sps:$4 sm:$0xff]  }
  0xbe   : > { %1126 = vmatmul.mubr.bf16.gmra.mrb[8].mxu0 %v11728_v7  ;;  %5628 = vmatmul.mubr.bf16.gmra.mrb[8].mxu1 %v11729_v8  ;;  %v12413_v7 = vld [vmem:[%s12520_s17 + $0x16c] ss:$20 sps:$4 sm:$0xff]   ;;  %v11781_v8 = vld [vmem:[%s14074_s1 + $0x194] ss:$8 sps:$4 sm:$0xff]  }
  0xbf   : > { %1591 = vmatpush1.bf16.msra.mxu0 %v11705_v9  ;;  %6093 = vmatpush1.bf16.msra.mxu1 %v11705_v9  ;;  %v11802_v9 = vld [vmem:[%s12520_s17 + $0xc] ss:$20 sps:$4 sm:$0xff]  }
  0xc0   : > { %1592 = vmatprep.subr.bf16.mxu0 %v11710_v10  ;;  %6094 = vmatprep.subr.bf16.mxu1 %v11710_v10  ;;  %v12414_v10 = vld [vmem:[%s12520_s17 + $0xa0] ss:$20 sps:$4 sm:$0xff]  }
  0xc1   : > { %1135 = vmatprep.mubr.bf16.mxu0 %v12450_v57  ;;  %5637 = vmatprep.mubr.bf16.mxu1 %v12450_v57 }
  0xc3   : > { %1593 = vmatpush1.bf16.msra.mxu0 %v11708_v11  ;;  %6095 = vmatpush1.bf16.msra.mxu1 %v11708_v11  ;;  %v12415_v11 = vld [vmem:[%s12520_s17 + $0x168] ss:$20 sps:$4 sm:$0xff]  }
  0xc4   : > { %1594 = vmatprep.subr.bf16.mxu0 %v11713_v12  ;;  %6096 = vmatprep.subr.bf16.mxu1 %v11713_v12  ;;  %v11779_v12 = vld [vmem:[%s14074_s1 + $0x190] ss:$8 sps:$4 sm:$0xff]  }
  0xc6   : > { %1136 = vmatmul.mubr.bf16.gmra.mrb[12].mxu0 %v11736_v13  ;;  %5638 = vmatmul.mubr.bf16.gmra.mrb[12].mxu1 %v11737_v14  ;;  %v11784_v13 = vld [vmem:[%s14074_s1 + $0x1a4] ss:$8 sps:$4 sm:$0xff]   ;;  %v12416_v14 = vld [vmem:[%s12520_s17 + $0xd4] ss:$20 sps:$4 sm:$0xff]  }
  0xc7   : > { %1595 = vmatpush1.bf16.msra.mxu0 %v11711_v15  ;;  %6097 = vmatpush1.bf16.msra.mxu1 %v11711_v15  ;;  %v11782_v15 = vld [vmem:[%s14074_s1 + $0x1a0] ss:$8 sps:$4 sm:$0xff]  }
  0xc8   : > { %1596 = vmatprep.subr.bf16.mxu0 %v11716_v16  ;;  %6098 = vmatprep.subr.bf16.mxu1 %v11716_v16  ;;  %v11787_v16 = vld [vmem:[%s14074_s1 + $0x1b4] ss:$8 sps:$4 sm:$0xff]  }
  0xc9   : > { %1145 = vmatprep.mubr.bf16.mxu0 %v12450_v57  ;;  %5647 = vmatprep.mubr.bf16.mxu1 %v12450_v57 }
  0xcb   : > { %1597 = vmatpush1.bf16.msra.mxu0 %v11714_v17  ;;  %6099 = vmatpush1.bf16.msra.mxu1 %v11714_v17  ;;  %v11785_v17 = vld [vmem:[%s14074_s1 + $0x1b0] ss:$8 sps:$4 sm:$0xff]  }
  0xcc   : > { %1598 = vmatprep.subr.bf16.mxu0 %v11719_v18  ;;  %6100 = vmatprep.subr.bf16.mxu1 %v11719_v18  ;;  %v11790_v18 = vld [vmem:[%s14074_s1 + $0x1c4] ss:$8 sps:$4 sm:$0xff]  }
  0xce   : > { %1146 = vmatmul.mubr.bf16.gmra.mrb[16].mxu0 %v11744_v19  ;;  %5648 = vmatmul.mubr.bf16.gmra.mrb[16].mxu1 %v11745_v20  ;;  %v11788_v19 = vld [vmem:[%s14074_s1 + $0x1c0] ss:$8 sps:$4 sm:$0xff]   ;;  %v11793_v20 = vld [vmem:[%s14074_s1 + $0x1d4] ss:$8 sps:$4 sm:$0xff]  }
  0xcf   : > { %1599 = vmatpush1.bf16.msra.mxu0 %v11717_v21  ;;  %6101 = vmatpush1.bf16.msra.mxu1 %v11717_v21  ;;  %v11791_v21 = vld [vmem:[%s14074_s1 + $0x1d0] ss:$8 sps:$4 sm:$0xff]  }
  0xd0   : > { %1600 = vmatprep.subr.bf16.mxu0 %v11724_v22  ;;  %6102 = vmatprep.subr.bf16.mxu1 %v11724_v22  ;;  %v11796_v22 = vld [vmem:[%s14074_s1 + $0x1e4] ss:$8 sps:$4 sm:$0xff]  }
  0xd1   : > { %1614 = vmatprep.mubr.bf16.mxu0 %v11751_v23  ;;  %6116 = vmatprep.mubr.bf16.mxu1 %v12644_v63  ;;  %v11733_v63 = vld [vmem:[%s14074_s1 + $0xc0] ss:$8 sps:$4 sm:$0xff]  }
  0xd2   : > { %v11794_v23 = vld [vmem:[%s14074_s1 + $0x1e0] ss:$8 sps:$4 sm:$0xff]  }
  0xd3   : > { %1601 = vmatpush1.bf16.msra.mxu0 %v11722_v24  ;;  %6103 = vmatpush1.bf16.msra.mxu1 %v11722_v24  ;;  %v11799_v24 = vld [vmem:[%s14074_s1 + $0x1f4] ss:$8 sps:$4 sm:$0xff]  }
  0xd4   : > { %1602 = vmatprep.subr.bf16.mxu0 %v11727_v25  ;;  %6104 = vmatprep.subr.bf16.mxu1 %v11727_v25  ;;  %v11797_v25 = vld [vmem:[%s14074_s1 + $0x1f0] ss:$8 sps:$4 sm:$0xff]  }
  0xd7   : > { %1603 = vmatpush1.bf16.msra.mxu0 %v11725_v26  ;;  %6105 = vmatpush1.bf16.msra.mxu1 %v11725_v26  ;;  %v11805_v26 = vld [vmem:[%s14074_s1 + $0x204] ss:$8 sps:$4 sm:$0xff]  }
  0xd8   : > { %1604 = vmatprep.subr.bf16.mxu0 %v11732_v27  ;;  %6106 = vmatprep.subr.bf16.mxu1 %v11732_v27  ;;  %v11800_v27 = vld [vmem:[%s12520_s17 + $0x8] ss:$20 sps:$4 sm:$0xff]  }
  0xdb   : > { %1605 = vmatpush1.bf16.msra.mxu0 %v11730_v28  ;;  %6107 = vmatpush1.bf16.msra.mxu1 %v11730_v28  ;;  %v11803_v28 = vld [vmem:[%s14074_s1 + $0x200] ss:$8 sps:$4 sm:$0xff]  }
  0xdc   : > { %1606 = vmatprep.subr.bf16.mxu0 %v11735_v29  ;;  %6108 = vmatprep.subr.bf16.mxu1 %v11735_v29  ;;  %v11808_v29 = vld [vmem:[%s14074_s1 + $0x214] ss:$8 sps:$4 sm:$0xff]  }
  0xdf   : > { %1607 = vmatpush1.bf16.msra.mxu0 %v11733_v63  ;;  %6109 = vmatpush1.bf16.msra.mxu1 %v11733_v63  ;;  %v12417_v63 = vld [vmem:[%s12520_s17 + $0xd0] ss:$20 sps:$4 sm:$0xff]  }
  0xe0   : > { %1608 = vmatprep.subr.bf16.mxu0 %v11740_v30  ;;  %6110 = vmatprep.subr.bf16.mxu1 %v11740_v30  ;;  %v11806_v30 = vld [vmem:[%s14074_s1 + $0x210] ss:$8 sps:$4 sm:$0xff]  }
  0xe3   : > { %1609 = vmatpush1.bf16.msra.mxu0 %v11738_v31  ;;  %6111 = vmatpush1.bf16.msra.mxu1 %v11738_v31  ;;  %v11811_v31 = vld [vmem:[%s14074_s1 + $0x224] ss:$8 sps:$4 sm:$0xff]  }
  0xe4   : > { %1610 = vmatprep.subr.bf16.mxu0 %v11743_v32  ;;  %6112 = vmatprep.subr.bf16.mxu1 %v11743_v32  ;;  %v12418_v32 = vld [vmem:[%s12520_s17 + $0x34] ss:$20 sps:$4 sm:$0xff]  }
  0xe7   : > { %1611 = vmatpush1.bf16.msra.mxu0 %v11741_v33  ;;  %6113 = vmatpush1.bf16.msra.mxu1 %v11741_v33  ;;  %v12419_v33 = vld [vmem:[%s12520_s17 + $0xfc] ss:$20 sps:$4 sm:$0xff]  }
  0xe8   : > { %1612 = vmatprep.subr.bf16.mxu0 %v11748_v34  ;;  %6114 = vmatprep.subr.bf16.mxu1 %v11748_v34  ;;  %v11809_v34 = vld [vmem:[%s14074_s1 + $0x220] ss:$8 sps:$4 sm:$0xff]  }
  0xeb   : > { %1613 = vmatpush1.bf16.msra.mxu0 %v11746_v35  ;;  %6115 = vmatpush1.bf16.msra.mxu1 %v11746_v35  ;;  %v11814_v35 = vld [vmem:[%s14074_s1 + $0x234] ss:$8 sps:$4 sm:$0xff]  }
  0xec   : > { %1665 = vmatprep.subr.bf16.mxu0 %v11754_v36  ;;  %6167 = vmatprep.subr.bf16.mxu1 %v11754_v36  ;;  %v12420_v36 = vld [vmem:[%s12520_s17 + $0x30] ss:$20 sps:$4 sm:$0xff]  }
  0xee   : > { %1615 = vmatmul.mubr.bf16.vlgmr.msra.gmra.mrb[0].mxu0 %v11749_v37  ;;  %6117 = vmatmul.mubr.bf16.vlgmr.msra.gmra.mrb[0].mxu1 %v12399_v40  ;;  %v12421_v37 = vld [vmem:[%s12520_s17 + $0xf8] ss:$20 sps:$4 sm:$0xff]  }
  0xef   : > { %1666 = vmatpush1.bf16.msra.mxu0 %v11752_v38  ;;  %6168 = vmatpush1.bf16.msra.mxu1 %v11752_v38  ;;  %v11812_v38 = vld [vmem:[%s14074_s1 + $0x230] ss:$8 sps:$4 sm:$0xff]   ;;  %v11817_v40 = vld [vmem:[%s14074_s1 + $0x244] ss:$8 sps:$4 sm:$0xff]  }
  0xf0   : > { %1667 = vmatprep.subr.bf16.mxu0 %v11757_v39  ;;  %6169 = vmatprep.subr.bf16.mxu1 %v11757_v39  ;;  %v12422_v39 = vld [vmem:[%s12520_s17 + $0x5c] ss:$20 sps:$4 sm:$0xff]  }
  0xf1   : > { %1624 = vmatprep.mubr.bf16.mxu0 %v12400_v43  ;;  %6126 = vmatprep.mubr.bf16.mxu1 %v12401_v44  ;;  %v11820_v43 = vld [vmem:[%s14074_s1 + $0x254] ss:$8 sps:$4 sm:$0xff]   ;;  %v12424_v44 = vld [vmem:[%s12520_s17 + $0x58] ss:$20 sps:$4 sm:$0xff]  }
  0xf3   : > { %1668 = vmatpush1.bf16.msra.mxu0 %v11755_v41  ;;  %6170 = vmatpush1.bf16.msra.mxu1 %v11755_v41  ;;  %v12423_v41 = vld [vmem:[%s12520_s17 + $0x124] ss:$20 sps:$4 sm:$0xff]  }
  0xf4   : > { %1669 = vmatprep.subr.bf16.mxu0 %v11760_v42  ;;  %6171 = vmatprep.subr.bf16.mxu1 %v11760_v42  ;;  %v11815_v42 = vld [vmem:[%s14074_s1 + $0x240] ss:$8 sps:$4 sm:$0xff]  }
  0xf6   : > { %1625 = vmatmul.mubr.bf16.gmra.mrb[4].mxu0 %v12402_v47  ;;  %6127 = vmatmul.mubr.bf16.gmra.mrb[4].mxu1 %v12403_v48  ;;  %v12426_v47 = vld [vmem:[%s12520_s17 + $0x84] ss:$20 sps:$4 sm:$0xff]   ;;  %v12427_v48 = vld [vmem:[%s12520_s17 + $0x14c] ss:$20 sps:$4 sm:$0xff]  }
  0xf7   : > { %1670 = vmatpush1.bf16.msra.mxu0 %v11758_v45  ;;  %6172 = vmatpush1.bf16.msra.mxu1 %v11758_v45  ;;  %v12425_v45 = vld [vmem:[%s12520_s17 + $0x120] ss:$20 sps:$4 sm:$0xff]  }
  0xf8   : > { %1671 = vmatprep.subr.bf16.mxu0 %v11763_v46  ;;  %6173 = vmatprep.subr.bf16.mxu1 %v11763_v46  ;;  %v11818_v46 = vld [vmem:[%s14074_s1 + $0x250] ss:$8 sps:$4 sm:$0xff]  }
  0xf9   : > { %1634 = vmatprep.mubr.bf16.mxu0 %v12404_v51  ;;  %6136 = vmatprep.mubr.bf16.mxu1 %v12405_v52  ;;  %v11826_v51 = vld [vmem:[%s14074_s1 + $0x274] ss:$8 sps:$4 sm:$0xff]  }
  0xfa   : > { %v12428_v52 = vld [vmem:[%s12520_s17 + $0x80] ss:$20 sps:$4 sm:$0xff]  }
  0xfb   : > { %1672 = vmatpush1.bf16.msra.mxu0 %v11761_v49  ;;  %6174 = vmatpush1.bf16.msra.mxu1 %v11761_v49  ;;  %v11823_v49 = vld [vmem:[%s14074_s1 + $0x264] ss:$8 sps:$4 sm:$0xff]  }
  0xfc   : > { %1673 = vmatprep.subr.bf16.mxu0 %v11766_v50  ;;  %6175 = vmatprep.subr.bf16.mxu1 %v11766_v50  ;;  %v11821_v50 = vld [vmem:[%s14074_s1 + $0x260] ss:$8 sps:$4 sm:$0xff]  }
  0xfe   : > { %1635 = vmatmul.mubr.bf16.gmra.mrb[8].mxu0 %v12406_v55  ;;  %6137 = vmatmul.mubr.bf16.gmra.mrb[8].mxu1 %v12407_v56  ;;  %v11824_v55 = vld [vmem:[%s14074_s1 + $0x270] ss:$8 sps:$4 sm:$0xff]   ;;  %v12431_v56 = vld [vmem:[%s12520_s17 + $0x174] ss:$20 sps:$4 sm:$0xff]  }
  0xff   : > { %1674 = vmatpush1.bf16.msra.mxu0 %v11764_v53  ;;  %6176 = vmatpush1.bf16.msra.mxu1 %v11764_v53  ;;  %v12429_v53 = vld [vmem:[%s12520_s17 + $0x148] ss:$20 sps:$4 sm:$0xff]  }
 0x100   : > { %1675 = vmatprep.subr.bf16.mxu0 %v11769_v54  ;;  %6177 = vmatprep.subr.bf16.mxu1 %v11769_v54  ;;  %v12430_v54 = vld [vmem:[%s12520_s17 + $0xac] ss:$20 sps:$4 sm:$0xff]  }
 0x101   : > { %1644 = vmatprep.mubr.bf16.mxu0 %v12408_v60  ;;  %6146 = vmatprep.mubr.bf16.mxu1 %v12409_v61  ;;  %v12433_v60 = vld [vmem:[%s12520_s17 + $0x170] ss:$20 sps:$4 sm:$0xff]  }
 0x102   : > { %v11830_v61 = vld [vmem:[%s12520_s17 + $0x10] ss:$20 sps:$4 sm:$0xff]  }
 0x103   : > { %1676 = vmatpush1.bf16.msra.mxu0 %v11767_v58  ;;  %6178 = vmatpush1.bf16.msra.mxu1 %v11767_v58  ;;  %v11829_v58 = vld [vmem:[%s14074_s1 + $0x504] ss:$8 sps:$4 sm:$0xff]  }
 0x104   : > { %1677 = vmatprep.subr.bf16.mxu0 %v11772_v59  ;;  %6179 = vmatprep.subr.bf16.mxu1 %v11772_v59  ;;  %v12432_v59 = vld [vmem:[%s12520_s17 + $0xa8] ss:$20 sps:$4 sm:$0xff]  }
 0x106   : > { %1645 = vmatmul.mubr.bf16.gmra.mrb[12].mxu0 %v12410_v1  ;;  %6147 = vmatmul.mubr.bf16.gmra.mrb[12].mxu1 %v12411_v2  ;;  %v11834_v1 = vld [vmem:[%s14074_s1 + $0x514] ss:$8 sps:$4 sm:$0xff]   ;;  %v11832_v2 = vld [vmem:[%s14074_s1 + $0x510] ss:$8 sps:$4 sm:$0xff]  }
 0x107   : > { %1678 = vmatpush1.bf16.msra.mxu0 %v11770_v62  ;;  %6180 = vmatpush1.bf16.msra.mxu1 %v11770_v62  ;;  %v11831_v62 = vld [vmem:[%s12520_s17 + $0xd8] ss:$20 sps:$4 sm:$0xff]  }
 0x108   : > { %1679 = vmatprep.subr.bf16.mxu0 %v11775_v0  ;;  %6181 = vmatprep.subr.bf16.mxu1 %v11775_v0  ;;  %v11827_v0 = vld [vmem:[%s14074_s1 + $0x500] ss:$8 sps:$4 sm:$0xff]  }
 0x109   : > { %1654 = vmatprep.mubr.bf16.mxu0 %v12412_v6  ;;  %6156 = vmatprep.mubr.bf16.mxu1 %v12413_v7  ;;  %v12434_v6 = vld [vmem:[%s12520_s17 + $0x38] ss:$20 sps:$4 sm:$0xff]   ;;  %v12435_v7 = vld [vmem:[%s12520_s17 + $0x100] ss:$20 sps:$4 sm:$0xff]  }
 0x10b   : > { %1680 = vmatpush1.bf16.msra.mxu0 %v11773_v3  ;;  %6182 = vmatpush1.bf16.msra.mxu1 %v11773_v3  ;;  %v11837_v3 = vld [vmem:[%s14074_s1 + $0x524] ss:$8 sps:$4 sm:$0xff]  }
 0x10c   : > { %1681 = vmatprep.subr.bf16.mxu0 %v11778_v4  ;;  %6183 = vmatprep.subr.bf16.mxu1 %v11778_v4  ;;  %v11835_v4 = vld [vmem:[%s14074_s1 + $0x520] ss:$8 sps:$4 sm:$0xff]  }
 0x10e   : > { %1655 = vmatmul.mubr.bf16.gmra.mrb[16].mxu0 %v12414_v10  ;;  %6157 = vmatmul.mubr.bf16.gmra.mrb[16].mxu1 %v12415_v11  ;;  %v11841_v10 = vld [vmem:[%s14074_s1 + $0x540] ss:$8 sps:$4 sm:$0xff]   ;;  %v11846_v11 = vld [vmem:[%s14074_s1 + $0x554] ss:$8 sps:$4 sm:$0xff]  }
 0x10f   : > { %1682 = vmatpush1.bf16.msra.mxu0 %v11776_v5  ;;  %6184 = vmatpush1.bf16.msra.mxu1 %v11776_v5  ;;  %v11840_v5 = vld [vmem:[%s14074_s1 + $0x534] ss:$8 sps:$4 sm:$0xff]  }
 0x110   : > { %1683 = vmatprep.subr.bf16.mxu0 %v11781_v8  ;;  %6185 = vmatprep.subr.bf16.mxu1 %v11781_v8  ;;  %v11838_v8 = vld [vmem:[%s14074_s1 + $0x530] ss:$8 sps:$4 sm:$0xff]  }
 0x111   : > { %1697 = vmatprep.mubr.bf16.mxu0 %v11802_v9  ;;  %6199 = vmatprep.mubr.bf16.mxu1 %v12416_v14  ;;  %v11843_v9 = vld [vmem:[%s14074_s1 + $0x544] ss:$8 sps:$4 sm:$0xff]   ;;  %v11844_v14 = vld [vmem:[%s14074_s1 + $0x550] ss:$8 sps:$4 sm:$0xff]  }
 0x113   : > { %1684 = vmatpush1.bf16.msra.mxu0 %v11779_v12  ;;  %6186 = vmatpush1.bf16.msra.mxu1 %v11779_v12  ;;  %v12436_v12 = vld [vmem:[%s12520_s17 + $0x60] ss:$20 sps:$4 sm:$0xff]  }
 0x114   : > { %1685 = vmatprep.subr.bf16.mxu0 %v11784_v13  ;;  %6187 = vmatprep.subr.bf16.mxu1 %v11784_v13  ;;  %v12437_v13 = vld [vmem:[%s12520_s17 + $0x128] ss:$20 sps:$4 sm:$0xff]  }
 0x117   : > { %1686 = vmatpush1.bf16.msra.mxu0 %v11782_v15  ;;  %6188 = vmatpush1.bf16.msra.mxu1 %v11782_v15  ;;  %v11849_v15 = vld [vmem:[%s14074_s1 + $0x564] ss:$8 sps:$4 sm:$0xff]  }
 0x118   : > { %1687 = vmatprep.subr.bf16.mxu0 %v11787_v16  ;;  %6189 = vmatprep.subr.bf16.mxu1 %v11787_v16  ;;  %v11847_v16 = vld [vmem:[%s14074_s1 + $0x560] ss:$8 sps:$4 sm:$0xff]  }
 0x11b   : > { %1688 = vmatpush1.bf16.msra.mxu0 %v11785_v17  ;;  %6190 = vmatpush1.bf16.msra.mxu1 %v11785_v17  ;;  %v11852_v17 = vld [vmem:[%s14074_s1 + $0x574] ss:$8 sps:$4 sm:$0xff]  }
 0x11c   : > { %1689 = vmatprep.subr.bf16.mxu0 %v11790_v18  ;;  %6191 = vmatprep.subr.bf16.mxu1 %v11790_v18  ;;  %v12438_v18 = vld [vmem:[%s12520_s17 + $0x88] ss:$20 sps:$4 sm:$0xff]  }
 0x11f   : > { %1690 = vmatpush1.bf16.msra.mxu0 %v11788_v19  ;;  %6192 = vmatpush1.bf16.msra.mxu1 %v11788_v19  ;;  %v12439_v19 = vld [vmem:[%s12520_s17 + $0x150] ss:$20 sps:$4 sm:$0xff]  }
 0x120   : > { %1691 = vmatprep.subr.bf16.mxu0 %v11793_v20  ;;  %6193 = vmatprep.subr.bf16.mxu1 %v11793_v20  ;;  %v11850_v20 = vld [vmem:[%s14074_s1 + $0x570] ss:$8 sps:$4 sm:$0xff]  }
 0x123   : > { %1692 = vmatpush1.bf16.msra.mxu0 %v11791_v21  ;;  %6194 = vmatpush1.bf16.msra.mxu1 %v11791_v21  ;;  %v11855_v21 = vld [vmem:[%s14074_s1 + $0x584] ss:$8 sps:$4 sm:$0xff]  }
 0x124   : > { %1693 = vmatprep.subr.bf16.mxu0 %v11796_v22  ;;  %6195 = vmatprep.subr.bf16.mxu1 %v11796_v22  ;;  %v11853_v22 = vld [vmem:[%s14074_s1 + $0x580] ss:$8 sps:$4 sm:$0xff]  }
 0x127   : > { %1694 = vmatpush1.bf16.msra.mxu0 %v11794_v23  ;;  %6196 = vmatpush1.bf16.msra.mxu1 %v11794_v23  ;;  %v11858_v23 = vld [vmem:[%s14074_s1 + $0x594] ss:$8 sps:$4 sm:$0xff]  }
 0x128   : > { %1695 = vmatprep.subr.bf16.mxu0 %v11799_v24  ;;  %6197 = vmatprep.subr.bf16.mxu1 %v11799_v24  ;;  %v11879_v24 = vld [vmem:[%s12520_s17 + $0x54] ss:$20 sps:$4 sm:$0xff]  }
 0x12b   : > { %1696 = vmatpush1.bf16.msra.mxu0 %v11797_v25  ;;  %6198 = vmatpush1.bf16.msra.mxu1 %v11797_v25  ;;  %v11885_v25 = vld [vmem:[%s12520_s17 + $0x11c] ss:$20 sps:$4 sm:$0xff]  }
 0x12c   : > { %1748 = vmatprep.subr.bf16.mxu0 %v11805_v26  ;;  %6250 = vmatprep.subr.bf16.mxu1 %v11805_v26  ;;  %v12440_v26 = vld [vmem:[%s12520_s17 + $0xb0] ss:$20 sps:$4 sm:$0xff]  }
 0x12e   : > { %1698 = vmatmul.mubr.bf16.vlgmr.msra.gmra.mrb[0].mxu0 %v11800_v27  ;;  %6200 = vmatmul.mubr.bf16.vlgmr.msra.gmra.mrb[0].mxu1 %v12417_v63  ;;  %v12441_v27 = vld [vmem:[%s12520_s17 + $0x178] ss:$20 sps:$4 sm:$0xff]   ;;  %v11859_v63 = vld [vmem:[%s14074_s1 + $0x5a0] ss:$8 sps:$4 sm:$0xff]  }
 0x12f   : > { %1749 = vmatpush1.bf16.msra.mxu0 %v11803_v28  ;;  %6251 = vmatpush1.bf16.msra.mxu1 %v11803_v28  ;;  %v11856_v28 = vld [vmem:[%s14074_s1 + $0x590] ss:$8 sps:$4 sm:$0xff]  }
 0x130   : > { %1750 = vmatprep.subr.bf16.mxu0 %v11808_v29  ;;  %6252 = vmatprep.subr.bf16.mxu1 %v11808_v29  ;;  %v11861_v29 = vld [vmem:[%s14074_s1 + $0x5a4] ss:$8 sps:$4 sm:$0xff]  }
 0x131   : > { %1707 = vmatprep.mubr.bf16.mxu0 %v12418_v32  ;;  %6209 = vmatprep.mubr.bf16.mxu1 %v12419_v33  ;;  %v11867_v32 = vld [vmem:[%s14074_s1 + $0x5c4] ss:$8 sps:$4 sm:$0xff]   ;;  %v11865_v33 = vld [vmem:[%s14074_s1 + $0x5c0] ss:$8 sps:$4 sm:$0xff]  }
 0x133   : > { %1751 = vmatpush1.bf16.msra.mxu0 %v11806_v30  ;;  %6253 = vmatpush1.bf16.msra.mxu1 %v11806_v30  ;;  %v11864_v30 = vld [vmem:[%s14074_s1 + $0x5b4] ss:$8 sps:$4 sm:$0xff]  }
 0x134   : > { %1752 = vmatprep.subr.bf16.mxu0 %v11811_v31  ;;  %6254 = vmatprep.subr.bf16.mxu1 %v11811_v31  ;;  %v11862_v31 = vld [vmem:[%s14074_s1 + $0x5b0] ss:$8 sps:$4 sm:$0xff]  }
 0x136   : > { %1708 = vmatmul.mubr.bf16.gmra.mrb[4].mxu0 %v12420_v36  ;;  %6210 = vmatmul.mubr.bf16.gmra.mrb[4].mxu1 %v12421_v37  ;;  %v11873_v36 = vld [vmem:[%s14074_s1 + $0x5e4] ss:$8 sps:$4 sm:$0xff]   ;;  %v11871_v37 = vld [vmem:[%s14074_s1 + $0x5e0] ss:$8 sps:$4 sm:$0xff]  }
 0x137   : > { %1753 = vmatpush1.bf16.msra.mxu0 %v11809_v34  ;;  %6255 = vmatpush1.bf16.msra.mxu1 %v11809_v34  ;;  %v11870_v34 = vld [vmem:[%s14074_s1 + $0x5d4] ss:$8 sps:$4 sm:$0xff]  }
 0x138   : > { %1717 = vmatprep.mubr.bf16.mxu0 %v12422_v39  ;;  %1754 = vmatprep.subr.bf16.mxu0 %v11814_v35  ;;  %v11874_v39 = vld [vmem:[%s14074_s1 + $0x5f0] ss:$8 sps:$4 sm:$0xff]  }
 0x139   : > { %6219 = vmatprep.mubr.bf16.mxu1 %v12423_v41  ;;  %6256 = vmatprep.subr.bf16.mxu1 %v11814_v35  ;;  %v11868_v35 = vld [vmem:[%s14074_s1 + $0x5d0] ss:$8 sps:$4 sm:$0xff]  }
 0x13a   : > { %v11877_v41 = vld [vmem:[%s12520_s17 + $0x50] ss:$20 sps:$4 sm:$0xff]  }
 0x13b   : > { %1755 = vmatpush1.bf16.msra.mxu0 %v11812_v38  ;;  %6257 = vmatpush1.bf16.msra.mxu1 %v11812_v38  ;;  %v11876_v38 = vld [vmem:[%s14074_s1 + $0x5f4] ss:$8 sps:$4 sm:$0xff]  }
 0x13c   : > { %1756 = vmatprep.subr.bf16.mxu0 %v11817_v40  ;;  %6258 = vmatprep.subr.bf16.mxu1 %v11817_v40  ;;  %v11882_v40 = vld [vmem:[%s14074_s1 + $0x604] ss:$8 sps:$4 sm:$0xff]  }
 0x13e   : > { %1718 = vmatmul.mubr.bf16.gmra.mrb[8].mxu0 %v12424_v44  ;;  %6220 = vmatmul.mubr.bf16.gmra.mrb[8].mxu1 %v12425_v45  ;;  %v11888_v44 = vld [vmem:[%s14074_s1 + $0x614] ss:$8 sps:$4 sm:$0xff]  }
 0x13f   : > { %1757 = vmatpush1.bf16.msra.mxu0 %v11815_v42  ;;  %6259 = vmatpush1.bf16.msra.mxu1 %v11815_v42  ;;  %v11883_v42 = vld [vmem:[%s12520_s17 + $0x118] ss:$20 sps:$4 sm:$0xff]   ;;  %v11907_v45 = vld [vmem:[%s12520_s17 + $0x7c] ss:$20 sps:$4 sm:$0xff]  }
 0x140   : > { %1727 = vmatprep.mubr.bf16.mxu0 %v12426_v47  ;;  %6229 = vmatprep.mubr.bf16.mxu1 %v12427_v48  ;;  %v11886_v47 = vld [vmem:[%s14074_s1 + $0x610] ss:$8 sps:$4 sm:$0xff]   ;;  %v11891_v48 = vld [vmem:[%s14074_s1 + $0x624] ss:$8 sps:$4 sm:$0xff]  }
 0x141   : > { %1758 = vmatprep.subr.bf16.mxu0 %v11820_v43  ;;  %6260 = vmatprep.subr.bf16.mxu1 %v11820_v43  ;;  %v11880_v43 = vld [vmem:[%s14074_s1 + $0x600] ss:$8 sps:$4 sm:$0xff]  }
 0x143   : > { %1759 = vmatpush1.bf16.msra.mxu0 %v11818_v46  ;;  %6261 = vmatpush1.bf16.msra.mxu1 %v11818_v46  ;;  %v11909_v46 = vld [vmem:[%s12520_s17 + $0x144] ss:$20 sps:$4 sm:$0xff]  }
 0x144   : > { %1760 = vmatprep.subr.bf16.mxu0 %v11823_v49  ;;  %6262 = vmatprep.subr.bf16.mxu1 %v11823_v49  ;;  %v11911_v49 = vld [vmem:[%s12520_s17 + $0x78] ss:$20 sps:$4 sm:$0xff]  }
 0x146   : > { %1728 = vmatmul.mubr.bf16.gmra.mrb[12].mxu0 %v12428_v52  ;;  %6230 = vmatmul.mubr.bf16.gmra.mrb[12].mxu1 %v12429_v53  ;;  %v11894_v52 = vld [vmem:[%s14074_s1 + $0x634] ss:$8 sps:$4 sm:$0xff]   ;;  %v11919_v53 = vld [vmem:[%s12520_s17 + $0xa4] ss:$20 sps:$4 sm:$0xff]  }
 0x147   : > { %1737 = vmatprep.mubr.bf16.mxu0 %v12430_v54  ;;  %1761 = vmatpush1.bf16.msra.mxu0 %v11821_v50  ;;  %v11921_v54 = vld [vmem:[%s12520_s17 + $0x16c] ss:$20 sps:$4 sm:$0xff]  }
 0x148   : > { %6239 = vmatprep.mubr.bf16.mxu1 %v12431_v56  ;;  %6263 = vmatpush1.bf16.msra.mxu1 %v11821_v50  ;;  %v11915_v50 = vld [vmem:[%s12520_s17 + $0x140] ss:$20 sps:$4 sm:$0xff]   ;;  %v11897_v56 = vld [vmem:[%s14074_s1 + $0x644] ss:$8 sps:$4 sm:$0xff]  }
 0x149   : > { %1762 = vmatprep.subr.bf16.mxu0 %v11826_v51  ;;  %6264 = vmatprep.subr.bf16.mxu1 %v11826_v51  ;;  %v11889_v51 = vld [vmem:[%s14074_s1 + $0x620] ss:$8 sps:$4 sm:$0xff]  }
 0x14b   : > { %1763 = vmatpush1.bf16.msra.mxu0 %v11824_v55 }
 0x14c   : > { %6265 = vmatpush1.bf16.msra.mxu1 %v11824_v55  ;;  %2472 = vmatprep.subr.bf16.mxu0 %v11829_v58  ;;  %v11892_v55 = vld [vmem:[%s14074_s1 + $0x630] ss:$8 sps:$4 sm:$0xff]  }
 0x14d   : > { %6973 = vmatprep.subr.bf16.mxu1 %v11829_v58  ;;  %v11923_v58 = vld [vmem:[%s12520_s17 + $0xa0] ss:$20 sps:$4 sm:$0xff]  }
 0x14e   : > { %1738 = vmatmul.mubr.bf16.gmra.mrb[16].mxu0 %v12432_v59  ;;  %6240 = vmatmul.mubr.bf16.gmra.mrb[16].mxu1 %v12433_v60  ;;  %v11927_v59 = vld [vmem:[%s12520_s17 + $0x168] ss:$20 sps:$4 sm:$0xff]  }
 0x14f   : > { %1780 = vmatprep.mubr.bf16.mxu0 %v12450_v57  ;;  %6282 = vmatprep.mubr.bf16.mxu1 %v12450_v57  ;;  %v11895_v60 = vld [vmem:[%s14074_s1 + $0x640] ss:$8 sps:$4 sm:$0xff]  }
 0x156   : > { %1781 = vmatmul.mubr.bf16.vlgmr.msra.gmra.mrb[0].mxu0 %v11830_v61  ;;  %6283 = vmatmul.mubr.bf16.vlgmr.msra.gmra.mrb[0].mxu1 %v11831_v62  ;;  %v11900_v61 = vld [vmem:[%s14074_s1 + $0x654] ss:$8 sps:$4 sm:$0xff]   ;;  %v11931_v62 = vld [vmem:[%s12520_s17 + $0xcc] ss:$20 sps:$4 sm:$0xff]  }
 0x157   : > { %2473 = vmatpush1.bf16.msra.mxu0 %v11827_v0  ;;  %6974 = vmatpush1.bf16.msra.mxu1 %v11827_v0  ;;  %v11933_v0 = vld [vmem:[%s12520_s17 + $0x194] ss:$20 sps:$4 sm:$0xff]  }
 0x158   : > { %2474 = vmatprep.subr.bf16.mxu0 %v11834_v1  ;;  %6975 = vmatprep.subr.bf16.mxu1 %v11834_v1  ;;  %v11898_v1 = vld [vmem:[%s14074_s1 + $0x650] ss:$8 sps:$4 sm:$0xff]  }
 0x159   : > { %1790 = vmatprep.mubr.bf16.mxu0 %v12450_v57  ;;  %6292 = vmatprep.mubr.bf16.mxu1 %v12450_v57 }
 0x15b   : > { %2475 = vmatpush1.bf16.msra.mxu0 %v11832_v2  ;;  %6976 = vmatpush1.bf16.msra.mxu1 %v11832_v2  ;;  %v11903_v2 = vld [vmem:[%s14074_s1 + $0x664] ss:$8 sps:$4 sm:$0xff]  }
 0x15c   : > { %2476 = vmatprep.subr.bf16.mxu0 %v11837_v3  ;;  %6977 = vmatprep.subr.bf16.mxu1 %v11837_v3  ;;  %v11935_v3 = vld [vmem:[%s12520_s17 + $0xc8] ss:$20 sps:$4 sm:$0xff]  }
 0x15e   : > { %1791 = vmatmul.mubr.bf16.gmra.mrb[4].mxu0 %v12434_v6  ;;  %6293 = vmatmul.mubr.bf16.gmra.mrb[4].mxu1 %v12435_v7  ;;  %v11906_v6 = vld [vmem:[%s14074_s1 + $0x674] ss:$8 sps:$4 sm:$0xff]  }
 0x15f   : > { %2477 = vmatpush1.bf16.msra.mxu0 %v11835_v4  ;;  %6978 = vmatpush1.bf16.msra.mxu1 %v11835_v4  ;;  %v11939_v4 = vld [vmem:[%s12520_s17 + $0x190] ss:$20 sps:$4 sm:$0xff]   ;;  %v11943_v7 = vld [vmem:[%s12520_s17 + $0xf4] ss:$20 sps:$4 sm:$0xff]  }
 0x160   : > { %2478 = vmatprep.subr.bf16.mxu0 %v11840_v5  ;;  %6979 = vmatprep.subr.bf16.mxu1 %v11840_v5  ;;  %v11901_v5 = vld [vmem:[%s14074_s1 + $0x660] ss:$8 sps:$4 sm:$0xff]  }
 0x161   : > { %1800 = vmatprep.mubr.bf16.mxu0 %v12450_v57  ;;  %6302 = vmatprep.mubr.bf16.mxu1 %v12450_v57 }
 0x163   : > { %2479 = vmatpush1.bf16.msra.mxu0 %v11838_v8  ;;  %6980 = vmatpush1.bf16.msra.mxu1 %v11838_v8  ;;  %v11945_v8 = vld [vmem:[%s12520_s17 + $0x1bc] ss:$20 sps:$4 sm:$0xff]  }
 0x164   : > { %2480 = vmatprep.subr.bf16.mxu0 %v11843_v9  ;;  %6981 = vmatprep.subr.bf16.mxu1 %v11843_v9  ;;  %v11904_v9 = vld [vmem:[%s14074_s1 + $0x670] ss:$8 sps:$4 sm:$0xff]  }
 0x166   : > { %1801 = vmatmul.mubr.bf16.gmra.mrb[8].mxu0 %v12436_v12  ;;  %6303 = vmatmul.mubr.bf16.gmra.mrb[8].mxu1 %v12437_v13  ;;  %v11951_v12 = vld [vmem:[%s12520_s17 + $0x1b8] ss:$20 sps:$4 sm:$0xff]   ;;  %v11912_v13 = vld [vmem:[%s14074_s1 + $0x680] ss:$8 sps:$4 sm:$0xff]  }
 0x167   : > { %2481 = vmatpush1.bf16.msra.mxu0 %v11841_v10  ;;  %6982 = vmatpush1.bf16.msra.mxu1 %v11841_v10  ;;  %v11914_v10 = vld [vmem:[%s14074_s1 + $0x684] ss:$8 sps:$4 sm:$0xff]  }
 0x168   : > { %2482 = vmatprep.subr.bf16.mxu0 %v11846_v11  ;;  %6983 = vmatprep.subr.bf16.mxu1 %v11846_v11  ;;  %v11947_v11 = vld [vmem:[%s12520_s17 + $0xf0] ss:$20 sps:$4 sm:$0xff]  }
 0x169   : > { %1810 = vmatprep.mubr.bf16.mxu0 %v12450_v57  ;;  %6312 = vmatprep.mubr.bf16.mxu1 %v12450_v57 }
 0x16b   : > { %2483 = vmatpush1.bf16.msra.mxu0 %v11844_v14  ;;  %6984 = vmatpush1.bf16.msra.mxu1 %v11844_v14  ;;  %v11918_v14 = vld [vmem:[%s14074_s1 + $0x694] ss:$8 sps:$4 sm:$0xff]  }
 0x16c   : > { %2484 = vmatprep.subr.bf16.mxu0 %v11849_v15  ;;  %6985 = vmatprep.subr.bf16.mxu1 %v11849_v15  ;;  %v11957_v15 = vld [vmem:[%s12520_s17 + $0x5c] ss:$20 sps:$4 sm:$0xff]  }
 0x16e   : > { %1811 = vmatmul.mubr.bf16.gmra.mrb[12].mxu0 %v12438_v18  ;;  %6313 = vmatmul.mubr.bf16.gmra.mrb[12].mxu1 %v12439_v19  ;;  %v11926_v18 = vld [vmem:[%s14074_s1 + $0x6a4] ss:$8 sps:$4 sm:$0xff]   ;;  %v11924_v19 = vld [vmem:[%s14074_s1 + $0x6a0] ss:$8 sps:$4 sm:$0xff]  }
 0x16f   : > { %2485 = vmatpush1.bf16.msra.mxu0 %v11847_v16  ;;  %6986 = vmatpush1.bf16.msra.mxu1 %v11847_v16  ;;  %v11960_v16 = vld [vmem:[%s12520_s17 + $0x124] ss:$20 sps:$4 sm:$0xff]  }
 0x170   : > { %2486 = vmatprep.subr.bf16.mxu0 %v11852_v17  ;;  %6987 = vmatprep.subr.bf16.mxu1 %v11852_v17  ;;  %v11916_v17 = vld [vmem:[%s14074_s1 + $0x690] ss:$8 sps:$4 sm:$0xff]  }
 0x171   : > { %1820 = vmatprep.mubr.bf16.mxu0 %v12450_v57  ;;  %6322 = vmatprep.mubr.bf16.mxu1 %v12450_v57 }
 0x173   : > { %2487 = vmatpush1.bf16.msra.mxu0 %v11850_v20  ;;  %6988 = vmatpush1.bf16.msra.mxu1 %v11850_v20  ;;  %v11930_v20 = vld [vmem:[%s14074_s1 + $0x6b4] ss:$8 sps:$4 sm:$0xff]  }
 0x174   : > { %2488 = vmatprep.subr.bf16.mxu0 %v11855_v21  ;;  %6989 = vmatprep.subr.bf16.mxu1 %v11855_v21  ;;  %v11928_v21 = vld [vmem:[%s14074_s1 + $0x6b0] ss:$8 sps:$4 sm:$0xff]  }
 0x176   : > { %1821 = vmatmul.mubr.bf16.gmra.mrb[16].mxu0 %v12440_v26  ;;  %6323 = vmatmul.mubr.bf16.gmra.mrb[16].mxu1 %v12441_v27  ;;  %v11950_v26 = vld [vmem:[%s14074_s1 + $0x6e4] ss:$8 sps:$4 sm:$0xff]   ;;  %v11948_v27 = vld [vmem:[%s14074_s1 + $0x6e0] ss:$8 sps:$4 sm:$0xff]  }
 0x177   : > { %2489 = vmatpush1.bf16.msra.mxu0 %v11853_v22  ;;  %6990 = vmatpush1.bf16.msra.mxu1 %v11853_v22  ;;  %v11938_v22 = vld [vmem:[%s14074_s1 + $0x6c4] ss:$8 sps:$4 sm:$0xff]  }
 0x178   : > { %2490 = vmatprep.subr.bf16.mxu0 %v11858_v23  ;;  %6991 = vmatprep.subr.bf16.mxu1 %v11858_v23  ;;  %v11936_v23 = vld [vmem:[%s14074_s1 + $0x6c0] ss:$8 sps:$4 sm:$0xff]  }
 0x179   : > { %2504 = vmatprep.mubr.bf16.mxu0 %v11879_v24  ;;  %7005 = vmatprep.mubr.bf16.mxu1 %v11885_v25  ;;  %v11942_v24 = vld [vmem:[%s14074_s1 + $0x6d4] ss:$8 sps:$4 sm:$0xff]   ;;  %v11940_v25 = vld [vmem:[%s14074_s1 + $0x6d0] ss:$8 sps:$4 sm:$0xff]  }
 0x17b   : > { %2491 = vmatpush1.bf16.msra.mxu0 %v11856_v28  ;;  %6992 = vmatpush1.bf16.msra.mxu1 %v11856_v28  ;;  %v11954_v28 = vld [vmem:[%s14074_s1 + $0x6f4] ss:$8 sps:$4 sm:$0xff]  }
 0x17c   : > { %2492 = vmatprep.subr.bf16.mxu0 %v11861_v29  ;;  %6993 = vmatprep.subr.bf16.mxu1 %v11861_v29  ;;  %v11952_v29 = vld [vmem:[%s14074_s1 + $0x6f0] ss:$8 sps:$4 sm:$0xff]  }
 0x17f   : > { %2493 = vmatpush1.bf16.msra.mxu0 %v11859_v63  ;;  %6994 = vmatpush1.bf16.msra.mxu1 %v11859_v63  ;;  %v11963_v63 = vld [vmem:[%s14074_s1 + $0x704] ss:$8 sps:$4 sm:$0xff]  }
 0x180   : > { %2494 = vmatprep.subr.bf16.mxu0 %v11864_v30  ;;  %6995 = vmatprep.subr.bf16.mxu1 %v11864_v30  ;;  %v11955_v30 = vld [vmem:[%s12520_s17 + $0x58] ss:$20 sps:$4 sm:$0xff]  }
 0x183   : > { %2495 = vmatpush1.bf16.msra.mxu0 %v11862_v31  ;;  %6996 = vmatpush1.bf16.msra.mxu1 %v11862_v31  ;;  %v11958_v31 = vld [vmem:[%s12520_s17 + $0x120] ss:$20 sps:$4 sm:$0xff]  }
 0x184   : > { %2496 = vmatprep.subr.bf16.mxu0 %v11867_v32  ;;  %6997 = vmatprep.subr.bf16.mxu1 %v11867_v32  ;;  %v11961_v32 = vld [vmem:[%s14074_s1 + $0x700] ss:$8 sps:$4 sm:$0xff]  }
 0x187   : > { %2497 = vmatpush1.bf16.msra.mxu0 %v11865_v33  ;;  %6998 = vmatpush1.bf16.msra.mxu1 %v11865_v33  ;;  %v11966_v33 = vld [vmem:[%s14074_s1 + $0x714] ss:$8 sps:$4 sm:$0xff]  }
 0x188   : > { %2498 = vmatprep.subr.bf16.mxu0 %v11870_v34  ;;  %6999 = vmatprep.subr.bf16.mxu1 %v11870_v34  ;;  %v11967_v34 = vld [vmem:[%s12520_s17 + $0x84] ss:$20 sps:$4 sm:$0xff]  }
 0x18b   : > { %2499 = vmatpush1.bf16.msra.mxu0 %v11868_v35  ;;  %7000 = vmatpush1.bf16.msra.mxu1 %v11868_v35  ;;  %v11969_v35 = vld [vmem:[%s12520_s17 + $0x14c] ss:$20 sps:$4 sm:$0xff]  }
 0x18c   : > { %2500 = vmatprep.subr.bf16.mxu0 %v11873_v36  ;;  %7001 = vmatprep.subr.bf16.mxu1 %v11873_v36  ;;  %v11964_v36 = vld [vmem:[%s14074_s1 + $0x710] ss:$8 sps:$4 sm:$0xff]  }
 0x18f   : > { %2501 = vmatpush1.bf16.msra.mxu0 %v11871_v37  ;;  %7002 = vmatpush1.bf16.msra.mxu1 %v11871_v37  ;;  %v11975_v37 = vld [vmem:[%s14074_s1 + $0x724] ss:$8 sps:$4 sm:$0xff]  }
 0x190   : > { %2502 = vmatprep.subr.bf16.mxu0 %v11876_v38  ;;  %7003 = vmatprep.subr.bf16.mxu1 %v11876_v38  ;;  %v11971_v38 = vld [vmem:[%s12520_s17 + $0x80] ss:$20 sps:$4 sm:$0xff]  }
 0x193   : > { %2503 = vmatpush1.bf16.msra.mxu0 %v11874_v39  ;;  %7004 = vmatpush1.bf16.msra.mxu1 %v11874_v39  ;;  %v11972_v39 = vld [vmem:[%s12520_s17 + $0x148] ss:$20 sps:$4 sm:$0xff]  }
 0x194   : > { %2555 = vmatprep.subr.bf16.mxu0 %v11882_v40  ;;  %7056 = vmatprep.subr.bf16.mxu1 %v11882_v40  ;;  %v11973_v40 = vld [vmem:[%s14074_s1 + $0x720] ss:$8 sps:$4 sm:$0xff]  }
 0x196   : > { %2505 = vmatmul.mubr.bf16.vlgmr.msra.gmra.mrb[0].mxu0 %v11877_v41  ;;  %7006 = vmatmul.mubr.bf16.vlgmr.msra.gmra.mrb[0].mxu1 %v11883_v42  ;;  %v11976_v41 = vld [vmem:[%s12520_s17 + $0xac] ss:$20 sps:$4 sm:$0xff]   ;;  %v11980_v42 = vld [vmem:[%s14074_s1 + $0x734] ss:$8 sps:$4 sm:$0xff]  }
 0x197   : > { %2556 = vmatpush1.bf16.msra.mxu0 %v11880_v43  ;;  %7057 = vmatpush1.bf16.msra.mxu1 %v11880_v43  ;;  %v11981_v43 = vld [vmem:[%s12520_s17 + $0x174] ss:$20 sps:$4 sm:$0xff]  }
 0x198   : > { %2557 = vmatprep.subr.bf16.mxu0 %v11888_v44  ;;  %7058 = vmatprep.subr.bf16.mxu1 %v11888_v44  ;;  %v11978_v44 = vld [vmem:[%s14074_s1 + $0x730] ss:$8 sps:$4 sm:$0xff]  }
 0x199   : > { %2514 = vmatprep.mubr.bf16.mxu0 %v11907_v45  ;;  %7015 = vmatprep.mubr.bf16.mxu1 %v11909_v46  ;;  %v11987_v45 = vld [vmem:[%s14074_s1 + $0x744] ss:$8 sps:$4 sm:$0xff]   ;;  %v11983_v46 = vld [vmem:[%s12520_s17 + $0xa8] ss:$20 sps:$4 sm:$0xff]  }
 0x19b   : > { %2558 = vmatpush1.bf16.msra.mxu0 %v11886_v47  ;;  %7059 = vmatpush1.bf16.msra.mxu1 %v11886_v47  ;;  %v11984_v47 = vld [vmem:[%s12520_s17 + $0x170] ss:$20 sps:$4 sm:$0xff]  }
 0x19c   : > { %2559 = vmatprep.subr.bf16.mxu0 %v11891_v48  ;;  %7060 = vmatprep.subr.bf16.mxu1 %v11891_v48  ;;  %v11985_v48 = vld [vmem:[%s14074_s1 + $0x740] ss:$8 sps:$4 sm:$0xff]  }
 0x19e   : > { %2515 = vmatmul.mubr.bf16.gmra.mrb[4].mxu0 %v11911_v49  ;;  %7016 = vmatmul.mubr.bf16.gmra.mrb[4].mxu1 %v11915_v50  ;;  %v11988_v49 = vld [vmem:[%s12520_s17 + $0xd4] ss:$20 sps:$4 sm:$0xff]   ;;  %v11990_v50 = vld [vmem:[%s12520_s17 + $0x19c] ss:$20 sps:$4 sm:$0xff]  }
 0x19f   : > { %2560 = vmatpush1.bf16.msra.mxu0 %v11889_v51  ;;  %7061 = vmatpush1.bf16.msra.mxu1 %v11889_v51  ;;  %v11996_v51 = vld [vmem:[%s14074_s1 + $0x754] ss:$8 sps:$4 sm:$0xff]  }
 0x1a0   : > { %2561 = vmatprep.subr.bf16.mxu0 %v11894_v52  ;;  %7062 = vmatprep.subr.bf16.mxu1 %v11894_v52  ;;  %v11994_v52 = vld [vmem:[%s14074_s1 + $0x750] ss:$8 sps:$4 sm:$0xff]  }
 0x1a1   : > { %2524 = vmatprep.mubr.bf16.mxu0 %v11919_v53  ;;  %7025 = vmatprep.mubr.bf16.mxu1 %v11921_v54  ;;  %v11999_v53 = vld [vmem:[%s14074_s1 + $0x764] ss:$8 sps:$4 sm:$0xff]  }
 0x1a2   : > { %v11992_v54 = vld [vmem:[%s12520_s17 + $0xd0] ss:$20 sps:$4 sm:$0xff]  }
 0x1a3   : > { %2562 = vmatpush1.bf16.msra.mxu0 %v11892_v55  ;;  %7063 = vmatpush1.bf16.msra.mxu1 %v11892_v55  ;;  %v11993_v55 = vld [vmem:[%s12520_s17 + $0x198] ss:$20 sps:$4 sm:$0xff]  }
 0x1a4   : > { %2563 = vmatprep.subr.bf16.mxu0 %v11897_v56  ;;  %7064 = vmatprep.subr.bf16.mxu1 %v11897_v56  ;;  %v11997_v56 = vld [vmem:[%s14074_s1 + $0x760] ss:$8 sps:$4 sm:$0xff]  }
 0x1a6   : > { %2525 = vmatmul.mubr.bf16.gmra.mrb[8].mxu0 %v11923_v58  ;;  %7026 = vmatmul.mubr.bf16.gmra.mrb[8].mxu1 %v11927_v59  ;;  %v12000_v58 = vld [vmem:[%s12520_s17 + $0xfc] ss:$20 sps:$4 sm:$0xff]   ;;  %v12002_v59 = vld [vmem:[%s12520_s17 + $0x1c4] ss:$20 sps:$4 sm:$0xff]  }
 0x1a7   : > { %2564 = vmatpush1.bf16.msra.mxu0 %v11895_v60  ;;  %7065 = vmatpush1.bf16.msra.mxu1 %v11895_v60  ;;  %v12008_v60 = vld [vmem:[%s14074_s1 + $0x774] ss:$8 sps:$4 sm:$0xff]  }
 0x1a8   : > { %2565 = vmatprep.subr.bf16.mxu0 %v11900_v61  ;;  %7066 = vmatprep.subr.bf16.mxu1 %v11900_v61  ;;  %v12006_v61 = vld [vmem:[%s14074_s1 + $0x770] ss:$8 sps:$4 sm:$0xff]  }
 0x1a9   : > { %2534 = vmatprep.mubr.bf16.mxu0 %v11931_v62  ;;  %7035 = vmatprep.mubr.bf16.mxu1 %v11933_v0  ;;  %v12011_v62 = vld [vmem:[%s14074_s1 + $0x784] ss:$8 sps:$4 sm:$0xff]  }
 0x1aa   : > { %v12004_v0 = vld [vmem:[%s12520_s17 + $0xf8] ss:$20 sps:$4 sm:$0xff]  }
 0x1ab   : > { %2566 = vmatpush1.bf16.msra.mxu0 %v11898_v1  ;;  %7067 = vmatpush1.bf16.msra.mxu1 %v11898_v1  ;;  %v12005_v1 = vld [vmem:[%s12520_s17 + $0x1c0] ss:$20 sps:$4 sm:$0xff]  }
 0x1ac   : > { %2567 = vmatprep.subr.bf16.mxu0 %v11903_v2  ;;  %7068 = vmatprep.subr.bf16.mxu1 %v11903_v2  ;;  %v12012_v2 = vld [vmem:[%s12520_s17 + $0x60] ss:$20 sps:$4 sm:$0xff]  }
 0x1ae   : > { %2535 = vmatmul.mubr.bf16.gmra.mrb[12].mxu0 %v11935_v3  ;;  %7036 = vmatmul.mubr.bf16.gmra.mrb[12].mxu1 %v11939_v4  ;;  %v12013_v3 = vld [vmem:[%s12520_s17 + $0x128] ss:$20 sps:$4 sm:$0xff]  }
 0x1af   : > { %2568 = vmatpush1.bf16.msra.mxu0 %v11901_v5  ;;  %7069 = vmatpush1.bf16.msra.mxu1 %v11901_v5  ;;  %v12009_v4 = vld [vmem:[%s14074_s1 + $0x780] ss:$8 sps:$4 sm:$0xff]   ;;  %v12016_v5 = vld [vmem:[%s14074_s1 + $0x794] ss:$8 sps:$4 sm:$0xff]  }
 0x1b0   : > { %2569 = vmatprep.subr.bf16.mxu0 %v11906_v6  ;;  %7070 = vmatprep.subr.bf16.mxu1 %v11906_v6  ;;  %v12014_v6 = vld [vmem:[%s14074_s1 + $0x790] ss:$8 sps:$4 sm:$0xff]  }
 0x1b1   : > { %2544 = vmatprep.mubr.bf16.mxu0 %v11943_v7  ;;  %7045 = vmatprep.mubr.bf16.mxu1 %v11945_v8  ;;  %v12019_v7 = vld [vmem:[%s14074_s1 + $0x7a4] ss:$8 sps:$4 sm:$0xff]   ;;  %v12038_v8 = vld [vmem:[%s12520_s17 + $0x88] ss:$20 sps:$4 sm:$0xff]  }
 0x1b3   : > { %2570 = vmatpush1.bf16.msra.mxu0 %v11904_v9  ;;  %7071 = vmatpush1.bf16.msra.mxu1 %v11904_v9  ;;  %v12039_v9 = vld [vmem:[%s12520_s17 + $0x150] ss:$20 sps:$4 sm:$0xff]  }
 0x1b4   : > { %2571 = vmatprep.subr.bf16.mxu0 %v11914_v10  ;;  %7072 = vmatprep.subr.bf16.mxu1 %v11914_v10  ;;  %v12017_v10 = vld [vmem:[%s14074_s1 + $0x7a0] ss:$8 sps:$4 sm:$0xff]  }
 0x1b6   : > { %2545 = vmatmul.mubr.bf16.gmra.mrb[16].mxu0 %v11947_v11  ;;  %7046 = vmatmul.mubr.bf16.gmra.mrb[16].mxu1 %v11951_v12  ;;  %v12022_v11 = vld [vmem:[%s14074_s1 + $0x7b4] ss:$8 sps:$4 sm:$0xff]   ;;  %v12020_v12 = vld [vmem:[%s14074_s1 + $0x7b0] ss:$8 sps:$4 sm:$0xff]  }
 0x1b7   : > { %2572 = vmatpush1.bf16.msra.mxu0 %v11912_v13  ;;  %7073 = vmatpush1.bf16.msra.mxu1 %v11912_v13  ;;  %v12025_v13 = vld [vmem:[%s14074_s1 + $0x7c4] ss:$8 sps:$4 sm:$0xff]  }
 0x1b8   : > { %2573 = vmatprep.subr.bf16.mxu0 %v11918_v14  ;;  %7074 = vmatprep.subr.bf16.mxu1 %v11918_v14  ;;  %v12046_v14 = vld [vmem:[%s12520_s17 + $0xb0] ss:$20 sps:$4 sm:$0xff]  }
 0x1b9   : > { %2587 = vmatprep.mubr.bf16.mxu0 %v11957_v15  ;;  %7088 = vmatprep.mubr.bf16.mxu1 %v11960_v16  ;;  %v12047_v15 = vld [vmem:[%s12520_s17 + $0x178] ss:$20 sps:$4 sm:$0xff]   ;;  %v12023_v16 = vld [vmem:[%s14074_s1 + $0x7c0] ss:$8 sps:$4 sm:$0xff]  }
 0x1bb   : > { %2574 = vmatpush1.bf16.msra.mxu0 %v11916_v17  ;;  %7075 = vmatpush1.bf16.msra.mxu1 %v11916_v17  ;;  %v12028_v17 = vld [vmem:[%s14074_s1 + $0x7d4] ss:$8 sps:$4 sm:$0xff]  }
 0x1bc   : > { %2575 = vmatprep.subr.bf16.mxu0 %v11926_v18  ;;  %7076 = vmatprep.subr.bf16.mxu1 %v11926_v18  ;;  %v12026_v18 = vld [vmem:[%s14074_s1 + $0x7d0] ss:$8 sps:$4 sm:$0xff]  }
 0x1bf   : > { %2576 = vmatpush1.bf16.msra.mxu0 %v11924_v19  ;;  %7077 = vmatpush1.bf16.msra.mxu1 %v11924_v19  ;;  %v12031_v19 = vld [vmem:[%s14074_s1 + $0x7e4] ss:$8 sps:$4 sm:$0xff]  }
 0x1c0   : > { %2577 = vmatprep.subr.bf16.mxu0 %v11930_v20  ;;  %7078 = vmatprep.subr.bf16.mxu1 %v11930_v20  ;;  %v12054_v20 = vld [vmem:[%s12520_s17 + $0xd8] ss:$20 sps:$4 sm:$0xff]  }
 0x1c3   : > { %2578 = vmatpush1.bf16.msra.mxu0 %v11928_v21  ;;  %7079 = vmatpush1.bf16.msra.mxu1 %v11928_v21  ;;  %v12055_v21 = vld [vmem:[%s12520_s17 + $0x1a0] ss:$20 sps:$4 sm:$0xff]  }
 0x1c4   : > { %2579 = vmatprep.subr.bf16.mxu0 %v11938_v22  ;;  %7080 = vmatprep.subr.bf16.mxu1 %v11938_v22  ;;  %v12029_v22 = vld [vmem:[%s14074_s1 + $0x7e0] ss:$8 sps:$4 sm:$0xff]  }
 0x1c7   : > { %2580 = vmatpush1.bf16.msra.mxu0 %v11936_v23  ;;  %7081 = vmatpush1.bf16.msra.mxu1 %v11936_v23  ;;  %v12034_v23 = vld [vmem:[%s14074_s1 + $0x7f4] ss:$8 sps:$4 sm:$0xff]  }
 0x1c8   : > { %2581 = vmatprep.subr.bf16.mxu0 %v11942_v24  ;;  %7082 = vmatprep.subr.bf16.mxu1 %v11942_v24  ;;  %v12032_v24 = vld [vmem:[%s14074_s1 + $0x7f0] ss:$8 sps:$4 sm:$0xff]  }
 0x1cb   : > { %2582 = vmatpush1.bf16.msra.mxu0 %v11940_v25  ;;  %7083 = vmatpush1.bf16.msra.mxu1 %v11940_v25  ;;  %v12037_v25 = vld [vmem:[%s14074_s1 + $0x804] ss:$8 sps:$4 sm:$0xff]  }
 0x1cc   : > { %2583 = vmatprep.subr.bf16.mxu0 %v11950_v26  ;;  %7084 = vmatprep.subr.bf16.mxu1 %v11950_v26  ;;  %v12062_v26 = vld [vmem:[%s12520_s17 + $0x100] ss:$20 sps:$4 sm:$0xff]  }
 0x1cf   : > { %2584 = vmatpush1.bf16.msra.mxu0 %v11948_v27  ;;  %7085 = vmatpush1.bf16.msra.mxu1 %v11948_v27  ;;  %v12063_v27 = vld [vmem:[%s12520_s17 + $0x1c8] ss:$20 sps:$4 sm:$0xff]  }
 0x1d0   : > { %2585 = vmatprep.subr.bf16.mxu0 %v11954_v28  ;;  %7086 = vmatprep.subr.bf16.mxu1 %v11954_v28  ;;  %v12035_v28 = vld [vmem:[%s14074_s1 + $0x800] ss:$8 sps:$4 sm:$0xff]  }
 0x1d3   : > { %2586 = vmatpush1.bf16.msra.mxu0 %v11952_v29  ;;  %7087 = vmatpush1.bf16.msra.mxu1 %v11952_v29  ;;  %v12042_v29 = vld [vmem:[%s14074_s1 + $0x814] ss:$8 sps:$4 sm:$0xff]  }
 0x1d4   : > { %2638 = vmatprep.subr.bf16.mxu0 %v11963_v63  ;;  %7139 = vmatprep.subr.bf16.mxu1 %v11963_v63  ;;  %v12069_v63 = vld [vmem:[%s12520_s17 + $0x7c] ss:$20 sps:$4 sm:$0xff]  }
 0x1d6   : > { %2588 = vmatmul.mubr.bf16.vlgmr.msra.gmra.mrb[0].mxu0 %v11955_v30  ;;  %7089 = vmatmul.mubr.bf16.vlgmr.msra.gmra.mrb[0].mxu1 %v11958_v31  ;;  %v12075_v30 = vld [vmem:[%s12520_s17 + $0x144] ss:$20 sps:$4 sm:$0xff]  }
 0x1d7   : > { %2639 = vmatpush1.bf16.msra.mxu0 %v11961_v32  ;;  %7140 = vmatpush1.bf16.msra.mxu1 %v11961_v32  ;;  %v12040_v31 = vld [vmem:[%s14074_s1 + $0x810] ss:$8 sps:$4 sm:$0xff]   ;;  %v12045_v32 = vld [vmem:[%s14074_s1 + $0x824] ss:$8 sps:$4 sm:$0xff]  }
 0x1d8   : > { %2640 = vmatprep.subr.bf16.mxu0 %v11966_v33  ;;  %7141 = vmatprep.subr.bf16.mxu1 %v11966_v33  ;;  %v12043_v33 = vld [vmem:[%s14074_s1 + $0x820] ss:$8 sps:$4 sm:$0xff]  }
 0x1d9   : > { %2597 = vmatprep.mubr.bf16.mxu0 %v11967_v34  ;;  %7098 = vmatprep.mubr.bf16.mxu1 %v11969_v35  ;;  %v12050_v34 = vld [vmem:[%s14074_s1 + $0x834] ss:$8 sps:$4 sm:$0xff]   ;;  %v12048_v35 = vld [vmem:[%s14074_s1 + $0x830] ss:$8 sps:$4 sm:$0xff]  }
 0x1db   : > { %2641 = vmatpush1.bf16.msra.mxu0 %v11964_v36  ;;  %7142 = vmatpush1.bf16.msra.mxu1 %v11964_v36  ;;  %v12053_v36 = vld [vmem:[%s14074_s1 + $0x844] ss:$8 sps:$4 sm:$0xff]  }
 0x1dc   : > { %2642 = vmatprep.subr.bf16.mxu0 %v11975_v37  ;;  %7143 = vmatprep.subr.bf16.mxu1 %v11975_v37  ;;  %v12051_v37 = vld [vmem:[%s14074_s1 + $0x840] ss:$8 sps:$4 sm:$0xff]  }
 0x1de   : > { %2598 = vmatmul.mubr.bf16.gmra.mrb[4].mxu0 %v11971_v38  ;;  %7099 = vmatmul.mubr.bf16.gmra.mrb[4].mxu1 %v11972_v39  ;;  %v12058_v38 = vld [vmem:[%s14074_s1 + $0x854] ss:$8 sps:$4 sm:$0xff]   ;;  %v12056_v39 = vld [vmem:[%s14074_s1 + $0x850] ss:$8 sps:$4 sm:$0xff]  }
 0x1df   : > { %2643 = vmatpush1.bf16.msra.mxu0 %v11973_v40  ;;  %7144 = vmatpush1.bf16.msra.mxu1 %v11973_v40  ;;  %v12061_v40 = vld [vmem:[%s14074_s1 + $0x864] ss:$8 sps:$4 sm:$0xff]  }
 0x1e0   : > { %2607 = vmatprep.mubr.bf16.mxu0 %v11976_v41  ;;  %2644 = vmatprep.subr.bf16.mxu0 %v11980_v42  ;;  %v12059_v41 = vld [vmem:[%s14074_s1 + $0x860] ss:$8 sps:$4 sm:$0xff]  }
 0x1e1   : > { %7108 = vmatprep.mubr.bf16.mxu1 %v11981_v43  ;;  %7145 = vmatprep.subr.bf16.mxu1 %v11980_v42  ;;  %v12066_v42 = vld [vmem:[%s14074_s1 + $0x874] ss:$8 sps:$4 sm:$0xff]   ;;  %v12064_v43 = vld [vmem:[%s14074_s1 + $0x870] ss:$8 sps:$4 sm:$0xff]  }
 0x1e3   : > { %2645 = vmatpush1.bf16.msra.mxu0 %v11978_v44  ;;  %7146 = vmatpush1.bf16.msra.mxu1 %v11978_v44  ;;  %v12072_v44 = vld [vmem:[%s14074_s1 + $0x884] ss:$8 sps:$4 sm:$0xff]  }
 0x1e4   : > { %2646 = vmatprep.subr.bf16.mxu0 %v11987_v45  ;;  %7147 = vmatprep.subr.bf16.mxu1 %v11987_v45  ;;  %v12067_v45 = vld [vmem:[%s12520_s17 + $0x78] ss:$20 sps:$4 sm:$0xff]  }
 0x1e6   : > { %2608 = vmatmul.mubr.bf16.gmra.mrb[8].mxu0 %v11983_v46  ;;  %7109 = vmatmul.mubr.bf16.gmra.mrb[8].mxu1 %v11984_v47  ;;  %v12073_v46 = vld [vmem:[%s12520_s17 + $0x140] ss:$20 sps:$4 sm:$0xff]  }
 0x1e7   : > { %2647 = vmatpush1.bf16.msra.mxu0 %v11985_v48  ;;  %7148 = vmatpush1.bf16.msra.mxu1 %v11985_v48  ;;  %v12070_v47 = vld [vmem:[%s14074_s1 + $0x880] ss:$8 sps:$4 sm:$0xff]   ;;  %v12078_v48 = vld [vmem:[%s14074_s1 + $0x894] ss:$8 sps:$4 sm:$0xff]  }
 0x1e8   : > { %2617 = vmatprep.mubr.bf16.mxu0 %v11988_v49  ;;  %7118 = vmatprep.mubr.bf16.mxu1 %v11990_v50  ;;  %v12097_v49 = vld [vmem:[%s12520_s17 + $0xa4] ss:$20 sps:$4 sm:$0xff]   ;;  %v12099_v50 = vld [vmem:[%s12520_s17 + $0x16c] ss:$20 sps:$4 sm:$0xff]  }
 0x1e9   : > { %2648 = vmatprep.subr.bf16.mxu0 %v11996_v51  ;;  %7149 = vmatprep.subr.bf16.mxu1 %v11996_v51  ;;  %v12076_v51 = vld [vmem:[%s14074_s1 + $0x890] ss:$8 sps:$4 sm:$0xff]  }
 0x1eb   : > { %2649 = vmatpush1.bf16.msra.mxu0 %v11994_v52  ;;  %7150 = vmatpush1.bf16.msra.mxu1 %v11994_v52  ;;  %v12081_v52 = vld [vmem:[%s14074_s1 + $0x8a4] ss:$8 sps:$4 sm:$0xff]  }
 0x1ec   : > { %2650 = vmatprep.subr.bf16.mxu0 %v11999_v53  ;;  %7151 = vmatprep.subr.bf16.mxu1 %v11999_v53  ;;  %v12101_v53 = vld [vmem:[%s12520_s17 + $0xa0] ss:$20 sps:$4 sm:$0xff]  }
 0x1ee   : > { %2618 = vmatmul.mubr.bf16.gmra.mrb[12].mxu0 %v11992_v54  ;;  %7119 = vmatmul.mubr.bf16.gmra.mrb[12].mxu1 %v11993_v55  ;;  %v12105_v54 = vld [vmem:[%s12520_s17 + $0x168] ss:$20 sps:$4 sm:$0xff]  }
 0x1ef   : > { %2627 = vmatprep.mubr.bf16.mxu0 %v12000_v58  ;;  %2651 = vmatpush1.bf16.msra.mxu0 %v11997_v56  ;;  %v12079_v55 = vld [vmem:[%s14074_s1 + $0x8a0] ss:$8 sps:$4 sm:$0xff]  }
 0x1f0   : > { %7128 = vmatprep.mubr.bf16.mxu1 %v12002_v59  ;;  %7152 = vmatpush1.bf16.msra.mxu1 %v11997_v56  ;;  %v12084_v56 = vld [vmem:[%s14074_s1 + $0x8b4] ss:$8 sps:$4 sm:$0xff]   ;;  %v12109_v58 = vld [vmem:[%s12520_s17 + $0xcc] ss:$20 sps:$4 sm:$0xff]  }
 0x1f1   : > { %2652 = vmatprep.subr.bf16.mxu0 %v12008_v60  ;;  %7153 = vmatprep.subr.bf16.mxu1 %v12008_v60  ;;  %v12111_v59 = vld [vmem:[%s12520_s17 + $0x194] ss:$20 sps:$4 sm:$0xff]   ;;  %v12082_v60 = vld [vmem:[%s14074_s1 + $0x8b0] ss:$8 sps:$4 sm:$0xff]  }
 0x1f3   : > { %2653 = vmatpush1.bf16.msra.mxu0 %v12006_v61 }
 0x1f4   : > { %7154 = vmatpush1.bf16.msra.mxu1 %v12006_v61  ;;  %3382 = vmatprep.subr.bf16.mxu0 %v12011_v62  ;;  %v12087_v61 = vld [vmem:[%s14074_s1 + $0x8c4] ss:$8 sps:$4 sm:$0xff]  }
 0x1f5   : > { %7882 = vmatprep.subr.bf16.mxu1 %v12011_v62  ;;  %v12113_v62 = vld [vmem:[%s12520_s17 + $0xc8] ss:$20 sps:$4 sm:$0xff]  }
 0x1f6   : > { %2628 = vmatmul.mubr.bf16.gmra.mrb[16].mxu0 %v12004_v0  ;;  %7129 = vmatmul.mubr.bf16.gmra.mrb[16].mxu1 %v12005_v1  ;;  %v12117_v0 = vld [vmem:[%s12520_s17 + $0x190] ss:$20 sps:$4 sm:$0xff]   ;;  %v12085_v1 = vld [vmem:[%s14074_s1 + $0x8c0] ss:$8 sps:$4 sm:$0xff]  }
 0x1f7   : > { %2670 = vmatprep.mubr.bf16.mxu0 %v12450_v57  ;;  %7171 = vmatprep.mubr.bf16.mxu1 %v12450_v57 }
 0x1fe   : > { %2671 = vmatmul.mubr.bf16.vlgmr.msra.gmra.mrb[0].mxu0 %v12012_v2  ;;  %7172 = vmatmul.mubr.bf16.vlgmr.msra.gmra.mrb[0].mxu1 %v12013_v3  ;;  %v12090_v2 = vld [vmem:[%s14074_s1 + $0x8d4] ss:$8 sps:$4 sm:$0xff]  }
 0x1ff   : > { %3383 = vmatpush1.bf16.msra.mxu0 %v12009_v4  ;;  %7883 = vmatpush1.bf16.msra.mxu1 %v12009_v4  ;;  %v12121_v3 = vld [vmem:[%s12520_s17 + $0xf4] ss:$20 sps:$4 sm:$0xff]   ;;  %v12123_v4 = vld [vmem:[%s12520_s17 + $0x1bc] ss:$20 sps:$4 sm:$0xff]  }
 0x200   : > { %3384 = vmatprep.subr.bf16.mxu0 %v12016_v5  ;;  %7884 = vmatprep.subr.bf16.mxu1 %v12016_v5  ;;  %v12088_v5 = vld [vmem:[%s14074_s1 + $0x8d0] ss:$8 sps:$4 sm:$0xff]  }
 0x201   : > { %2680 = vmatprep.mubr.bf16.mxu0 %v12450_v57  ;;  %7181 = vmatprep.mubr.bf16.mxu1 %v12450_v57 }
 0x203   : > { %3385 = vmatpush1.bf16.msra.mxu0 %v12014_v6  ;;  %7885 = vmatpush1.bf16.msra.mxu1 %v12014_v6  ;;  %v12093_v6 = vld [vmem:[%s14074_s1 + $0x8e4] ss:$8 sps:$4 sm:$0xff]  }
 0x204   : > { %3386 = vmatprep.subr.bf16.mxu0 %v12019_v7  ;;  %7886 = vmatprep.subr.bf16.mxu1 %v12019_v7  ;;  %v12125_v7 = vld [vmem:[%s12520_s17 + $0xf0] ss:$20 sps:$4 sm:$0xff]  }
 0x206   : > { %2681 = vmatmul.mubr.bf16.gmra.mrb[4].mxu0 %v12038_v8  ;;  %7182 = vmatmul.mubr.bf16.gmra.mrb[4].mxu1 %v12039_v9  ;;  %v12129_v8 = vld [vmem:[%s12520_s17 + $0x1b8] ss:$20 sps:$4 sm:$0xff]   ;;  %v12091_v9 = vld [vmem:[%s14074_s1 + $0x8e0] ss:$8 sps:$4 sm:$0xff]  }
 0x207   : > { %3387 = vmatpush1.bf16.msra.mxu0 %v12017_v10  ;;  %7887 = vmatpush1.bf16.msra.mxu1 %v12017_v10  ;;  %v12096_v10 = vld [vmem:[%s14074_s1 + $0x8f4] ss:$8 sps:$4 sm:$0xff]  }
 0x208   : > { %3388 = vmatprep.subr.bf16.mxu0 %v12022_v11  ;;  %7888 = vmatprep.subr.bf16.mxu1 %v12022_v11  ;;  %v12133_v11 = vld [vmem:[%s12520_s17 + $0x11c] ss:$20 sps:$4 sm:$0xff]  }
 0x209   : > { %2690 = vmatprep.mubr.bf16.mxu0 %v12450_v57  ;;  %7191 = vmatprep.mubr.bf16.mxu1 %v12450_v57 }
 0x20b   : > { %3389 = vmatpush1.bf16.msra.mxu0 %v12020_v12  ;;  %7889 = vmatpush1.bf16.msra.mxu1 %v12020_v12  ;;  %v12135_v12 = vld [vmem:[%s12520_s17 + $0x1e4] ss:$20 sps:$4 sm:$0xff]  }
 0x20c   : > { %3390 = vmatprep.subr.bf16.mxu0 %v12025_v13  ;;  %7890 = vmatprep.subr.bf16.mxu1 %v12025_v13  ;;  %v12094_v13 = vld [vmem:[%s14074_s1 + $0x8f0] ss:$8 sps:$4 sm:$0xff]  }
 0x20e   : > { %2691 = vmatmul.mubr.bf16.gmra.mrb[8].mxu0 %v12046_v14  ;;  %7192 = vmatmul.mubr.bf16.gmra.mrb[8].mxu1 %v12047_v15  ;;  %v12104_v14 = vld [vmem:[%s14074_s1 + $0x904] ss:$8 sps:$4 sm:$0xff]  }
 0x20f   : > { %3391 = vmatpush1.bf16.msra.mxu0 %v12023_v16  ;;  %7891 = vmatpush1.bf16.msra.mxu1 %v12023_v16  ;;  %v12137_v15 = vld [vmem:[%s12520_s17 + $0x118] ss:$20 sps:$4 sm:$0xff]   ;;  %v12141_v16 = vld [vmem:[%s12520_s17 + $0x1e0] ss:$20 sps:$4 sm:$0xff]  }
 0x210   : > { %3392 = vmatprep.subr.bf16.mxu0 %v12028_v17  ;;  %7892 = vmatprep.subr.bf16.mxu1 %v12028_v17  ;;  %v12102_v17 = vld [vmem:[%s14074_s1 + $0x900] ss:$8 sps:$4 sm:$0xff]  }
 0x211   : > { %2700 = vmatprep.mubr.bf16.mxu0 %v12450_v57  ;;  %7201 = vmatprep.mubr.bf16.mxu1 %v12450_v57 }
 0x213   : > { %3393 = vmatpush1.bf16.msra.mxu0 %v12026_v18  ;;  %7893 = vmatpush1.bf16.msra.mxu1 %v12026_v18  ;;  %v12108_v18 = vld [vmem:[%s14074_s1 + $0x914] ss:$8 sps:$4 sm:$0xff]  }
 0x214   : > { %3394 = vmatprep.subr.bf16.mxu0 %v12031_v19  ;;  %7894 = vmatprep.subr.bf16.mxu1 %v12031_v19  ;;  %v12147_v19 = vld [vmem:[%s12520_s17 + $0x84] ss:$20 sps:$4 sm:$0xff]  }
 0x216   : > { %2701 = vmatmul.mubr.bf16.gmra.mrb[12].mxu0 %v12054_v20  ;;  %7202 = vmatmul.mubr.bf16.gmra.mrb[12].mxu1 %v12055_v21  ;;  %v12150_v20 = vld [vmem:[%s12520_s17 + $0x14c] ss:$20 sps:$4 sm:$0xff]   ;;  %v12106_v21 = vld [vmem:[%s14074_s1 + $0x910] ss:$8 sps:$4 sm:$0xff]  }
 0x217   : > { %3395 = vmatpush1.bf16.msra.mxu0 %v12029_v22  ;;  %7895 = vmatpush1.bf16.msra.mxu1 %v12029_v22  ;;  %v12116_v22 = vld [vmem:[%s14074_s1 + $0x924] ss:$8 sps:$4 sm:$0xff]  }
 0x218   : > { %3396 = vmatprep.subr.bf16.mxu0 %v12034_v23  ;;  %7896 = vmatprep.subr.bf16.mxu1 %v12034_v23  ;;  %v12114_v23 = vld [vmem:[%s14074_s1 + $0x920] ss:$8 sps:$4 sm:$0xff]  }
 0x219   : > { %2710 = vmatprep.mubr.bf16.mxu0 %v12450_v57  ;;  %7211 = vmatprep.mubr.bf16.mxu1 %v12450_v57 }
 0x21b   : > { %3397 = vmatpush1.bf16.msra.mxu0 %v12032_v24  ;;  %7897 = vmatpush1.bf16.msra.mxu1 %v12032_v24  ;;  %v12120_v24 = vld [vmem:[%s14074_s1 + $0x934] ss:$8 sps:$4 sm:$0xff]  }
 0x21c   : > { %3398 = vmatprep.subr.bf16.mxu0 %v12037_v25  ;;  %7898 = vmatprep.subr.bf16.mxu1 %v12037_v25  ;;  %v12118_v25 = vld [vmem:[%s14074_s1 + $0x930] ss:$8 sps:$4 sm:$0xff]  }
 0x21e   : > { %2711 = vmatmul.mubr.bf16.gmra.mrb[16].mxu0 %v12062_v26  ;;  %7212 = vmatmul.mubr.bf16.gmra.mrb[16].mxu1 %v12063_v27  ;;  %v12128_v26 = vld [vmem:[%s14074_s1 + $0x944] ss:$8 sps:$4 sm:$0xff]   ;;  %v12126_v27 = vld [vmem:[%s14074_s1 + $0x940] ss:$8 sps:$4 sm:$0xff]  }
 0x21f   : > { %3399 = vmatpush1.bf16.msra.mxu0 %v12035_v28  ;;  %7899 = vmatpush1.bf16.msra.mxu1 %v12035_v28  ;;  %v12132_v28 = vld [vmem:[%s14074_s1 + $0x954] ss:$8 sps:$4 sm:$0xff]  }
 0x220   : > { %3400 = vmatprep.subr.bf16.mxu0 %v12042_v29  ;;  %7900 = vmatprep.subr.bf16.mxu1 %v12042_v29  ;;  %v12130_v29 = vld [vmem:[%s14074_s1 + $0x950] ss:$8 sps:$4 sm:$0xff]  }
 0x221   : > { %3414 = vmatprep.mubr.bf16.mxu0 %v12069_v63  ;;  %7914 = vmatprep.mubr.bf16.mxu1 %v12075_v30  ;;  %v12140_v63 = vld [vmem:[%s14074_s1 + $0x964] ss:$8 sps:$4 sm:$0xff]   ;;  %v12138_v30 = vld [vmem:[%s14074_s1 + $0x960] ss:$8 sps:$4 sm:$0xff]  }
 0x223   : > { %3401 = vmatpush1.bf16.msra.mxu0 %v12040_v31  ;;  %7901 = vmatpush1.bf16.msra.mxu1 %v12040_v31  ;;  %v12144_v31 = vld [vmem:[%s14074_s1 + $0x974] ss:$8 sps:$4 sm:$0xff]  }
 0x224   : > { %3402 = vmatprep.subr.bf16.mxu0 %v12045_v32  ;;  %7902 = vmatprep.subr.bf16.mxu1 %v12045_v32  ;;  %v12142_v32 = vld [vmem:[%s14074_s1 + $0x970] ss:$8 sps:$4 sm:$0xff]  }
 0x227   : > { %3403 = vmatpush1.bf16.msra.mxu0 %v12043_v33  ;;  %7903 = vmatpush1.bf16.msra.mxu1 %v12043_v33  ;;  %v12153_v33 = vld [vmem:[%s14074_s1 + $0x984] ss:$8 sps:$4 sm:$0xff]  }
 0x228   : > { %3404 = vmatprep.subr.bf16.mxu0 %v12050_v34  ;;  %7904 = vmatprep.subr.bf16.mxu1 %v12050_v34  ;;  %v12145_v34 = vld [vmem:[%s12520_s17 + $0x80] ss:$20 sps:$4 sm:$0xff]  }
 0x22b   : > { %3405 = vmatpush1.bf16.msra.mxu0 %v12048_v35  ;;  %7905 = vmatpush1.bf16.msra.mxu1 %v12048_v35  ;;  %v12148_v35 = vld [vmem:[%s12520_s17 + $0x148] ss:$20 sps:$4 sm:$0xff]  }
 0x22c   : > { %3406 = vmatprep.subr.bf16.mxu0 %v12053_v36  ;;  %7906 = vmatprep.subr.bf16.mxu1 %v12053_v36  ;;  %v12151_v36 = vld [vmem:[%s14074_s1 + $0x980] ss:$8 sps:$4 sm:$0xff]  }
 0x22f   : > { %3407 = vmatpush1.bf16.msra.mxu0 %v12051_v37  ;;  %7907 = vmatpush1.bf16.msra.mxu1 %v12051_v37  ;;  %v12156_v37 = vld [vmem:[%s14074_s1 + $0x994] ss:$8 sps:$4 sm:$0xff]  }
 0x230   : > { %3408 = vmatprep.subr.bf16.mxu0 %v12058_v38  ;;  %7908 = vmatprep.subr.bf16.mxu1 %v12058_v38  ;;  %v12157_v38 = vld [vmem:[%s12520_s17 + $0xac] ss:$20 sps:$4 sm:$0xff]  }
 0x233   : > { %3409 = vmatpush1.bf16.msra.mxu0 %v12056_v39  ;;  %7909 = vmatpush1.bf16.msra.mxu1 %v12056_v39  ;;  %v12159_v39 = vld [vmem:[%s12520_s17 + $0x174] ss:$20 sps:$4 sm:$0xff]  }
 0x234   : > { %3410 = vmatprep.subr.bf16.mxu0 %v12061_v40  ;;  %7910 = vmatprep.subr.bf16.mxu1 %v12061_v40  ;;  %v12154_v40 = vld [vmem:[%s14074_s1 + $0x990] ss:$8 sps:$4 sm:$0xff]  }
 0x237   : > { %3411 = vmatpush1.bf16.msra.mxu0 %v12059_v41  ;;  %7911 = vmatpush1.bf16.msra.mxu1 %v12059_v41  ;;  %v12165_v41 = vld [vmem:[%s14074_s1 + $0x9a4] ss:$8 sps:$4 sm:$0xff]  }
 0x238   : > { %3412 = vmatprep.subr.bf16.mxu0 %v12066_v42  ;;  %7912 = vmatprep.subr.bf16.mxu1 %v12066_v42  ;;  %v12161_v42 = vld [vmem:[%s12520_s17 + $0xa8] ss:$20 sps:$4 sm:$0xff]  }
 0x23b   : > { %3413 = vmatpush1.bf16.msra.mxu0 %v12064_v43  ;;  %7913 = vmatpush1.bf16.msra.mxu1 %v12064_v43  ;;  %v12162_v43 = vld [vmem:[%s12520_s17 + $0x170] ss:$20 sps:$4 sm:$0xff]  }
 0x23c   : > { %3465 = vmatprep.subr.bf16.mxu0 %v12072_v44  ;;  %7965 = vmatprep.subr.bf16.mxu1 %v12072_v44  ;;  %v12163_v44 = vld [vmem:[%s14074_s1 + $0x9a0] ss:$8 sps:$4 sm:$0xff]  }
 0x23e   : > { %3415 = vmatmul.mubr.bf16.vlgmr.msra.gmra.mrb[0].mxu0 %v12067_v45  ;;  %7915 = vmatmul.mubr.bf16.vlgmr.msra.gmra.mrb[0].mxu1 %v12073_v46  ;;  %v12166_v45 = vld [vmem:[%s12520_s17 + $0xd4] ss:$20 sps:$4 sm:$0xff]  }
 0x23f   : > { %3466 = vmatpush1.bf16.msra.mxu0 %v12070_v47  ;;  %7966 = vmatpush1.bf16.msra.mxu1 %v12070_v47  ;;  %v12170_v46 = vld [vmem:[%s14074_s1 + $0x9b4] ss:$8 sps:$4 sm:$0xff]  }
 0x240   : > { %3467 = vmatprep.subr.bf16.mxu0 %v12078_v48  ;;  %7967 = vmatprep.subr.bf16.mxu1 %v12078_v48  ;;  %v12171_v47 = vld [vmem:[%s12520_s17 + $0x19c] ss:$20 sps:$4 sm:$0xff]  }
 0x241   : > { %3424 = vmatprep.mubr.bf16.mxu0 %v12097_v49  ;;  %7924 = vmatprep.mubr.bf16.mxu1 %v12099_v50  ;;  %v12168_v48 = vld [vmem:[%s14074_s1 + $0x9b0] ss:$8 sps:$4 sm:$0xff]   ;;  %v12177_v49 = vld [vmem:[%s14074_s1 + $0x9c4] ss:$8 sps:$4 sm:$0xff]  }
 0x242   : > { %v12173_v50 = vld [vmem:[%s12520_s17 + $0xd0] ss:$20 sps:$4 sm:$0xff]  }
 0x243   : > { %3468 = vmatpush1.bf16.msra.mxu0 %v12076_v51  ;;  %7968 = vmatpush1.bf16.msra.mxu1 %v12076_v51  ;;  %v12174_v51 = vld [vmem:[%s12520_s17 + $0x198] ss:$20 sps:$4 sm:$0xff]  }
 0x244   : > { %3469 = vmatprep.subr.bf16.mxu0 %v12081_v52  ;;  %7969 = vmatprep.subr.bf16.mxu1 %v12081_v52  ;;  %v12175_v52 = vld [vmem:[%s14074_s1 + $0x9c0] ss:$8 sps:$4 sm:$0xff]  }
 0x246   : > { %3425 = vmatmul.mubr.bf16.gmra.mrb[4].mxu0 %v12101_v53  ;;  %7925 = vmatmul.mubr.bf16.gmra.mrb[4].mxu1 %v12105_v54  ;;  %v12178_v53 = vld [vmem:[%s12520_s17 + $0xfc] ss:$20 sps:$4 sm:$0xff]   ;;  %v12180_v54 = vld [vmem:[%s12520_s17 + $0x1c4] ss:$20 sps:$4 sm:$0xff]  }
 0x247   : > { %3470 = vmatpush1.bf16.msra.mxu0 %v12079_v55  ;;  %7970 = vmatpush1.bf16.msra.mxu1 %v12079_v55  ;;  %v12186_v55 = vld [vmem:[%s14074_s1 + $0x9d4] ss:$8 sps:$4 sm:$0xff]  }
 0x248   : > { %3471 = vmatprep.subr.bf16.mxu0 %v12084_v56  ;;  %7971 = vmatprep.subr.bf16.mxu1 %v12084_v56  ;;  %v12184_v56 = vld [vmem:[%s14074_s1 + $0x9d0] ss:$8 sps:$4 sm:$0xff]  }
 0x249   : > { %3434 = vmatprep.mubr.bf16.mxu0 %v12109_v58  ;;  %7934 = vmatprep.mubr.bf16.mxu1 %v12111_v59  ;;  %v12189_v58 = vld [vmem:[%s14074_s1 + $0x9e4] ss:$8 sps:$4 sm:$0xff]  }
 0x24a   : > { %v12182_v59 = vld [vmem:[%s12520_s17 + $0xf8] ss:$20 sps:$4 sm:$0xff]  }
 0x24b   : > { %3472 = vmatpush1.bf16.msra.mxu0 %v12082_v60  ;;  %7972 = vmatpush1.bf16.msra.mxu1 %v12082_v60  ;;  %v12183_v60 = vld [vmem:[%s12520_s17 + $0x1c0] ss:$20 sps:$4 sm:$0xff]  }
 0x24c   : > { %3473 = vmatprep.subr.bf16.mxu0 %v12087_v61  ;;  %7973 = vmatprep.subr.bf16.mxu1 %v12087_v61  ;;  %v12187_v61 = vld [vmem:[%s14074_s1 + $0x9e0] ss:$8 sps:$4 sm:$0xff]  }
 0x24e   : > { %3435 = vmatmul.mubr.bf16.gmra.mrb[8].mxu0 %v12113_v62  ;;  %7935 = vmatmul.mubr.bf16.gmra.mrb[8].mxu1 %v12117_v0  ;;  %v12190_v62 = vld [vmem:[%s12520_s17 + $0x124] ss:$20 sps:$4 sm:$0xff]   ;;  %v12192_v0 = vld [vmem:[%s12520_s17 + $0x1ec] ss:$20 sps:$4 sm:$0xff]  }
 0x24f   : > { %3474 = vmatpush1.bf16.msra.mxu0 %v12085_v1  ;;  %7974 = vmatpush1.bf16.msra.mxu1 %v12085_v1  ;;  %v12198_v1 = vld [vmem:[%s14074_s1 + $0x9f4] ss:$8 sps:$4 sm:$0xff]  }
 0x250   : > { %3475 = vmatprep.subr.bf16.mxu0 %v12090_v2  ;;  %7975 = vmatprep.subr.bf16.mxu1 %v12090_v2  ;;  %v12196_v2 = vld [vmem:[%s14074_s1 + $0x9f0] ss:$8 sps:$4 sm:$0xff]  }
 0x251   : > { %3444 = vmatprep.mubr.bf16.mxu0 %v12121_v3  ;;  %7944 = vmatprep.mubr.bf16.mxu1 %v12123_v4  ;;  %v12201_v3 = vld [vmem:[%s14074_s1 + $0xa04] ss:$8 sps:$4 sm:$0xff]   ;;  %v12194_v4 = vld [vmem:[%s12520_s17 + $0x120] ss:$20 sps:$4 sm:$0xff]  }
 0x253   : > { %3476 = vmatpush1.bf16.msra.mxu0 %v12088_v5  ;;  %7976 = vmatpush1.bf16.msra.mxu1 %v12088_v5  ;;  %v12195_v5 = vld [vmem:[%s12520_s17 + $0x1e8] ss:$20 sps:$4 sm:$0xff]  }
 0x254   : > { %3477 = vmatprep.subr.bf16.mxu0 %v12093_v6  ;;  %7977 = vmatprep.subr.bf16.mxu1 %v12093_v6  ;;  %v12202_v6 = vld [vmem:[%s12520_s17 + $0x88] ss:$20 sps:$4 sm:$0xff]  }
 0x256   : > { %3445 = vmatmul.mubr.bf16.gmra.mrb[12].mxu0 %v12125_v7  ;;  %7945 = vmatmul.mubr.bf16.gmra.mrb[12].mxu1 %v12129_v8  ;;  %v12203_v7 = vld [vmem:[%s12520_s17 + $0x150] ss:$20 sps:$4 sm:$0xff]   ;;  %v12199_v8 = vld [vmem:[%s14074_s1 + $0xa00] ss:$8 sps:$4 sm:$0xff]  }
 0x257   : > { %3478 = vmatpush1.bf16.msra.mxu0 %v12091_v9  ;;  %7978 = vmatpush1.bf16.msra.mxu1 %v12091_v9  ;;  %v12206_v9 = vld [vmem:[%s14074_s1 + $0xa14] ss:$8 sps:$4 sm:$0xff]  }
 0x258   : > { %3479 = vmatprep.subr.bf16.mxu0 %v12096_v10  ;;  %7979 = vmatprep.subr.bf16.mxu1 %v12096_v10  ;;  %v12204_v10 = vld [vmem:[%s14074_s1 + $0xa10] ss:$8 sps:$4 sm:$0xff]  }
 0x259   : > { %3454 = vmatprep.mubr.bf16.mxu0 %v12133_v11  ;;  %7954 = vmatprep.mubr.bf16.mxu1 %v12135_v12  ;;  %v12209_v11 = vld [vmem:[%s14074_s1 + $0xa24] ss:$8 sps:$4 sm:$0xff]  }
 0x25a   : > { %v12228_v12 = vld [vmem:[%s12520_s17 + $0xb0] ss:$20 sps:$4 sm:$0xff]  }
 0x25b   : > { %3480 = vmatpush1.bf16.msra.mxu0 %v12094_v13  ;;  %7980 = vmatpush1.bf16.msra.mxu1 %v12094_v13  ;;  %v12229_v13 = vld [vmem:[%s12520_s17 + $0x178] ss:$20 sps:$4 sm:$0xff]  }
 0x25c   : > { %3481 = vmatprep.subr.bf16.mxu0 %v12104_v14  ;;  %7981 = vmatprep.subr.bf16.mxu1 %v12104_v14  ;;  %v12207_v14 = vld [vmem:[%s14074_s1 + $0xa20] ss:$8 sps:$4 sm:$0xff]  }
 0x25e   : > { %3455 = vmatmul.mubr.bf16.gmra.mrb[16].mxu0 %v12137_v15  ;;  %7955 = vmatmul.mubr.bf16.gmra.mrb[16].mxu1 %v12141_v16  ;;  %v12212_v15 = vld [vmem:[%s14074_s1 + $0xa34] ss:$8 sps:$4 sm:$0xff]   ;;  %v12210_v16 = vld [vmem:[%s14074_s1 + $0xa30] ss:$8 sps:$4 sm:$0xff]  }
 0x25f   : > { %3482 = vmatpush1.bf16.msra.mxu0 %v12102_v17  ;;  %7982 = vmatpush1.bf16.msra.mxu1 %v12102_v17  ;;  %v12215_v17 = vld [vmem:[%s14074_s1 + $0xa44] ss:$8 sps:$4 sm:$0xff]  }
 0x260   : > { %3483 = vmatprep.subr.bf16.mxu0 %v12108_v18  ;;  %7983 = vmatprep.subr.bf16.mxu1 %v12108_v18  ;;  %v12236_v18 = vld [vmem:[%s12520_s17 + $0xd8] ss:$20 sps:$4 sm:$0xff]  }
 0x261   : > { %3497 = vmatprep.mubr.bf16.mxu0 %v12147_v19  ;;  %7997 = vmatprep.mubr.bf16.mxu1 %v12150_v20  ;;  %v12237_v19 = vld [vmem:[%s12520_s17 + $0x1a0] ss:$20 sps:$4 sm:$0xff]  }
 0x262   : > { %v12213_v20 = vld [vmem:[%s14074_s1 + $0xa40] ss:$8 sps:$4 sm:$0xff]  }
 0x263   : > { %3484 = vmatpush1.bf16.msra.mxu0 %v12106_v21  ;;  %7984 = vmatpush1.bf16.msra.mxu1 %v12106_v21  ;;  %v12218_v21 = vld [vmem:[%s14074_s1 + $0xa54] ss:$8 sps:$4 sm:$0xff]  }
 0x264   : > { %3485 = vmatprep.subr.bf16.mxu0 %v12116_v22  ;;  %7985 = vmatprep.subr.bf16.mxu1 %v12116_v22  ;;  %v12216_v22 = vld [vmem:[%s14074_s1 + $0xa50] ss:$8 sps:$4 sm:$0xff]  }
 0x267   : > { %3486 = vmatpush1.bf16.msra.mxu0 %v12114_v23  ;;  %7986 = vmatpush1.bf16.msra.mxu1 %v12114_v23  ;;  %v12221_v23 = vld [vmem:[%s14074_s1 + $0xa64] ss:$8 sps:$4 sm:$0xff]  }
 0x268   : > { %3487 = vmatprep.subr.bf16.mxu0 %v12120_v24  ;;  %7987 = vmatprep.subr.bf16.mxu1 %v12120_v24  ;;  %v12244_v24 = vld [vmem:[%s12520_s17 + $0x100] ss:$20 sps:$4 sm:$0xff]  }
 0x26b   : > { %3488 = vmatpush1.bf16.msra.mxu0 %v12118_v25  ;;  %7988 = vmatpush1.bf16.msra.mxu1 %v12118_v25  ;;  %v12245_v25 = vld [vmem:[%s12520_s17 + $0x1c8] ss:$20 sps:$4 sm:$0xff]  }
 0x26c   : > { %3489 = vmatprep.subr.bf16.mxu0 %v12128_v26  ;;  %7989 = vmatprep.subr.bf16.mxu1 %v12128_v26  ;;  %v12219_v26 = vld [vmem:[%s14074_s1 + $0xa60] ss:$8 sps:$4 sm:$0xff]  }
 0x26f   : > { %3490 = vmatpush1.bf16.msra.mxu0 %v12126_v27  ;;  %7990 = vmatpush1.bf16.msra.mxu1 %v12126_v27  ;;  %v12224_v27 = vld [vmem:[%s14074_s1 + $0xa74] ss:$8 sps:$4 sm:$0xff]  }
 0x270   : > { %3491 = vmatprep.subr.bf16.mxu0 %v12132_v28  ;;  %7991 = vmatprep.subr.bf16.mxu1 %v12132_v28  ;;  %v12222_v28 = vld [vmem:[%s14074_s1 + $0xa70] ss:$8 sps:$4 sm:$0xff]  }
 0x273   : > { %3492 = vmatpush1.bf16.msra.mxu0 %v12130_v29  ;;  %7992 = vmatpush1.bf16.msra.mxu1 %v12130_v29  ;;  %v12227_v29 = vld [vmem:[%s14074_s1 + $0xa84] ss:$8 sps:$4 sm:$0xff]  }
 0x274   : > { %3493 = vmatprep.subr.bf16.mxu0 %v12140_v63  ;;  %7993 = vmatprep.subr.bf16.mxu1 %v12140_v63  ;;  %v12252_v63 = vld [vmem:[%s12520_s17 + $0x128] ss:$20 sps:$4 sm:$0xff]  }
 0x277   : > { %3494 = vmatpush1.bf16.msra.mxu0 %v12138_v30  ;;  %7994 = vmatpush1.bf16.msra.mxu1 %v12138_v30  ;;  %v12253_v30 = vld [vmem:[%s12520_s17 + $0x1f0] ss:$20 sps:$4 sm:$0xff]  }
 0x278   : > { %3495 = vmatprep.subr.bf16.mxu0 %v12144_v31  ;;  %7995 = vmatprep.subr.bf16.mxu1 %v12144_v31  ;;  %v12225_v31 = vld [vmem:[%s14074_s1 + $0xa80] ss:$8 sps:$4 sm:$0xff]  }
 0x27b   : > { %3496 = vmatpush1.bf16.msra.mxu0 %v12142_v32  ;;  %7996 = vmatpush1.bf16.msra.mxu1 %v12142_v32  ;;  %v12232_v32 = vld [vmem:[%s14074_s1 + $0xa94] ss:$8 sps:$4 sm:$0xff]  }
 0x27c   : > { %3548 = vmatprep.subr.bf16.mxu0 %v12153_v33  ;;  %8048 = vmatprep.subr.bf16.mxu1 %v12153_v33  ;;  %v12259_v33 = vld [vmem:[%s12520_s17 + $0xa4] ss:$20 sps:$4 sm:$0xff]  }
 0x27e   : > { %3498 = vmatmul.mubr.bf16.vlgmr.msra.gmra.mrb[0].mxu0 %v12145_v34  ;;  %7998 = vmatmul.mubr.bf16.vlgmr.msra.gmra.mrb[0].mxu1 %v12148_v35  ;;  %v12265_v34 = vld [vmem:[%s12520_s17 + $0x16c] ss:$20 sps:$4 sm:$0xff]   ;;  %v12230_v35 = vld [vmem:[%s14074_s1 + $0xa90] ss:$8 sps:$4 sm:$0xff]  }
 0x27f   : > { %3549 = vmatpush1.bf16.msra.mxu0 %v12151_v36  ;;  %8049 = vmatpush1.bf16.msra.mxu1 %v12151_v36  ;;  %v12235_v36 = vld [vmem:[%s14074_s1 + $0xaa4] ss:$8 sps:$4 sm:$0xff]  }
 0x280   : > { %3550 = vmatprep.subr.bf16.mxu0 %v12156_v37  ;;  %8050 = vmatprep.subr.bf16.mxu1 %v12156_v37  ;;  %v12233_v37 = vld [vmem:[%s14074_s1 + $0xaa0] ss:$8 sps:$4 sm:$0xff]  }
 0x281   : > { %3507 = vmatprep.mubr.bf16.mxu0 %v12157_v38  ;;  %8007 = vmatprep.mubr.bf16.mxu1 %v12159_v39  ;;  %v12240_v38 = vld [vmem:[%s14074_s1 + $0xab4] ss:$8 sps:$4 sm:$0xff]   ;;  %v12238_v39 = vld [vmem:[%s14074_s1 + $0xab0] ss:$8 sps:$4 sm:$0xff]  }
 0x283   : > { %3551 = vmatpush1.bf16.msra.mxu0 %v12154_v40  ;;  %8051 = vmatpush1.bf16.msra.mxu1 %v12154_v40  ;;  %v12243_v40 = vld [vmem:[%s14074_s1 + $0xac4] ss:$8 sps:$4 sm:$0xff]  }
 0x284   : > { %3552 = vmatprep.subr.bf16.mxu0 %v12165_v41  ;;  %8052 = vmatprep.subr.bf16.mxu1 %v12165_v41  ;;  %v12241_v41 = vld [vmem:[%s14074_s1 + $0xac0] ss:$8 sps:$4 sm:$0xff]  }
 0x286   : > { %3508 = vmatmul.mubr.bf16.gmra.mrb[4].mxu0 %v12161_v42  ;;  %8008 = vmatmul.mubr.bf16.gmra.mrb[4].mxu1 %v12162_v43  ;;  %v12248_v42 = vld [vmem:[%s14074_s1 + $0xad4] ss:$8 sps:$4 sm:$0xff]   ;;  %v12246_v43 = vld [vmem:[%s14074_s1 + $0xad0] ss:$8 sps:$4 sm:$0xff]  }
 0x287   : > { %3553 = vmatpush1.bf16.msra.mxu0 %v12163_v44  ;;  %8053 = vmatpush1.bf16.msra.mxu1 %v12163_v44  ;;  %v12251_v44 = vld [vmem:[%s14074_s1 + $0xae4] ss:$8 sps:$4 sm:$0xff]  }
 0x288   : > { %3517 = vmatprep.mubr.bf16.mxu0 %v12166_v45  ;;  %3554 = vmatprep.subr.bf16.mxu0 %v12170_v46  ;;  %v12249_v45 = vld [vmem:[%s14074_s1 + $0xae0] ss:$8 sps:$4 sm:$0xff]  }
 0x289   : > { %8017 = vmatprep.mubr.bf16.mxu1 %v12171_v47  ;;  %8054 = vmatprep.subr.bf16.mxu1 %v12170_v46  ;;  %v12256_v46 = vld [vmem:[%s14074_s1 + $0xaf4] ss:$8 sps:$4 sm:$0xff]   ;;  %v12254_v47 = vld [vmem:[%s14074_s1 + $0xaf0] ss:$8 sps:$4 sm:$0xff]  }
 0x28b   : > { %3555 = vmatpush1.bf16.msra.mxu0 %v12168_v48  ;;  %8055 = vmatpush1.bf16.msra.mxu1 %v12168_v48  ;;  %v12262_v48 = vld [vmem:[%s14074_s1 + $0xb04] ss:$8 sps:$4 sm:$0xff]  }
 0x28c   : > { %3556 = vmatprep.subr.bf16.mxu0 %v12177_v49  ;;  %8056 = vmatprep.subr.bf16.mxu1 %v12177_v49  ;;  %v12257_v49 = vld [vmem:[%s12520_s17 + $0xa0] ss:$20 sps:$4 sm:$0xff]  }
 0x28e   : > { %3518 = vmatmul.mubr.bf16.gmra.mrb[8].mxu0 %v12173_v50  ;;  %8018 = vmatmul.mubr.bf16.gmra.mrb[8].mxu1 %v12174_v51  ;;  %v12263_v50 = vld [vmem:[%s12520_s17 + $0x168] ss:$20 sps:$4 sm:$0xff]  }
 0x28f   : > { %3557 = vmatpush1.bf16.msra.mxu0 %v12175_v52  ;;  %8057 = vmatpush1.bf16.msra.mxu1 %v12175_v52  ;;  %v12260_v51 = vld [vmem:[%s14074_s1 + $0xb00] ss:$8 sps:$4 sm:$0xff]   ;;  %v12268_v52 = vld [vmem:[%s14074_s1 + $0xb14] ss:$8 sps:$4 sm:$0xff]  }
 0x290   : > { %3527 = vmatprep.mubr.bf16.mxu0 %v12178_v53  ;;  %8027 = vmatprep.mubr.bf16.mxu1 %v12180_v54  ;;  %v12287_v53 = vld [vmem:[%s12520_s17 + $0xcc] ss:$20 sps:$4 sm:$0xff]   ;;  %v12289_v54 = vld [vmem:[%s12520_s17 + $0x194] ss:$20 sps:$4 sm:$0xff]  }
 0x291   : > { %3558 = vmatprep.subr.bf16.mxu0 %v12186_v55  ;;  %8058 = vmatprep.subr.bf16.mxu1 %v12186_v55  ;;  %v12266_v55 = vld [vmem:[%s14074_s1 + $0xb10] ss:$8 sps:$4 sm:$0xff]  }
 0x293   : > { %3559 = vmatpush1.bf16.msra.mxu0 %v12184_v56  ;;  %8059 = vmatpush1.bf16.msra.mxu1 %v12184_v56  ;;  %v12271_v56 = vld [vmem:[%s14074_s1 + $0xb24] ss:$8 sps:$4 sm:$0xff]  }
 0x294   : > { %3560 = vmatprep.subr.bf16.mxu0 %v12189_v58  ;;  %8060 = vmatprep.subr.bf16.mxu1 %v12189_v58  ;;  %v12291_v58 = vld [vmem:[%s12520_s17 + $0xc8] ss:$20 sps:$4 sm:$0xff]  }
 0x296   : > { %3528 = vmatmul.mubr.bf16.gmra.mrb[12].mxu0 %v12182_v59  ;;  %8028 = vmatmul.mubr.bf16.gmra.mrb[12].mxu1 %v12183_v60  ;;  %v12295_v59 = vld [vmem:[%s12520_s17 + $0x190] ss:$20 sps:$4 sm:$0xff]   ;;  %v12269_v60 = vld [vmem:[%s14074_s1 + $0xb20] ss:$8 sps:$4 sm:$0xff]  }
 0x297   : > { %3537 = vmatprep.mubr.bf16.mxu0 %v12190_v62  ;;  %3561 = vmatpush1.bf16.msra.mxu0 %v12187_v61  ;;  %v12299_v62 = vld [vmem:[%s12520_s17 + $0xf4] ss:$20 sps:$4 sm:$0xff]  }
 0x298   : > { %8037 = vmatprep.mubr.bf16.mxu1 %v12192_v0  ;;  %8061 = vmatpush1.bf16.msra.mxu1 %v12187_v61  ;;  %v12274_v61 = vld [vmem:[%s14074_s1 + $0xb34] ss:$8 sps:$4 sm:$0xff]  }
 0x299   : > { %3562 = vmatprep.subr.bf16.mxu0 %v12198_v1  ;;  %8062 = vmatprep.subr.bf16.mxu1 %v12198_v1  ;;  %v12301_v0 = vld [vmem:[%s12520_s17 + $0x1bc] ss:$20 sps:$4 sm:$0xff]  }
 0x29a   : > { %v12272_v1 = vld [vmem:[%s14074_s1 + $0xb30] ss:$8 sps:$4 sm:$0xff]  }
 0x29b   : > { %3563 = vmatpush1.bf16.msra.mxu0 %v12196_v2 }
 0x29c   : > { %8063 = vmatpush1.bf16.msra.mxu1 %v12196_v2  ;;  %4292 = vmatprep.subr.bf16.mxu0 %v12201_v3  ;;  %v12277_v2 = vld [vmem:[%s14074_s1 + $0xb44] ss:$8 sps:$4 sm:$0xff]  }
 0x29d   : > { %8791 = vmatprep.subr.bf16.mxu1 %v12201_v3  ;;  %v12303_v3 = vld [vmem:[%s12520_s17 + $0xf0] ss:$20 sps:$4 sm:$0xff]  }
 0x29e   : > { %3538 = vmatmul.mubr.bf16.gmra.mrb[16].mxu0 %v12194_v4  ;;  %8038 = vmatmul.mubr.bf16.gmra.mrb[16].mxu1 %v12195_v5  ;;  %v12307_v4 = vld [vmem:[%s12520_s17 + $0x1b8] ss:$20 sps:$4 sm:$0xff]   ;;  %v12275_v5 = vld [vmem:[%s14074_s1 + $0xb40] ss:$8 sps:$4 sm:$0xff]  }
 0x29f   : > { %3580 = vmatprep.mubr.bf16.mxu0 %v12450_v57  ;;  %8080 = vmatprep.mubr.bf16.mxu1 %v12450_v57 }
 0x2a6   : > { %3581 = vmatmul.mubr.bf16.vlgmr.msra.gmra.mrb[0].mxu0 %v12202_v6  ;;  %8081 = vmatmul.mubr.bf16.vlgmr.msra.gmra.mrb[0].mxu1 %v12203_v7  ;;  %v12280_v6 = vld [vmem:[%s14074_s1 + $0xb54] ss:$8 sps:$4 sm:$0xff]  }
 0x2a7   : > { %4293 = vmatpush1.bf16.msra.mxu0 %v12199_v8  ;;  %8792 = vmatpush1.bf16.msra.mxu1 %v12199_v8  ;;  %v12311_v7 = vld [vmem:[%s12520_s17 + $0x11c] ss:$20 sps:$4 sm:$0xff]   ;;  %v12313_v8 = vld [vmem:[%s12520_s17 + $0x1e4] ss:$20 sps:$4 sm:$0xff]  }
 0x2a8   : > { %4294 = vmatprep.subr.bf16.mxu0 %v12206_v9  ;;  %8793 = vmatprep.subr.bf16.mxu1 %v12206_v9  ;;  %v12278_v9 = vld [vmem:[%s14074_s1 + $0xb50] ss:$8 sps:$4 sm:$0xff]  }
 0x2a9   : > { %3590 = vmatprep.mubr.bf16.mxu0 %v12450_v57  ;;  %8090 = vmatprep.mubr.bf16.mxu1 %v12450_v57 }
 0x2ab   : > { %4295 = vmatpush1.bf16.msra.mxu0 %v12204_v10  ;;  %8794 = vmatpush1.bf16.msra.mxu1 %v12204_v10  ;;  %v12283_v10 = vld [vmem:[%s14074_s1 + $0xb64] ss:$8 sps:$4 sm:$0xff]  }
 0x2ac   : > { %4296 = vmatprep.subr.bf16.mxu0 %v12209_v11  ;;  %8795 = vmatprep.subr.bf16.mxu1 %v12209_v11  ;;  %v12315_v11 = vld [vmem:[%s12520_s17 + $0x118] ss:$20 sps:$4 sm:$0xff]  }
 0x2ae   : > { %3591 = vmatmul.mubr.bf16.gmra.mrb[4].mxu0 %v12228_v12  ;;  %8091 = vmatmul.mubr.bf16.gmra.mrb[4].mxu1 %v12229_v13  ;;  %v12319_v12 = vld [vmem:[%s12520_s17 + $0x1e0] ss:$20 sps:$4 sm:$0xff]  }
 0x2af   : > { %4297 = vmatpush1.bf16.msra.mxu0 %v12207_v14  ;;  %8796 = vmatpush1.bf16.msra.mxu1 %v12207_v14  ;;  %v12281_v13 = vld [vmem:[%s14074_s1 + $0xb60] ss:$8 sps:$4 sm:$0xff]   ;;  %v12286_v14 = vld [vmem:[%s14074_s1 + $0xb74] ss:$8 sps:$4 sm:$0xff]  }
 0x2b0   : > { %4298 = vmatprep.subr.bf16.mxu0 %v12212_v15  ;;  %8797 = vmatprep.subr.bf16.mxu1 %v12212_v15  ;;  %v12323_v15 = vld [vmem:[%s12520_s17 + $0x144] ss:$20 sps:$4 sm:$0xff]  }
 0x2b1   : > { %3600 = vmatprep.mubr.bf16.mxu0 %v12450_v57  ;;  %8100 = vmatprep.mubr.bf16.mxu1 %v12450_v57 }
 0x2b3   : > { %4299 = vmatpush1.bf16.msra.mxu0 %v12210_v16  ;;  %8798 = vmatpush1.bf16.msra.mxu1 %v12210_v16  ;;  %v12325_v16 = vld [vmem:[%s12520_s17 + $0x20c] ss:$20 sps:$4 sm:$0xff]  }
 0x2b4   : > { %4300 = vmatprep.subr.bf16.mxu0 %v12215_v17  ;;  %8799 = vmatprep.subr.bf16.mxu1 %v12215_v17  ;;  %v12284_v17 = vld [vmem:[%s14074_s1 + $0xb70] ss:$8 sps:$4 sm:$0xff]  }
 0x2b6   : > { %3601 = vmatmul.mubr.bf16.gmra.mrb[8].mxu0 %v12236_v18  ;;  %8101 = vmatmul.mubr.bf16.gmra.mrb[8].mxu1 %v12237_v19  ;;  %v12294_v18 = vld [vmem:[%s14074_s1 + $0xb84] ss:$8 sps:$4 sm:$0xff]   ;;  %v12327_v19 = vld [vmem:[%s12520_s17 + $0x140] ss:$20 sps:$4 sm:$0xff]  }
 0x2b7   : > { %4301 = vmatpush1.bf16.msra.mxu0 %v12213_v20  ;;  %8800 = vmatpush1.bf16.msra.mxu1 %v12213_v20  ;;  %v12331_v20 = vld [vmem:[%s12520_s17 + $0x208] ss:$20 sps:$4 sm:$0xff]  }
 0x2b8   : > { %4302 = vmatprep.subr.bf16.mxu0 %v12218_v21  ;;  %8801 = vmatprep.subr.bf16.mxu1 %v12218_v21  ;;  %v12292_v21 = vld [vmem:[%s14074_s1 + $0xb80] ss:$8 sps:$4 sm:$0xff]  }
 0x2b9   : > { %3610 = vmatprep.mubr.bf16.mxu0 %v12450_v57  ;;  %8110 = vmatprep.mubr.bf16.mxu1 %v12450_v57 }
 0x2bb   : > { %4303 = vmatpush1.bf16.msra.mxu0 %v12216_v22  ;;  %8802 = vmatpush1.bf16.msra.mxu1 %v12216_v22  ;;  %v12298_v22 = vld [vmem:[%s14074_s1 + $0xb94] ss:$8 sps:$4 sm:$0xff]  }
 0x2bc   : > { %4304 = vmatprep.subr.bf16.mxu0 %v12221_v23  ;;  %8803 = vmatprep.subr.bf16.mxu1 %v12221_v23  ;;  %v12337_v23 = vld [vmem:[%s12520_s17 + $0xac] ss:$20 sps:$4 sm:$0xff]  }
 0x2be   : > { %3611 = vmatmul.mubr.bf16.gmra.mrb[12].mxu0 %v12244_v24  ;;  %8111 = vmatmul.mubr.bf16.gmra.mrb[12].mxu1 %v12245_v25  ;;  %v12340_v24 = vld [vmem:[%s12520_s17 + $0x174] ss:$20 sps:$4 sm:$0xff]   ;;  %v12296_v25 = vld [vmem:[%s14074_s1 + $0xb90] ss:$8 sps:$4 sm:$0xff]  }
 0x2bf   : > { %4305 = vmatpush1.bf16.msra.mxu0 %v12219_v26  ;;  %8804 = vmatpush1.bf16.msra.mxu1 %v12219_v26  ;;  %v12306_v26 = vld [vmem:[%s14074_s1 + $0xba4] ss:$8 sps:$4 sm:$0xff]  }
 0x2c0   : > { %4306 = vmatprep.subr.bf16.mxu0 %v12224_v27  ;;  %8805 = vmatprep.subr.bf16.mxu1 %v12224_v27  ;;  %v12304_v27 = vld [vmem:[%s14074_s1 + $0xba0] ss:$8 sps:$4 sm:$0xff]  }
 0x2c1   : > { %3620 = vmatprep.mubr.bf16.mxu0 %v12450_v57  ;;  %8120 = vmatprep.mubr.bf16.mxu1 %v12450_v57 }
 0x2c3   : > { %4307 = vmatpush1.bf16.msra.mxu0 %v12222_v28  ;;  %8806 = vmatpush1.bf16.msra.mxu1 %v12222_v28  ;;  %v12310_v28 = vld [vmem:[%s14074_s1 + $0xbb4] ss:$8 sps:$4 sm:$0xff]  }
 0x2c4   : > { %4308 = vmatprep.subr.bf16.mxu0 %v12227_v29  ;;  %8807 = vmatprep.subr.bf16.mxu1 %v12227_v29  ;;  %v12308_v29 = vld [vmem:[%s14074_s1 + $0xbb0] ss:$8 sps:$4 sm:$0xff]  }
 0x2c6   : > { %3621 = vmatmul.mubr.bf16.gmra.mrb[16].mxu0 %v12252_v63  ;;  %8121 = vmatmul.mubr.bf16.gmra.mrb[16].mxu1 %v12253_v30  ;;  %v12318_v63 = vld [vmem:[%s14074_s1 + $0xbc4] ss:$8 sps:$4 sm:$0xff]   ;;  %v12316_v30 = vld [vmem:[%s14074_s1 + $0xbc0] ss:$8 sps:$4 sm:$0xff]  }
 0x2c7   : > { %4309 = vmatpush1.bf16.msra.mxu0 %v12225_v31  ;;  %8808 = vmatpush1.bf16.msra.mxu1 %v12225_v31  ;;  %v12322_v31 = vld [vmem:[%s14074_s1 + $0xbd4] ss:$8 sps:$4 sm:$0xff]  }
 0x2c8   : > { %4310 = vmatprep.subr.bf16.mxu0 %v12232_v32  ;;  %8809 = vmatprep.subr.bf16.mxu1 %v12232_v32  ;;  %v12320_v32 = vld [vmem:[%s14074_s1 + $0xbd0] ss:$8 sps:$4 sm:$0xff]  }
 0x2c9   : > { %4324 = vmatprep.mubr.bf16.mxu0 %v12259_v33  ;;  %8823 = vmatprep.mubr.bf16.mxu1 %v12265_v34  ;;  %v12330_v33 = vld [vmem:[%s14074_s1 + $0xbe4] ss:$8 sps:$4 sm:$0xff]   ;;  %v12328_v34 = vld [vmem:[%s14074_s1 + $0xbe0] ss:$8 sps:$4 sm:$0xff]  }
 0x2cb   : > { %4311 = vmatpush1.bf16.msra.mxu0 %v12230_v35  ;;  %8810 = vmatpush1.bf16.msra.mxu1 %v12230_v35  ;;  %v12334_v35 = vld [vmem:[%s14074_s1 + $0xbf4] ss:$8 sps:$4 sm:$0xff]  }
 0x2cc   : > { %4312 = vmatprep.subr.bf16.mxu0 %v12235_v36  ;;  %8811 = vmatprep.subr.bf16.mxu1 %v12235_v36  ;;  %v12332_v36 = vld [vmem:[%s14074_s1 + $0xbf0] ss:$8 sps:$4 sm:$0xff]  }
 0x2cf   : > { %4313 = vmatpush1.bf16.msra.mxu0 %v12233_v37  ;;  %8812 = vmatpush1.bf16.msra.mxu1 %v12233_v37  ;;  %v12343_v37 = vld [vmem:[%s14074_s1 + $0xc04] ss:$8 sps:$4 sm:$0xff]  }
 0x2d0   : > { %4314 = vmatprep.subr.bf16.mxu0 %v12240_v38  ;;  %8813 = vmatprep.subr.bf16.mxu1 %v12240_v38  ;;  %v12335_v38 = vld [vmem:[%s12520_s17 + $0xa8] ss:$20 sps:$4 sm:$0xff]  }
 0x2d3   : > { %4315 = vmatpush1.bf16.msra.mxu0 %v12238_v39  ;;  %8814 = vmatpush1.bf16.msra.mxu1 %v12238_v39  ;;  %v12338_v39 = vld [vmem:[%s12520_s17 + $0x170] ss:$20 sps:$4 sm:$0xff]  }
 0x2d4   : > { %4316 = vmatprep.subr.bf16.mxu0 %v12243_v40  ;;  %8815 = vmatprep.subr.bf16.mxu1 %v12243_v40  ;;  %v12341_v40 = vld [vmem:[%s14074_s1 + $0xc00] ss:$8 sps:$4 sm:$0xff]  }
 0x2d7   : > { %4317 = vmatpush1.bf16.msra.mxu0 %v12241_v41  ;;  %8816 = vmatpush1.bf16.msra.mxu1 %v12241_v41  ;;  %v12346_v41 = vld [vmem:[%s14074_s1 + $0xc14] ss:$8 sps:$4 sm:$0xff]  }
 0x2d8   : > { %4318 = vmatprep.subr.bf16.mxu0 %v12248_v42  ;;  %8817 = vmatprep.subr.bf16.mxu1 %v12248_v42  ;;  %v12347_v42 = vld [vmem:[%s12520_s17 + $0xd4] ss:$20 sps:$4 sm:$0xff]  }
 0x2db   : > { %4319 = vmatpush1.bf16.msra.mxu0 %v12246_v43  ;;  %8818 = vmatpush1.bf16.msra.mxu1 %v12246_v43  ;;  %v12349_v43 = vld [vmem:[%s12520_s17 + $0x19c] ss:$20 sps:$4 sm:$0xff]  }
 0x2dc   : > { %4320 = vmatprep.subr.bf16.mxu0 %v12251_v44  ;;  %8819 = vmatprep.subr.bf16.mxu1 %v12251_v44  ;;  %v12344_v44 = vld [vmem:[%s14074_s1 + $0xc10] ss:$8 sps:$4 sm:$0xff]  }
 0x2df   : > { %4321 = vmatpush1.bf16.msra.mxu0 %v12249_v45  ;;  %8820 = vmatpush1.bf16.msra.mxu1 %v12249_v45  ;;  %v12355_v45 = vld [vmem:[%s14074_s1 + $0xc24] ss:$8 sps:$4 sm:$0xff]  }
 0x2e0   : > { %4322 = vmatprep.subr.bf16.mxu0 %v12256_v46  ;;  %8821 = vmatprep.subr.bf16.mxu1 %v12256_v46  ;;  %v12351_v46 = vld [vmem:[%s12520_s17 + $0xd0] ss:$20 sps:$4 sm:$0xff]  }
 0x2e3   : > { %4323 = vmatpush1.bf16.msra.mxu0 %v12254_v47  ;;  %8822 = vmatpush1.bf16.msra.mxu1 %v12254_v47  ;;  %v12352_v47 = vld [vmem:[%s12520_s17 + $0x198] ss:$20 sps:$4 sm:$0xff]  }
 0x2e4   : > { %4375 = vmatprep.subr.bf16.mxu0 %v12262_v48  ;;  %8874 = vmatprep.subr.bf16.mxu1 %v12262_v48  ;;  %v12353_v48 = vld [vmem:[%s14074_s1 + $0xc20] ss:$8 sps:$4 sm:$0xff]  }
 0x2e6   : > { %4325 = vmatmul.mubr.bf16.vlgmr.msra.gmra.mrb[0].mxu0 %v12257_v49  ;;  %8824 = vmatmul.mubr.bf16.vlgmr.msra.gmra.mrb[0].mxu1 %v12263_v50  ;;  %v12356_v49 = vld [vmem:[%s12520_s17 + $0xfc] ss:$20 sps:$4 sm:$0xff]  }
 0x2e7   : > { %4376 = vmatpush1.bf16.msra.mxu0 %v12260_v51  ;;  %8875 = vmatpush1.bf16.msra.mxu1 %v12260_v51  ;;  %v12360_v50 = vld [vmem:[%s14074_s1 + $0xc34] ss:$8 sps:$4 sm:$0xff]   ;;  %v12361_v51 = vld [vmem:[%s12520_s17 + $0x1c4] ss:$20 sps:$4 sm:$0xff]  }
 0x2e8   : > { %4377 = vmatprep.subr.bf16.mxu0 %v12268_v52  ;;  %8876 = vmatprep.subr.bf16.mxu1 %v12268_v52  ;;  %v12358_v52 = vld [vmem:[%s14074_s1 + $0xc30] ss:$8 sps:$4 sm:$0xff]  }
 0x2e9   : > { %4334 = vmatprep.mubr.bf16.mxu0 %v12287_v53  ;;  %8833 = vmatprep.mubr.bf16.mxu1 %v12289_v54  ;;  %v12367_v53 = vld [vmem:[%s14074_s1 + $0xc44] ss:$8 sps:$4 sm:$0xff]  }
 0x2ea   : > { %v12363_v54 = vld [vmem:[%s12520_s17 + $0xf8] ss:$20 sps:$4 sm:$0xff]  }
 0x2eb   : > { %4378 = vmatpush1.bf16.msra.mxu0 %v12266_v55  ;;  %8877 = vmatpush1.bf16.msra.mxu1 %v12266_v55  ;;  %v12364_v55 = vld [vmem:[%s12520_s17 + $0x1c0] ss:$20 sps:$4 sm:$0xff]  }
 0x2ec   : > { %4379 = vmatprep.subr.bf16.mxu0 %v12271_v56  ;;  %8878 = vmatprep.subr.bf16.mxu1 %v12271_v56  ;;  %v12365_v56 = vld [vmem:[%s14074_s1 + $0xc40] ss:$8 sps:$4 sm:$0xff]  }
 0x2ee   : > { %4335 = vmatmul.mubr.bf16.gmra.mrb[4].mxu0 %v12291_v58  ;;  %8834 = vmatmul.mubr.bf16.gmra.mrb[4].mxu1 %v12295_v59  ;;  %v12368_v58 = vld [vmem:[%s12520_s17 + $0x124] ss:$20 sps:$4 sm:$0xff]   ;;  %v12370_v59 = vld [vmem:[%s12520_s17 + $0x1ec] ss:$20 sps:$4 sm:$0xff]  }
 0x2ef   : > { %4380 = vmatpush1.bf16.msra.mxu0 %v12269_v60  ;;  %8879 = vmatpush1.bf16.msra.mxu1 %v12269_v60  ;;  %v12376_v60 = vld [vmem:[%s14074_s1 + $0xc54] ss:$8 sps:$4 sm:$0xff]  }
 0x2f0   : > { %4381 = vmatprep.subr.bf16.mxu0 %v12274_v61  ;;  %8880 = vmatprep.subr.bf16.mxu1 %v12274_v61  ;;  %v12374_v61 = vld [vmem:[%s14074_s1 + $0xc50] ss:$8 sps:$4 sm:$0xff]  }
 0x2f1   : > { %4344 = vmatprep.mubr.bf16.mxu0 %v12299_v62  ;;  %8843 = vmatprep.mubr.bf16.mxu1 %v12301_v0  ;;  %v12379_v62 = vld [vmem:[%s14074_s1 + $0xc64] ss:$8 sps:$4 sm:$0xff]   ;;  %v12372_v0 = vld [vmem:[%s12520_s17 + $0x120] ss:$20 sps:$4 sm:$0xff]  }
 0x2f3   : > { %4382 = vmatpush1.bf16.msra.mxu0 %v12272_v1  ;;  %8881 = vmatpush1.bf16.msra.mxu1 %v12272_v1  ;;  %v12373_v1 = vld [vmem:[%s12520_s17 + $0x1e8] ss:$20 sps:$4 sm:$0xff]  }
 0x2f4   : > { %4383 = vmatprep.subr.bf16.mxu0 %v12277_v2  ;;  %8882 = vmatprep.subr.bf16.mxu1 %v12277_v2  ;;  %v12377_v2 = vld [vmem:[%s14074_s1 + $0xc60] ss:$8 sps:$4 sm:$0xff]  }
 0x2f6   : > { %4345 = vmatmul.mubr.bf16.gmra.mrb[8].mxu0 %v12303_v3  ;;  %8844 = vmatmul.mubr.bf16.gmra.mrb[8].mxu1 %v12307_v4  ;;  %v12380_v3 = vld [vmem:[%s12520_s17 + $0x14c] ss:$20 sps:$4 sm:$0xff]   ;;  %v12382_v4 = vld [vmem:[%s12520_s17 + $0x214] ss:$20 sps:$4 sm:$0xff]  }
 0x2f7   : > { %4384 = vmatpush1.bf16.msra.mxu0 %v12275_v5  ;;  %8883 = vmatpush1.bf16.msra.mxu1 %v12275_v5  ;;  %v12388_v5 = vld [vmem:[%s14074_s1 + $0xc74] ss:$8 sps:$4 sm:$0xff]  }
 0x2f8   : > { %4385 = vmatprep.subr.bf16.mxu0 %v12280_v6  ;;  %8884 = vmatprep.subr.bf16.mxu1 %v12280_v6  ;;  %v12386_v6 = vld [vmem:[%s14074_s1 + $0xc70] ss:$8 sps:$4 sm:$0xff]  }
 0x2f9   : > { %4354 = vmatprep.mubr.bf16.mxu0 %v12311_v7  ;;  %8853 = vmatprep.mubr.bf16.mxu1 %v12313_v8  ;;  %v12384_v7 = vld [vmem:[%s12520_s17 + $0x148] ss:$20 sps:$4 sm:$0xff]   ;;  %v12385_v8 = vld [vmem:[%s12520_s17 + $0x210] ss:$20 sps:$4 sm:$0xff]  }
 0x2fb   : > { %4386 = vmatpush1.bf16.msra.mxu0 %v12278_v9  ;;  %8885 = vmatpush1.bf16.msra.mxu1 %v12278_v9  ;;  %v12389_v9 = vld [vmem:[%s12520_s17 + $0xb0] ss:$20 sps:$4 sm:$0xff]  }
 0x2fc   : > { %4387 = vmatprep.subr.bf16.mxu0 %v12283_v10  ;;  %8886 = vmatprep.subr.bf16.mxu1 %v12283_v10  ;;  %v12390_v10 = vld [vmem:[%s12520_s17 + $0x178] ss:$20 sps:$4 sm:$0xff]  }
 0x2fe   : > { %4355 = vmatmul.mubr.bf16.gmra.mrb[12].mxu0 %v12315_v11  ;;  %8854 = vmatmul.mubr.bf16.gmra.mrb[12].mxu1 %v12319_v12  ;;  %v12391_v11 = vld [vmem:[%s12520_s17 + $0xd8] ss:$20 sps:$4 sm:$0xff]   ;;  %v12392_v12 = vld [vmem:[%s12520_s17 + $0x1a0] ss:$20 sps:$4 sm:$0xff]  }
 0x2ff   : > { %4388 = vmatpush1.bf16.msra.mxu0 %v12281_v13  ;;  %8887 = vmatpush1.bf16.msra.mxu1 %v12281_v13  ;;  %v12393_v13 = vld [vmem:[%s12520_s17 + $0x100] ss:$20 sps:$4 sm:$0xff]  }
 0x300   : > { %4389 = vmatprep.subr.bf16.mxu0 %v12286_v14  ;;  %8888 = vmatprep.subr.bf16.mxu1 %v12286_v14  ;;  %v12394_v14 = vld [vmem:[%s12520_s17 + $0x1c8] ss:$20 sps:$4 sm:$0xff]  }
 0x301   : > { %4364 = vmatprep.mubr.bf16.mxu0 %v12323_v15  ;;  %8863 = vmatprep.mubr.bf16.mxu1 %v12325_v16  ;;  %v12395_v15 = vld [vmem:[%s12520_s17 + $0x128] ss:$20 sps:$4 sm:$0xff]   ;;  %v12396_v16 = vld [vmem:[%s12520_s17 + $0x1f0] ss:$20 sps:$4 sm:$0xff]  }
 0x303   : > { %4390 = vmatpush1.bf16.msra.mxu0 %v12284_v17  ;;  %8889 = vmatpush1.bf16.msra.mxu1 %v12284_v17  ;;  %v12397_v17 = vld [vmem:[%s12520_s17 + $0x150] ss:$20 sps:$4 sm:$0xff]  }
 0x304   : > { %4391 = vmatprep.subr.bf16.mxu0 %v12294_v18  ;;  %8890 = vmatprep.subr.bf16.mxu1 %v12294_v18  ;;  %v12398_v18 = vld [vmem:[%s12520_s17 + $0x218] ss:$20 sps:$4 sm:$0xff]  }
 0x306   : > { %4365 = vmatmul.mubr.bf16.gmra.mrb[16].mxu0 %v12327_v19  ;;  %8864 = vmatmul.mubr.bf16.gmra.mrb[16].mxu1 %v12331_v20  ;;  %v4563_v19 = vlaneseq }
 0x307   : > { %4392 = vmatpush1.bf16.msra.mxu0 %v12292_v21  ;;  %8891 = vmatpush1.bf16.msra.mxu1 %v12292_v21 }
 0x308   : > { %4393 = vmatprep.subr.bf16.mxu0 %v12298_v22  ;;  %8892 = vmatprep.subr.bf16.mxu1 %v12298_v22  ;;  %v4564_v20 = vshrl.u32 %v4563_v19, 7  ;;  %v4561_v22 = vld [vmem:[%s14075_s2] sm:$0x3] }
 0x309   : > { %4407 = vmatprep.mubr.bf16.mxu0 %v12337_v23  ;;  %8906 = vmatprep.mubr.bf16.mxu1 %v12340_v24  ;;  %v9060_v23 = vld [vmem:[%s14075_s2] sm:$0x3] }
 0x30a   : > { %v4565_v21 = vsub.s32 0, %v4564_v20  ;;  %v4569_v24 = vsub.s32 1, %v4564_v20 }
 0x30b   : > { %4394 = vmatpush1.bf16.msra.mxu0 %v12296_v25  ;;  %8893 = vmatpush1.bf16.msra.mxu1 %v12296_v25 }
 0x30c   : > { %4395 = vmatprep.subr.bf16.mxu0 %v12306_v26  ;;  %8894 = vmatprep.subr.bf16.mxu1 %v12306_v26  ;;  %v13999_v25 = vrot.slane %v9060_v23, %v4565_v21  ;;  %v14001_v26 = vrot.slane %v4561_v22, %v4569_v24 }
 0x30f   : > { %4396 = vmatpush1.bf16.msra.mxu0 %v12304_v27  ;;  %8895 = vmatpush1.bf16.msra.mxu1 %v12304_v27  ;;  %v14003_v27 = vrot.slane %v9060_v23, %v4569_v24 }
 0x310   : > { %4397 = vmatprep.subr.bf16.mxu0 %v12310_v28  ;;  %8896 = vmatprep.subr.bf16.mxu1 %v12310_v28 }
 0x313   : > { %4398 = vmatpush1.bf16.msra.mxu0 %v12308_v29  ;;  %8897 = vmatpush1.bf16.msra.mxu1 %v12308_v29 }
 0x314   : > { %4399 = vmatprep.subr.bf16.mxu0 %v12318_v63  ;;  %8898 = vmatprep.subr.bf16.mxu1 %v12318_v63 }
 0x317   : > { %4400 = vmatpush1.bf16.msra.mxu0 %v12316_v30  ;;  %8899 = vmatpush1.bf16.msra.mxu1 %v12316_v30 }
 0x318   : > { %4401 = vmatprep.subr.bf16.mxu0 %v12322_v31  ;;  %8900 = vmatprep.subr.bf16.mxu1 %v12322_v31 }
 0x31b   : > { %4402 = vmatpush1.bf16.msra.mxu0 %v12320_v32  ;;  %8901 = vmatpush1.bf16.msra.mxu1 %v12320_v32 }
 0x31c   : > { %4403 = vmatprep.subr.bf16.mxu0 %v12330_v33  ;;  %8902 = vmatprep.subr.bf16.mxu1 %v12330_v33 }
 0x31f   : > { %4404 = vmatpush1.bf16.msra.mxu0 %v12328_v34  ;;  %8903 = vmatpush1.bf16.msra.mxu1 %v12328_v34 }
 0x320   : > { %4405 = vmatprep.subr.bf16.mxu0 %v12334_v35  ;;  %8904 = vmatprep.subr.bf16.mxu1 %v12334_v35 }
 0x323   : > { %4406 = vmatpush1.bf16.msra.mxu0 %v12332_v36  ;;  %8905 = vmatpush1.bf16.msra.mxu1 %v12332_v36 }
 0x324   : > { %4458 = vmatprep.subr.bf16.mxu0 %v12343_v37  ;;  %8957 = vmatprep.subr.bf16.mxu1 %v12343_v37 }
 0x326   : > { %4408 = vmatmul.mubr.bf16.vlgmr.msra.gmra.mrb[0].mxu0 %v12335_v38  ;;  %8907 = vmatmul.mubr.bf16.vlgmr.msra.gmra.mrb[0].mxu1 %v12338_v39 }
 0x327   : > { %4459 = vmatpush1.bf16.msra.mxu0 %v12341_v40  ;;  %8958 = vmatpush1.bf16.msra.mxu1 %v12341_v40 }
 0x328   : > { %4460 = vmatprep.subr.bf16.mxu0 %v12346_v41  ;;  %8959 = vmatprep.subr.bf16.mxu1 %v12346_v41 }
 0x329   : > { %4417 = vmatprep.mubr.bf16.mxu0 %v12347_v42  ;;  %8916 = vmatprep.mubr.bf16.mxu1 %v12349_v43 }
 0x32b   : > { %4461 = vmatpush1.bf16.msra.mxu0 %v12344_v44  ;;  %8960 = vmatpush1.bf16.msra.mxu1 %v12344_v44 }
 0x32c   : > { %4462 = vmatprep.subr.bf16.mxu0 %v12355_v45  ;;  %8961 = vmatprep.subr.bf16.mxu1 %v12355_v45 }
 0x32e   : > { %4418 = vmatmul.mubr.bf16.gmra.mrb[4].mxu0 %v12351_v46  ;;  %8917 = vmatmul.mubr.bf16.gmra.mrb[4].mxu1 %v12352_v47 }
 0x32f   : > { %4463 = vmatpush1.bf16.msra.mxu0 %v12353_v48  ;;  %8962 = vmatpush1.bf16.msra.mxu1 %v12353_v48 }
 0x330   : > { %4427 = vmatprep.mubr.bf16.mxu0 %v12356_v49  ;;  %4464 = vmatprep.subr.bf16.mxu0 %v12360_v50 }
 0x331   : > { %8926 = vmatprep.mubr.bf16.mxu1 %v12361_v51  ;;  %8963 = vmatprep.subr.bf16.mxu1 %v12360_v50 }
 0x333   : > { %4465 = vmatpush1.bf16.msra.mxu0 %v12358_v52  ;;  %8964 = vmatpush1.bf16.msra.mxu1 %v12358_v52 }
 0x334   : > { %4466 = vmatprep.subr.bf16.mxu0 %v12367_v53  ;;  %8965 = vmatprep.subr.bf16.mxu1 %v12367_v53 }
 0x336   : > { %4428 = vmatmul.mubr.bf16.gmra.mrb[8].mxu0 %v12363_v54  ;;  %8927 = vmatmul.mubr.bf16.gmra.mrb[8].mxu1 %v12364_v55 }
 0x337   : > { %4467 = vmatpush1.bf16.msra.mxu0 %v12365_v56  ;;  %8966 = vmatpush1.bf16.msra.mxu1 %v12365_v56 }
 0x338   : > { %4437 = vmatprep.mubr.bf16.mxu0 %v12368_v58  ;;  %8936 = vmatprep.mubr.bf16.mxu1 %v12370_v59 }
 0x339   : > { %4468 = vmatprep.subr.bf16.mxu0 %v12376_v60  ;;  %8967 = vmatprep.subr.bf16.mxu1 %v12376_v60 }
 0x33b   : > { %4469 = vmatpush1.bf16.msra.mxu0 %v12374_v61  ;;  %8968 = vmatpush1.bf16.msra.mxu1 %v12374_v61 }
 0x33c   : > { %4470 = vmatprep.subr.bf16.mxu0 %v12379_v62  ;;  %8969 = vmatprep.subr.bf16.mxu1 %v12379_v62 }
 0x33e   : > { %4438 = vmatmul.mubr.bf16.gmra.mrb[12].mxu0 %v12372_v0  ;;  %8937 = vmatmul.mubr.bf16.gmra.mrb[12].mxu1 %v12373_v1 }
 0x33f   : > { %4447 = vmatprep.mubr.bf16.mxu0 %v12380_v3  ;;  %4471 = vmatpush1.bf16.msra.mxu0 %v12377_v2 }
 0x340   : > { %8946 = vmatprep.mubr.bf16.mxu1 %v12382_v4  ;;  %8970 = vmatpush1.bf16.msra.mxu1 %v12377_v2 }
 0x341   : > { %4472 = vmatprep.subr.bf16.mxu0 %v12388_v5  ;;  %8971 = vmatprep.subr.bf16.mxu1 %v12388_v5 }
 0x343   : > { %4473 = vmatpush1.bf16.msra.mxu0 %v12386_v6 }
 0x344   : > { %8972 = vmatpush1.bf16.msra.mxu1 %v12386_v6 }
 0x346   : > { %4448 = vmatmul.mubr.bf16.gmra.mrb[16].mxu0 %v12384_v7  ;;  %8947 = vmatmul.mubr.bf16.gmra.mrb[16].mxu1 %v12385_v8 }
 0x347   : > { %4490 = vmatprep.mubr.bf16.mxu0 %v12450_v57  ;;  %8989 = vmatprep.mubr.bf16.mxu1 %v12450_v57 }
 0x34e   : > { %4491 = vmatmul.mubr.bf16.vlgmr.msra.gmra.mrb[0].mxu0 %v12389_v9  ;;  %8990 = vmatmul.mubr.bf16.vlgmr.msra.gmra.mrb[0].mxu1 %v12390_v10 }
 0x34f   : > { %4500 = vmatprep.mubr.bf16.mxu0 %v12450_v57  ;;  %8999 = vmatprep.mubr.bf16.mxu1 %v12450_v57 }
 0x356   : > { %4501 = vmatmul.mubr.bf16.gmra.mrb[4].mxu0 %v12391_v11  ;;  %9000 = vmatmul.mubr.bf16.gmra.mrb[4].mxu1 %v12392_v12 }
 0x357   : > { %4510 = vmatprep.mubr.bf16.mxu0 %v12450_v57  ;;  %9009 = vmatprep.mubr.bf16.mxu1 %v12450_v57 }
 0x35e   : > { %4511 = vmatmul.mubr.bf16.gmra.mrb[8].mxu0 %v12393_v13  ;;  %9010 = vmatmul.mubr.bf16.gmra.mrb[8].mxu1 %v12394_v14 }
 0x35f   : > { %4520 = vmatprep.mubr.bf16.mxu0 %v12450_v57  ;;  %9019 = vmatprep.mubr.bf16.mxu1 %v12450_v57 }
 0x366   : > { %4521 = vmatmul.mubr.bf16.gmra.mrb[12].mxu0 %v12395_v15  ;;  %9020 = vmatmul.mubr.bf16.gmra.mrb[12].mxu1 %v12396_v16 }
 0x367   : > { %4530 = vmatprep.mubr.bf16.mxu0 %v12450_v57  ;;  %9029 = vmatprep.mubr.bf16.mxu1 %v12450_v57  ;;  %v13997_v57 = vrot.slane %v4561_v22, %v4565_v21 }
 0x36e   : > { %4531 = vmatmul.mubr.bf16.gmra.mrb[16].mxu0 %v12397_v17  ;;  %9030 = vmatmul.mubr.bf16.gmra.mrb[16].mxu1 %v12398_v18 }
 0x421   : > { %v4492_v28 = vpop.f32.mrb[0].mxu0  ;;  %v8991_v29 = vpop.f32.mrb[0].mxu1 }
 0x422   : > { %v4573_v63 = vadd.f32 %v13997_v57, %v4492_v28  ;;  %v9072_v30 = vadd.f32 %v13999_v25, %v8991_v29  ;;  %v4494_v31 = vpop.f32.mrb[1].mxu0  ;;  %v8993_v32 = vpop.f32.mrb[1].mxu1 }
 0x423   : > { %v4574_v33 = vadd.f32 %v14001_v26, %v4494_v31  ;;  %v9073_v34 = vadd.f32 %v14003_v27, %v8993_v32  ;;  %v4496_v35 = vpop.f32.mrb[2].mxu0  ;;  %v8995_v36 = vpop.f32.mrb[2].mxu1 }
 0x424   : > { %v4593_v37 = vmax.f32 %v4573_v63, 0.0  ;;  %v9092_v38 = vmax.f32 %v9072_v30, 0.0  ;;  %v4575_v39 = vadd.f32 %v13997_v57, %v4496_v35  ;;  %v9074_v40 = vadd.f32 %v13999_v25, %v8995_v36  ;;  %v4498_v41 = vpop.f32.mrb[3].mxu0  ;;  %v8997_v42 = vpop.f32.mrb[3].mxu1 }
 0x425   : > { %v4594_v43 = vmax.f32 %v4574_v33, 0.0  ;;  %v9093_v44 = vmax.f32 %v9073_v34, 0.0  ;;  %v4576_v45 = vadd.f32 %v14001_v26, %v4498_v41  ;;  %v9075_v46 = vadd.f32 %v14003_v27, %v8997_v42 }
 0x426   : > { %v4595_v47 = vmax.f32 %v4575_v39, 0.0  ;;  %v9094_v48 = vmax.f32 %v9074_v40, 0.0 }
 0x427   : > { %v10921_v49 = vpack.c.bf16 %v4594_v43, %v4593_v37  ;;  %v10931_v50 = vpack.c.bf16 %v9093_v44, %v9092_v38  ;;  %v4596_v51 = vmax.f32 %v4576_v45, 0.0  ;;  %v9095_v52 = vmax.f32 %v9075_v46, 0.0 }
 0x429   : > { %4673 = vst [vmem:[%s14016_s5] sm:$0xff] %v10921_v49  ;;  %9172 = vst [vmem:[%s14016_s5 + $0x50] sm:$0xff] %v10931_v50  ;;  %v10922_v53 = vpack.c.bf16 %v4596_v51, %v4595_v47  ;;  %v10932_v54 = vpack.c.bf16 %v9095_v52, %v9094_v48  ;;  %v4502_v55 = vpop.f32.mrb[4].mxu0  ;;  %v9001_v56 = vpop.f32.mrb[4].mxu1 }
 0x42a   : > { %v4577_v58 = vadd.f32 %v13997_v57, %v4502_v55  ;;  %v9076_v59 = vadd.f32 %v13999_v25, %v9001_v56  ;;  %v4504_v60 = vpop.f32.mrb[5].mxu0  ;;  %v9003_v61 = vpop.f32.mrb[5].mxu1 }
 0x42b   : > { %4674 = vst [vmem:[%s14016_s5 + $0x8] sm:$0xff] %v10922_v53  ;;  %9173 = vst [vmem:[%s14016_s5 + $0x58] sm:$0xff] %v10932_v54  ;;  %v4578_v62 = vadd.f32 %v14001_v26, %v4504_v60  ;;  %v9077_v0 = vadd.f32 %v14003_v27, %v9003_v61  ;;  %v4506_v1 = vpop.f32.mrb[6].mxu0  ;;  %v9005_v2 = vpop.f32.mrb[6].mxu1 }
 0x42c   : > { %v4597_v3 = vmax.f32 %v4577_v58, 0.0  ;;  %v9096_v4 = vmax.f32 %v9076_v59, 0.0  ;;  %v4579_v5 = vadd.f32 %v13997_v57, %v4506_v1  ;;  %v9078_v6 = vadd.f32 %v13999_v25, %v9005_v2  ;;  %v4508_v7 = vpop.f32.mrb[7].mxu0  ;;  %v9007_v8 = vpop.f32.mrb[7].mxu1 }
 0x42d   : > { %v4598_v9 = vmax.f32 %v4578_v62, 0.0  ;;  %v9097_v10 = vmax.f32 %v9077_v0, 0.0  ;;  %v4580_v11 = vadd.f32 %v14001_v26, %v4508_v7  ;;  %v9079_v12 = vadd.f32 %v14003_v27, %v9007_v8 }
 0x42e   : > { %v4599_v13 = vmax.f32 %v4579_v5, 0.0  ;;  %v9098_v14 = vmax.f32 %v9078_v6, 0.0 }
 0x42f   : > { %v10923_v15 = vpack.c.bf16 %v4598_v9, %v4597_v3  ;;  %v10933_v16 = vpack.c.bf16 %v9097_v10, %v9096_v4  ;;  %v4600_v17 = vmax.f32 %v4580_v11, 0.0  ;;  %v9099_v18 = vmax.f32 %v9079_v12, 0.0 }
 0x431   : > { %4675 = vst [vmem:[%s14016_s5 + $0x10] sm:$0xff] %v10923_v15  ;;  %9174 = vst [vmem:[%s14016_s5 + $0x60] sm:$0xff] %v10933_v16  ;;  %v10924_v19 = vpack.c.bf16 %v4600_v17, %v4599_v13  ;;  %v10934_v20 = vpack.c.bf16 %v9099_v18, %v9098_v14  ;;  %v4512_v21 = vpop.f32.mrb[8].mxu0  ;;  %v9011_v22 = vpop.f32.mrb[8].mxu1 }
 0x432   : > { %v4581_v23 = vadd.f32 %v13997_v57, %v4512_v21  ;;  %v9080_v24 = vadd.f32 %v13999_v25, %v9011_v22  ;;  %v4514_v28 = vpop.f32.mrb[9].mxu0  ;;  %v9013_v29 = vpop.f32.mrb[9].mxu1 }
 0x433   : > { %4676 = vst [vmem:[%s14016_s5 + $0x18] sm:$0xff] %v10924_v19  ;;  %9175 = vst [vmem:[%s14016_s5 + $0x68] sm:$0xff] %v10934_v20  ;;  %v4582_v63 = vadd.f32 %v14001_v26, %v4514_v28  ;;  %v9081_v30 = vadd.f32 %v14003_v27, %v9013_v29  ;;  %v4516_v31 = vpop.f32.mrb[10].mxu0  ;;  %v9015_v32 = vpop.f32.mrb[10].mxu1 }
 0x434   : > { %v4601_v33 = vmax.f32 %v4581_v23, 0.0  ;;  %v9100_v34 = vmax.f32 %v9080_v24, 0.0  ;;  %v4583_v35 = vadd.f32 %v13997_v57, %v4516_v31  ;;  %v9082_v36 = vadd.f32 %v13999_v25, %v9015_v32  ;;  %v4518_v37 = vpop.f32.mrb[11].mxu0  ;;  %v9017_v38 = vpop.f32.mrb[11].mxu1 }
 0x435   : > { %v4602_v39 = vmax.f32 %v4582_v63, 0.0  ;;  %v9101_v40 = vmax.f32 %v9081_v30, 0.0  ;;  %v4584_v41 = vadd.f32 %v14001_v26, %v4518_v37  ;;  %v9083_v42 = vadd.f32 %v14003_v27, %v9017_v38 }
 0x436   : > { %v4603_v43 = vmax.f32 %v4583_v35, 0.0  ;;  %v9102_v44 = vmax.f32 %v9082_v36, 0.0 }
 0x437   : > { %v10925_v45 = vpack.c.bf16 %v4602_v39, %v4601_v33  ;;  %v10935_v46 = vpack.c.bf16 %v9101_v40, %v9100_v34  ;;  %v4604_v47 = vmax.f32 %v4584_v41, 0.0  ;;  %v9103_v48 = vmax.f32 %v9083_v42, 0.0 }
 0x439   : > { %4677 = vst [vmem:[%s14016_s5 + $0x20] sm:$0xff] %v10925_v45  ;;  %9176 = vst [vmem:[%s14016_s5 + $0x70] sm:$0xff] %v10935_v46  ;;  %v10926_v49 = vpack.c.bf16 %v4604_v47, %v4603_v43  ;;  %v10936_v50 = vpack.c.bf16 %v9103_v48, %v9102_v44  ;;  %v4522_v51 = vpop.f32.mrb[12].mxu0  ;;  %v9021_v52 = vpop.f32.mrb[12].mxu1 }
 0x43a   : > { %v4585_v53 = vadd.f32 %v13997_v57, %v4522_v51  ;;  %v9084_v54 = vadd.f32 %v13999_v25, %v9021_v52  ;;  %v4524_v55 = vpop.f32.mrb[13].mxu0  ;;  %v9023_v56 = vpop.f32.mrb[13].mxu1 }
 0x43b   : > { %4678 = vst [vmem:[%s14016_s5 + $0x28] sm:$0xff] %v10926_v49  ;;  %9177 = vst [vmem:[%s14016_s5 + $0x78] sm:$0xff] %v10936_v50  ;;  %v4586_v58 = vadd.f32 %v14001_v26, %v4524_v55  ;;  %v9085_v59 = vadd.f32 %v14003_v27, %v9023_v56  ;;  %v4526_v60 = vpop.f32.mrb[14].mxu0  ;;  %v9025_v61 = vpop.f32.mrb[14].mxu1 }
 0x43c   : > { %v4605_v62 = vmax.f32 %v4585_v53, 0.0  ;;  %v9104_v0 = vmax.f32 %v9084_v54, 0.0  ;;  %v4587_v1 = vadd.f32 %v13997_v57, %v4526_v60  ;;  %v9086_v2 = vadd.f32 %v13999_v25, %v9025_v61  ;;  %v4528_v3 = vpop.f32.mrb[15].mxu0  ;;  %v9027_v4 = vpop.f32.mrb[15].mxu1 }
 0x43d   : > { %v4606_v5 = vmax.f32 %v4586_v58, 0.0  ;;  %v9105_v6 = vmax.f32 %v9085_v59, 0.0  ;;  %v4588_v7 = vadd.f32 %v14001_v26, %v4528_v3  ;;  %v9087_v8 = vadd.f32 %v14003_v27, %v9027_v4 }
 0x43e   : > { %v4607_v9 = vmax.f32 %v4587_v1, 0.0  ;;  %v9106_v10 = vmax.f32 %v9086_v2, 0.0 }
 0x43f   : > { %v10927_v11 = vpack.c.bf16 %v4606_v5, %v4605_v62  ;;  %v10937_v12 = vpack.c.bf16 %v9105_v6, %v9104_v0  ;;  %v4608_v13 = vmax.f32 %v4588_v7, 0.0  ;;  %v9107_v14 = vmax.f32 %v9087_v8, 0.0 }
 0x441   : > { %4679 = vst [vmem:[%s14016_s5 + $0x30] sm:$0xff] %v10927_v11  ;;  %9178 = vst [vmem:[%s14016_s5 + $0x80] sm:$0xff] %v10937_v12  ;;  %v10928_v15 = vpack.c.bf16 %v4608_v13, %v4607_v9  ;;  %v10938_v16 = vpack.c.bf16 %v9107_v14, %v9106_v10  ;;  %v4532_v17 = vpop.f32.mrb[16].mxu0  ;;  %v9031_v18 = vpop.f32.mrb[16].mxu1 }
 0x442   : > { %v4589_v19 = vadd.f32 %v13997_v57, %v4532_v17  ;;  %v9088_v20 = vadd.f32 %v13999_v25, %v9031_v18  ;;  %v4534_v21 = vpop.f32.mrb[17].mxu0  ;;  %v9033_v22 = vpop.f32.mrb[17].mxu1 }
 0x443   : > { %4680 = vst [vmem:[%s14016_s5 + $0x38] sm:$0xff] %v10928_v15  ;;  %9179 = vst [vmem:[%s14016_s5 + $0x88] sm:$0xff] %v10938_v16  ;;  %v4590_v23 = vadd.f32 %v14001_v26, %v4534_v21  ;;  %v9089_v24 = vadd.f32 %v14003_v27, %v9033_v22  ;;  %v4536_v28 = vpop.f32.mrb[18].mxu0  ;;  %v9035_v29 = vpop.f32.mrb[18].mxu1 }
 0x444   : > { %v4609_v63 = vmax.f32 %v4589_v19, 0.0  ;;  %v9108_v30 = vmax.f32 %v9088_v20, 0.0  ;;  %v4591_v31 = vadd.f32 %v13997_v57, %v4536_v28  ;;  %v9090_v32 = vadd.f32 %v13999_v25, %v9035_v29  ;;  %v4538_v33 = vpop.f32.mrb[19].mxu0  ;;  %v9037_v34 = vpop.f32.mrb[19].mxu1 }
 0x445   : > { %v4610_v35 = vmax.f32 %v4590_v23, 0.0  ;;  %v9109_v36 = vmax.f32 %v9089_v24, 0.0  ;;  %v4592_v37 = vadd.f32 %v14001_v26, %v4538_v33  ;;  %v9091_v38 = vadd.f32 %v14003_v27, %v9037_v34 }
 0x446   : > { %v4611_v39 = vmax.f32 %v4591_v31, 0.0  ;;  %v9110_v40 = vmax.f32 %v9090_v32, 0.0 }
 0x447   : > { %v10929_v41 = vpack.c.bf16 %v4610_v35, %v4609_v63  ;;  %v10939_v42 = vpack.c.bf16 %v9109_v36, %v9108_v30  ;;  %v4612_v43 = vmax.f32 %v4592_v37, 0.0  ;;  %v9111_v44 = vmax.f32 %v9091_v38, 0.0 }
 0x449   : > { %4681 = vst [vmem:[%s14016_s5 + $0x40] sm:$0xff] %v10929_v41  ;;  %9180 = vst [vmem:[%s14016_s5 + $0x90] sm:$0xff] %v10939_v42  ;;  %v10930_v57 = vpack.c.bf16 %v4612_v43, %v4611_v39  ;;  %v10940_v25 = vpack.c.bf16 %v9111_v44, %v9110_v40 }
 0x44b   : > { %4682 = vst [vmem:[%s14016_s5 + $0x48] sm:$0xff] %v10930_v57  ;;  %9181 = vst [vmem:[%s14016_s5 + $0x98] sm:$0xff] %v10940_v25 }
 0x44c PF: > { %s13_s12 = sadd.s32 1, %s12448_s12  }
 0x44d   : > { %p10_p5 = scmp.ge.s32.totalorder %s13_s12, 4  }
 0x44f   :  { %12 = sbr.rel (!%p10_p5) target bundleno = 1 (0x1), region = 66 }

</bundles_post_ra>
